<compile_context>
chip_gen: v7x
topology: tpu7x:2x2x1
jax: 0.10.0
libtpu: 0.0.40
codegen_flags: <defaults>
</compile_context>

<pallas_src>
import functools

import jax
import jax.numpy as jnp
from jax.experimental import pallas as pl
from jax.experimental.pallas import tpu as pltpu


# ============================================================================
# Fused kernel: CNN branches + stats MLP (prologue) + gate-tiled LSTM + fc
# ============================================================================
def _policy_kernel(chars_ref, stats_in_ref, h0_ref, c0_ref,
                   w1_ref, b1_ref, w2_ref, b2_ref,
                   mw1_ref, mb1_ref, mw2_ref, mb2_ref,
                   wih_ref, whh_ref, lb_ref, wfc_ref, bfc_ref,
                   pol_ref, h_out_ref, c_out_ref,
                   xpad_ref, c1pad_ref, feat_ref, gates_ref,
                   *, B, H, W, conv_feat):
    n = pl.program_id(0)
    HW = H * W

    # ------------------ iteration 0: feature-extraction prologue -------------
    @pl.when(n == 0)
    def _features():
        # Pad + cast chars inside the kernel (zeroed VMEM scratch as the halo).
        xpad_ref[...] = jnp.zeros_like(xpad_ref)
        xpad_ref[:, 1:H + 1, 1:W + 1, :] = chars_ref[...].astype(jnp.float32)

        # conv1 for BOTH branches (1 -> 32 ch: 16 dungeon + 16 screen), 3x3,
        # pad=1: nine broadcast-FMAs over the whole batch (Cin == 1).
        acc1 = jnp.zeros((B, H, W, 32), jnp.float32)
        for dy in range(3):
            for dx in range(3):
                tap = w1_ref[3 * dy + dx, :]                       # (32,)
                acc1 = acc1 + xpad_ref[:, dy:dy + H, dx:dx + W, :] * tap
        c1 = jnp.maximum(acc1 + b1_ref[...], 0.0)                  # (B,H,W,32)

        # Zero-padded conv1 activations (halo for conv2).
        c1pad_ref[...] = jnp.zeros_like(c1pad_ref)
        c1pad_ref[:, 1:H + 1, 1:W + 1, :] = c1

        # conv2 for BOTH branches (block-diagonal weights): 9 accumulated
        # per-tap matmuls on static ref windows -- no im2col buffer/concat.
        acc2 = jnp.zeros((B * HW, 64), jnp.float32)
        for dy in range(3):
            for dx in range(3):
                win = c1pad_ref[:, dy:dy + H, dx:dx + W, :].reshape(B * HW, 32)
                acc2 = acc2 + jnp.dot(win, w2_ref[3 * dy + dx],
                                      preferred_element_type=jnp.float32)
        c2 = jnp.maximum(acc2 + b2_ref[...], 0.0)                  # (B*HW, 64)

        # Scatter conv features into the fused LSTM-input slab in natural
        # (position-major, channel-fastest) order.  torch's channel-major
        # Flatten order is absorbed into the W_ih row permutation at load time.
        for b in range(B):
            for p in range(HW):
                feat_ref[b:b + 1, p * 64:(p + 1) * 64] = (
                    c2[b * HW + p:b * HW + p + 1, :].astype(feat_ref.dtype))

        # blstats MLP: Linear -> ReLU -> Linear -> ReLU.
        hmid = jnp.dot(stats_in_ref[...], mw1_ref[...],
                       preferred_element_type=jnp.float32)
        hmid = jnp.maximum(hmid + mb1_ref[...], 0.0)
        s = jnp.dot(hmid, mw2_ref[...], preferred_element_type=jnp.float32)
        s = jnp.maximum(s + mb2_ref[...], 0.0)                     # (B, 64)
        feat_ref[:, conv_feat:] = s.astype(feat_ref.dtype)

    # ------------------ every iteration: one gate-chunk matmul ---------------
    # Gate n (PyTorch order i, f, g, o): bf16 operands, f32 accumulation.  The
    # contiguous gate-major weight tile for n+1 is DMA'd while this runs.
    g = (jnp.dot(feat_ref[...], wih_ref[...],
                 preferred_element_type=jnp.float32)
         + jnp.dot(h0_ref[...].astype(jnp.bfloat16), whh_ref[...],
                   preferred_element_type=jnp.float32)
         + lb_ref[...])
    gates_ref[n] = g

    # ------------------ last iteration: cell update + policy head ------------
    @pl.when(n == pl.num_programs(0) - 1)
    def _finalize():
        i_g = jax.nn.sigmoid(gates_ref[0])
        f_g = jax.nn.sigmoid(gates_ref[1])
        g_g = jnp.tanh(gates_ref[2])
        o_g = jax.nn.sigmoid(gates_ref[3])
        c_new = f_g * c0_ref[...] + i_g * g_g
        h_new = o_g * jnp.tanh(c_new)
        c_out_ref[...] = c_new
        h_out_ref[...] = h_new
        pol_ref[...] = (jnp.dot(h_new.astype(jnp.bfloat16), wfc_ref[...],
                                preferred_element_type=jnp.float32)
                        + bfc_ref[...])


def fused_policy_step(chars, blstats, h0, c0, params, *, H, W):
    B = chars.shape[0]
    HW = H * W
    conv_feat = 64 * HW
    stats_dim = blstats.shape[1]
    hidden = h0.shape[1]
    feat_dim = conv_feat + 64
    n_act = params['fc_b'].shape[1]
    n_gates = 4

    kern = functools.partial(_policy_kernel, B=B, H=H, W=W, conv_feat=conv_feat)

    flops = (2 * B * HW * 9 * 32                       # conv1
             + 2 * B * HW * 9 * 32 * 64                # conv2
             + 2 * B * (stats_dim * 128 + 128 * 64)    # stats MLP
             + 2 * B * feat_dim * n_gates * hidden     # LSTM input matmul
             + 2 * B * hidden * n_gates * hidden       # LSTM hidden matmul
             + 2 * B * hidden * n_act)                 # policy head
    bytes_accessed = (sum(int(params[k].size) * int(params[k].dtype.itemsize)
                          for k in params)
                      + int(chars.size) * 4 + int(blstats.size) * 4
                      + (int(h0.size) + int(c0.size)) * 4
                      + B * (n_act + 2 * hidden) * 4)
    cost = pl.CostEstimate(flops=flops, transcendentals=5 * B * hidden,
                           bytes_accessed=bytes_accessed)

    return pl.pallas_call(
        kern,
        out_shape=(jax.ShapeDtypeStruct((B, n_act), jnp.float32),
                   jax.ShapeDtypeStruct((B, hidden), jnp.float32),
                   jax.ShapeDtypeStruct((B, hidden), jnp.float32)),
        grid=(n_gates,),
        in_specs=[
            pl.BlockSpec((B, H, W, 1), lambda n: (0, 0, 0, 0)),       # chars
            pl.BlockSpec((B, stats_dim), lambda n: (0, 0)),           # blstats
            pl.BlockSpec((B, hidden), lambda n: (0, 0)),              # h0
            pl.BlockSpec((B, hidden), lambda n: (0, 0)),              # c0
            pl.BlockSpec((9, 32), lambda n: (0, 0)),                  # conv_w1
            pl.BlockSpec((1, 32), lambda n: (0, 0)),                  # conv_b1
            pl.BlockSpec((9, 32, 64), lambda n: (0, 0, 0)),           # conv_w2
            pl.BlockSpec((1, 64), lambda n: (0, 0)),                  # conv_b2
            pl.BlockSpec((stats_dim, 128), lambda n: (0, 0)),         # m_w1
            pl.BlockSpec((1, 128), lambda n: (0, 0)),                 # m_b1
            pl.BlockSpec((128, 64), lambda n: (0, 0)),                # m_w2
            pl.BlockSpec((1, 64), lambda n: (0, 0)),                  # m_b2
            pl.BlockSpec((None, feat_dim, hidden), lambda n: (n, 0, 0)),  # W_ih gate tile
            pl.BlockSpec((None, hidden, hidden), lambda n: (n, 0, 0)),    # W_hh gate tile
            pl.BlockSpec((None, 1, hidden), lambda n: (n, 0, 0)),         # bias gate tile
            pl.BlockSpec((hidden, n_act), lambda n: (0, 0)),          # fc_w
            pl.BlockSpec((1, n_act), lambda n: (0, 0)),               # fc_b
        ],
        out_specs=(pl.BlockSpec((B, n_act), lambda n: (0, 0)),
                   pl.BlockSpec((B, hidden), lambda n: (0, 0)),
                   pl.BlockSpec((B, hidden), lambda n: (0, 0))),
        scratch_shapes=[
            pltpu.VMEM((B, H + 2, W + 2, 1), jnp.float32),    # padded chars
            pltpu.VMEM((B, H + 2, W + 2, 32), jnp.float32),   # padded conv1 act
            pltpu.VMEM((B, feat_dim), jnp.bfloat16),          # fused LSTM input
            pltpu.VMEM((n_gates, B, hidden), jnp.float32),    # gate pre-acts
        ],
        compiler_params=pltpu.CompilerParams(
            # Gate axis must run in-order on one core: features and gate
            # chunks are carried in VMEM scratch, finalize runs on the last
            # step.  (See module TODO for the v7x dual-TC variant.)
            dimension_semantics=("arbitrary",),
            vmem_limit_bytes=12 * 1024 * 1024),
        cost_estimate=cost,
    )(chars, blstats, h0, c0,
      params['conv_w1'], params['conv_b1'], params['conv_w2'], params['conv_b2'],
      params['m_w1'], params['m_b1'], params['m_w2'], params['m_b2'],
      params['l_wih'], params['l_whh'], params['l_b'],
      params['fc_w'], params['fc_b'])


# ============================================================================
# Full forward pass (wrapper is only a trailing-unit-dim view + dtype guard)
# ============================================================================
def nethack_policy_forward(params, obs, hx, cx):
    B, H, W = obs['chars'].shape
    chars = obs['chars'][:, :, :, None]               # int; cast+pad in-kernel
    blstats = obs['blstats'].astype(jnp.float32)      # (B, stats_dim)
    policy, h_new, c_new = fused_policy_step(chars, blstats, hx[0], cx[0],
                                             params, H=H, W=W)
    return policy, (h_new[None], c_new[None])


# ============================================================================
# Deterministic synthetic parameters in kernel-ready layouts.
# ============================================================================
def init_params(key, H, W, stats_dim, n_actions, hidden):
    ks = jax.random.split(key, 16)

    def rn(k, shape, scale=0.05):
        return jax.random.normal(k, shape, jnp.float32) * scale

    HW = H * W
    conv_feat = 64 * HW
    feat_dim = conv_feat + 64

    # conv1 fused across branches along Cout (tap order t = dy*3+dx).
    d_w1, s_w1 = rn(ks[0], (9, 16)), rn(ks[1], (9, 16))
    conv_w1 = jnp.concatenate([d_w1, s_w1], axis=1)                    # (9, 32)
    conv_b1 = jnp.concatenate([rn(ks[2], (16,)), rn(ks[3], (16,))]).reshape(1, 32)

    # conv2 fused as per-tap block-diagonal (9, 32, 64): dungeon outputs read
    # only dungeon conv1 channels, screen outputs only screen channels.
    d_w2, s_w2 = rn(ks[4], (9, 16, 32)), rn(ks[5], (9, 16, 32))
    z = jnp.zeros((9, 16, 32), jnp.float32)
    conv_w2 = jnp.concatenate(
        [jnp.concatenate([d_w2, z], axis=2),
         jnp.concatenate([z, s_w2], axis=2)], axis=1)                  # (9, 32, 64)
    conv_b2 = jnp.concatenate([rn(ks[6], (32,)), rn(ks[7], (32,))]).reshape(1, 64)

    # LSTM / fc weights gate-major, pre-transposed for right-multiplication,
    # rows permuted to the kernel feature order (see module docstring for the
    # torch-weight mapping).  The big input weight dominates HBM traffic and
    # is stored bf16.  l_b folds b_ih + b_hh.
    params = dict(
        conv_w1=conv_w1, conv_b1=conv_b1, conv_w2=conv_w2, conv_b2=conv_b2,
        m_w1=rn(ks[8], (stats_dim, 128)),
        m_b1=rn(ks[9], (128,)).reshape(1, -1),
        m_w2=rn(ks[10], (128, 64)),
        m_b2=rn(ks[11], (64,)).reshape(1, -1),
        l_wih=rn(ks[12], (4, feat_dim, hidden), 0.02).astype(jnp.bfloat16),
        l_whh=rn(ks[13], (4, hidden, hidden), 0.02).astype(jnp.bfloat16),
        l_b=rn(ks[14], (4, 1, hidden)),
        fc_w=rn(ks[15], (hidden, n_actions)).astype(jnp.bfloat16),
        fc_b=jnp.zeros((1, n_actions), jnp.float32),
    )
    return params


if __name__ == "__main__":
    key = jax.random.PRNGKey(0)
    B, H, W = 2, 8, 8
    STATS = H * W          # = 64; keeps the module's LSTM input_size consistent
    N_ACTIONS = 10
    HIDDEN = 256

    k_chars, k_stats, k_h, k_c, k_p = jax.random.split(key, 5)
    obs = {
        'chars': jax.random.randint(k_chars, (B, H, W), 32, 128,
                                    dtype=jnp.int32),
        'blstats': jax.random.normal(k_stats, (B, STATS), jnp.float32),
    }
    hx = jax.random.normal(k_h, (1, B, HIDDEN), jnp.float32) * 0.1
    cx = jax.random.normal(k_c, (1, B, HIDDEN), jnp.float32) * 0.1
    params = init_params(k_p, H, W, STATS, N_ACTIONS, HIDDEN)

    fwd = jax.jit(nethack_policy_forward)
    policy, (h_new, c_new) = fwd(params, obs, hx, cx)
    jax.block_until_ready((policy, h_new, c_new))

    assert policy.shape == (B, N_ACTIONS)
    assert h_new.shape == (1, B, HIDDEN) and c_new.shape == (1, B, HIDDEN)
    assert jnp.all(jnp.isfinite(policy))
    assert jnp.all(jnp.isfinite(h_new)) and jnp.all(jnp.isfinite(c_new))
    print("KERNEL_OK")
</pallas_src>

<mosaic_0001>
module attributes {stable_mosaic.version = 11 : i64} {
  func.func @_policy_kernel(%arg0: i32, %arg1: memref<2x8x8x1xi32, #tpu.memory_space<vmem>>, %arg2: memref<2x64xf32, #tpu.memory_space<vmem>>, %arg3: memref<2x256xf32, #tpu.memory_space<vmem>>, %arg4: memref<2x256xf32, #tpu.memory_space<vmem>>, %arg5: memref<9x32xf32, #tpu.memory_space<vmem>>, %arg6: memref<1x32xf32, #tpu.memory_space<vmem>>, %arg7: memref<9x32x64xf32, #tpu.memory_space<vmem>>, %arg8: memref<1x64xf32, #tpu.memory_space<vmem>>, %arg9: memref<64x128xf32, #tpu.memory_space<vmem>>, %arg10: memref<1x128xf32, #tpu.memory_space<vmem>>, %arg11: memref<128x64xf32, #tpu.memory_space<vmem>>, %arg12: memref<1x64xf32, #tpu.memory_space<vmem>>, %arg13: memref<1x4160x256xbf16, #tpu.memory_space<vmem>>, %arg14: memref<1x256x256xbf16, #tpu.memory_space<vmem>>, %arg15: memref<1x1x256xf32, #tpu.memory_space<vmem>>, %arg16: memref<256x10xbf16, #tpu.memory_space<vmem>>, %arg17: memref<1x10xf32, #tpu.memory_space<vmem>>, %arg18: memref<2x10xf32, #tpu.memory_space<vmem>>, %arg19: memref<2x256xf32, #tpu.memory_space<vmem>>, %arg20: memref<2x256xf32, #tpu.memory_space<vmem>>, %arg21: memref<2x10x10x1xf32, #tpu.memory_space<vmem>>, %arg22: memref<2x10x10x32xf32, #tpu.memory_space<vmem>>, %arg23: memref<2x4160xbf16, #tpu.memory_space<vmem>>, %arg24: memref<4x2x256xf32, #tpu.memory_space<vmem>>) attributes {dimension_semantics = [#tpu.dimension_semantics<arbitrary>], iteration_bounds = array<i64: 4>, scalar_prefetch = 0 : i64, scratch_operands = 4 : i64, tpu.core_type = #tpu.core_type<tc>, window_params = [{pipeline_mode = #tpu.pipeline_mode<synchronous>, transform_indices = @transform_0, window_bounds = array<i64: 2, 8, 8, 1>}, {pipeline_mode = #tpu.pipeline_mode<synchronous>, transform_indices = @transform_1, window_bounds = array<i64: 2, 64>}, {pipeline_mode = #tpu.pipeline_mode<synchronous>, transform_indices = @transform_2, window_bounds = array<i64: 2, 256>}, {pipeline_mode = #tpu.pipeline_mode<synchronous>, transform_indices = @transform_3, window_bounds = array<i64: 2, 256>}, {pipeline_mode = #tpu.pipeline_mode<synchronous>, transform_indices = @transform_4, window_bounds = array<i64: 9, 32>}, {pipeline_mode = #tpu.pipeline_mode<synchronous>, transform_indices = @transform_5, window_bounds = array<i64: 1, 32>}, {pipeline_mode = #tpu.pipeline_mode<synchronous>, transform_indices = @transform_6, window_bounds = array<i64: 9, 32, 64>}, {pipeline_mode = #tpu.pipeline_mode<synchronous>, transform_indices = @transform_7, window_bounds = array<i64: 1, 64>}, {pipeline_mode = #tpu.pipeline_mode<synchronous>, transform_indices = @transform_8, window_bounds = array<i64: 64, 128>}, {pipeline_mode = #tpu.pipeline_mode<synchronous>, transform_indices = @transform_9, window_bounds = array<i64: 1, 128>}, {pipeline_mode = #tpu.pipeline_mode<synchronous>, transform_indices = @transform_10, window_bounds = array<i64: 128, 64>}, {pipeline_mode = #tpu.pipeline_mode<synchronous>, transform_indices = @transform_11, window_bounds = array<i64: 1, 64>}, {transform_indices = @transform_12, window_bounds = array<i64: 1, 4160, 256>}, {transform_indices = @transform_13, window_bounds = array<i64: 1, 256, 256>}, {transform_indices = @transform_14, window_bounds = array<i64: 1, 1, 256>}, {pipeline_mode = #tpu.pipeline_mode<synchronous>, transform_indices = @transform_15, window_bounds = array<i64: 256, 10>}, {pipeline_mode = #tpu.pipeline_mode<synchronous>, transform_indices = @transform_16, window_bounds = array<i64: 1, 10>}, {pipeline_mode = #tpu.pipeline_mode<synchronous>, transform_indices = @transform_17, window_bounds = array<i64: 2, 10>}, {pipeline_mode = #tpu.pipeline_mode<synchronous>, transform_indices = @transform_18, window_bounds = array<i64: 2, 256>}, {pipeline_mode = #tpu.pipeline_mode<synchronous>, transform_indices = @transform_19, window_bounds = array<i64: 2, 256>}]} {
    %c0_i32 = arith.constant 0 : i32
    %0 = arith.cmpi eq, %arg0, %c0_i32 : i32
    %1 = arith.extui %0 : i1 to i32
    %c0_i32_0 = arith.constant 0 : i32
    %2 = arith.cmpi ne, %1, %c0_i32_0 : i32
    scf.if %2 {
      %cst_17 = arith.constant 0.000000e+00 : f32
      %24 = vector.broadcast %cst_17 : f32 to vector<2x10x10x1xf32>
      %c0_18 = arith.constant 0 : index
      %c0_19 = arith.constant 0 : index
      %c0_20 = arith.constant 0 : index
      %c0_21 = arith.constant 0 : index
      %25 = vector.load %arg21[%c0_18, %c0_19, %c0_20, %c0_21] : memref<2x10x10x1xf32, #tpu.memory_space<vmem>>, vector<2x10x10x1xf32>
      tpu.vector_store %arg21[%c0_18, %c0_19, %c0_20, %c0_21], %24 {strides = array<i32>} : memref<2x10x10x1xf32, #tpu.memory_space<vmem>>, vector<2x10x10x1xf32>,
      %c0_22 = arith.constant 0 : index
      %c0_23 = arith.constant 0 : index
      %c0_24 = arith.constant 0 : index
      %c0_25 = arith.constant 0 : index
      %26 = vector.load %arg1[%c0_22, %c0_23, %c0_24, %c0_25] : memref<2x8x8x1xi32, #tpu.memory_space<vmem>>, vector<2x8x8x1xi32>
      %27 = arith.sitofp %26 : vector<2x8x8x1xi32> to vector<2x8x8x1xf32>
      %c0_26 = arith.constant 0 : index
      %c1 = arith.constant 1 : index
      %c1_27 = arith.constant 1 : index
      %c0_28 = arith.constant 0 : index
      %28 = vector.load %arg21[%c0_26, %c1, %c1_27, %c0_28] : memref<2x10x10x1xf32, #tpu.memory_space<vmem>>, vector<2x8x8x1xf32>
      tpu.vector_store %arg21[%c0_26, %c1, %c1_27, %c0_28], %27 {strides = array<i32>} : memref<2x10x10x1xf32, #tpu.memory_space<vmem>>, vector<2x8x8x1xf32>,
      %cst_29 = arith.constant 0.000000e+00 : f32
      %29 = vector.broadcast %cst_29 : f32 to vector<2x8x8x32xf32>
      %c0_30 = arith.constant 0 : index
      %c0_31 = arith.constant 0 : index
      %30 = vector.load %arg5[%c0_30, %c0_31] : memref<9x32xf32, #tpu.memory_space<vmem>>, vector<1x32xf32>
      %31 = vector.shape_cast %30 : vector<1x32xf32> to vector<32xf32>
      %c0_32 = arith.constant 0 : index
      %c0_33 = arith.constant 0 : index
      %c0_34 = arith.constant 0 : index
      %c0_35 = arith.constant 0 : index
      %32 = vector.load %arg21[%c0_32, %c0_33, %c0_34, %c0_35] : memref<2x10x10x1xf32, #tpu.memory_space<vmem>>, vector<2x8x8x1xf32>
      %33 = vector.shape_cast %31 : vector<32xf32> to vector<1x1x1x32xf32>
      %34 = vector.broadcast %32 : vector<2x8x8x1xf32> to vector<2x8x8x32xf32>
      %35 = vector.broadcast %33 : vector<1x1x1x32xf32> to vector<2x8x8x32xf32>
      %36 = arith.mulf %34, %35 : vector<2x8x8x32xf32>
      %37 = arith.addf %29, %36 : vector<2x8x8x32xf32>
      %c1_36 = arith.constant 1 : index
      %c0_37 = arith.constant 0 : index
      %38 = vector.load %arg5[%c1_36, %c0_37] : memref<9x32xf32, #tpu.memory_space<vmem>>, vector<1x32xf32>
      %39 = vector.shape_cast %38 : vector<1x32xf32> to vector<32xf32>
      %c0_38 = arith.constant 0 : index
      %c0_39 = arith.constant 0 : index
      %c1_40 = arith.constant 1 : index
      %c0_41 = arith.constant 0 : index
      %40 = vector.load %arg21[%c0_38, %c0_39, %c1_40, %c0_41] : memref<2x10x10x1xf32, #tpu.memory_space<vmem>>, vector<2x8x8x1xf32>
      %41 = vector.shape_cast %39 : vector<32xf32> to vector<1x1x1x32xf32>
      %42 = vector.broadcast %40 : vector<2x8x8x1xf32> to vector<2x8x8x32xf32>
      %43 = vector.broadcast %41 : vector<1x1x1x32xf32> to vector<2x8x8x32xf32>
      %44 = arith.mulf %42, %43 : vector<2x8x8x32xf32>
      %45 = arith.addf %37, %44 : vector<2x8x8x32xf32>
      %c2 = arith.constant 2 : index
      %c0_42 = arith.constant 0 : index
      %46 = vector.load %arg5[%c2, %c0_42] : memref<9x32xf32, #tpu.memory_space<vmem>>, vector<1x32xf32>
      %47 = vector.shape_cast %46 : vector<1x32xf32> to vector<32xf32>
      %c0_43 = arith.constant 0 : index
      %c0_44 = arith.constant 0 : index
      %c2_45 = arith.constant 2 : index
      %c0_46 = arith.constant 0 : index
      %48 = vector.load %arg21[%c0_43, %c0_44, %c2_45, %c0_46] : memref<2x10x10x1xf32, #tpu.memory_space<vmem>>, vector<2x8x8x1xf32>
      %49 = vector.shape_cast %47 : vector<32xf32> to vector<1x1x1x32xf32>
      %50 = vector.broadcast %48 : vector<2x8x8x1xf32> to vector<2x8x8x32xf32>
      %51 = vector.broadcast %49 : vector<1x1x1x32xf32> to vector<2x8x8x32xf32>
      %52 = arith.mulf %50, %51 : vector<2x8x8x32xf32>
      %53 = arith.addf %45, %52 : vector<2x8x8x32xf32>
      %c3 = arith.constant 3 : index
      %c0_47 = arith.constant 0 : index
      %54 = vector.load %arg5[%c3, %c0_47] : memref<9x32xf32, #tpu.memory_space<vmem>>, vector<1x32xf32>
      %55 = vector.shape_cast %54 : vector<1x32xf32> to vector<32xf32>
      %c0_48 = arith.constant 0 : index
      %c1_49 = arith.constant 1 : index
      %c0_50 = arith.constant 0 : index
      %c0_51 = arith.constant 0 : index
      %56 = vector.load %arg21[%c0_48, %c1_49, %c0_50, %c0_51] : memref<2x10x10x1xf32, #tpu.memory_space<vmem>>, vector<2x8x8x1xf32>
      %57 = vector.shape_cast %55 : vector<32xf32> to vector<1x1x1x32xf32>
      %58 = vector.broadcast %56 : vector<2x8x8x1xf32> to vector<2x8x8x32xf32>
      %59 = vector.broadcast %57 : vector<1x1x1x32xf32> to vector<2x8x8x32xf32>
      %60 = arith.mulf %58, %59 : vector<2x8x8x32xf32>
      %61 = arith.addf %53, %60 : vector<2x8x8x32xf32>
      %c4 = arith.constant 4 : index
      %c0_52 = arith.constant 0 : index
      %62 = vector.load %arg5[%c4, %c0_52] : memref<9x32xf32, #tpu.memory_space<vmem>>, vector<1x32xf32>
      %63 = vector.shape_cast %62 : vector<1x32xf32> to vector<32xf32>
      %c0_53 = arith.constant 0 : index
      %c1_54 = arith.constant 1 : index
      %c1_55 = arith.constant 1 : index
      %c0_56 = arith.constant 0 : index
      %64 = vector.load %arg21[%c0_53, %c1_54, %c1_55, %c0_56] : memref<2x10x10x1xf32, #tpu.memory_space<vmem>>, vector<2x8x8x1xf32>
      %65 = vector.shape_cast %63 : vector<32xf32> to vector<1x1x1x32xf32>
      %66 = vector.broadcast %64 : vector<2x8x8x1xf32> to vector<2x8x8x32xf32>
      %67 = vector.broadcast %65 : vector<1x1x1x32xf32> to vector<2x8x8x32xf32>
      %68 = arith.mulf %66, %67 : vector<2x8x8x32xf32>
      %69 = arith.addf %61, %68 : vector<2x8x8x32xf32>
      %c5 = arith.constant 5 : index
      %c0_57 = arith.constant 0 : index
      %70 = vector.load %arg5[%c5, %c0_57] : memref<9x32xf32, #tpu.memory_space<vmem>>, vector<1x32xf32>
      %71 = vector.shape_cast %70 : vector<1x32xf32> to vector<32xf32>
      %c0_58 = arith.constant 0 : index
      %c1_59 = arith.constant 1 : index
      %c2_60 = arith.constant 2 : index
      %c0_61 = arith.constant 0 : index
      %72 = vector.load %arg21[%c0_58, %c1_59, %c2_60, %c0_61] : memref<2x10x10x1xf32, #tpu.memory_space<vmem>>, vector<2x8x8x1xf32>
      %73 = vector.shape_cast %71 : vector<32xf32> to vector<1x1x1x32xf32>
      %74 = vector.broadcast %72 : vector<2x8x8x1xf32> to vector<2x8x8x32xf32>
      %75 = vector.broadcast %73 : vector<1x1x1x32xf32> to vector<2x8x8x32xf32>
      %76 = arith.mulf %74, %75 : vector<2x8x8x32xf32>
      %77 = arith.addf %69, %76 : vector<2x8x8x32xf32>
      %c6 = arith.constant 6 : index
      %c0_62 = arith.constant 0 : index
      %78 = vector.load %arg5[%c6, %c0_62] : memref<9x32xf32, #tpu.memory_space<vmem>>, vector<1x32xf32>
      %79 = vector.shape_cast %78 : vector<1x32xf32> to vector<32xf32>
      %c0_63 = arith.constant 0 : index
      %c2_64 = arith.constant 2 : index
      %c0_65 = arith.constant 0 : index
      %c0_66 = arith.constant 0 : index
      %80 = vector.load %arg21[%c0_63, %c2_64, %c0_65, %c0_66] : memref<2x10x10x1xf32, #tpu.memory_space<vmem>>, vector<2x8x8x1xf32>
      %81 = vector.shape_cast %79 : vector<32xf32> to vector<1x1x1x32xf32>
      %82 = vector.broadcast %80 : vector<2x8x8x1xf32> to vector<2x8x8x32xf32>
      %83 = vector.broadcast %81 : vector<1x1x1x32xf32> to vector<2x8x8x32xf32>
      %84 = arith.mulf %82, %83 : vector<2x8x8x32xf32>
      %85 = arith.addf %77, %84 : vector<2x8x8x32xf32>
      %c7 = arith.constant 7 : index
      %c0_67 = arith.constant 0 : index
      %86 = vector.load %arg5[%c7, %c0_67] : memref<9x32xf32, #tpu.memory_space<vmem>>, vector<1x32xf32>
      %87 = vector.shape_cast %86 : vector<1x32xf32> to vector<32xf32>
      %c0_68 = arith.constant 0 : index
      %c2_69 = arith.constant 2 : index
      %c1_70 = arith.constant 1 : index
      %c0_71 = arith.constant 0 : index
      %88 = vector.load %arg21[%c0_68, %c2_69, %c1_70, %c0_71] : memref<2x10x10x1xf32, #tpu.memory_space<vmem>>, vector<2x8x8x1xf32>
      %89 = vector.shape_cast %87 : vector<32xf32> to vector<1x1x1x32xf32>
      %90 = vector.broadcast %88 : vector<2x8x8x1xf32> to vector<2x8x8x32xf32>
      %91 = vector.broadcast %89 : vector<1x1x1x32xf32> to vector<2x8x8x32xf32>
      %92 = arith.mulf %90, %91 : vector<2x8x8x32xf32>
      %93 = arith.addf %85, %92 : vector<2x8x8x32xf32>
      %c8 = arith.constant 8 : index
      %c0_72 = arith.constant 0 : index
      %94 = vector.load %arg5[%c8, %c0_72] : memref<9x32xf32, #tpu.memory_space<vmem>>, vector<1x32xf32>
      %95 = vector.shape_cast %94 : vector<1x32xf32> to vector<32xf32>
      %c0_73 = arith.constant 0 : index
      %c2_74 = arith.constant 2 : index
      %c2_75 = arith.constant 2 : index
      %c0_76 = arith.constant 0 : index
      %96 = vector.load %arg21[%c0_73, %c2_74, %c2_75, %c0_76] : memref<2x10x10x1xf32, #tpu.memory_space<vmem>>, vector<2x8x8x1xf32>
      %97 = vector.shape_cast %95 : vector<32xf32> to vector<1x1x1x32xf32>
      %98 = vector.broadcast %96 : vector<2x8x8x1xf32> to vector<2x8x8x32xf32>
      %99 = vector.broadcast %97 : vector<1x1x1x32xf32> to vector<2x8x8x32xf32>
      %100 = arith.mulf %98, %99 : vector<2x8x8x32xf32>
      %101 = arith.addf %93, %100 : vector<2x8x8x32xf32>
      %c0_77 = arith.constant 0 : index
      %c0_78 = arith.constant 0 : index
      %102 = vector.load %arg6[%c0_77, %c0_78] : memref<1x32xf32, #tpu.memory_space<vmem>>, vector<1x32xf32>
      %103 = vector.shape_cast %102 : vector<1x32xf32> to vector<1x1x1x32xf32>
      %104 = vector.broadcast %103 : vector<1x1x1x32xf32> to vector<2x8x8x32xf32>
      %105 = arith.addf %101, %104 : vector<2x8x8x32xf32>
      %cst_79 = arith.constant 0.000000e+00 : f32
      %106 = vector.broadcast %cst_79 : f32 to vector<2x8x8x32xf32>
      %107 = arith.maximumf %105, %106 : vector<2x8x8x32xf32>
      %cst_80 = arith.constant 0.000000e+00 : f32
      %108 = vector.broadcast %cst_80 : f32 to vector<2x10x10x32xf32>
      %c0_81 = arith.constant 0 : index
      %c0_82 = arith.constant 0 : index
      %c0_83 = arith.constant 0 : index
      %c0_84 = arith.constant 0 : index
      %109 = vector.load %arg22[%c0_81, %c0_82, %c0_83, %c0_84] : memref<2x10x10x32xf32, #tpu.memory_space<vmem>>, vector<2x10x10x32xf32>
      tpu.vector_store %arg22[%c0_81, %c0_82, %c0_83, %c0_84], %108 {strides = array<i32>} : memref<2x10x10x32xf32, #tpu.memory_space<vmem>>, vector<2x10x10x32xf32>,
      %c0_85 = arith.constant 0 : index
      %c1_86 = arith.constant 1 : index
      %c1_87 = arith.constant 1 : index
      %c0_88 = arith.constant 0 : index
      %110 = vector.load %arg22[%c0_85, %c1_86, %c1_87, %c0_88] : memref<2x10x10x32xf32, #tpu.memory_space<vmem>>, vector<2x8x8x32xf32>
      tpu.vector_store %arg22[%c0_85, %c1_86, %c1_87, %c0_88], %107 {strides = array<i32>} : memref<2x10x10x32xf32, #tpu.memory_space<vmem>>, vector<2x8x8x32xf32>,
      %cst_89 = arith.constant 0.000000e+00 : f32
      %111 = vector.broadcast %cst_89 : f32 to vector<128x64xf32>
      %c0_90 = arith.constant 0 : index
      %c0_91 = arith.constant 0 : index
      %c0_92 = arith.constant 0 : index
      %c0_93 = arith.constant 0 : index
      %112 = vector.load %arg22[%c0_90, %c0_91, %c0_92, %c0_93] : memref<2x10x10x32xf32, #tpu.memory_space<vmem>>, vector<2x8x8x32xf32>
      %113 = vector.shape_cast %112 : vector<2x8x8x32xf32> to vector<128x32xf32>
      %c0_94 = arith.constant 0 : index
      %c0_95 = arith.constant 0 : index
      %c0_96 = arith.constant 0 : index
      %114 = vector.load %arg7[%c0_94, %c0_95, %c0_96] : memref<9x32x64xf32, #tpu.memory_space<vmem>>, vector<1x32x64xf32>
      %115 = vector.shape_cast %114 : vector<1x32x64xf32> to vector<32x64xf32>
      %cst_97 = arith.constant dense<0.000000e+00> : vector<128x64xf32>
      %116 = tpu.matmul %113, %115, %cst_97 {dimension_numbers = #tpu.dot_dimension_numbers<[1], [0], [0], [1], [0, 0, 1, 1], [], []>} : vector<128x32xf32>, vector<32x64xf32>, vector<128x64xf32> -> vector<128x64xf32>
      %117 = arith.addf %111, %116 : vector<128x64xf32>
      %c0_98 = arith.constant 0 : index
      %c0_99 = arith.constant 0 : index
      %c1_100 = arith.constant 1 : index
      %c0_101 = arith.constant 0 : index
      %118 = vector.load %arg22[%c0_98, %c0_99, %c1_100, %c0_101] : memref<2x10x10x32xf32, #tpu.memory_space<vmem>>, vector<2x8x8x32xf32>
      %119 = vector.shape_cast %118 : vector<2x8x8x32xf32> to vector<128x32xf32>
      %c1_102 = arith.constant 1 : index
      %c0_103 = arith.constant 0 : index
      %c0_104 = arith.constant 0 : index
      %120 = vector.load %arg7[%c1_102, %c0_103, %c0_104] : memref<9x32x64xf32, #tpu.memory_space<vmem>>, vector<1x32x64xf32>
      %121 = vector.shape_cast %120 : vector<1x32x64xf32> to vector<32x64xf32>
      %cst_105 = arith.constant dense<0.000000e+00> : vector<128x64xf32>
      %122 = tpu.matmul %119, %121, %cst_105 {dimension_numbers = #tpu.dot_dimension_numbers<[1], [0], [0], [1], [0, 0, 1, 1], [], []>} : vector<128x32xf32>, vector<32x64xf32>, vector<128x64xf32> -> vector<128x64xf32>
      %123 = arith.addf %117, %122 : vector<128x64xf32>
      %c0_106 = arith.constant 0 : index
      %c0_107 = arith.constant 0 : index
      %c2_108 = arith.constant 2 : index
      %c0_109 = arith.constant 0 : index
      %124 = vector.load %arg22[%c0_106, %c0_107, %c2_108, %c0_109] : memref<2x10x10x32xf32, #tpu.memory_space<vmem>>, vector<2x8x8x32xf32>
      %125 = vector.shape_cast %124 : vector<2x8x8x32xf32> to vector<128x32xf32>
      %c2_110 = arith.constant 2 : index
      %c0_111 = arith.constant 0 : index
      %c0_112 = arith.constant 0 : index
      %126 = vector.load %arg7[%c2_110, %c0_111, %c0_112] : memref<9x32x64xf32, #tpu.memory_space<vmem>>, vector<1x32x64xf32>
      %127 = vector.shape_cast %126 : vector<1x32x64xf32> to vector<32x64xf32>
      %cst_113 = arith.constant dense<0.000000e+00> : vector<128x64xf32>
      %128 = tpu.matmul %125, %127, %cst_113 {dimension_numbers = #tpu.dot_dimension_numbers<[1], [0], [0], [1], [0, 0, 1, 1], [], []>} : vector<128x32xf32>, vector<32x64xf32>, vector<128x64xf32> -> vector<128x64xf32>
      %129 = arith.addf %123, %128 : vector<128x64xf32>
      %c0_114 = arith.constant 0 : index
      %c1_115 = arith.constant 1 : index
      %c0_116 = arith.constant 0 : index
      %c0_117 = arith.constant 0 : index
      %130 = vector.load %arg22[%c0_114, %c1_115, %c0_116, %c0_117] : memref<2x10x10x32xf32, #tpu.memory_space<vmem>>, vector<2x8x8x32xf32>
      %131 = vector.shape_cast %130 : vector<2x8x8x32xf32> to vector<128x32xf32>
      %c3_118 = arith.constant 3 : index
      %c0_119 = arith.constant 0 : index
      %c0_120 = arith.constant 0 : index
      %132 = vector.load %arg7[%c3_118, %c0_119, %c0_120] : memref<9x32x64xf32, #tpu.memory_space<vmem>>, vector<1x32x64xf32>
      %133 = vector.shape_cast %132 : vector<1x32x64xf32> to vector<32x64xf32>
      %cst_121 = arith.constant dense<0.000000e+00> : vector<128x64xf32>
      %134 = tpu.matmul %131, %133, %cst_121 {dimension_numbers = #tpu.dot_dimension_numbers<[1], [0], [0], [1], [0, 0, 1, 1], [], []>} : vector<128x32xf32>, vector<32x64xf32>, vector<128x64xf32> -> vector<128x64xf32>
      %135 = arith.addf %129, %134 : vector<128x64xf32>
      %c0_122 = arith.constant 0 : index
      %c1_123 = arith.constant 1 : index
      %c1_124 = arith.constant 1 : index
      %c0_125 = arith.constant 0 : index
      %136 = vector.load %arg22[%c0_122, %c1_123, %c1_124, %c0_125] : memref<2x10x10x32xf32, #tpu.memory_space<vmem>>, vector<2x8x8x32xf32>
      %137 = vector.shape_cast %136 : vector<2x8x8x32xf32> to vector<128x32xf32>
      %c4_126 = arith.constant 4 : index
      %c0_127 = arith.constant 0 : index
      %c0_128 = arith.constant 0 : index
      %138 = vector.load %arg7[%c4_126, %c0_127, %c0_128] : memref<9x32x64xf32, #tpu.memory_space<vmem>>, vector<1x32x64xf32>
      %139 = vector.shape_cast %138 : vector<1x32x64xf32> to vector<32x64xf32>
      %cst_129 = arith.constant dense<0.000000e+00> : vector<128x64xf32>
      %140 = tpu.matmul %137, %139, %cst_129 {dimension_numbers = #tpu.dot_dimension_numbers<[1], [0], [0], [1], [0, 0, 1, 1], [], []>} : vector<128x32xf32>, vector<32x64xf32>, vector<128x64xf32> -> vector<128x64xf32>
      %141 = arith.addf %135, %140 : vector<128x64xf32>
      %c0_130 = arith.constant 0 : index
      %c1_131 = arith.constant 1 : index
      %c2_132 = arith.constant 2 : index
      %c0_133 = arith.constant 0 : index
      %142 = vector.load %arg22[%c0_130, %c1_131, %c2_132, %c0_133] : memref<2x10x10x32xf32, #tpu.memory_space<vmem>>, vector<2x8x8x32xf32>
      %143 = vector.shape_cast %142 : vector<2x8x8x32xf32> to vector<128x32xf32>
      %c5_134 = arith.constant 5 : index
      %c0_135 = arith.constant 0 : index
      %c0_136 = arith.constant 0 : index
      %144 = vector.load %arg7[%c5_134, %c0_135, %c0_136] : memref<9x32x64xf32, #tpu.memory_space<vmem>>, vector<1x32x64xf32>
      %145 = vector.shape_cast %144 : vector<1x32x64xf32> to vector<32x64xf32>
      %cst_137 = arith.constant dense<0.000000e+00> : vector<128x64xf32>
      %146 = tpu.matmul %143, %145, %cst_137 {dimension_numbers = #tpu.dot_dimension_numbers<[1], [0], [0], [1], [0, 0, 1, 1], [], []>} : vector<128x32xf32>, vector<32x64xf32>, vector<128x64xf32> -> vector<128x64xf32>
      %147 = arith.addf %141, %146 : vector<128x64xf32>
      %c0_138 = arith.constant 0 : index
      %c2_139 = arith.constant 2 : index
      %c0_140 = arith.constant 0 : index
      %c0_141 = arith.constant 0 : index
      %148 = vector.load %arg22[%c0_138, %c2_139, %c0_140, %c0_141] : memref<2x10x10x32xf32, #tpu.memory_space<vmem>>, vector<2x8x8x32xf32>
      %149 = vector.shape_cast %148 : vector<2x8x8x32xf32> to vector<128x32xf32>
      %c6_142 = arith.constant 6 : index
      %c0_143 = arith.constant 0 : index
      %c0_144 = arith.constant 0 : index
      %150 = vector.load %arg7[%c6_142, %c0_143, %c0_144] : memref<9x32x64xf32, #tpu.memory_space<vmem>>, vector<1x32x64xf32>
      %151 = vector.shape_cast %150 : vector<1x32x64xf32> to vector<32x64xf32>
      %cst_145 = arith.constant dense<0.000000e+00> : vector<128x64xf32>
      %152 = tpu.matmul %149, %151, %cst_145 {dimension_numbers = #tpu.dot_dimension_numbers<[1], [0], [0], [1], [0, 0, 1, 1], [], []>} : vector<128x32xf32>, vector<32x64xf32>, vector<128x64xf32> -> vector<128x64xf32>
      %153 = arith.addf %147, %152 : vector<128x64xf32>
      %c0_146 = arith.constant 0 : index
      %c2_147 = arith.constant 2 : index
      %c1_148 = arith.constant 1 : index
      %c0_149 = arith.constant 0 : index
      %154 = vector.load %arg22[%c0_146, %c2_147, %c1_148, %c0_149] : memref<2x10x10x32xf32, #tpu.memory_space<vmem>>, vector<2x8x8x32xf32>
      %155 = vector.shape_cast %154 : vector<2x8x8x32xf32> to vector<128x32xf32>
      %c7_150 = arith.constant 7 : index
      %c0_151 = arith.constant 0 : index
      %c0_152 = arith.constant 0 : index
      %156 = vector.load %arg7[%c7_150, %c0_151, %c0_152] : memref<9x32x64xf32, #tpu.memory_space<vmem>>, vector<1x32x64xf32>
      %157 = vector.shape_cast %156 : vector<1x32x64xf32> to vector<32x64xf32>
      %cst_153 = arith.constant dense<0.000000e+00> : vector<128x64xf32>
      %158 = tpu.matmul %155, %157, %cst_153 {dimension_numbers = #tpu.dot_dimension_numbers<[1], [0], [0], [1], [0, 0, 1, 1], [], []>} : vector<128x32xf32>, vector<32x64xf32>, vector<128x64xf32> -> vector<128x64xf32>
      %159 = arith.addf %153, %158 : vector<128x64xf32>
      %c0_154 = arith.constant 0 : index
      %c2_155 = arith.constant 2 : index
      %c2_156 = arith.constant 2 : index
      %c0_157 = arith.constant 0 : index
      %160 = vector.load %arg22[%c0_154, %c2_155, %c2_156, %c0_157] : memref<2x10x10x32xf32, #tpu.memory_space<vmem>>, vector<2x8x8x32xf32>
      %161 = vector.shape_cast %160 : vector<2x8x8x32xf32> to vector<128x32xf32>
      %c8_158 = arith.constant 8 : index
      %c0_159 = arith.constant 0 : index
      %c0_160 = arith.constant 0 : index
      %162 = vector.load %arg7[%c8_158, %c0_159, %c0_160] : memref<9x32x64xf32, #tpu.memory_space<vmem>>, vector<1x32x64xf32>
      %163 = vector.shape_cast %162 : vector<1x32x64xf32> to vector<32x64xf32>
      %cst_161 = arith.constant dense<0.000000e+00> : vector<128x64xf32>
      %164 = tpu.matmul %161, %163, %cst_161 {dimension_numbers = #tpu.dot_dimension_numbers<[1], [0], [0], [1], [0, 0, 1, 1], [], []>} : vector<128x32xf32>, vector<32x64xf32>, vector<128x64xf32> -> vector<128x64xf32>
      %165 = arith.addf %159, %164 : vector<128x64xf32>
      %c0_162 = arith.constant 0 : index
      %c0_163 = arith.constant 0 : index
      %166 = vector.load %arg8[%c0_162, %c0_163] : memref<1x64xf32, #tpu.memory_space<vmem>>, vector<1x64xf32>
      %167 = vector.broadcast %166 : vector<1x64xf32> to vector<128x64xf32>
      %168 = arith.addf %165, %167 : vector<128x64xf32>
      %cst_164 = arith.constant 0.000000e+00 : f32
      %169 = vector.broadcast %cst_164 : f32 to vector<128x64xf32>
      %170 = arith.maximumf %168, %169 : vector<128x64xf32>
      %171 = vector.extract_strided_slice %170 {offsets = [0, 0], sizes = [1, 64], strides = [1, 1]} : vector<128x64xf32> to vector<1x64xf32>
      %172 = arith.truncf %171 : vector<1x64xf32> to vector<1x64xbf16>
      %c0_165 = arith.constant 0 : index
      %c0_166 = arith.constant 0 : index
      %173 = vector.load %arg23[%c0_165, %c0_166] : memref<2x4160xbf16, #tpu.memory_space<vmem>>, vector<1x64xbf16>
      tpu.vector_store %arg23[%c0_165, %c0_166], %172 {strides = array<i32>} : memref<2x4160xbf16, #tpu.memory_space<vmem>>, vector<1x64xbf16>,
      %174 = vector.extract_strided_slice %170 {offsets = [1, 0], sizes = [1, 64], strides = [1, 1]} : vector<128x64xf32> to vector<1x64xf32>
      %175 = arith.truncf %174 : vector<1x64xf32> to vector<1x64xbf16>
      %c0_167 = arith.constant 0 : index
      %c64 = arith.constant 64 : index
      %176 = vector.load %arg23[%c0_167, %c64] : memref<2x4160xbf16, #tpu.memory_space<vmem>>, vector<1x64xbf16>
      tpu.vector_store %arg23[%c0_167, %c64], %175 {strides = array<i32>} : memref<2x4160xbf16, #tpu.memory_space<vmem>>, vector<1x64xbf16>,
      %177 = vector.extract_strided_slice %170 {offsets = [2, 0], sizes = [1, 64], strides = [1, 1]} : vector<128x64xf32> to vector<1x64xf32>
      %178 = arith.truncf %177 : vector<1x64xf32> to vector<1x64xbf16>
      %c0_168 = arith.constant 0 : index
      %c128 = arith.constant 128 : index
      %179 = vector.load %arg23[%c0_168, %c128] : memref<2x4160xbf16, #tpu.memory_space<vmem>>, vector<1x64xbf16>
      tpu.vector_store %arg23[%c0_168, %c128], %178 {strides = array<i32>} : memref<2x4160xbf16, #tpu.memory_space<vmem>>, vector<1x64xbf16>,
      %180 = vector.extract_strided_slice %170 {offsets = [3, 0], sizes = [1, 64], strides = [1, 1]} : vector<128x64xf32> to vector<1x64xf32>
      %181 = arith.truncf %180 : vector<1x64xf32> to vector<1x64xbf16>
      %c0_169 = arith.constant 0 : index
      %c192 = arith.constant 192 : index
      %182 = vector.load %arg23[%c0_169, %c192] : memref<2x4160xbf16, #tpu.memory_space<vmem>>, vector<1x64xbf16>
      tpu.vector_store %arg23[%c0_169, %c192], %181 {strides = array<i32>} : memref<2x4160xbf16, #tpu.memory_space<vmem>>, vector<1x64xbf16>,
      %183 = vector.extract_strided_slice %170 {offsets = [4, 0], sizes = [1, 64], strides = [1, 1]} : vector<128x64xf32> to vector<1x64xf32>
      %184 = arith.truncf %183 : vector<1x64xf32> to vector<1x64xbf16>
      %c0_170 = arith.constant 0 : index
      %c256 = arith.constant 256 : index
      %185 = vector.load %arg23[%c0_170, %c256] : memref<2x4160xbf16, #tpu.memory_space<vmem>>, vector<1x64xbf16>
      tpu.vector_store %arg23[%c0_170, %c256], %184 {strides = array<i32>} : memref<2x4160xbf16, #tpu.memory_space<vmem>>, vector<1x64xbf16>,
      %186 = vector.extract_strided_slice %170 {offsets = [5, 0], sizes = [1, 64], strides = [1, 1]} : vector<128x64xf32> to vector<1x64xf32>
      %187 = arith.truncf %186 : vector<1x64xf32> to vector<1x64xbf16>
      %c0_171 = arith.constant 0 : index
      %c320 = arith.constant 320 : index
      %188 = vector.load %arg23[%c0_171, %c320] : memref<2x4160xbf16, #tpu.memory_space<vmem>>, vector<1x64xbf16>
      tpu.vector_store %arg23[%c0_171, %c320], %187 {strides = array<i32>} : memref<2x4160xbf16, #tpu.memory_space<vmem>>, vector<1x64xbf16>,
      %189 = vector.extract_strided_slice %170 {offsets = [6, 0], sizes = [1, 64], strides = [1, 1]} : vector<128x64xf32> to vector<1x64xf32>
      %190 = arith.truncf %189 : vector<1x64xf32> to vector<1x64xbf16>
      %c0_172 = arith.constant 0 : index
      %c384 = arith.constant 384 : index
      %191 = vector.load %arg23[%c0_172, %c384] : memref<2x4160xbf16, #tpu.memory_space<vmem>>, vector<1x64xbf16>
      tpu.vector_store %arg23[%c0_172, %c384], %190 {strides = array<i32>} : memref<2x4160xbf16, #tpu.memory_space<vmem>>, vector<1x64xbf16>,
      %192 = vector.extract_strided_slice %170 {offsets = [7, 0], sizes = [1, 64], strides = [1, 1]} : vector<128x64xf32> to vector<1x64xf32>
      %193 = arith.truncf %192 : vector<1x64xf32> to vector<1x64xbf16>
      %c0_173 = arith.constant 0 : index
      %c448 = arith.constant 448 : index
      %194 = vector.load %arg23[%c0_173, %c448] : memref<2x4160xbf16, #tpu.memory_space<vmem>>, vector<1x64xbf16>
      tpu.vector_store %arg23[%c0_173, %c448], %193 {strides = array<i32>} : memref<2x4160xbf16, #tpu.memory_space<vmem>>, vector<1x64xbf16>,
      %195 = vector.extract_strided_slice %170 {offsets = [8, 0], sizes = [1, 64], strides = [1, 1]} : vector<128x64xf32> to vector<1x64xf32>
      %196 = arith.truncf %195 : vector<1x64xf32> to vector<1x64xbf16>
      %c0_174 = arith.constant 0 : index
      %c512 = arith.constant 512 : index
      %197 = vector.load %arg23[%c0_174, %c512] : memref<2x4160xbf16, #tpu.memory_space<vmem>>, vector<1x64xbf16>
      tpu.vector_store %arg23[%c0_174, %c512], %196 {strides = array<i32>} : memref<2x4160xbf16, #tpu.memory_space<vmem>>, vector<1x64xbf16>,
      %198 = vector.extract_strided_slice %170 {offsets = [9, 0], sizes = [1, 64], strides = [1, 1]} : vector<128x64xf32> to vector<1x64xf32>
      %199 = arith.truncf %198 : vector<1x64xf32> to vector<1x64xbf16>
      %c0_175 = arith.constant 0 : index
      %c576 = arith.constant 576 : index
      %200 = vector.load %arg23[%c0_175, %c576] : memref<2x4160xbf16, #tpu.memory_space<vmem>>, vector<1x64xbf16>
      tpu.vector_store %arg23[%c0_175, %c576], %199 {strides = array<i32>} : memref<2x4160xbf16, #tpu.memory_space<vmem>>, vector<1x64xbf16>,
      %201 = vector.extract_strided_slice %170 {offsets = [10, 0], sizes = [1, 64], strides = [1, 1]} : vector<128x64xf32> to vector<1x64xf32>
      %202 = arith.truncf %201 : vector<1x64xf32> to vector<1x64xbf16>
      %c0_176 = arith.constant 0 : index
      %c640 = arith.constant 640 : index
      %203 = vector.load %arg23[%c0_176, %c640] : memref<2x4160xbf16, #tpu.memory_space<vmem>>, vector<1x64xbf16>
      tpu.vector_store %arg23[%c0_176, %c640], %202 {strides = array<i32>} : memref<2x4160xbf16, #tpu.memory_space<vmem>>, vector<1x64xbf16>,
      %204 = vector.extract_strided_slice %170 {offsets = [11, 0], sizes = [1, 64], strides = [1, 1]} : vector<128x64xf32> to vector<1x64xf32>
      %205 = arith.truncf %204 : vector<1x64xf32> to vector<1x64xbf16>
      %c0_177 = arith.constant 0 : index
      %c704 = arith.constant 704 : index
      %206 = vector.load %arg23[%c0_177, %c704] : memref<2x4160xbf16, #tpu.memory_space<vmem>>, vector<1x64xbf16>
      tpu.vector_store %arg23[%c0_177, %c704], %205 {strides = array<i32>} : memref<2x4160xbf16, #tpu.memory_space<vmem>>, vector<1x64xbf16>,
      %207 = vector.extract_strided_slice %170 {offsets = [12, 0], sizes = [1, 64], strides = [1, 1]} : vector<128x64xf32> to vector<1x64xf32>
      %208 = arith.truncf %207 : vector<1x64xf32> to vector<1x64xbf16>
      %c0_178 = arith.constant 0 : index
      %c768 = arith.constant 768 : index
      %209 = vector.load %arg23[%c0_178, %c768] : memref<2x4160xbf16, #tpu.memory_space<vmem>>, vector<1x64xbf16>
      tpu.vector_store %arg23[%c0_178, %c768], %208 {strides = array<i32>} : memref<2x4160xbf16, #tpu.memory_space<vmem>>, vector<1x64xbf16>,
      %210 = vector.extract_strided_slice %170 {offsets = [13, 0], sizes = [1, 64], strides = [1, 1]} : vector<128x64xf32> to vector<1x64xf32>
      %211 = arith.truncf %210 : vector<1x64xf32> to vector<1x64xbf16>
      %c0_179 = arith.constant 0 : index
      %c832 = arith.constant 832 : index
      %212 = vector.load %arg23[%c0_179, %c832] : memref<2x4160xbf16, #tpu.memory_space<vmem>>, vector<1x64xbf16>
      tpu.vector_store %arg23[%c0_179, %c832], %211 {strides = array<i32>} : memref<2x4160xbf16, #tpu.memory_space<vmem>>, vector<1x64xbf16>,
      %213 = vector.extract_strided_slice %170 {offsets = [14, 0], sizes = [1, 64], strides = [1, 1]} : vector<128x64xf32> to vector<1x64xf32>
      %214 = arith.truncf %213 : vector<1x64xf32> to vector<1x64xbf16>
      %c0_180 = arith.constant 0 : index
      %c896 = arith.constant 896 : index
      %215 = vector.load %arg23[%c0_180, %c896] : memref<2x4160xbf16, #tpu.memory_space<vmem>>, vector<1x64xbf16>
      tpu.vector_store %arg23[%c0_180, %c896], %214 {strides = array<i32>} : memref<2x4160xbf16, #tpu.memory_space<vmem>>, vector<1x64xbf16>,
      %216 = vector.extract_strided_slice %170 {offsets = [15, 0], sizes = [1, 64], strides = [1, 1]} : vector<128x64xf32> to vector<1x64xf32>
      %217 = arith.truncf %216 : vector<1x64xf32> to vector<1x64xbf16>
      %c0_181 = arith.constant 0 : index
      %c960 = arith.constant 960 : index
      %218 = vector.load %arg23[%c0_181, %c960] : memref<2x4160xbf16, #tpu.memory_space<vmem>>, vector<1x64xbf16>
      tpu.vector_store %arg23[%c0_181, %c960], %217 {strides = array<i32>} : memref<2x4160xbf16, #tpu.memory_space<vmem>>, vector<1x64xbf16>,
      %219 = vector.extract_strided_slice %170 {offsets = [16, 0], sizes = [1, 64], strides = [1, 1]} : vector<128x64xf32> to vector<1x64xf32>
      %220 = arith.truncf %219 : vector<1x64xf32> to vector<1x64xbf16>
      %c0_182 = arith.constant 0 : index
      %c1024 = arith.constant 1024 : index
      %221 = vector.load %arg23[%c0_182, %c1024] : memref<2x4160xbf16, #tpu.memory_space<vmem>>, vector<1x64xbf16>
      tpu.vector_store %arg23[%c0_182, %c1024], %220 {strides = array<i32>} : memref<2x4160xbf16, #tpu.memory_space<vmem>>, vector<1x64xbf16>,
      %222 = vector.extract_strided_slice %170 {offsets = [17, 0], sizes = [1, 64], strides = [1, 1]} : vector<128x64xf32> to vector<1x64xf32>
      %223 = arith.truncf %222 : vector<1x64xf32> to vector<1x64xbf16>
      %c0_183 = arith.constant 0 : index
      %c1088 = arith.constant 1088 : index
      %224 = vector.load %arg23[%c0_183, %c1088] : memref<2x4160xbf16, #tpu.memory_space<vmem>>, vector<1x64xbf16>
      tpu.vector_store %arg23[%c0_183, %c1088], %223 {strides = array<i32>} : memref<2x4160xbf16, #tpu.memory_space<vmem>>, vector<1x64xbf16>,
      %225 = vector.extract_strided_slice %170 {offsets = [18, 0], sizes = [1, 64], strides = [1, 1]} : vector<128x64xf32> to vector<1x64xf32>
      %226 = arith.truncf %225 : vector<1x64xf32> to vector<1x64xbf16>
      %c0_184 = arith.constant 0 : index
      %c1152 = arith.constant 1152 : index
      %227 = vector.load %arg23[%c0_184, %c1152] : memref<2x4160xbf16, #tpu.memory_space<vmem>>, vector<1x64xbf16>
      tpu.vector_store %arg23[%c0_184, %c1152], %226 {strides = array<i32>} : memref<2x4160xbf16, #tpu.memory_space<vmem>>, vector<1x64xbf16>,
      %228 = vector.extract_strided_slice %170 {offsets = [19, 0], sizes = [1, 64], strides = [1, 1]} : vector<128x64xf32> to vector<1x64xf32>
      %229 = arith.truncf %228 : vector<1x64xf32> to vector<1x64xbf16>
      %c0_185 = arith.constant 0 : index
      %c1216 = arith.constant 1216 : index
      %230 = vector.load %arg23[%c0_185, %c1216] : memref<2x4160xbf16, #tpu.memory_space<vmem>>, vector<1x64xbf16>
      tpu.vector_store %arg23[%c0_185, %c1216], %229 {strides = array<i32>} : memref<2x4160xbf16, #tpu.memory_space<vmem>>, vector<1x64xbf16>,
      %231 = vector.extract_strided_slice %170 {offsets = [20, 0], sizes = [1, 64], strides = [1, 1]} : vector<128x64xf32> to vector<1x64xf32>
      %232 = arith.truncf %231 : vector<1x64xf32> to vector<1x64xbf16>
      %c0_186 = arith.constant 0 : index
      %c1280 = arith.constant 1280 : index
      %233 = vector.load %arg23[%c0_186, %c1280] : memref<2x4160xbf16, #tpu.memory_space<vmem>>, vector<1x64xbf16>
      tpu.vector_store %arg23[%c0_186, %c1280], %232 {strides = array<i32>} : memref<2x4160xbf16, #tpu.memory_space<vmem>>, vector<1x64xbf16>,
      %234 = vector.extract_strided_slice %170 {offsets = [21, 0], sizes = [1, 64], strides = [1, 1]} : vector<128x64xf32> to vector<1x64xf32>
      %235 = arith.truncf %234 : vector<1x64xf32> to vector<1x64xbf16>
      %c0_187 = arith.constant 0 : index
      %c1344 = arith.constant 1344 : index
      %236 = vector.load %arg23[%c0_187, %c1344] : memref<2x4160xbf16, #tpu.memory_space<vmem>>, vector<1x64xbf16>
      tpu.vector_store %arg23[%c0_187, %c1344], %235 {strides = array<i32>} : memref<2x4160xbf16, #tpu.memory_space<vmem>>, vector<1x64xbf16>,
      %237 = vector.extract_strided_slice %170 {offsets = [22, 0], sizes = [1, 64], strides = [1, 1]} : vector<128x64xf32> to vector<1x64xf32>
      %238 = arith.truncf %237 : vector<1x64xf32> to vector<1x64xbf16>
      %c0_188 = arith.constant 0 : index
      %c1408 = arith.constant 1408 : index
      %239 = vector.load %arg23[%c0_188, %c1408] : memref<2x4160xbf16, #tpu.memory_space<vmem>>, vector<1x64xbf16>
      tpu.vector_store %arg23[%c0_188, %c1408], %238 {strides = array<i32>} : memref<2x4160xbf16, #tpu.memory_space<vmem>>, vector<1x64xbf16>,
      %240 = vector.extract_strided_slice %170 {offsets = [23, 0], sizes = [1, 64], strides = [1, 1]} : vector<128x64xf32> to vector<1x64xf32>
      %241 = arith.truncf %240 : vector<1x64xf32> to vector<1x64xbf16>
      %c0_189 = arith.constant 0 : index
      %c1472 = arith.constant 1472 : index
      %242 = vector.load %arg23[%c0_189, %c1472] : memref<2x4160xbf16, #tpu.memory_space<vmem>>, vector<1x64xbf16>
      tpu.vector_store %arg23[%c0_189, %c1472], %241 {strides = array<i32>} : memref<2x4160xbf16, #tpu.memory_space<vmem>>, vector<1x64xbf16>,
      %243 = vector.extract_strided_slice %170 {offsets = [24, 0], sizes = [1, 64], strides = [1, 1]} : vector<128x64xf32> to vector<1x64xf32>
      %244 = arith.truncf %243 : vector<1x64xf32> to vector<1x64xbf16>
      %c0_190 = arith.constant 0 : index
      %c1536 = arith.constant 1536 : index
      %245 = vector.load %arg23[%c0_190, %c1536] : memref<2x4160xbf16, #tpu.memory_space<vmem>>, vector<1x64xbf16>
      tpu.vector_store %arg23[%c0_190, %c1536], %244 {strides = array<i32>} : memref<2x4160xbf16, #tpu.memory_space<vmem>>, vector<1x64xbf16>,
      %246 = vector.extract_strided_slice %170 {offsets = [25, 0], sizes = [1, 64], strides = [1, 1]} : vector<128x64xf32> to vector<1x64xf32>
      %247 = arith.truncf %246 : vector<1x64xf32> to vector<1x64xbf16>
      %c0_191 = arith.constant 0 : index
      %c1600 = arith.constant 1600 : index
      %248 = vector.load %arg23[%c0_191, %c1600] : memref<2x4160xbf16, #tpu.memory_space<vmem>>, vector<1x64xbf16>
      tpu.vector_store %arg23[%c0_191, %c1600], %247 {strides = array<i32>} : memref<2x4160xbf16, #tpu.memory_space<vmem>>, vector<1x64xbf16>,
      %249 = vector.extract_strided_slice %170 {offsets = [26, 0], sizes = [1, 64], strides = [1, 1]} : vector<128x64xf32> to vector<1x64xf32>
      %250 = arith.truncf %249 : vector<1x64xf32> to vector<1x64xbf16>
      %c0_192 = arith.constant 0 : index
      %c1664 = arith.constant 1664 : index
      %251 = vector.load %arg23[%c0_192, %c1664] : memref<2x4160xbf16, #tpu.memory_space<vmem>>, vector<1x64xbf16>
      tpu.vector_store %arg23[%c0_192, %c1664], %250 {strides = array<i32>} : memref<2x4160xbf16, #tpu.memory_space<vmem>>, vector<1x64xbf16>,
      %252 = vector.extract_strided_slice %170 {offsets = [27, 0], sizes = [1, 64], strides = [1, 1]} : vector<128x64xf32> to vector<1x64xf32>
      %253 = arith.truncf %252 : vector<1x64xf32> to vector<1x64xbf16>
      %c0_193 = arith.constant 0 : index
      %c1728 = arith.constant 1728 : index
      %254 = vector.load %arg23[%c0_193, %c1728] : memref<2x4160xbf16, #tpu.memory_space<vmem>>, vector<1x64xbf16>
      tpu.vector_store %arg23[%c0_193, %c1728], %253 {strides = array<i32>} : memref<2x4160xbf16, #tpu.memory_space<vmem>>, vector<1x64xbf16>,
      %255 = vector.extract_strided_slice %170 {offsets = [28, 0], sizes = [1, 64], strides = [1, 1]} : vector<128x64xf32> to vector<1x64xf32>
      %256 = arith.truncf %255 : vector<1x64xf32> to vector<1x64xbf16>
      %c0_194 = arith.constant 0 : index
      %c1792 = arith.constant 1792 : index
      %257 = vector.load %arg23[%c0_194, %c1792] : memref<2x4160xbf16, #tpu.memory_space<vmem>>, vector<1x64xbf16>
      tpu.vector_store %arg23[%c0_194, %c1792], %256 {strides = array<i32>} : memref<2x4160xbf16, #tpu.memory_space<vmem>>, vector<1x64xbf16>,
      %258 = vector.extract_strided_slice %170 {offsets = [29, 0], sizes = [1, 64], strides = [1, 1]} : vector<128x64xf32> to vector<1x64xf32>
      %259 = arith.truncf %258 : vector<1x64xf32> to vector<1x64xbf16>
      %c0_195 = arith.constant 0 : index
      %c1856 = arith.constant 1856 : index
      %260 = vector.load %arg23[%c0_195, %c1856] : memref<2x4160xbf16, #tpu.memory_space<vmem>>, vector<1x64xbf16>
      tpu.vector_store %arg23[%c0_195, %c1856], %259 {strides = array<i32>} : memref<2x4160xbf16, #tpu.memory_space<vmem>>, vector<1x64xbf16>,
      %261 = vector.extract_strided_slice %170 {offsets = [30, 0], sizes = [1, 64], strides = [1, 1]} : vector<128x64xf32> to vector<1x64xf32>
      %262 = arith.truncf %261 : vector<1x64xf32> to vector<1x64xbf16>
      %c0_196 = arith.constant 0 : index
      %c1920 = arith.constant 1920 : index
      %263 = vector.load %arg23[%c0_196, %c1920] : memref<2x4160xbf16, #tpu.memory_space<vmem>>, vector<1x64xbf16>
      tpu.vector_store %arg23[%c0_196, %c1920], %262 {strides = array<i32>} : memref<2x4160xbf16, #tpu.memory_space<vmem>>, vector<1x64xbf16>,
      %264 = vector.extract_strided_slice %170 {offsets = [31, 0], sizes = [1, 64], strides = [1, 1]} : vector<128x64xf32> to vector<1x64xf32>
      %265 = arith.truncf %264 : vector<1x64xf32> to vector<1x64xbf16>
      %c0_197 = arith.constant 0 : index
      %c1984 = arith.constant 1984 : index
      %266 = vector.load %arg23[%c0_197, %c1984] : memref<2x4160xbf16, #tpu.memory_space<vmem>>, vector<1x64xbf16>
      tpu.vector_store %arg23[%c0_197, %c1984], %265 {strides = array<i32>} : memref<2x4160xbf16, #tpu.memory_space<vmem>>, vector<1x64xbf16>,
      %267 = vector.extract_strided_slice %170 {offsets = [32, 0], sizes = [1, 64], strides = [1, 1]} : vector<128x64xf32> to vector<1x64xf32>
      %268 = arith.truncf %267 : vector<1x64xf32> to vector<1x64xbf16>
      %c0_198 = arith.constant 0 : index
      %c2048 = arith.constant 2048 : index
      %269 = vector.load %arg23[%c0_198, %c2048] : memref<2x4160xbf16, #tpu.memory_space<vmem>>, vector<1x64xbf16>
      tpu.vector_store %arg23[%c0_198, %c2048], %268 {strides = array<i32>} : memref<2x4160xbf16, #tpu.memory_space<vmem>>, vector<1x64xbf16>,
      %270 = vector.extract_strided_slice %170 {offsets = [33, 0], sizes = [1, 64], strides = [1, 1]} : vector<128x64xf32> to vector<1x64xf32>
      %271 = arith.truncf %270 : vector<1x64xf32> to vector<1x64xbf16>
      %c0_199 = arith.constant 0 : index
      %c2112 = arith.constant 2112 : index
      %272 = vector.load %arg23[%c0_199, %c2112] : memref<2x4160xbf16, #tpu.memory_space<vmem>>, vector<1x64xbf16>
      tpu.vector_store %arg23[%c0_199, %c2112], %271 {strides = array<i32>} : memref<2x4160xbf16, #tpu.memory_space<vmem>>, vector<1x64xbf16>,
      %273 = vector.extract_strided_slice %170 {offsets = [34, 0], sizes = [1, 64], strides = [1, 1]} : vector<128x64xf32> to vector<1x64xf32>
      %274 = arith.truncf %273 : vector<1x64xf32> to vector<1x64xbf16>
      %c0_200 = arith.constant 0 : index
      %c2176 = arith.constant 2176 : index
      %275 = vector.load %arg23[%c0_200, %c2176] : memref<2x4160xbf16, #tpu.memory_space<vmem>>, vector<1x64xbf16>
      tpu.vector_store %arg23[%c0_200, %c2176], %274 {strides = array<i32>} : memref<2x4160xbf16, #tpu.memory_space<vmem>>, vector<1x64xbf16>,
      %276 = vector.extract_strided_slice %170 {offsets = [35, 0], sizes = [1, 64], strides = [1, 1]} : vector<128x64xf32> to vector<1x64xf32>
      %277 = arith.truncf %276 : vector<1x64xf32> to vector<1x64xbf16>
      %c0_201 = arith.constant 0 : index
      %c2240 = arith.constant 2240 : index
      %278 = vector.load %arg23[%c0_201, %c2240] : memref<2x4160xbf16, #tpu.memory_space<vmem>>, vector<1x64xbf16>
      tpu.vector_store %arg23[%c0_201, %c2240], %277 {strides = array<i32>} : memref<2x4160xbf16, #tpu.memory_space<vmem>>, vector<1x64xbf16>,
      %279 = vector.extract_strided_slice %170 {offsets = [36, 0], sizes = [1, 64], strides = [1, 1]} : vector<128x64xf32> to vector<1x64xf32>
      %280 = arith.truncf %279 : vector<1x64xf32> to vector<1x64xbf16>
      %c0_202 = arith.constant 0 : index
      %c2304 = arith.constant 2304 : index
      %281 = vector.load %arg23[%c0_202, %c2304] : memref<2x4160xbf16, #tpu.memory_space<vmem>>, vector<1x64xbf16>
      tpu.vector_store %arg23[%c0_202, %c2304], %280 {strides = array<i32>} : memref<2x4160xbf16, #tpu.memory_space<vmem>>, vector<1x64xbf16>,
      %282 = vector.extract_strided_slice %170 {offsets = [37, 0], sizes = [1, 64], strides = [1, 1]} : vector<128x64xf32> to vector<1x64xf32>
      %283 = arith.truncf %282 : vector<1x64xf32> to vector<1x64xbf16>
      %c0_203 = arith.constant 0 : index
      %c2368 = arith.constant 2368 : index
      %284 = vector.load %arg23[%c0_203, %c2368] : memref<2x4160xbf16, #tpu.memory_space<vmem>>, vector<1x64xbf16>
      tpu.vector_store %arg23[%c0_203, %c2368], %283 {strides = array<i32>} : memref<2x4160xbf16, #tpu.memory_space<vmem>>, vector<1x64xbf16>,
      %285 = vector.extract_strided_slice %170 {offsets = [38, 0], sizes = [1, 64], strides = [1, 1]} : vector<128x64xf32> to vector<1x64xf32>
      %286 = arith.truncf %285 : vector<1x64xf32> to vector<1x64xbf16>
      %c0_204 = arith.constant 0 : index
      %c2432 = arith.constant 2432 : index
      %287 = vector.load %arg23[%c0_204, %c2432] : memref<2x4160xbf16, #tpu.memory_space<vmem>>, vector<1x64xbf16>
      tpu.vector_store %arg23[%c0_204, %c2432], %286 {strides = array<i32>} : memref<2x4160xbf16, #tpu.memory_space<vmem>>, vector<1x64xbf16>,
      %288 = vector.extract_strided_slice %170 {offsets = [39, 0], sizes = [1, 64], strides = [1, 1]} : vector<128x64xf32> to vector<1x64xf32>
      %289 = arith.truncf %288 : vector<1x64xf32> to vector<1x64xbf16>
      %c0_205 = arith.constant 0 : index
      %c2496 = arith.constant 2496 : index
      %290 = vector.load %arg23[%c0_205, %c2496] : memref<2x4160xbf16, #tpu.memory_space<vmem>>, vector<1x64xbf16>
      tpu.vector_store %arg23[%c0_205, %c2496], %289 {strides = array<i32>} : memref<2x4160xbf16, #tpu.memory_space<vmem>>, vector<1x64xbf16>,
      %291 = vector.extract_strided_slice %170 {offsets = [40, 0], sizes = [1, 64], strides = [1, 1]} : vector<128x64xf32> to vector<1x64xf32>
      %292 = arith.truncf %291 : vector<1x64xf32> to vector<1x64xbf16>
      %c0_206 = arith.constant 0 : index
      %c2560 = arith.constant 2560 : index
      %293 = vector.load %arg23[%c0_206, %c2560] : memref<2x4160xbf16, #tpu.memory_space<vmem>>, vector<1x64xbf16>
      tpu.vector_store %arg23[%c0_206, %c2560], %292 {strides = array<i32>} : memref<2x4160xbf16, #tpu.memory_space<vmem>>, vector<1x64xbf16>,
      %294 = vector.extract_strided_slice %170 {offsets = [41, 0], sizes = [1, 64], strides = [1, 1]} : vector<128x64xf32> to vector<1x64xf32>
      %295 = arith.truncf %294 : vector<1x64xf32> to vector<1x64xbf16>
      %c0_207 = arith.constant 0 : index
      %c2624 = arith.constant 2624 : index
      %296 = vector.load %arg23[%c0_207, %c2624] : memref<2x4160xbf16, #tpu.memory_space<vmem>>, vector<1x64xbf16>
      tpu.vector_store %arg23[%c0_207, %c2624], %295 {strides = array<i32>} : memref<2x4160xbf16, #tpu.memory_space<vmem>>, vector<1x64xbf16>,
      %297 = vector.extract_strided_slice %170 {offsets = [42, 0], sizes = [1, 64], strides = [1, 1]} : vector<128x64xf32> to vector<1x64xf32>
      %298 = arith.truncf %297 : vector<1x64xf32> to vector<1x64xbf16>
      %c0_208 = arith.constant 0 : index
      %c2688 = arith.constant 2688 : index
      %299 = vector.load %arg23[%c0_208, %c2688] : memref<2x4160xbf16, #tpu.memory_space<vmem>>, vector<1x64xbf16>
      tpu.vector_store %arg23[%c0_208, %c2688], %298 {strides = array<i32>} : memref<2x4160xbf16, #tpu.memory_space<vmem>>, vector<1x64xbf16>,
      %300 = vector.extract_strided_slice %170 {offsets = [43, 0], sizes = [1, 64], strides = [1, 1]} : vector<128x64xf32> to vector<1x64xf32>
      %301 = arith.truncf %300 : vector<1x64xf32> to vector<1x64xbf16>
      %c0_209 = arith.constant 0 : index
      %c2752 = arith.constant 2752 : index
      %302 = vector.load %arg23[%c0_209, %c2752] : memref<2x4160xbf16, #tpu.memory_space<vmem>>, vector<1x64xbf16>
      tpu.vector_store %arg23[%c0_209, %c2752], %301 {strides = array<i32>} : memref<2x4160xbf16, #tpu.memory_space<vmem>>, vector<1x64xbf16>,
      %303 = vector.extract_strided_slice %170 {offsets = [44, 0], sizes = [1, 64], strides = [1, 1]} : vector<128x64xf32> to vector<1x64xf32>
      %304 = arith.truncf %303 : vector<1x64xf32> to vector<1x64xbf16>
      %c0_210 = arith.constant 0 : index
      %c2816 = arith.constant 2816 : index
      %305 = vector.load %arg23[%c0_210, %c2816] : memref<2x4160xbf16, #tpu.memory_space<vmem>>, vector<1x64xbf16>
      tpu.vector_store %arg23[%c0_210, %c2816], %304 {strides = array<i32>} : memref<2x4160xbf16, #tpu.memory_space<vmem>>, vector<1x64xbf16>,
      %306 = vector.extract_strided_slice %170 {offsets = [45, 0], sizes = [1, 64], strides = [1, 1]} : vector<128x64xf32> to vector<1x64xf32>
      %307 = arith.truncf %306 : vector<1x64xf32> to vector<1x64xbf16>
      %c0_211 = arith.constant 0 : index
      %c2880 = arith.constant 2880 : index
      %308 = vector.load %arg23[%c0_211, %c2880] : memref<2x4160xbf16, #tpu.memory_space<vmem>>, vector<1x64xbf16>
      tpu.vector_store %arg23[%c0_211, %c2880], %307 {strides = array<i32>} : memref<2x4160xbf16, #tpu.memory_space<vmem>>, vector<1x64xbf16>,
      %309 = vector.extract_strided_slice %170 {offsets = [46, 0], sizes = [1, 64], strides = [1, 1]} : vector<128x64xf32> to vector<1x64xf32>
      %310 = arith.truncf %309 : vector<1x64xf32> to vector<1x64xbf16>
      %c0_212 = arith.constant 0 : index
      %c2944 = arith.constant 2944 : index
      %311 = vector.load %arg23[%c0_212, %c2944] : memref<2x4160xbf16, #tpu.memory_space<vmem>>, vector<1x64xbf16>
      tpu.vector_store %arg23[%c0_212, %c2944], %310 {strides = array<i32>} : memref<2x4160xbf16, #tpu.memory_space<vmem>>, vector<1x64xbf16>,
      %312 = vector.extract_strided_slice %170 {offsets = [47, 0], sizes = [1, 64], strides = [1, 1]} : vector<128x64xf32> to vector<1x64xf32>
      %313 = arith.truncf %312 : vector<1x64xf32> to vector<1x64xbf16>
      %c0_213 = arith.constant 0 : index
      %c3008 = arith.constant 3008 : index
      %314 = vector.load %arg23[%c0_213, %c3008] : memref<2x4160xbf16, #tpu.memory_space<vmem>>, vector<1x64xbf16>
      tpu.vector_store %arg23[%c0_213, %c3008], %313 {strides = array<i32>} : memref<2x4160xbf16, #tpu.memory_space<vmem>>, vector<1x64xbf16>,
      %315 = vector.extract_strided_slice %170 {offsets = [48, 0], sizes = [1, 64], strides = [1, 1]} : vector<128x64xf32> to vector<1x64xf32>
      %316 = arith.truncf %315 : vector<1x64xf32> to vector<1x64xbf16>
      %c0_214 = arith.constant 0 : index
      %c3072 = arith.constant 3072 : index
      %317 = vector.load %arg23[%c0_214, %c3072] : memref<2x4160xbf16, #tpu.memory_space<vmem>>, vector<1x64xbf16>
      tpu.vector_store %arg23[%c0_214, %c3072], %316 {strides = array<i32>} : memref<2x4160xbf16, #tpu.memory_space<vmem>>, vector<1x64xbf16>,
      %318 = vector.extract_strided_slice %170 {offsets = [49, 0], sizes = [1, 64], strides = [1, 1]} : vector<128x64xf32> to vector<1x64xf32>
      %319 = arith.truncf %318 : vector<1x64xf32> to vector<1x64xbf16>
      %c0_215 = arith.constant 0 : index
      %c3136 = arith.constant 3136 : index
      %320 = vector.load %arg23[%c0_215, %c3136] : memref<2x4160xbf16, #tpu.memory_space<vmem>>, vector<1x64xbf16>
      tpu.vector_store %arg23[%c0_215, %c3136], %319 {strides = array<i32>} : memref<2x4160xbf16, #tpu.memory_space<vmem>>, vector<1x64xbf16>,
      %321 = vector.extract_strided_slice %170 {offsets = [50, 0], sizes = [1, 64], strides = [1, 1]} : vector<128x64xf32> to vector<1x64xf32>
      %322 = arith.truncf %321 : vector<1x64xf32> to vector<1x64xbf16>
      %c0_216 = arith.constant 0 : index
      %c3200 = arith.constant 3200 : index
      %323 = vector.load %arg23[%c0_216, %c3200] : memref<2x4160xbf16, #tpu.memory_space<vmem>>, vector<1x64xbf16>
      tpu.vector_store %arg23[%c0_216, %c3200], %322 {strides = array<i32>} : memref<2x4160xbf16, #tpu.memory_space<vmem>>, vector<1x64xbf16>,
      %324 = vector.extract_strided_slice %170 {offsets = [51, 0], sizes = [1, 64], strides = [1, 1]} : vector<128x64xf32> to vector<1x64xf32>
      %325 = arith.truncf %324 : vector<1x64xf32> to vector<1x64xbf16>
      %c0_217 = arith.constant 0 : index
      %c3264 = arith.constant 3264 : index
      %326 = vector.load %arg23[%c0_217, %c3264] : memref<2x4160xbf16, #tpu.memory_space<vmem>>, vector<1x64xbf16>
      tpu.vector_store %arg23[%c0_217, %c3264], %325 {strides = array<i32>} : memref<2x4160xbf16, #tpu.memory_space<vmem>>, vector<1x64xbf16>,
      %327 = vector.extract_strided_slice %170 {offsets = [52, 0], sizes = [1, 64], strides = [1, 1]} : vector<128x64xf32> to vector<1x64xf32>
      %328 = arith.truncf %327 : vector<1x64xf32> to vector<1x64xbf16>
      %c0_218 = arith.constant 0 : index
      %c3328 = arith.constant 3328 : index
      %329 = vector.load %arg23[%c0_218, %c3328] : memref<2x4160xbf16, #tpu.memory_space<vmem>>, vector<1x64xbf16>
      tpu.vector_store %arg23[%c0_218, %c3328], %328 {strides = array<i32>} : memref<2x4160xbf16, #tpu.memory_space<vmem>>, vector<1x64xbf16>,
      %330 = vector.extract_strided_slice %170 {offsets = [53, 0], sizes = [1, 64], strides = [1, 1]} : vector<128x64xf32> to vector<1x64xf32>
      %331 = arith.truncf %330 : vector<1x64xf32> to vector<1x64xbf16>
      %c0_219 = arith.constant 0 : index
      %c3392 = arith.constant 3392 : index
      %332 = vector.load %arg23[%c0_219, %c3392] : memref<2x4160xbf16, #tpu.memory_space<vmem>>, vector<1x64xbf16>
      tpu.vector_store %arg23[%c0_219, %c3392], %331 {strides = array<i32>} : memref<2x4160xbf16, #tpu.memory_space<vmem>>, vector<1x64xbf16>,
      %333 = vector.extract_strided_slice %170 {offsets = [54, 0], sizes = [1, 64], strides = [1, 1]} : vector<128x64xf32> to vector<1x64xf32>
      %334 = arith.truncf %333 : vector<1x64xf32> to vector<1x64xbf16>
      %c0_220 = arith.constant 0 : index
      %c3456 = arith.constant 3456 : index
      %335 = vector.load %arg23[%c0_220, %c3456] : memref<2x4160xbf16, #tpu.memory_space<vmem>>, vector<1x64xbf16>
      tpu.vector_store %arg23[%c0_220, %c3456], %334 {strides = array<i32>} : memref<2x4160xbf16, #tpu.memory_space<vmem>>, vector<1x64xbf16>,
      %336 = vector.extract_strided_slice %170 {offsets = [55, 0], sizes = [1, 64], strides = [1, 1]} : vector<128x64xf32> to vector<1x64xf32>
      %337 = arith.truncf %336 : vector<1x64xf32> to vector<1x64xbf16>
      %c0_221 = arith.constant 0 : index
      %c3520 = arith.constant 3520 : index
      %338 = vector.load %arg23[%c0_221, %c3520] : memref<2x4160xbf16, #tpu.memory_space<vmem>>, vector<1x64xbf16>
      tpu.vector_store %arg23[%c0_221, %c3520], %337 {strides = array<i32>} : memref<2x4160xbf16, #tpu.memory_space<vmem>>, vector<1x64xbf16>,
      %339 = vector.extract_strided_slice %170 {offsets = [56, 0], sizes = [1, 64], strides = [1, 1]} : vector<128x64xf32> to vector<1x64xf32>
      %340 = arith.truncf %339 : vector<1x64xf32> to vector<1x64xbf16>
      %c0_222 = arith.constant 0 : index
      %c3584 = arith.constant 3584 : index
      %341 = vector.load %arg23[%c0_222, %c3584] : memref<2x4160xbf16, #tpu.memory_space<vmem>>, vector<1x64xbf16>
      tpu.vector_store %arg23[%c0_222, %c3584], %340 {strides = array<i32>} : memref<2x4160xbf16, #tpu.memory_space<vmem>>, vector<1x64xbf16>,
      %342 = vector.extract_strided_slice %170 {offsets = [57, 0], sizes = [1, 64], strides = [1, 1]} : vector<128x64xf32> to vector<1x64xf32>
      %343 = arith.truncf %342 : vector<1x64xf32> to vector<1x64xbf16>
      %c0_223 = arith.constant 0 : index
      %c3648 = arith.constant 3648 : index
      %344 = vector.load %arg23[%c0_223, %c3648] : memref<2x4160xbf16, #tpu.memory_space<vmem>>, vector<1x64xbf16>
      tpu.vector_store %arg23[%c0_223, %c3648], %343 {strides = array<i32>} : memref<2x4160xbf16, #tpu.memory_space<vmem>>, vector<1x64xbf16>,
      %345 = vector.extract_strided_slice %170 {offsets = [58, 0], sizes = [1, 64], strides = [1, 1]} : vector<128x64xf32> to vector<1x64xf32>
      %346 = arith.truncf %345 : vector<1x64xf32> to vector<1x64xbf16>
      %c0_224 = arith.constant 0 : index
      %c3712 = arith.constant 3712 : index
      %347 = vector.load %arg23[%c0_224, %c3712] : memref<2x4160xbf16, #tpu.memory_space<vmem>>, vector<1x64xbf16>
      tpu.vector_store %arg23[%c0_224, %c3712], %346 {strides = array<i32>} : memref<2x4160xbf16, #tpu.memory_space<vmem>>, vector<1x64xbf16>,
      %348 = vector.extract_strided_slice %170 {offsets = [59, 0], sizes = [1, 64], strides = [1, 1]} : vector<128x64xf32> to vector<1x64xf32>
      %349 = arith.truncf %348 : vector<1x64xf32> to vector<1x64xbf16>
      %c0_225 = arith.constant 0 : index
      %c3776 = arith.constant 3776 : index
      %350 = vector.load %arg23[%c0_225, %c3776] : memref<2x4160xbf16, #tpu.memory_space<vmem>>, vector<1x64xbf16>
      tpu.vector_store %arg23[%c0_225, %c3776], %349 {strides = array<i32>} : memref<2x4160xbf16, #tpu.memory_space<vmem>>, vector<1x64xbf16>,
      %351 = vector.extract_strided_slice %170 {offsets = [60, 0], sizes = [1, 64], strides = [1, 1]} : vector<128x64xf32> to vector<1x64xf32>
      %352 = arith.truncf %351 : vector<1x64xf32> to vector<1x64xbf16>
      %c0_226 = arith.constant 0 : index
      %c3840 = arith.constant 3840 : index
      %353 = vector.load %arg23[%c0_226, %c3840] : memref<2x4160xbf16, #tpu.memory_space<vmem>>, vector<1x64xbf16>
      tpu.vector_store %arg23[%c0_226, %c3840], %352 {strides = array<i32>} : memref<2x4160xbf16, #tpu.memory_space<vmem>>, vector<1x64xbf16>,
      %354 = vector.extract_strided_slice %170 {offsets = [61, 0], sizes = [1, 64], strides = [1, 1]} : vector<128x64xf32> to vector<1x64xf32>
      %355 = arith.truncf %354 : vector<1x64xf32> to vector<1x64xbf16>
      %c0_227 = arith.constant 0 : index
      %c3904 = arith.constant 3904 : index
      %356 = vector.load %arg23[%c0_227, %c3904] : memref<2x4160xbf16, #tpu.memory_space<vmem>>, vector<1x64xbf16>
      tpu.vector_store %arg23[%c0_227, %c3904], %355 {strides = array<i32>} : memref<2x4160xbf16, #tpu.memory_space<vmem>>, vector<1x64xbf16>,
      %357 = vector.extract_strided_slice %170 {offsets = [62, 0], sizes = [1, 64], strides = [1, 1]} : vector<128x64xf32> to vector<1x64xf32>
      %358 = arith.truncf %357 : vector<1x64xf32> to vector<1x64xbf16>
      %c0_228 = arith.constant 0 : index
      %c3968 = arith.constant 3968 : index
      %359 = vector.load %arg23[%c0_228, %c3968] : memref<2x4160xbf16, #tpu.memory_space<vmem>>, vector<1x64xbf16>
      tpu.vector_store %arg23[%c0_228, %c3968], %358 {strides = array<i32>} : memref<2x4160xbf16, #tpu.memory_space<vmem>>, vector<1x64xbf16>,
      %360 = vector.extract_strided_slice %170 {offsets = [63, 0], sizes = [1, 64], strides = [1, 1]} : vector<128x64xf32> to vector<1x64xf32>
      %361 = arith.truncf %360 : vector<1x64xf32> to vector<1x64xbf16>
      %c0_229 = arith.constant 0 : index
      %c4032 = arith.constant 4032 : index
      %362 = vector.load %arg23[%c0_229, %c4032] : memref<2x4160xbf16, #tpu.memory_space<vmem>>, vector<1x64xbf16>
      tpu.vector_store %arg23[%c0_229, %c4032], %361 {strides = array<i32>} : memref<2x4160xbf16, #tpu.memory_space<vmem>>, vector<1x64xbf16>,
      %363 = vector.extract_strided_slice %170 {offsets = [64, 0], sizes = [1, 64], strides = [1, 1]} : vector<128x64xf32> to vector<1x64xf32>
      %364 = arith.truncf %363 : vector<1x64xf32> to vector<1x64xbf16>
      %c1_230 = arith.constant 1 : index
      %c0_231 = arith.constant 0 : index
      %365 = vector.load %arg23[%c1_230, %c0_231] : memref<2x4160xbf16, #tpu.memory_space<vmem>>, vector<1x64xbf16>
      tpu.vector_store %arg23[%c1_230, %c0_231], %364 {strides = array<i32>} : memref<2x4160xbf16, #tpu.memory_space<vmem>>, vector<1x64xbf16>,
      %366 = vector.extract_strided_slice %170 {offsets = [65, 0], sizes = [1, 64], strides = [1, 1]} : vector<128x64xf32> to vector<1x64xf32>
      %367 = arith.truncf %366 : vector<1x64xf32> to vector<1x64xbf16>
      %c1_232 = arith.constant 1 : index
      %c64_233 = arith.constant 64 : index
      %368 = vector.load %arg23[%c1_232, %c64_233] : memref<2x4160xbf16, #tpu.memory_space<vmem>>, vector<1x64xbf16>
      tpu.vector_store %arg23[%c1_232, %c64_233], %367 {strides = array<i32>} : memref<2x4160xbf16, #tpu.memory_space<vmem>>, vector<1x64xbf16>,
      %369 = vector.extract_strided_slice %170 {offsets = [66, 0], sizes = [1, 64], strides = [1, 1]} : vector<128x64xf32> to vector<1x64xf32>
      %370 = arith.truncf %369 : vector<1x64xf32> to vector<1x64xbf16>
      %c1_234 = arith.constant 1 : index
      %c128_235 = arith.constant 128 : index
      %371 = vector.load %arg23[%c1_234, %c128_235] : memref<2x4160xbf16, #tpu.memory_space<vmem>>, vector<1x64xbf16>
      tpu.vector_store %arg23[%c1_234, %c128_235], %370 {strides = array<i32>} : memref<2x4160xbf16, #tpu.memory_space<vmem>>, vector<1x64xbf16>,
      %372 = vector.extract_strided_slice %170 {offsets = [67, 0], sizes = [1, 64], strides = [1, 1]} : vector<128x64xf32> to vector<1x64xf32>
      %373 = arith.truncf %372 : vector<1x64xf32> to vector<1x64xbf16>
      %c1_236 = arith.constant 1 : index
      %c192_237 = arith.constant 192 : index
      %374 = vector.load %arg23[%c1_236, %c192_237] : memref<2x4160xbf16, #tpu.memory_space<vmem>>, vector<1x64xbf16>
      tpu.vector_store %arg23[%c1_236, %c192_237], %373 {strides = array<i32>} : memref<2x4160xbf16, #tpu.memory_space<vmem>>, vector<1x64xbf16>,
      %375 = vector.extract_strided_slice %170 {offsets = [68, 0], sizes = [1, 64], strides = [1, 1]} : vector<128x64xf32> to vector<1x64xf32>
      %376 = arith.truncf %375 : vector<1x64xf32> to vector<1x64xbf16>
      %c1_238 = arith.constant 1 : index
      %c256_239 = arith.constant 256 : index
      %377 = vector.load %arg23[%c1_238, %c256_239] : memref<2x4160xbf16, #tpu.memory_space<vmem>>, vector<1x64xbf16>
      tpu.vector_store %arg23[%c1_238, %c256_239], %376 {strides = array<i32>} : memref<2x4160xbf16, #tpu.memory_space<vmem>>, vector<1x64xbf16>,
      %378 = vector.extract_strided_slice %170 {offsets = [69, 0], sizes = [1, 64], strides = [1, 1]} : vector<128x64xf32> to vector<1x64xf32>
      %379 = arith.truncf %378 : vector<1x64xf32> to vector<1x64xbf16>
      %c1_240 = arith.constant 1 : index
      %c320_241 = arith.constant 320 : index
      %380 = vector.load %arg23[%c1_240, %c320_241] : memref<2x4160xbf16, #tpu.memory_space<vmem>>, vector<1x64xbf16>
      tpu.vector_store %arg23[%c1_240, %c320_241], %379 {strides = array<i32>} : memref<2x4160xbf16, #tpu.memory_space<vmem>>, vector<1x64xbf16>,
      %381 = vector.extract_strided_slice %170 {offsets = [70, 0], sizes = [1, 64], strides = [1, 1]} : vector<128x64xf32> to vector<1x64xf32>
      %382 = arith.truncf %381 : vector<1x64xf32> to vector<1x64xbf16>
      %c1_242 = arith.constant 1 : index
      %c384_243 = arith.constant 384 : index
      %383 = vector.load %arg23[%c1_242, %c384_243] : memref<2x4160xbf16, #tpu.memory_space<vmem>>, vector<1x64xbf16>
      tpu.vector_store %arg23[%c1_242, %c384_243], %382 {strides = array<i32>} : memref<2x4160xbf16, #tpu.memory_space<vmem>>, vector<1x64xbf16>,
      %384 = vector.extract_strided_slice %170 {offsets = [71, 0], sizes = [1, 64], strides = [1, 1]} : vector<128x64xf32> to vector<1x64xf32>
      %385 = arith.truncf %384 : vector<1x64xf32> to vector<1x64xbf16>
      %c1_244 = arith.constant 1 : index
      %c448_245 = arith.constant 448 : index
      %386 = vector.load %arg23[%c1_244, %c448_245] : memref<2x4160xbf16, #tpu.memory_space<vmem>>, vector<1x64xbf16>
      tpu.vector_store %arg23[%c1_244, %c448_245], %385 {strides = array<i32>} : memref<2x4160xbf16, #tpu.memory_space<vmem>>, vector<1x64xbf16>,
      %387 = vector.extract_strided_slice %170 {offsets = [72, 0], sizes = [1, 64], strides = [1, 1]} : vector<128x64xf32> to vector<1x64xf32>
      %388 = arith.truncf %387 : vector<1x64xf32> to vector<1x64xbf16>
      %c1_246 = arith.constant 1 : index
      %c512_247 = arith.constant 512 : index
      %389 = vector.load %arg23[%c1_246, %c512_247] : memref<2x4160xbf16, #tpu.memory_space<vmem>>, vector<1x64xbf16>
      tpu.vector_store %arg23[%c1_246, %c512_247], %388 {strides = array<i32>} : memref<2x4160xbf16, #tpu.memory_space<vmem>>, vector<1x64xbf16>,
      %390 = vector.extract_strided_slice %170 {offsets = [73, 0], sizes = [1, 64], strides = [1, 1]} : vector<128x64xf32> to vector<1x64xf32>
      %391 = arith.truncf %390 : vector<1x64xf32> to vector<1x64xbf16>
      %c1_248 = arith.constant 1 : index
      %c576_249 = arith.constant 576 : index
      %392 = vector.load %arg23[%c1_248, %c576_249] : memref<2x4160xbf16, #tpu.memory_space<vmem>>, vector<1x64xbf16>
      tpu.vector_store %arg23[%c1_248, %c576_249], %391 {strides = array<i32>} : memref<2x4160xbf16, #tpu.memory_space<vmem>>, vector<1x64xbf16>,
      %393 = vector.extract_strided_slice %170 {offsets = [74, 0], sizes = [1, 64], strides = [1, 1]} : vector<128x64xf32> to vector<1x64xf32>
      %394 = arith.truncf %393 : vector<1x64xf32> to vector<1x64xbf16>
      %c1_250 = arith.constant 1 : index
      %c640_251 = arith.constant 640 : index
      %395 = vector.load %arg23[%c1_250, %c640_251] : memref<2x4160xbf16, #tpu.memory_space<vmem>>, vector<1x64xbf16>
      tpu.vector_store %arg23[%c1_250, %c640_251], %394 {strides = array<i32>} : memref<2x4160xbf16, #tpu.memory_space<vmem>>, vector<1x64xbf16>,
      %396 = vector.extract_strided_slice %170 {offsets = [75, 0], sizes = [1, 64], strides = [1, 1]} : vector<128x64xf32> to vector<1x64xf32>
      %397 = arith.truncf %396 : vector<1x64xf32> to vector<1x64xbf16>
      %c1_252 = arith.constant 1 : index
      %c704_253 = arith.constant 704 : index
      %398 = vector.load %arg23[%c1_252, %c704_253] : memref<2x4160xbf16, #tpu.memory_space<vmem>>, vector<1x64xbf16>
      tpu.vector_store %arg23[%c1_252, %c704_253], %397 {strides = array<i32>} : memref<2x4160xbf16, #tpu.memory_space<vmem>>, vector<1x64xbf16>,
      %399 = vector.extract_strided_slice %170 {offsets = [76, 0], sizes = [1, 64], strides = [1, 1]} : vector<128x64xf32> to vector<1x64xf32>
      %400 = arith.truncf %399 : vector<1x64xf32> to vector<1x64xbf16>
      %c1_254 = arith.constant 1 : index
      %c768_255 = arith.constant 768 : index
      %401 = vector.load %arg23[%c1_254, %c768_255] : memref<2x4160xbf16, #tpu.memory_space<vmem>>, vector<1x64xbf16>
      tpu.vector_store %arg23[%c1_254, %c768_255], %400 {strides = array<i32>} : memref<2x4160xbf16, #tpu.memory_space<vmem>>, vector<1x64xbf16>,
      %402 = vector.extract_strided_slice %170 {offsets = [77, 0], sizes = [1, 64], strides = [1, 1]} : vector<128x64xf32> to vector<1x64xf32>
      %403 = arith.truncf %402 : vector<1x64xf32> to vector<1x64xbf16>
      %c1_256 = arith.constant 1 : index
      %c832_257 = arith.constant 832 : index
      %404 = vector.load %arg23[%c1_256, %c832_257] : memref<2x4160xbf16, #tpu.memory_space<vmem>>, vector<1x64xbf16>
      tpu.vector_store %arg23[%c1_256, %c832_257], %403 {strides = array<i32>} : memref<2x4160xbf16, #tpu.memory_space<vmem>>, vector<1x64xbf16>,
      %405 = vector.extract_strided_slice %170 {offsets = [78, 0], sizes = [1, 64], strides = [1, 1]} : vector<128x64xf32> to vector<1x64xf32>
      %406 = arith.truncf %405 : vector<1x64xf32> to vector<1x64xbf16>
      %c1_258 = arith.constant 1 : index
      %c896_259 = arith.constant 896 : index
      %407 = vector.load %arg23[%c1_258, %c896_259] : memref<2x4160xbf16, #tpu.memory_space<vmem>>, vector<1x64xbf16>
      tpu.vector_store %arg23[%c1_258, %c896_259], %406 {strides = array<i32>} : memref<2x4160xbf16, #tpu.memory_space<vmem>>, vector<1x64xbf16>,
      %408 = vector.extract_strided_slice %170 {offsets = [79, 0], sizes = [1, 64], strides = [1, 1]} : vector<128x64xf32> to vector<1x64xf32>
      %409 = arith.truncf %408 : vector<1x64xf32> to vector<1x64xbf16>
      %c1_260 = arith.constant 1 : index
      %c960_261 = arith.constant 960 : index
      %410 = vector.load %arg23[%c1_260, %c960_261] : memref<2x4160xbf16, #tpu.memory_space<vmem>>, vector<1x64xbf16>
      tpu.vector_store %arg23[%c1_260, %c960_261], %409 {strides = array<i32>} : memref<2x4160xbf16, #tpu.memory_space<vmem>>, vector<1x64xbf16>,
      %411 = vector.extract_strided_slice %170 {offsets = [80, 0], sizes = [1, 64], strides = [1, 1]} : vector<128x64xf32> to vector<1x64xf32>
      %412 = arith.truncf %411 : vector<1x64xf32> to vector<1x64xbf16>
      %c1_262 = arith.constant 1 : index
      %c1024_263 = arith.constant 1024 : index
      %413 = vector.load %arg23[%c1_262, %c1024_263] : memref<2x4160xbf16, #tpu.memory_space<vmem>>, vector<1x64xbf16>
      tpu.vector_store %arg23[%c1_262, %c1024_263], %412 {strides = array<i32>} : memref<2x4160xbf16, #tpu.memory_space<vmem>>, vector<1x64xbf16>,
      %414 = vector.extract_strided_slice %170 {offsets = [81, 0], sizes = [1, 64], strides = [1, 1]} : vector<128x64xf32> to vector<1x64xf32>
      %415 = arith.truncf %414 : vector<1x64xf32> to vector<1x64xbf16>
      %c1_264 = arith.constant 1 : index
      %c1088_265 = arith.constant 1088 : index
      %416 = vector.load %arg23[%c1_264, %c1088_265] : memref<2x4160xbf16, #tpu.memory_space<vmem>>, vector<1x64xbf16>
      tpu.vector_store %arg23[%c1_264, %c1088_265], %415 {strides = array<i32>} : memref<2x4160xbf16, #tpu.memory_space<vmem>>, vector<1x64xbf16>,
      %417 = vector.extract_strided_slice %170 {offsets = [82, 0], sizes = [1, 64], strides = [1, 1]} : vector<128x64xf32> to vector<1x64xf32>
      %418 = arith.truncf %417 : vector<1x64xf32> to vector<1x64xbf16>
      %c1_266 = arith.constant 1 : index
      %c1152_267 = arith.constant 1152 : index
      %419 = vector.load %arg23[%c1_266, %c1152_267] : memref<2x4160xbf16, #tpu.memory_space<vmem>>, vector<1x64xbf16>
      tpu.vector_store %arg23[%c1_266, %c1152_267], %418 {strides = array<i32>} : memref<2x4160xbf16, #tpu.memory_space<vmem>>, vector<1x64xbf16>,
      %420 = vector.extract_strided_slice %170 {offsets = [83, 0], sizes = [1, 64], strides = [1, 1]} : vector<128x64xf32> to vector<1x64xf32>
      %421 = arith.truncf %420 : vector<1x64xf32> to vector<1x64xbf16>
      %c1_268 = arith.constant 1 : index
      %c1216_269 = arith.constant 1216 : index
      %422 = vector.load %arg23[%c1_268, %c1216_269] : memref<2x4160xbf16, #tpu.memory_space<vmem>>, vector<1x64xbf16>
      tpu.vector_store %arg23[%c1_268, %c1216_269], %421 {strides = array<i32>} : memref<2x4160xbf16, #tpu.memory_space<vmem>>, vector<1x64xbf16>,
      %423 = vector.extract_strided_slice %170 {offsets = [84, 0], sizes = [1, 64], strides = [1, 1]} : vector<128x64xf32> to vector<1x64xf32>
      %424 = arith.truncf %423 : vector<1x64xf32> to vector<1x64xbf16>
      %c1_270 = arith.constant 1 : index
      %c1280_271 = arith.constant 1280 : index
      %425 = vector.load %arg23[%c1_270, %c1280_271] : memref<2x4160xbf16, #tpu.memory_space<vmem>>, vector<1x64xbf16>
      tpu.vector_store %arg23[%c1_270, %c1280_271], %424 {strides = array<i32>} : memref<2x4160xbf16, #tpu.memory_space<vmem>>, vector<1x64xbf16>,
      %426 = vector.extract_strided_slice %170 {offsets = [85, 0], sizes = [1, 64], strides = [1, 1]} : vector<128x64xf32> to vector<1x64xf32>
      %427 = arith.truncf %426 : vector<1x64xf32> to vector<1x64xbf16>
      %c1_272 = arith.constant 1 : index
      %c1344_273 = arith.constant 1344 : index
      %428 = vector.load %arg23[%c1_272, %c1344_273] : memref<2x4160xbf16, #tpu.memory_space<vmem>>, vector<1x64xbf16>
      tpu.vector_store %arg23[%c1_272, %c1344_273], %427 {strides = array<i32>} : memref<2x4160xbf16, #tpu.memory_space<vmem>>, vector<1x64xbf16>,
      %429 = vector.extract_strided_slice %170 {offsets = [86, 0], sizes = [1, 64], strides = [1, 1]} : vector<128x64xf32> to vector<1x64xf32>
      %430 = arith.truncf %429 : vector<1x64xf32> to vector<1x64xbf16>
      %c1_274 = arith.constant 1 : index
      %c1408_275 = arith.constant 1408 : index
      %431 = vector.load %arg23[%c1_274, %c1408_275] : memref<2x4160xbf16, #tpu.memory_space<vmem>>, vector<1x64xbf16>
      tpu.vector_store %arg23[%c1_274, %c1408_275], %430 {strides = array<i32>} : memref<2x4160xbf16, #tpu.memory_space<vmem>>, vector<1x64xbf16>,
      %432 = vector.extract_strided_slice %170 {offsets = [87, 0], sizes = [1, 64], strides = [1, 1]} : vector<128x64xf32> to vector<1x64xf32>
      %433 = arith.truncf %432 : vector<1x64xf32> to vector<1x64xbf16>
      %c1_276 = arith.constant 1 : index
      %c1472_277 = arith.constant 1472 : index
      %434 = vector.load %arg23[%c1_276, %c1472_277] : memref<2x4160xbf16, #tpu.memory_space<vmem>>, vector<1x64xbf16>
      tpu.vector_store %arg23[%c1_276, %c1472_277], %433 {strides = array<i32>} : memref<2x4160xbf16, #tpu.memory_space<vmem>>, vector<1x64xbf16>,
      %435 = vector.extract_strided_slice %170 {offsets = [88, 0], sizes = [1, 64], strides = [1, 1]} : vector<128x64xf32> to vector<1x64xf32>
      %436 = arith.truncf %435 : vector<1x64xf32> to vector<1x64xbf16>
      %c1_278 = arith.constant 1 : index
      %c1536_279 = arith.constant 1536 : index
      %437 = vector.load %arg23[%c1_278, %c1536_279] : memref<2x4160xbf16, #tpu.memory_space<vmem>>, vector<1x64xbf16>
      tpu.vector_store %arg23[%c1_278, %c1536_279], %436 {strides = array<i32>} : memref<2x4160xbf16, #tpu.memory_space<vmem>>, vector<1x64xbf16>,
      %438 = vector.extract_strided_slice %170 {offsets = [89, 0], sizes = [1, 64], strides = [1, 1]} : vector<128x64xf32> to vector<1x64xf32>
      %439 = arith.truncf %438 : vector<1x64xf32> to vector<1x64xbf16>
      %c1_280 = arith.constant 1 : index
      %c1600_281 = arith.constant 1600 : index
      %440 = vector.load %arg23[%c1_280, %c1600_281] : memref<2x4160xbf16, #tpu.memory_space<vmem>>, vector<1x64xbf16>
      tpu.vector_store %arg23[%c1_280, %c1600_281], %439 {strides = array<i32>} : memref<2x4160xbf16, #tpu.memory_space<vmem>>, vector<1x64xbf16>,
      %441 = vector.extract_strided_slice %170 {offsets = [90, 0], sizes = [1, 64], strides = [1, 1]} : vector<128x64xf32> to vector<1x64xf32>
      %442 = arith.truncf %441 : vector<1x64xf32> to vector<1x64xbf16>
      %c1_282 = arith.constant 1 : index
      %c1664_283 = arith.constant 1664 : index
      %443 = vector.load %arg23[%c1_282, %c1664_283] : memref<2x4160xbf16, #tpu.memory_space<vmem>>, vector<1x64xbf16>
      tpu.vector_store %arg23[%c1_282, %c1664_283], %442 {strides = array<i32>} : memref<2x4160xbf16, #tpu.memory_space<vmem>>, vector<1x64xbf16>,
      %444 = vector.extract_strided_slice %170 {offsets = [91, 0], sizes = [1, 64], strides = [1, 1]} : vector<128x64xf32> to vector<1x64xf32>
      %445 = arith.truncf %444 : vector<1x64xf32> to vector<1x64xbf16>
      %c1_284 = arith.constant 1 : index
      %c1728_285 = arith.constant 1728 : index
      %446 = vector.load %arg23[%c1_284, %c1728_285] : memref<2x4160xbf16, #tpu.memory_space<vmem>>, vector<1x64xbf16>
      tpu.vector_store %arg23[%c1_284, %c1728_285], %445 {strides = array<i32>} : memref<2x4160xbf16, #tpu.memory_space<vmem>>, vector<1x64xbf16>,
      %447 = vector.extract_strided_slice %170 {offsets = [92, 0], sizes = [1, 64], strides = [1, 1]} : vector<128x64xf32> to vector<1x64xf32>
      %448 = arith.truncf %447 : vector<1x64xf32> to vector<1x64xbf16>
      %c1_286 = arith.constant 1 : index
      %c1792_287 = arith.constant 1792 : index
      %449 = vector.load %arg23[%c1_286, %c1792_287] : memref<2x4160xbf16, #tpu.memory_space<vmem>>, vector<1x64xbf16>
      tpu.vector_store %arg23[%c1_286, %c1792_287], %448 {strides = array<i32>} : memref<2x4160xbf16, #tpu.memory_space<vmem>>, vector<1x64xbf16>,
      %450 = vector.extract_strided_slice %170 {offsets = [93, 0], sizes = [1, 64], strides = [1, 1]} : vector<128x64xf32> to vector<1x64xf32>
      %451 = arith.truncf %450 : vector<1x64xf32> to vector<1x64xbf16>
      %c1_288 = arith.constant 1 : index
      %c1856_289 = arith.constant 1856 : index
      %452 = vector.load %arg23[%c1_288, %c1856_289] : memref<2x4160xbf16, #tpu.memory_space<vmem>>, vector<1x64xbf16>
      tpu.vector_store %arg23[%c1_288, %c1856_289], %451 {strides = array<i32>} : memref<2x4160xbf16, #tpu.memory_space<vmem>>, vector<1x64xbf16>,
      %453 = vector.extract_strided_slice %170 {offsets = [94, 0], sizes = [1, 64], strides = [1, 1]} : vector<128x64xf32> to vector<1x64xf32>
      %454 = arith.truncf %453 : vector<1x64xf32> to vector<1x64xbf16>
      %c1_290 = arith.constant 1 : index
      %c1920_291 = arith.constant 1920 : index
      %455 = vector.load %arg23[%c1_290, %c1920_291] : memref<2x4160xbf16, #tpu.memory_space<vmem>>, vector<1x64xbf16>
      tpu.vector_store %arg23[%c1_290, %c1920_291], %454 {strides = array<i32>} : memref<2x4160xbf16, #tpu.memory_space<vmem>>, vector<1x64xbf16>,
      %456 = vector.extract_strided_slice %170 {offsets = [95, 0], sizes = [1, 64], strides = [1, 1]} : vector<128x64xf32> to vector<1x64xf32>
      %457 = arith.truncf %456 : vector<1x64xf32> to vector<1x64xbf16>
      %c1_292 = arith.constant 1 : index
      %c1984_293 = arith.constant 1984 : index
      %458 = vector.load %arg23[%c1_292, %c1984_293] : memref<2x4160xbf16, #tpu.memory_space<vmem>>, vector<1x64xbf16>
      tpu.vector_store %arg23[%c1_292, %c1984_293], %457 {strides = array<i32>} : memref<2x4160xbf16, #tpu.memory_space<vmem>>, vector<1x64xbf16>,
      %459 = vector.extract_strided_slice %170 {offsets = [96, 0], sizes = [1, 64], strides = [1, 1]} : vector<128x64xf32> to vector<1x64xf32>
      %460 = arith.truncf %459 : vector<1x64xf32> to vector<1x64xbf16>
      %c1_294 = arith.constant 1 : index
      %c2048_295 = arith.constant 2048 : index
      %461 = vector.load %arg23[%c1_294, %c2048_295] : memref<2x4160xbf16, #tpu.memory_space<vmem>>, vector<1x64xbf16>
      tpu.vector_store %arg23[%c1_294, %c2048_295], %460 {strides = array<i32>} : memref<2x4160xbf16, #tpu.memory_space<vmem>>, vector<1x64xbf16>,
      %462 = vector.extract_strided_slice %170 {offsets = [97, 0], sizes = [1, 64], strides = [1, 1]} : vector<128x64xf32> to vector<1x64xf32>
      %463 = arith.truncf %462 : vector<1x64xf32> to vector<1x64xbf16>
      %c1_296 = arith.constant 1 : index
      %c2112_297 = arith.constant 2112 : index
      %464 = vector.load %arg23[%c1_296, %c2112_297] : memref<2x4160xbf16, #tpu.memory_space<vmem>>, vector<1x64xbf16>
      tpu.vector_store %arg23[%c1_296, %c2112_297], %463 {strides = array<i32>} : memref<2x4160xbf16, #tpu.memory_space<vmem>>, vector<1x64xbf16>,
      %465 = vector.extract_strided_slice %170 {offsets = [98, 0], sizes = [1, 64], strides = [1, 1]} : vector<128x64xf32> to vector<1x64xf32>
      %466 = arith.truncf %465 : vector<1x64xf32> to vector<1x64xbf16>
      %c1_298 = arith.constant 1 : index
      %c2176_299 = arith.constant 2176 : index
      %467 = vector.load %arg23[%c1_298, %c2176_299] : memref<2x4160xbf16, #tpu.memory_space<vmem>>, vector<1x64xbf16>
      tpu.vector_store %arg23[%c1_298, %c2176_299], %466 {strides = array<i32>} : memref<2x4160xbf16, #tpu.memory_space<vmem>>, vector<1x64xbf16>,
      %468 = vector.extract_strided_slice %170 {offsets = [99, 0], sizes = [1, 64], strides = [1, 1]} : vector<128x64xf32> to vector<1x64xf32>
      %469 = arith.truncf %468 : vector<1x64xf32> to vector<1x64xbf16>
      %c1_300 = arith.constant 1 : index
      %c2240_301 = arith.constant 2240 : index
      %470 = vector.load %arg23[%c1_300, %c2240_301] : memref<2x4160xbf16, #tpu.memory_space<vmem>>, vector<1x64xbf16>
      tpu.vector_store %arg23[%c1_300, %c2240_301], %469 {strides = array<i32>} : memref<2x4160xbf16, #tpu.memory_space<vmem>>, vector<1x64xbf16>,
      %471 = vector.extract_strided_slice %170 {offsets = [100, 0], sizes = [1, 64], strides = [1, 1]} : vector<128x64xf32> to vector<1x64xf32>
      %472 = arith.truncf %471 : vector<1x64xf32> to vector<1x64xbf16>
      %c1_302 = arith.constant 1 : index
      %c2304_303 = arith.constant 2304 : index
      %473 = vector.load %arg23[%c1_302, %c2304_303] : memref<2x4160xbf16, #tpu.memory_space<vmem>>, vector<1x64xbf16>
      tpu.vector_store %arg23[%c1_302, %c2304_303], %472 {strides = array<i32>} : memref<2x4160xbf16, #tpu.memory_space<vmem>>, vector<1x64xbf16>,
      %474 = vector.extract_strided_slice %170 {offsets = [101, 0], sizes = [1, 64], strides = [1, 1]} : vector<128x64xf32> to vector<1x64xf32>
      %475 = arith.truncf %474 : vector<1x64xf32> to vector<1x64xbf16>
      %c1_304 = arith.constant 1 : index
      %c2368_305 = arith.constant 2368 : index
      %476 = vector.load %arg23[%c1_304, %c2368_305] : memref<2x4160xbf16, #tpu.memory_space<vmem>>, vector<1x64xbf16>
      tpu.vector_store %arg23[%c1_304, %c2368_305], %475 {strides = array<i32>} : memref<2x4160xbf16, #tpu.memory_space<vmem>>, vector<1x64xbf16>,
      %477 = vector.extract_strided_slice %170 {offsets = [102, 0], sizes = [1, 64], strides = [1, 1]} : vector<128x64xf32> to vector<1x64xf32>
      %478 = arith.truncf %477 : vector<1x64xf32> to vector<1x64xbf16>
      %c1_306 = arith.constant 1 : index
      %c2432_307 = arith.constant 2432 : index
      %479 = vector.load %arg23[%c1_306, %c2432_307] : memref<2x4160xbf16, #tpu.memory_space<vmem>>, vector<1x64xbf16>
      tpu.vector_store %arg23[%c1_306, %c2432_307], %478 {strides = array<i32>} : memref<2x4160xbf16, #tpu.memory_space<vmem>>, vector<1x64xbf16>,
      %480 = vector.extract_strided_slice %170 {offsets = [103, 0], sizes = [1, 64], strides = [1, 1]} : vector<128x64xf32> to vector<1x64xf32>
      %481 = arith.truncf %480 : vector<1x64xf32> to vector<1x64xbf16>
      %c1_308 = arith.constant 1 : index
      %c2496_309 = arith.constant 2496 : index
      %482 = vector.load %arg23[%c1_308, %c2496_309] : memref<2x4160xbf16, #tpu.memory_space<vmem>>, vector<1x64xbf16>
      tpu.vector_store %arg23[%c1_308, %c2496_309], %481 {strides = array<i32>} : memref<2x4160xbf16, #tpu.memory_space<vmem>>, vector<1x64xbf16>,
      %483 = vector.extract_strided_slice %170 {offsets = [104, 0], sizes = [1, 64], strides = [1, 1]} : vector<128x64xf32> to vector<1x64xf32>
      %484 = arith.truncf %483 : vector<1x64xf32> to vector<1x64xbf16>
      %c1_310 = arith.constant 1 : index
      %c2560_311 = arith.constant 2560 : index
      %485 = vector.load %arg23[%c1_310, %c2560_311] : memref<2x4160xbf16, #tpu.memory_space<vmem>>, vector<1x64xbf16>
      tpu.vector_store %arg23[%c1_310, %c2560_311], %484 {strides = array<i32>} : memref<2x4160xbf16, #tpu.memory_space<vmem>>, vector<1x64xbf16>,
      %486 = vector.extract_strided_slice %170 {offsets = [105, 0], sizes = [1, 64], strides = [1, 1]} : vector<128x64xf32> to vector<1x64xf32>
      %487 = arith.truncf %486 : vector<1x64xf32> to vector<1x64xbf16>
      %c1_312 = arith.constant 1 : index
      %c2624_313 = arith.constant 2624 : index
      %488 = vector.load %arg23[%c1_312, %c2624_313] : memref<2x4160xbf16, #tpu.memory_space<vmem>>, vector<1x64xbf16>
      tpu.vector_store %arg23[%c1_312, %c2624_313], %487 {strides = array<i32>} : memref<2x4160xbf16, #tpu.memory_space<vmem>>, vector<1x64xbf16>,
      %489 = vector.extract_strided_slice %170 {offsets = [106, 0], sizes = [1, 64], strides = [1, 1]} : vector<128x64xf32> to vector<1x64xf32>
      %490 = arith.truncf %489 : vector<1x64xf32> to vector<1x64xbf16>
      %c1_314 = arith.constant 1 : index
      %c2688_315 = arith.constant 2688 : index
      %491 = vector.load %arg23[%c1_314, %c2688_315] : memref<2x4160xbf16, #tpu.memory_space<vmem>>, vector<1x64xbf16>
      tpu.vector_store %arg23[%c1_314, %c2688_315], %490 {strides = array<i32>} : memref<2x4160xbf16, #tpu.memory_space<vmem>>, vector<1x64xbf16>,
      %492 = vector.extract_strided_slice %170 {offsets = [107, 0], sizes = [1, 64], strides = [1, 1]} : vector<128x64xf32> to vector<1x64xf32>
      %493 = arith.truncf %492 : vector<1x64xf32> to vector<1x64xbf16>
      %c1_316 = arith.constant 1 : index
      %c2752_317 = arith.constant 2752 : index
      %494 = vector.load %arg23[%c1_316, %c2752_317] : memref<2x4160xbf16, #tpu.memory_space<vmem>>, vector<1x64xbf16>
      tpu.vector_store %arg23[%c1_316, %c2752_317], %493 {strides = array<i32>} : memref<2x4160xbf16, #tpu.memory_space<vmem>>, vector<1x64xbf16>,
      %495 = vector.extract_strided_slice %170 {offsets = [108, 0], sizes = [1, 64], strides = [1, 1]} : vector<128x64xf32> to vector<1x64xf32>
      %496 = arith.truncf %495 : vector<1x64xf32> to vector<1x64xbf16>
      %c1_318 = arith.constant 1 : index
      %c2816_319 = arith.constant 2816 : index
      %497 = vector.load %arg23[%c1_318, %c2816_319] : memref<2x4160xbf16, #tpu.memory_space<vmem>>, vector<1x64xbf16>
      tpu.vector_store %arg23[%c1_318, %c2816_319], %496 {strides = array<i32>} : memref<2x4160xbf16, #tpu.memory_space<vmem>>, vector<1x64xbf16>,
      %498 = vector.extract_strided_slice %170 {offsets = [109, 0], sizes = [1, 64], strides = [1, 1]} : vector<128x64xf32> to vector<1x64xf32>
      %499 = arith.truncf %498 : vector<1x64xf32> to vector<1x64xbf16>
      %c1_320 = arith.constant 1 : index
      %c2880_321 = arith.constant 2880 : index
      %500 = vector.load %arg23[%c1_320, %c2880_321] : memref<2x4160xbf16, #tpu.memory_space<vmem>>, vector<1x64xbf16>
      tpu.vector_store %arg23[%c1_320, %c2880_321], %499 {strides = array<i32>} : memref<2x4160xbf16, #tpu.memory_space<vmem>>, vector<1x64xbf16>,
      %501 = vector.extract_strided_slice %170 {offsets = [110, 0], sizes = [1, 64], strides = [1, 1]} : vector<128x64xf32> to vector<1x64xf32>
      %502 = arith.truncf %501 : vector<1x64xf32> to vector<1x64xbf16>
      %c1_322 = arith.constant 1 : index
      %c2944_323 = arith.constant 2944 : index
      %503 = vector.load %arg23[%c1_322, %c2944_323] : memref<2x4160xbf16, #tpu.memory_space<vmem>>, vector<1x64xbf16>
      tpu.vector_store %arg23[%c1_322, %c2944_323], %502 {strides = array<i32>} : memref<2x4160xbf16, #tpu.memory_space<vmem>>, vector<1x64xbf16>,
      %504 = vector.extract_strided_slice %170 {offsets = [111, 0], sizes = [1, 64], strides = [1, 1]} : vector<128x64xf32> to vector<1x64xf32>
      %505 = arith.truncf %504 : vector<1x64xf32> to vector<1x64xbf16>
      %c1_324 = arith.constant 1 : index
      %c3008_325 = arith.constant 3008 : index
      %506 = vector.load %arg23[%c1_324, %c3008_325] : memref<2x4160xbf16, #tpu.memory_space<vmem>>, vector<1x64xbf16>
      tpu.vector_store %arg23[%c1_324, %c3008_325], %505 {strides = array<i32>} : memref<2x4160xbf16, #tpu.memory_space<vmem>>, vector<1x64xbf16>,
      %507 = vector.extract_strided_slice %170 {offsets = [112, 0], sizes = [1, 64], strides = [1, 1]} : vector<128x64xf32> to vector<1x64xf32>
      %508 = arith.truncf %507 : vector<1x64xf32> to vector<1x64xbf16>
      %c1_326 = arith.constant 1 : index
      %c3072_327 = arith.constant 3072 : index
      %509 = vector.load %arg23[%c1_326, %c3072_327] : memref<2x4160xbf16, #tpu.memory_space<vmem>>, vector<1x64xbf16>
      tpu.vector_store %arg23[%c1_326, %c3072_327], %508 {strides = array<i32>} : memref<2x4160xbf16, #tpu.memory_space<vmem>>, vector<1x64xbf16>,
      %510 = vector.extract_strided_slice %170 {offsets = [113, 0], sizes = [1, 64], strides = [1, 1]} : vector<128x64xf32> to vector<1x64xf32>
      %511 = arith.truncf %510 : vector<1x64xf32> to vector<1x64xbf16>
      %c1_328 = arith.constant 1 : index
      %c3136_329 = arith.constant 3136 : index
      %512 = vector.load %arg23[%c1_328, %c3136_329] : memref<2x4160xbf16, #tpu.memory_space<vmem>>, vector<1x64xbf16>
      tpu.vector_store %arg23[%c1_328, %c3136_329], %511 {strides = array<i32>} : memref<2x4160xbf16, #tpu.memory_space<vmem>>, vector<1x64xbf16>,
      %513 = vector.extract_strided_slice %170 {offsets = [114, 0], sizes = [1, 64], strides = [1, 1]} : vector<128x64xf32> to vector<1x64xf32>
      %514 = arith.truncf %513 : vector<1x64xf32> to vector<1x64xbf16>
      %c1_330 = arith.constant 1 : index
      %c3200_331 = arith.constant 3200 : index
      %515 = vector.load %arg23[%c1_330, %c3200_331] : memref<2x4160xbf16, #tpu.memory_space<vmem>>, vector<1x64xbf16>
      tpu.vector_store %arg23[%c1_330, %c3200_331], %514 {strides = array<i32>} : memref<2x4160xbf16, #tpu.memory_space<vmem>>, vector<1x64xbf16>,
      %516 = vector.extract_strided_slice %170 {offsets = [115, 0], sizes = [1, 64], strides = [1, 1]} : vector<128x64xf32> to vector<1x64xf32>
      %517 = arith.truncf %516 : vector<1x64xf32> to vector<1x64xbf16>
      %c1_332 = arith.constant 1 : index
      %c3264_333 = arith.constant 3264 : index
      %518 = vector.load %arg23[%c1_332, %c3264_333] : memref<2x4160xbf16, #tpu.memory_space<vmem>>, vector<1x64xbf16>
      tpu.vector_store %arg23[%c1_332, %c3264_333], %517 {strides = array<i32>} : memref<2x4160xbf16, #tpu.memory_space<vmem>>, vector<1x64xbf16>,
      %519 = vector.extract_strided_slice %170 {offsets = [116, 0], sizes = [1, 64], strides = [1, 1]} : vector<128x64xf32> to vector<1x64xf32>
      %520 = arith.truncf %519 : vector<1x64xf32> to vector<1x64xbf16>
      %c1_334 = arith.constant 1 : index
      %c3328_335 = arith.constant 3328 : index
      %521 = vector.load %arg23[%c1_334, %c3328_335] : memref<2x4160xbf16, #tpu.memory_space<vmem>>, vector<1x64xbf16>
      tpu.vector_store %arg23[%c1_334, %c3328_335], %520 {strides = array<i32>} : memref<2x4160xbf16, #tpu.memory_space<vmem>>, vector<1x64xbf16>,
      %522 = vector.extract_strided_slice %170 {offsets = [117, 0], sizes = [1, 64], strides = [1, 1]} : vector<128x64xf32> to vector<1x64xf32>
      %523 = arith.truncf %522 : vector<1x64xf32> to vector<1x64xbf16>
      %c1_336 = arith.constant 1 : index
      %c3392_337 = arith.constant 3392 : index
      %524 = vector.load %arg23[%c1_336, %c3392_337] : memref<2x4160xbf16, #tpu.memory_space<vmem>>, vector<1x64xbf16>
      tpu.vector_store %arg23[%c1_336, %c3392_337], %523 {strides = array<i32>} : memref<2x4160xbf16, #tpu.memory_space<vmem>>, vector<1x64xbf16>,
      %525 = vector.extract_strided_slice %170 {offsets = [118, 0], sizes = [1, 64], strides = [1, 1]} : vector<128x64xf32> to vector<1x64xf32>
      %526 = arith.truncf %525 : vector<1x64xf32> to vector<1x64xbf16>
      %c1_338 = arith.constant 1 : index
      %c3456_339 = arith.constant 3456 : index
      %527 = vector.load %arg23[%c1_338, %c3456_339] : memref<2x4160xbf16, #tpu.memory_space<vmem>>, vector<1x64xbf16>
      tpu.vector_store %arg23[%c1_338, %c3456_339], %526 {strides = array<i32>} : memref<2x4160xbf16, #tpu.memory_space<vmem>>, vector<1x64xbf16>,
      %528 = vector.extract_strided_slice %170 {offsets = [119, 0], sizes = [1, 64], strides = [1, 1]} : vector<128x64xf32> to vector<1x64xf32>
      %529 = arith.truncf %528 : vector<1x64xf32> to vector<1x64xbf16>
      %c1_340 = arith.constant 1 : index
      %c3520_341 = arith.constant 3520 : index
      %530 = vector.load %arg23[%c1_340, %c3520_341] : memref<2x4160xbf16, #tpu.memory_space<vmem>>, vector<1x64xbf16>
      tpu.vector_store %arg23[%c1_340, %c3520_341], %529 {strides = array<i32>} : memref<2x4160xbf16, #tpu.memory_space<vmem>>, vector<1x64xbf16>,
      %531 = vector.extract_strided_slice %170 {offsets = [120, 0], sizes = [1, 64], strides = [1, 1]} : vector<128x64xf32> to vector<1x64xf32>
      %532 = arith.truncf %531 : vector<1x64xf32> to vector<1x64xbf16>
      %c1_342 = arith.constant 1 : index
      %c3584_343 = arith.constant 3584 : index
      %533 = vector.load %arg23[%c1_342, %c3584_343] : memref<2x4160xbf16, #tpu.memory_space<vmem>>, vector<1x64xbf16>
      tpu.vector_store %arg23[%c1_342, %c3584_343], %532 {strides = array<i32>} : memref<2x4160xbf16, #tpu.memory_space<vmem>>, vector<1x64xbf16>,
      %534 = vector.extract_strided_slice %170 {offsets = [121, 0], sizes = [1, 64], strides = [1, 1]} : vector<128x64xf32> to vector<1x64xf32>
      %535 = arith.truncf %534 : vector<1x64xf32> to vector<1x64xbf16>
      %c1_344 = arith.constant 1 : index
      %c3648_345 = arith.constant 3648 : index
      %536 = vector.load %arg23[%c1_344, %c3648_345] : memref<2x4160xbf16, #tpu.memory_space<vmem>>, vector<1x64xbf16>
      tpu.vector_store %arg23[%c1_344, %c3648_345], %535 {strides = array<i32>} : memref<2x4160xbf16, #tpu.memory_space<vmem>>, vector<1x64xbf16>,
      %537 = vector.extract_strided_slice %170 {offsets = [122, 0], sizes = [1, 64], strides = [1, 1]} : vector<128x64xf32> to vector<1x64xf32>
      %538 = arith.truncf %537 : vector<1x64xf32> to vector<1x64xbf16>
      %c1_346 = arith.constant 1 : index
      %c3712_347 = arith.constant 3712 : index
      %539 = vector.load %arg23[%c1_346, %c3712_347] : memref<2x4160xbf16, #tpu.memory_space<vmem>>, vector<1x64xbf16>
      tpu.vector_store %arg23[%c1_346, %c3712_347], %538 {strides = array<i32>} : memref<2x4160xbf16, #tpu.memory_space<vmem>>, vector<1x64xbf16>,
      %540 = vector.extract_strided_slice %170 {offsets = [123, 0], sizes = [1, 64], strides = [1, 1]} : vector<128x64xf32> to vector<1x64xf32>
      %541 = arith.truncf %540 : vector<1x64xf32> to vector<1x64xbf16>
      %c1_348 = arith.constant 1 : index
      %c3776_349 = arith.constant 3776 : index
      %542 = vector.load %arg23[%c1_348, %c3776_349] : memref<2x4160xbf16, #tpu.memory_space<vmem>>, vector<1x64xbf16>
      tpu.vector_store %arg23[%c1_348, %c3776_349], %541 {strides = array<i32>} : memref<2x4160xbf16, #tpu.memory_space<vmem>>, vector<1x64xbf16>,
      %543 = vector.extract_strided_slice %170 {offsets = [124, 0], sizes = [1, 64], strides = [1, 1]} : vector<128x64xf32> to vector<1x64xf32>
      %544 = arith.truncf %543 : vector<1x64xf32> to vector<1x64xbf16>
      %c1_350 = arith.constant 1 : index
      %c3840_351 = arith.constant 3840 : index
      %545 = vector.load %arg23[%c1_350, %c3840_351] : memref<2x4160xbf16, #tpu.memory_space<vmem>>, vector<1x64xbf16>
      tpu.vector_store %arg23[%c1_350, %c3840_351], %544 {strides = array<i32>} : memref<2x4160xbf16, #tpu.memory_space<vmem>>, vector<1x64xbf16>,
      %546 = vector.extract_strided_slice %170 {offsets = [125, 0], sizes = [1, 64], strides = [1, 1]} : vector<128x64xf32> to vector<1x64xf32>
      %547 = arith.truncf %546 : vector<1x64xf32> to vector<1x64xbf16>
      %c1_352 = arith.constant 1 : index
      %c3904_353 = arith.constant 3904 : index
      %548 = vector.load %arg23[%c1_352, %c3904_353] : memref<2x4160xbf16, #tpu.memory_space<vmem>>, vector<1x64xbf16>
      tpu.vector_store %arg23[%c1_352, %c3904_353], %547 {strides = array<i32>} : memref<2x4160xbf16, #tpu.memory_space<vmem>>, vector<1x64xbf16>,
      %549 = vector.extract_strided_slice %170 {offsets = [126, 0], sizes = [1, 64], strides = [1, 1]} : vector<128x64xf32> to vector<1x64xf32>
      %550 = arith.truncf %549 : vector<1x64xf32> to vector<1x64xbf16>
      %c1_354 = arith.constant 1 : index
      %c3968_355 = arith.constant 3968 : index
      %551 = vector.load %arg23[%c1_354, %c3968_355] : memref<2x4160xbf16, #tpu.memory_space<vmem>>, vector<1x64xbf16>
      tpu.vector_store %arg23[%c1_354, %c3968_355], %550 {strides = array<i32>} : memref<2x4160xbf16, #tpu.memory_space<vmem>>, vector<1x64xbf16>,
      %552 = vector.extract_strided_slice %170 {offsets = [127, 0], sizes = [1, 64], strides = [1, 1]} : vector<128x64xf32> to vector<1x64xf32>
      %553 = arith.truncf %552 : vector<1x64xf32> to vector<1x64xbf16>
      %c1_356 = arith.constant 1 : index
      %c4032_357 = arith.constant 4032 : index
      %554 = vector.load %arg23[%c1_356, %c4032_357] : memref<2x4160xbf16, #tpu.memory_space<vmem>>, vector<1x64xbf16>
      tpu.vector_store %arg23[%c1_356, %c4032_357], %553 {strides = array<i32>} : memref<2x4160xbf16, #tpu.memory_space<vmem>>, vector<1x64xbf16>,
      %c0_358 = arith.constant 0 : index
      %c0_359 = arith.constant 0 : index
      %555 = vector.load %arg2[%c0_358, %c0_359] : memref<2x64xf32, #tpu.memory_space<vmem>>, vector<2x64xf32>
      %c0_360 = arith.constant 0 : index
      %c0_361 = arith.constant 0 : index
      %556 = vector.load %arg9[%c0_360, %c0_361] : memref<64x128xf32, #tpu.memory_space<vmem>>, vector<64x128xf32>
      %cst_362 = arith.constant dense<0.000000e+00> : vector<2x128xf32>
      %557 = tpu.matmul %555, %556, %cst_362 {dimension_numbers = #tpu.dot_dimension_numbers<[1], [0], [0], [1], [0, 0, 1, 1], [], []>} : vector<2x64xf32>, vector<64x128xf32>, vector<2x128xf32> -> vector<2x128xf32>
      %c0_363 = arith.constant 0 : index
      %c0_364 = arith.constant 0 : index
      %558 = vector.load %arg10[%c0_363, %c0_364] : memref<1x128xf32, #tpu.memory_space<vmem>>, vector<1x128xf32>
      %559 = vector.broadcast %558 : vector<1x128xf32> to vector<2x128xf32>
      %560 = arith.addf %557, %559 : vector<2x128xf32>
      %cst_365 = arith.constant 0.000000e+00 : f32
      %561 = vector.broadcast %cst_365 : f32 to vector<2x128xf32>
      %562 = arith.maximumf %560, %561 : vector<2x128xf32>
      %c0_366 = arith.constant 0 : index
      %c0_367 = arith.constant 0 : index
      %563 = vector.load %arg11[%c0_366, %c0_367] : memref<128x64xf32, #tpu.memory_space<vmem>>, vector<128x64xf32>
      %cst_368 = arith.constant dense<0.000000e+00> : vector<2x64xf32>
      %564 = tpu.matmul %562, %563, %cst_368 {dimension_numbers = #tpu.dot_dimension_numbers<[1], [0], [0], [1], [0, 0, 1, 1], [], []>} : vector<2x128xf32>, vector<128x64xf32>, vector<2x64xf32> -> vector<2x64xf32>
      %c0_369 = arith.constant 0 : index
      %c0_370 = arith.constant 0 : index
      %565 = vector.load %arg12[%c0_369, %c0_370] : memref<1x64xf32, #tpu.memory_space<vmem>>, vector<1x64xf32>
      %566 = vector.broadcast %565 : vector<1x64xf32> to vector<2x64xf32>
      %567 = arith.addf %564, %566 : vector<2x64xf32>
      %cst_371 = arith.constant 0.000000e+00 : f32
      %568 = vector.broadcast %cst_371 : f32 to vector<2x64xf32>
      %569 = arith.maximumf %567, %568 : vector<2x64xf32>
      %570 = arith.truncf %569 : vector<2x64xf32> to vector<2x64xbf16>
      %c0_372 = arith.constant 0 : index
      %c4096 = arith.constant 4096 : index
      %571 = vector.load %arg23[%c0_372, %c4096] : memref<2x4160xbf16, #tpu.memory_space<vmem>>, vector<2x64xbf16>
      tpu.vector_store %arg23[%c0_372, %c4096], %570 {strides = array<i32>} : memref<2x4160xbf16, #tpu.memory_space<vmem>>, vector<2x64xbf16>,
    } else {
    }
    %c0 = arith.constant 0 : index
    %c0_1 = arith.constant 0 : index
    %3 = vector.load %arg23[%c0, %c0_1] : memref<2x4160xbf16, #tpu.memory_space<vmem>>, vector<2x4160xbf16>
    %c0_2 = arith.constant 0 : index
    %c0_3 = arith.constant 0 : index
    %c0_4 = arith.constant 0 : index
    %4 = vector.load %arg13[%c0_2, %c0_3, %c0_4] : memref<1x4160x256xbf16, #tpu.memory_space<vmem>>, vector<1x4160x256xbf16>
    %5 = vector.shape_cast %4 : vector<1x4160x256xbf16> to vector<4160x256xbf16>
    %cst = arith.constant dense<0.000000e+00> : vector<2x256xf32>
    %6 = tpu.matmul %3, %5, %cst {dimension_numbers = #tpu.dot_dimension_numbers<[1], [0], [0], [1], [0, 0, 1, 1], [], []>} : vector<2x4160xbf16>, vector<4160x256xbf16>, vector<2x256xf32> -> vector<2x256xf32>
    %c0_5 = arith.constant 0 : index
    %c0_6 = arith.constant 0 : index
    %7 = vector.load %arg3[%c0_5, %c0_6] : memref<2x256xf32, #tpu.memory_space<vmem>>, vector<2x256xf32>
    %8 = arith.truncf %7 : vector<2x256xf32> to vector<2x256xbf16>
    %c0_7 = arith.constant 0 : index
    %c0_8 = arith.constant 0 : index
    %c0_9 = arith.constant 0 : index
    %9 = vector.load %arg14[%c0_7, %c0_8, %c0_9] : memref<1x256x256xbf16, #tpu.memory_space<vmem>>, vector<1x256x256xbf16>
    %10 = vector.shape_cast %9 : vector<1x256x256xbf16> to vector<256x256xbf16>
    %cst_10 = arith.constant dense<0.000000e+00> : vector<2x256xf32>
    %11 = tpu.matmul %8, %10, %cst_10 {dimension_numbers = #tpu.dot_dimension_numbers<[1], [0], [0], [1], [0, 0, 1, 1], [], []>} : vector<2x256xbf16>, vector<256x256xbf16>, vector<2x256xf32> -> vector<2x256xf32>
    %12 = arith.addf %6, %11 : vector<2x256xf32>
    %c0_11 = arith.constant 0 : index
    %c0_12 = arith.constant 0 : index
    %c0_13 = arith.constant 0 : index
    %13 = vector.load %arg15[%c0_11, %c0_12, %c0_13] : memref<1x1x256xf32, #tpu.memory_space<vmem>>, vector<1x1x256xf32>
    %14 = vector.shape_cast %13 : vector<1x1x256xf32> to vector<1x256xf32>
    %15 = vector.broadcast %14 : vector<1x256xf32> to vector<2x256xf32>
    %16 = arith.addf %12, %15 : vector<2x256xf32>
    %17 = arith.index_cast %arg0 : i32 to index
    %c0_14 = arith.constant 0 : index
    %c0_15 = arith.constant 0 : index
    %18 = vector.load %arg24[%17, %c0_14, %c0_15] : memref<4x2x256xf32, #tpu.memory_space<vmem>>, vector<1x2x256xf32>
    %19 = vector.shape_cast %18 : vector<1x2x256xf32> to vector<2x256xf32>
    %20 = vector.shape_cast %16 : vector<2x256xf32> to vector<1x2x256xf32>
    tpu.vector_store %arg24[%17, %c0_14, %c0_15], %20 {strides = array<i32>} : memref<4x2x256xf32, #tpu.memory_space<vmem>>, vector<1x2x256xf32>,
    %c3_i32 = arith.constant 3 : i32
    %21 = arith.cmpi eq, %arg0, %c3_i32 : i32
    %22 = arith.extui %21 : i1 to i32
    %c0_i32_16 = arith.constant 0 : i32
    %23 = arith.cmpi ne, %22, %c0_i32_16 : i32
    scf.if %23 {
      %c0_17 = arith.constant 0 : index
      %c0_18 = arith.constant 0 : index
      %c0_19 = arith.constant 0 : index
      %24 = vector.load %arg24[%c0_17, %c0_18, %c0_19] : memref<4x2x256xf32, #tpu.memory_space<vmem>>, vector<1x2x256xf32>
      %25 = vector.shape_cast %24 : vector<1x2x256xf32> to vector<2x256xf32>
      %26 = arith.negf %25 : vector<2x256xf32>
      %27 = math.exp %26 : vector<2x256xf32>
      %cst_20 = arith.constant 1.000000e+00 : f32
      %28 = vector.broadcast %cst_20 : f32 to vector<2x256xf32>
      %29 = arith.addf %28, %27 : vector<2x256xf32>
      %30 = arith.divf %28, %29 : vector<2x256xf32>
      %c1 = arith.constant 1 : index
      %c0_21 = arith.constant 0 : index
      %c0_22 = arith.constant 0 : index
      %31 = vector.load %arg24[%c1, %c0_21, %c0_22] : memref<4x2x256xf32, #tpu.memory_space<vmem>>, vector<1x2x256xf32>
      %32 = vector.shape_cast %31 : vector<1x2x256xf32> to vector<2x256xf32>
      %33 = arith.negf %32 : vector<2x256xf32>
      %34 = math.exp %33 : vector<2x256xf32>
      %cst_23 = arith.constant 1.000000e+00 : f32
      %35 = vector.broadcast %cst_23 : f32 to vector<2x256xf32>
      %36 = arith.addf %35, %34 : vector<2x256xf32>
      %37 = arith.divf %35, %36 : vector<2x256xf32>
      %c2 = arith.constant 2 : index
      %c0_24 = arith.constant 0 : index
      %c0_25 = arith.constant 0 : index
      %38 = vector.load %arg24[%c2, %c0_24, %c0_25] : memref<4x2x256xf32, #tpu.memory_space<vmem>>, vector<1x2x256xf32>
      %39 = vector.shape_cast %38 : vector<1x2x256xf32> to vector<2x256xf32>
      %40 = math.tanh %39 : vector<2x256xf32>
      %c3 = arith.constant 3 : index
      %c0_26 = arith.constant 0 : index
      %c0_27 = arith.constant 0 : index
      %41 = vector.load %arg24[%c3, %c0_26, %c0_27] : memref<4x2x256xf32, #tpu.memory_space<vmem>>, vector<1x2x256xf32>
      %42 = vector.shape_cast %41 : vector<1x2x256xf32> to vector<2x256xf32>
      %43 = arith.negf %42 : vector<2x256xf32>
      %44 = math.exp %43 : vector<2x256xf32>
      %cst_28 = arith.constant 1.000000e+00 : f32
      %45 = vector.broadcast %cst_28 : f32 to vector<2x256xf32>
      %46 = arith.addf %45, %44 : vector<2x256xf32>
      %47 = arith.divf %45, %46 : vector<2x256xf32>
      %c0_29 = arith.constant 0 : index
      %c0_30 = arith.constant 0 : index
      %48 = vector.load %arg4[%c0_29, %c0_30] : memref<2x256xf32, #tpu.memory_space<vmem>>, vector<2x256xf32>
      %49 = arith.mulf %37, %48 : vector<2x256xf32>
      %50 = arith.mulf %30, %40 : vector<2x256xf32>
      %51 = arith.addf %49, %50 : vector<2x256xf32>
      %52 = math.tanh %51 : vector<2x256xf32>
      %53 = arith.mulf %47, %52 : vector<2x256xf32>
      %c0_31 = arith.constant 0 : index
      %c0_32 = arith.constant 0 : index
      %54 = vector.load %arg20[%c0_31, %c0_32] : memref<2x256xf32, #tpu.memory_space<vmem>>, vector<2x256xf32>
      tpu.vector_store %arg20[%c0_31, %c0_32], %51 {strides = array<i32>} : memref<2x256xf32, #tpu.memory_space<vmem>>, vector<2x256xf32>,
      %c0_33 = arith.constant 0 : index
      %c0_34 = arith.constant 0 : index
      %55 = vector.load %arg19[%c0_33, %c0_34] : memref<2x256xf32, #tpu.memory_space<vmem>>, vector<2x256xf32>
      tpu.vector_store %arg19[%c0_33, %c0_34], %53 {strides = array<i32>} : memref<2x256xf32, #tpu.memory_space<vmem>>, vector<2x256xf32>,
      %56 = arith.truncf %53 : vector<2x256xf32> to vector<2x256xbf16>
      %c0_35 = arith.constant 0 : index
      %c0_36 = arith.constant 0 : index
      %57 = vector.load %arg16[%c0_35, %c0_36] : memref<256x10xbf16, #tpu.memory_space<vmem>>, vector<256x10xbf16>
      %cst_37 = arith.constant dense<0.000000e+00> : vector<2x10xf32>
      %58 = tpu.matmul %56, %57, %cst_37 {dimension_numbers = #tpu.dot_dimension_numbers<[1], [0], [0], [1], [0, 0, 1, 1], [], []>} : vector<2x256xbf16>, vector<256x10xbf16>, vector<2x10xf32> -> vector<2x10xf32>
      %c0_38 = arith.constant 0 : index
      %c0_39 = arith.constant 0 : index
      %59 = vector.load %arg17[%c0_38, %c0_39] : memref<1x10xf32, #tpu.memory_space<vmem>>, vector<1x10xf32>
      %60 = vector.broadcast %59 : vector<1x10xf32> to vector<2x10xf32>
      %61 = arith.addf %58, %60 : vector<2x10xf32>
      %c0_40 = arith.constant 0 : index
      %c0_41 = arith.constant 0 : index
      %62 = vector.load %arg18[%c0_40, %c0_41] : memref<2x10xf32, #tpu.memory_space<vmem>>, vector<2x10xf32>
      tpu.vector_store %arg18[%c0_40, %c0_41], %61 {strides = array<i32>} : memref<2x10xf32, #tpu.memory_space<vmem>>, vector<2x10xf32>,
    } else {
    }
    return
  }
  func.func @transform_0(%arg0: i32) -> (i32, i32, i32, i32) {
    %c0_i32 = arith.constant 0 : i32
    %c0_i32_0 = arith.constant 0 : i32
    %c0_i32_1 = arith.constant 0 : i32
    %c0_i32_2 = arith.constant 0 : i32
    %c0_i32_3 = arith.constant 0 : i32
    return %c0_i32, %c0_i32_0, %c0_i32_1, %c0_i32_2 : i32, i32, i32, i32
  }
  func.func @transform_1(%arg0: i32) -> (i32, i32) {
    %c0_i32 = arith.constant 0 : i32
    %c0_i32_0 = arith.constant 0 : i32
    %c0_i32_1 = arith.constant 0 : i32
    return %c0_i32, %c0_i32_0 : i32, i32
  }
  func.func @transform_2(%arg0: i32) -> (i32, i32) {
    %c0_i32 = arith.constant 0 : i32
    %c0_i32_0 = arith.constant 0 : i32
    %c0_i32_1 = arith.constant 0 : i32
    return %c0_i32, %c0_i32_0 : i32, i32
  }
  func.func @transform_3(%arg0: i32) -> (i32, i32) {
    %c0_i32 = arith.constant 0 : i32
    %c0_i32_0 = arith.constant 0 : i32
    %c0_i32_1 = arith.constant 0 : i32
    return %c0_i32, %c0_i32_0 : i32, i32
  }
  func.func @transform_4(%arg0: i32) -> (i32, i32) {
    %c0_i32 = arith.constant 0 : i32
    %c0_i32_0 = arith.constant 0 : i32
    %c0_i32_1 = arith.constant 0 : i32
    return %c0_i32, %c0_i32_0 : i32, i32
  }
  func.func @transform_5(%arg0: i32) -> (i32, i32) {
    %c0_i32 = arith.constant 0 : i32
    %c0_i32_0 = arith.constant 0 : i32
    %c0_i32_1 = arith.constant 0 : i32
    return %c0_i32, %c0_i32_0 : i32, i32
  }
  func.func @transform_6(%arg0: i32) -> (i32, i32, i32) {
    %c0_i32 = arith.constant 0 : i32
    %c0_i32_0 = arith.constant 0 : i32
    %c0_i32_1 = arith.constant 0 : i32
    %c0_i32_2 = arith.constant 0 : i32
    return %c0_i32, %c0_i32_0, %c0_i32_1 : i32, i32, i32
  }
  func.func @transform_7(%arg0: i32) -> (i32, i32) {
    %c0_i32 = arith.constant 0 : i32
    %c0_i32_0 = arith.constant 0 : i32
    %c0_i32_1 = arith.constant 0 : i32
    return %c0_i32, %c0_i32_0 : i32, i32
  }
  func.func @transform_8(%arg0: i32) -> (i32, i32) {
    %c0_i32 = arith.constant 0 : i32
    %c0_i32_0 = arith.constant 0 : i32
    %c0_i32_1 = arith.constant 0 : i32
    return %c0_i32, %c0_i32_0 : i32, i32
  }
  func.func @transform_9(%arg0: i32) -> (i32, i32) {
    %c0_i32 = arith.constant 0 : i32
    %c0_i32_0 = arith.constant 0 : i32
    %c0_i32_1 = arith.constant 0 : i32
    return %c0_i32, %c0_i32_0 : i32, i32
  }
  func.func @transform_10(%arg0: i32) -> (i32, i32) {
    %c0_i32 = arith.constant 0 : i32
    %c0_i32_0 = arith.constant 0 : i32
    %c0_i32_1 = arith.constant 0 : i32
    return %c0_i32, %c0_i32_0 : i32, i32
  }
  func.func @transform_11(%arg0: i32) -> (i32, i32) {
    %c0_i32 = arith.constant 0 : i32
    %c0_i32_0 = arith.constant 0 : i32
    %c0_i32_1 = arith.constant 0 : i32
    return %c0_i32, %c0_i32_0 : i32, i32
  }
  func.func @transform_12(%arg0: i32) -> (i32, i32, i32) {
    %c0_i32 = arith.constant 0 : i32
    %c0_i32_0 = arith.constant 0 : i32
    %c0_i32_1 = arith.constant 0 : i32
    return %arg0, %c0_i32, %c0_i32_0 : i32, i32, i32
  }
  func.func @transform_13(%arg0: i32) -> (i32, i32, i32) {
    %c0_i32 = arith.constant 0 : i32
    %c0_i32_0 = arith.constant 0 : i32
    %c0_i32_1 = arith.constant 0 : i32
    return %arg0, %c0_i32, %c0_i32_0 : i32, i32, i32
  }
  func.func @transform_14(%arg0: i32) -> (i32, i32, i32) {
    %c0_i32 = arith.constant 0 : i32
    %c0_i32_0 = arith.constant 0 : i32
    %c0_i32_1 = arith.constant 0 : i32
    return %arg0, %c0_i32, %c0_i32_0 : i32, i32, i32
  }
  func.func @transform_15(%arg0: i32) -> (i32, i32) {
    %c0_i32 = arith.constant 0 : i32
    %c0_i32_0 = arith.constant 0 : i32
    %c0_i32_1 = arith.constant 0 : i32
    return %c0_i32, %c0_i32_0 : i32, i32
  }
  func.func @transform_16(%arg0: i32) -> (i32, i32) {
    %c0_i32 = arith.constant 0 : i32
    %c0_i32_0 = arith.constant 0 : i32
    %c0_i32_1 = arith.constant 0 : i32
    return %c0_i32, %c0_i32_0 : i32, i32
  }
  func.func @transform_17(%arg0: i32) -> (i32, i32) {
    %c0_i32 = arith.constant 0 : i32
    %c0_i32_0 = arith.constant 0 : i32
    %c0_i32_1 = arith.constant 0 : i32
    return %c0_i32, %c0_i32_0 : i32, i32
  }
  func.func @transform_18(%arg0: i32) -> (i32, i32) {
    %c0_i32 = arith.constant 0 : i32
    %c0_i32_0 = arith.constant 0 : i32
    %c0_i32_1 = arith.constant 0 : i32
    return %c0_i32, %c0_i32_0 : i32, i32
  }
  func.func @transform_19(%arg0: i32) -> (i32, i32) {
    %c0_i32 = arith.constant 0 : i32
    %c0_i32_0 = arith.constant 0 : i32
    %c0_i32_1 = arith.constant 0 : i32
    return %c0_i32, %c0_i32_0 : i32, i32
  }
}

</mosaic_0001>

<bundles_post_ra>
// kernel: nethack_policy_forward.1
= control target key start
LH: loop header
LB: loop body
LE: loop exit
PB: predicated region body
PF: predicated region fallthrough
CT: control target
= control target key end

     0   :  { %s17297_s0 = inlined_call_operand.vmem [shape: s32[2,8,8,1], index: 0, kind: input, shape index: {}]   ;;  %s17298_s1 = inlined_call_operand.hbm [shape: f32[2,64], index: 1, kind: input, shape index: {}]   ;;  %s17299_s2 = inlined_call_operand.hbm [shape: f32[2,256], index: 2, kind: input, shape index: {}]   ;;  %s17300_s3 = inlined_call_operand.hbm [shape: f32[2,256], index: 3, kind: input, shape index: {}]   ;;  %s17301_s4 = inlined_call_operand.hbm [shape: f32[9,32], index: 4, kind: input, shape index: {}]   ;;  %s17302_s5 = inlined_call_operand.hbm [shape: f32[1,32], index: 5, kind: input, shape index: {}]   ;;  %s17303_s6 = inlined_call_operand.hbm [shape: f32[9,32,64], index: 6, kind: input, shape index: {}]   ;;  %s17304_s7 = inlined_call_operand.hbm [shape: f32[1,64], index: 7, kind: input, shape index: {}]   ;;  %s17305_s8 = inlined_call_operand.hbm [shape: f32[64,128], index: 8, kind: input, shape index: {}]   ;;  %s17306_s9 = inlined_call_operand.hbm [shape: f32[1,128], index: 9, kind: input, shape index: {}]   ;;  %s17307_s10 = inlined_call_operand.vmem [shape: f32[128,64], index: 10, kind: input, shape index: {}]   ;;  %s17308_s11 = inlined_call_operand.hbm [shape: f32[1,64], index: 11, kind: input, shape index: {}]   ;;  %s17309_s12 = inlined_call_operand.hbm [shape: bf16[4,4160,256], index: 12, kind: input, shape index: {}]   ;;  %s17310_s13 = inlined_call_operand.hbm [shape: bf16[4,256,256], index: 13, kind: input, shape index: {}]   ;;  %s17311_s14 = inlined_call_operand.hbm [shape: f32[4,1,256], index: 14, kind: input, shape index: {}]   ;;  %s17312_s15 = inlined_call_operand.vmem [shape: bf16[256,10], index: 15, kind: input, shape index: {}]   ;;  %s17313_s16 = inlined_call_operand.hbm [shape: f32[1,10], index: 16, kind: input, shape index: {}]   ;;  %s17314_s17 = inlined_call_operand.hbm [shape: f32[2,10], index: 17, kind: output, shape index: {0}]   ;;  %s17315_s18 = inlined_call_operand.hbm [shape: f32[2,256], index: 18, kind: output, shape index: {1}]   ;;  %s17316_s19 = inlined_call_operand.hbm [shape: f32[2,256], index: 19, kind: output, shape index: {2}]  }
   0x1   :  { %17356 = sst [smem:[#allocation55_spill]] %s17297_s0 }
   0x2   :  { %17357 = sst [smem:[#allocation56_spill]] %s17298_s1 }
   0x3   :  { %17358 = sst [smem:[#allocation57_spill]] %s17299_s2 }
   0x4   :  { %17359 = sst [smem:[#allocation58_spill]] %s17300_s3 }
   0x5   :  { %17360 = sst [smem:[#allocation59_spill]] %s17307_s10 }
   0x6   :  { %17361 = sst [smem:[#allocation60_spill]] %s17309_s12 }
   0x7   :  { %17362 = sst [smem:[#allocation61_spill]] %s17311_s14 }
   0x8   :  { %17363 = sst [smem:[#allocation62_spill]] %s17312_s15 }
   0x9   :  { %17364 = sst [smem:[#allocation63_spill]] %s17313_s16 }
   0xa   :  { %17365 = sst [smem:[#allocation64_spill]] %s17314_s17 }
   0xb   :  { %17366 = sst [smem:[#allocation65_spill]] %s17315_s18 }
   0xc   :  { %17367 = sst [smem:[#allocation66_spill]] %s17316_s19 }
   0xd   :  { %25 = vsyncpa [#allocation7], 0 }
   0xe   :  { %26 = vsyncpa [#allocation10], 0 }
   0xf   :  { %27 = vsyncpa [#allocation13], 0 }
  0x10   :  { %28 = vsyncpa [#allocation16], 0 }
  0x11   :  { %29 = vsyncpa [#allocation19], 0 }
  0x12   :  { %30 = vsyncpa [#allocation22], 0 }
  0x13   :  { %31 = vsyncpa [#allocation8], 0 }
  0x14   :  { %32 = vsyncpa [#allocation29], 0  ;;  %s13980_s0 = smov 0   ;;  %s13982_s30 = smov 0  }
  0x15   :  { %s13984_s20 = smov 0   ;;  %s13986_s21 = smov 0  }
  0x16 LB: > { %17368 = sst [smem:[#allocation41_spill]] %s13842_s30  ;;  %s13852_s1 = smov [#allocation6]   ;;  %s13850_s21 = sphi %s13986_s21, %s17449_s21   ;;  %s13846_s20 = sphi %s13984_s20, %s17452_s20   ;;  %s13842_s30 = sphi %s13982_s30, %s17451_s30   ;;  %s13838_s0 = sphi %s13980_s0, %s17450_s0  }
  0x17   : > { %17369 = sst [smem:[#allocation42_spill]] %s13846_s20  ;;  %s494_s22 = sshll.u32 %s13852_s1, 4  ;;  %s495_s22 = int_to_ptr.vmem [resolvable:$true] %s494_s22 }
  0x18   : > { %s14001_s2 = sadd.s32 4294967295, %s13850_s21   ;;  %p10611_p0 = scmp.ge.s32.totalorder %s13850_s21, 1 }
  0x19   : > { %17370 = sst [smem:[#allocation43_spill]] %s14001_s2  ;;  %p17324_p1 = scmp.eq.s32.totalorder %s14001_s2, 0 }
  0x1a   : > { %p478_p2 = scmp.lt.s32.totalorder %s13850_s21, 5  ;;  %s13853_s24 = smov [#allocation9]  }
  0x1b   : > { %s505_s25 = sshll.u32 %s13853_s24, 4  ;;  %s17374_s28 = sld [smem:[#allocation56_spill]]  ;;  %s14013_s25 = int_to_ptr.vmem [resolvable:$true] %s505_s25 }
  0x1c   : > { %p14007_p4 = pnand %p10611_p0, %p478_p2 }
  0x1e   : > { %s17371_s23 = scalar_select %p14007_p4, 1, 0 }
  0x1f   : > { %p12297_p5 = pneg %p14007_p4 }
  0x20   : > { %17372 = sst [smem:[#allocation44_spill]] %s17371_s23 }
  0x21   : > { %p14017_p6 = pnand %p12297_p5, %p17324_p1  ;;  %s13304_s29 = scalar_lea.hbm %s17374_s28, 32 }
  0x22   : > { %p13305_p7 = scmp.ne.s32.totalorder %s17374_s28, %s13304_s29  ;;  %p13311_p11 = scmp.lt.u32.totalorder %s13304_s29, %s17374_s28 }
  0x23   : > { %s17373_s3 = scalar_select %p14017_p6, 1, 0 }
  0x24   : > { %p14029_p8 = pneg %p14017_p6 }
  0x26   : > { %s17375_s17 = scalar_select %p14029_p8, 1, 0 }
  0x27   : > { %p13307_p9 = pnand %p14029_p8, %p13305_p7 }
  0x29   : > { %p13308_p10 = pneg %p13307_p9 }
  0x2b   : > { %p13313_p12 = pnand %p13311_p11, %p13308_p10 }
  0x2d   : > { %13316 = shalt.err (!%p13313_p12)
}
  0x2e   : > { %s13317_s26 = scalar_lea.vmem %s495_s22, 32  ;;  %p13325_p5 = scmp.lt.s32.totalorder %s495_s22, %s495_s22 }
  0x2f   : > { %p13318_p13 = scmp.ne.s32.totalorder %s495_s22, %s13317_s26  ;;  %p13326_p3 = scmp.lt.s32.totalorder %s13317_s26, %s13317_s26 }
  0x31   : > { %p13320_p0 = pnand %p13318_p13, %p14029_p8  ;;  %p13327_p1 = por %p13326_p3, %p13325_p5 }
  0x33   : > { %p13321_p2 = pneg %p13320_p0 }
  0x35   : > { %p13328_p4 = pnand %p13327_p1, %p13321_p2 }
  0x37   : > { %13331 = shalt.err (!%p13328_p4)
}
  0x38   : > { %12300 = dma.hbm_to_vmem [thread:$0]  (!%p14017_p6), %s17374_s28, 32, %s495_s22, [#allocation7]  }
  0x39   : > { %s17376_s1 = sld [smem:[#allocation57_spill]] }
  0x3f   : > { %s13332_s24 = scalar_lea.hbm %s17376_s1, 64 }
  0x40   : > { %p13333_p7 = scmp.ne.s32.totalorder %s17376_s1, %s13332_s24  ;;  %p13339_p1 = scmp.lt.u32.totalorder %s13332_s24, %s17376_s1 }
  0x42   : > { %p13335_p9 = pnand %p13333_p7, %p14029_p8 }
  0x44   : > { %p13336_p3 = pneg %p13335_p9 }
  0x46   : > { %p13341_p4 = pnand %p13339_p1, %p13336_p3 }
  0x48   : > { %13344 = shalt.err (!%p13341_p4)
}
  0x49   : > { %s13345_s22 = scalar_lea.vmem %s14013_s25, 64  ;;  %p13353_p13 = scmp.lt.s32.totalorder %s14013_s25, %s14013_s25 }
  0x4a   : > { %p13346_p10 = scmp.ne.s32.totalorder %s14013_s25, %s13345_s22  ;;  %p13354_p0 = scmp.lt.s32.totalorder %s13345_s22, %s13345_s22 }
  0x4c   : > { %p13348_p11 = pnand %p13346_p10, %p14029_p8  ;;  %p13355_p2 = por %p13354_p0, %p13353_p13 }
  0x4e   : > { %p13349_p12 = pneg %p13348_p11 }
  0x50   : > { %p13356_p5 = pnand %p13355_p2, %p13349_p12 }
  0x52   : > { %13359 = shalt.err (!%p13356_p5)
}
  0x53   : > { %12303 = dma.hbm_to_vmem [thread:$0]  (!%p14017_p6), %s17376_s1, 64, %s14013_s25, [#allocation10]  }
  0x54   : > { %s14069_s23 = sadd.s32 1, %s13850_s21   ;;  %s297_s19 = sadd.s32 1, %s13846_s20 }
  0x55   : > { %17377 = sst [smem:[#allocation45_spill]] %s14069_s23  ;;  %s294_s27 = ssub.s32 %s13850_s21, %s14069_s23 }
  0x56   : > { %p304_p7 = scmp.ne.s32.totalorder %s13846_s20, %s13842_s30  ;;  %p295_p9 = scmp.eq.s32.totalorder %s294_s27, 0 }
  0x57   : > { %p305_p3 = scmp.eq.s32.totalorder %s13850_s21, 0  ;;  %p310_p1 = scmp.ne.s32.totalorder %s13842_s30, %s13838_s0 }
  0x58   : > { %s14080_s18 = scalar_select %p295_p9, %s13846_s20, %s297_s19  }
  0x59   : > { %p306_p4 = por %p305_p3, %p304_p7  ;;  %p17379_p10 = scmp.eq.s32.totalorder %s14001_s2, 0 }
  0x5a   : > { %17378 = sst [smem:[#allocation46_spill]] %s14080_s18  ;;  %p12352_p12 = scmp.lt.s32.totalorder %s13850_s21, 4 }
  0x5b   : > { %p14084_p11 = por %p17379_p10, %p310_p1  ;;  %s627_s24 = sand.u32 1, %s13850_s21  }
  0x5c   : > { %s14091_s25 = sand.u32 1, %s13846_s20   ;;  %s12233_s22 = smul.u32 66560, %s13850_s21 }
  0x5d   : > { %s17380_s29 = scalar_select %p14084_p11, 1, 0 }
  0x5e   : > { %s12232_s26 = smul.u32 4160, %s14091_s25  ;;  %p14095_p13 = pnand %p12352_p12, %p306_p4 }
  0x5f   : > { %17381 = sst [smem:[#allocation47_spill]] %s17380_s29  ;;  %s17383_s12 = sld [smem:[#allocation60_spill]] }
  0x60   : > { %s17382_s10 = scalar_select %p14095_p13, 1, 0 }
  0x61   : > { %s631_s27 = scalar_lea.vmem [#allocation23], %s12232_s26  ;;  %s14106_s28 = scalar_lea.sflag [#allocation7], %s627_s24 }
  0x62   : > { %s638_s1 = sshll.u32 %s631_s27, 4  ;;  %p14112_p2 = pneg %p14095_p13  ;;  %s14104_s1 = int_to_ptr.vmem [resolvable:$true] %s638_s1 }
  0x64   : > { %s17384_s20 = scalar_select %p14112_p2, 1, 0 }
  0x65   : > { %s14102_s19 = scalar_lea.hbm %s17383_s12, %s12233_s22  ;;  %s13365_s26 = scalar_lea.hbm %s17383_s12, 266240 }
  0x66   : > { %s13360_s18 = scalar_lea.hbm %s14102_s19, 66560  ;;  %p13366_p9 = scmp.lt.u32.totalorder %s14102_s19, %s17383_s12 }
  0x67   : > { %p13361_p0 = scmp.ne.s32.totalorder %s14102_s19, %s13360_s18  ;;  %p13367_p3 = scmp.lt.u32.totalorder %s13365_s26, %s13360_s18 }
  0x68   : > { %p13369_p4 = scmp.lt.u32.totalorder %s13360_s18, %s14102_s19 }
  0x69   : > { %p13363_p5 = pnand %p14112_p2, %p13361_p0  ;;  %p13368_p1 = por %p13367_p3, %p13366_p9 }
  0x6b   : > { %p13364_p7 = pneg %p13363_p5  ;;  %p13370_p10 = por %p13369_p4, %p13368_p1 }
  0x6d   : > { %p13371_p12 = pnand %p13370_p10, %p13364_p7 }
  0x6f   : > { %13374 = shalt.err (!%p13371_p12)
}
  0x70   : > { %s13375_s24 = scalar_lea.vmem %s14104_s1, 66560  ;;  %s13854_s22 = smov [#allocation23]  }
  0x71   : > { %p13376_p0 = scmp.ne.s32.totalorder %s14104_s1, %s13375_s24  ;;  %s13380_s0 = sshll.u32 %s13854_s22, 4  ;;  %s13381_s0 = int_to_ptr.vmem [resolvable:$false] %s13380_s0 }
  0x72   : > { %s13382_s15 = scalar_lea.vmem %s13381_s0, 133120  ;;  %p13383_p6 = scmp.lt.s32.totalorder %s14104_s1, %s13381_s0 }
  0x73   : > { %p13378_p5 = pnand %p13376_p0, %p14112_p2  ;;  %p13384_p8 = scmp.lt.s32.totalorder %s13382_s15, %s13375_s24 }
  0x75   : > { %p13379_p11 = pneg %p13378_p5  ;;  %p13385_p9 = por %p13384_p8, %p13383_p6 }
  0x77   : > { %p13386_p3 = pnand %p13385_p9, %p13379_p11 }
  0x79   : > { %13389 = shalt.err (!%p13386_p3)
}
  0x7a   : > { %s13855_s18 = smov 128   ;;  %s13856_s26 = smov 8  }
  0x7b   : > { %12334 = dma.hbm_to_vmem [thread:$0]  (!%p14095_p13), %s14102_s19, 66560, %s14104_s1, %s14106_s28, %s13855_s18, %s13855_s18, %s13856_s26  }
  0x7c   : > { %s13857_s27 = smov [#allocation11]   ;;  %s13858_s0 = smov [#allocation12]  }
  0x7d   : > { %s516_s22 = sshll.u32 %s13857_s27, 4  ;;  %s526_s24 = sshll.u32 %s13858_s0, 4  ;;  %s517_s22 = int_to_ptr.vmem [resolvable:$true] %s516_s22  ;;  %s527_s24 = int_to_ptr.vmem [resolvable:$true] %s526_s24 }
  0x7e   : > { %s17385_s23 = sld [smem:[#allocation58_spill]]  ;;  %p17386_p8 = scmp.ne.s32.totalorder %s17375_s17, 0 }
  0x84   : > { %s13390_s29 = scalar_lea.hbm %s17385_s23, 64 }
  0x85   : > { %p13391_p6 = scmp.ne.s32.totalorder %s17385_s23, %s13390_s29  ;;  %p13397_p1 = scmp.lt.u32.totalorder %s13390_s29, %s17385_s23 }
  0x87   : > { %p13393_p11 = pnand %p13391_p6, %p17386_p8 }
  0x89   : > { %p13394_p7 = pneg %p13393_p11 }
  0x8b   : > { %p13399_p4 = pnand %p13397_p1, %p13394_p7 }
  0x8d   : > { %13402 = shalt.err (!%p13399_p4)
}
  0x8e   : > { %s13403_s1 = scalar_lea.vmem %s517_s22, 64  ;;  %p13411_p5 = scmp.lt.s32.totalorder %s517_s22, %s517_s22 }
  0x8f   : > { %p13404_p10 = scmp.ne.s32.totalorder %s517_s22, %s13403_s1  ;;  %p13412_p9 = scmp.lt.s32.totalorder %s13403_s1, %s13403_s1 }
  0x91   : > { %p13406_p12 = pnand %p13404_p10, %p17386_p8  ;;  %p13413_p3 = por %p13412_p9, %p13411_p5 }
  0x93   : > { %p13407_p0 = pneg %p13406_p12 }
  0x95   : > { %p13414_p13 = pnand %p13413_p3, %p13407_p0 }
  0x97   : > { %13417 = shalt.err (!%p13414_p13)
}
  0x98   : > { %p17387_p6 = scmp.ne.s32.totalorder %s17373_s3, 0  ;;  %s13418_s2 = scalar_lea.hbm %s17301_s4, 256 }
  0x99   : > { %p13419_p11 = scmp.ne.s32.totalorder %s17301_s4, %s13418_s2  ;;  %p13425_p13 = scmp.lt.u32.totalorder %s13418_s2, %s17301_s4 }
  0x9a   : > { %12306 = dma.hbm_to_vmem [thread:$0]  (!%p17387_p6), %s17385_s23, 64, %s517_s22, [#allocation10]  }
  0x9b   : > { %p13421_p7 = pnand %p13419_p11, %p17386_p8 }
  0x9d   : > { %p13422_p1 = pneg %p13421_p7 }
  0x9f   : > { %p13427_p4 = pnand %p13425_p13, %p13422_p1 }
  0xa1   : > { %13430 = shalt.err (!%p13427_p4)
}
  0xa2   : > { %s13431_s15 = scalar_lea.vmem %s527_s24, 256  ;;  %p13439_p5 = scmp.lt.s32.totalorder %s527_s24, %s527_s24 }
  0xa3   : > { %p13432_p10 = scmp.ne.s32.totalorder %s527_s24, %s13431_s15  ;;  %p13440_p9 = scmp.lt.s32.totalorder %s13431_s15, %s13431_s15 }
  0xa5   : > { %p13434_p12 = pnand %p13432_p10, %p17386_p8  ;;  %p13441_p3 = por %p13440_p9, %p13439_p5 }
  0xa7   : > { %p13435_p0 = pneg %p13434_p12 }
  0xa9   : > { %p13442_p2 = pnand %p13441_p3, %p13435_p0 }
  0xab   : > { %13445 = shalt.err (!%p13442_p2)
}
  0xac   : > { %12309 = dma.hbm_to_vmem [thread:$0]  (!%p17387_p6), %s17301_s4, 256, %s527_s24, [#allocation13], %s13855_s18, %s13855_s18, %s13856_s26  }
  0xad   : > { %s13859_s12 = smov [#allocation15]   ;;  %s13860_s14 = smov [#allocation18]  }
  0xae   : > { %s550_s30 = sshll.u32 %s13859_s12, 4  ;;  %s574_s16 = sshll.u32 %s13860_s14, 4  ;;  %s551_s30 = int_to_ptr.vmem [resolvable:$true] %s550_s30  ;;  %s575_s16 = int_to_ptr.vmem [resolvable:$true] %s574_s16 }
  0xaf   : > { %s13446_s19 = scalar_lea.hbm %s17303_s6, 4608 }
  0xb0   : > { %p13447_p2 = scmp.ne.s32.totalorder %s17303_s6, %s13446_s19  ;;  %p13453_p1 = scmp.lt.u32.totalorder %s13446_s19, %s17303_s6 }
  0xb2   : > { %p13449_p11 = pnand %p13447_p2, %p17386_p8 }
  0xb4   : > { %p13450_p7 = pneg %p13449_p11 }
  0xb6   : > { %p13455_p13 = pnand %p13453_p1, %p13450_p7 }
  0xb8   : > { %13458 = shalt.err (!%p13455_p13)
}
  0xb9   : > { %s13459_s24 = scalar_lea.vmem %s551_s30, 4608  ;;  %p13467_p0 = scmp.lt.s32.totalorder %s551_s30, %s551_s30 }
  0xba   : > { %p13460_p4 = scmp.ne.s32.totalorder %s551_s30, %s13459_s24  ;;  %p13468_p5 = scmp.lt.s32.totalorder %s13459_s24, %s13459_s24 }
  0xbc   : > { %p13462_p10 = pnand %p13460_p4, %p17386_p8  ;;  %p13469_p9 = por %p13468_p5, %p13467_p0 }
  0xbe   : > { %p13463_p12 = pneg %p13462_p10 }
  0xc0   : > { %p13470_p3 = pnand %p13469_p9, %p13463_p12 }
  0xc2   : > { %13473 = shalt.err (!%p13470_p3)
}
  0xc3   : > { %12315 = dma.hbm_to_vmem [thread:$0]  (!%p17387_p6), %s17303_s6, 4608, %s551_s30, [#allocation16], %s13855_s18, %s13855_s18, %s13856_s26  }
  0xc4   : > { %s10625_s14 = sshll.u32 %s14091_s25, 8  ;;  %s13474_s19 = scalar_lea.hbm %s17305_s8, 1024 }
  0xc5   : > { %p13475_p2 = scmp.ne.s32.totalorder %s17305_s8, %s13474_s19  ;;  %p13481_p1 = scmp.lt.u32.totalorder %s13474_s19, %s17305_s8 }
  0xc7   : > { %p13477_p11 = pnand %p13475_p2, %p17386_p8 }
  0xc9   : > { %p13478_p7 = pneg %p13477_p11 }
  0xcb   : > { %p13483_p13 = pnand %p13481_p1, %p13478_p7 }
  0xcd   : > { %13486 = shalt.err (!%p13483_p13)
}
  0xce   : > { %s13487_s30 = scalar_lea.vmem %s575_s16, 1024  ;;  %p13495_p0 = scmp.lt.s32.totalorder %s575_s16, %s575_s16 }
  0xcf   : > { %p13488_p4 = scmp.ne.s32.totalorder %s575_s16, %s13487_s30  ;;  %p13496_p5 = scmp.lt.s32.totalorder %s13487_s30, %s13487_s30 }
  0xd1   : > { %p13490_p10 = pnand %p13488_p4, %p17386_p8  ;;  %p13497_p9 = por %p13496_p5, %p13495_p0 }
  0xd3   : > { %p13491_p12 = pneg %p13490_p10 }
  0xd5   : > { %p13498_p3 = pnand %p13497_p9, %p13491_p12 }
  0xd7   : > { %13501 = shalt.err (!%p13498_p3)
}
  0xd8   : > { %12321 = dma.hbm_to_vmem [thread:$0]  (!%p17387_p6), %s17305_s8, 1024, %s575_s16, [#allocation19], %s13855_s18, %s13855_s18, %s13856_s26  }
  0xd9   : > { %s11423_s12 = sshll.u32 %s13850_s21, 12  ;;  %s652_s27 = scalar_lea.vmem [#allocation24], %s10625_s14 }
  0xda   : > { %s14225_s19 = scalar_lea.hbm %s17310_s13, %s11423_s12  ;;  %s659_s0 = sshll.u32 %s652_s27, 4  ;;  %s14227_s0 = int_to_ptr.vmem [resolvable:$true] %s659_s0 }
  0xdb   : > { %s13502_s15 = scalar_lea.hbm %s14225_s19, 4096  ;;  %p17388_p11 = scmp.ne.s32.totalorder %s17384_s20, 0 }
  0xdc   : > { %p13503_p2 = scmp.ne.s32.totalorder %s14225_s19, %s13502_s15  ;;  %s13507_s30 = scalar_lea.hbm %s17310_s13, 16384 }
  0xdd   : > { %p13508_p13 = scmp.lt.u32.totalorder %s14225_s19, %s17310_s13  ;;  %p13509_p4 = scmp.lt.u32.totalorder %s13507_s30, %s13502_s15 }
  0xde   : > { %p13505_p7 = pnand %p13503_p2, %p17388_p11  ;;  %p13511_p12 = scmp.lt.u32.totalorder %s13502_s15, %s14225_s19 }
  0xdf   : > { %p13510_p10 = por %p13509_p4, %p13508_p13 }
  0xe0   : > { %p13506_p1 = pneg %p13505_p7 }
  0xe1   : > { %p13512_p0 = por %p13511_p12, %p13510_p10 }
  0xe3   : > { %p13513_p5 = pnand %p13512_p0, %p13506_p1 }
  0xe5   : > { %13516 = shalt.err (!%p13513_p5)
}
  0xe6   : > { %s13517_s14 = scalar_lea.vmem %s14227_s0, 4096  ;;  %s13861_s12 = smov [#allocation24]  }
  0xe7   : > { %p13518_p9 = scmp.ne.s32.totalorder %s14227_s0, %s13517_s14  ;;  %s13522_s2 = sshll.u32 %s13861_s12, 4  ;;  %s13523_s2 = int_to_ptr.vmem [resolvable:$false] %s13522_s2 }
  0xe8   : > { %s13524_s29 = scalar_lea.vmem %s13523_s2, 8192  ;;  %p13525_p7 = scmp.lt.s32.totalorder %s14227_s0, %s13523_s2 }
  0xe9   : > { %p13520_p3 = pnand %p13518_p9, %p17388_p11  ;;  %p13526_p6 = scmp.lt.s32.totalorder %s13524_s29, %s13517_s14 }
  0xeb   : > { %p13521_p2 = pneg %p13520_p3  ;;  %p13527_p13 = por %p13526_p6, %p13525_p7 }
  0xed   : > { %p13528_p4 = pnand %p13527_p13, %p13521_p2 }
  0xef   : > { %13531 = shalt.err (!%p13528_p4)
}
  0xf0   : > { %p17389_p1 = scmp.ne.s32.totalorder %s17382_s10, 0  ;;  %s13862_s27 = smov [#allocation14]  }
  0xf1   : > { %s540_s15 = sshll.u32 %s13862_s27, 4  ;;  %s13863_s16 = smov [#allocation17]   ;;  %s541_s15 = int_to_ptr.vmem [resolvable:$true] %s540_s15 }
  0xf2   : > { %12337 = dma.hbm_to_vmem [thread:$0]  (!%p17389_p1), %s14225_s19, 4096, %s14227_s0, %s14106_s28, %s13855_s18, %s13855_s18, %s13856_s26  }
  0xf3   : > { %s564_s22 = sshll.u32 %s13863_s16, 4  ;;  %s13532_s1 = scalar_lea.hbm %s17302_s5, 16  ;;  %s565_s22 = int_to_ptr.vmem [resolvable:$true] %s564_s22 }
  0xf4   : > { %p13533_p6 = scmp.ne.s32.totalorder %s17302_s5, %s13532_s1  ;;  %p13539_p0 = scmp.lt.u32.totalorder %s13532_s1, %s17302_s5 }
  0xf6   : > { %p13535_p10 = pnand %p13533_p6, %p17386_p8 }
  0xf8   : > { %p13536_p12 = pneg %p13535_p10 }
  0xfa   : > { %p13541_p5 = pnand %p13539_p0, %p13536_p12 }
  0xfc   : > { %13544 = shalt.err (!%p13541_p5)
}
  0xfd   : > { %s13545_s18 = scalar_lea.vmem %s541_s15, 16  ;;  %s13552_s26 = scalar_lea.vmem %s541_s15, 32 }
  0xfe   : > { %p13546_p9 = scmp.ne.s32.totalorder %s541_s15, %s13545_s18  ;;  %p13553_p7 = scmp.lt.s32.totalorder %s541_s15, %s541_s15 }
  0xff   : > { %p13554_p13 = scmp.lt.s32.totalorder %s13552_s26, %s13545_s18 }
 0x100   : > { %p13548_p3 = pnand %p13546_p9, %p17386_p8 }
 0x101   : > { %p13555_p4 = por %p13554_p13, %p13553_p7 }
 0x102   : > { %p13549_p2 = pneg %p13548_p3 }
 0x104   : > { %p13556_p1 = pnand %p13555_p4, %p13549_p2 }
 0x106   : > { %13559 = shalt.err (!%p13556_p1)
}
 0x107   : > { %p17390_p6 = scmp.ne.s32.totalorder %s17373_s3, 0  ;;  %s13560_s30 = scalar_lea.hbm %s17304_s7, 16 }
 0x108   : > { %p13561_p10 = scmp.ne.s32.totalorder %s17304_s7, %s13560_s30  ;;  %p13567_p1 = scmp.lt.u32.totalorder %s13560_s30, %s17304_s7 }
 0x109   : > { %12312 = dma.hbm_to_vmem [thread:$0]  (!%p17390_p6), %s17302_s5, 16, %s541_s15, [#allocation13]  }
 0x10a   : > { %p13563_p12 = pnand %p13561_p10, %p17386_p8 }
 0x10c   : > { %p13564_p0 = pneg %p13563_p12 }
 0x10e   : > { %p13569_p5 = pnand %p13567_p1, %p13564_p0 }
 0x110   : > { %13572 = shalt.err (!%p13569_p5)
}
 0x111   : > { %s13573_s2 = scalar_lea.vmem %s565_s22, 16  ;;  %s13580_s15 = scalar_lea.vmem %s565_s22, 32 }
 0x112   : > { %p13574_p9 = scmp.ne.s32.totalorder %s565_s22, %s13573_s2  ;;  %p13581_p7 = scmp.lt.s32.totalorder %s565_s22, %s565_s22 }
 0x113   : > { %p13582_p13 = scmp.lt.s32.totalorder %s13580_s15, %s13573_s2 }
 0x114   : > { %p13576_p3 = pnand %p13574_p9, %p17386_p8 }
 0x115   : > { %p13583_p4 = por %p13582_p13, %p13581_p7 }
 0x116   : > { %p13577_p2 = pneg %p13576_p3 }
 0x118   : > { %p13584_p11 = pnand %p13583_p4, %p13577_p2 }
 0x11a   : > { %13587 = shalt.err (!%p13584_p11)
}
 0x11b   : > { %12318 = dma.hbm_to_vmem [thread:$0]  (!%p17390_p6), %s17304_s7, 16, %s565_s22, [#allocation16]  }
 0x11c   : > { %s13864_s26 = smov [#allocation20]   ;;  %s13865_s0 = smov [#allocation21]  }
 0x11d   : > { %s588_s19 = sshll.u32 %s13864_s26, 4  ;;  %s602_s27 = sshll.u32 %s13865_s0, 4  ;;  %s589_s19 = int_to_ptr.vmem [resolvable:$true] %s588_s19  ;;  %s603_s27 = int_to_ptr.vmem [resolvable:$true] %s602_s27 }
 0x11e   : > { %s13588_s24 = scalar_lea.hbm %s17306_s9, 16 }
 0x11f   : > { %p13589_p11 = scmp.ne.s32.totalorder %s17306_s9, %s13588_s24  ;;  %p13595_p0 = scmp.lt.u32.totalorder %s13588_s24, %s17306_s9 }
 0x121   : > { %p13591_p10 = pnand %p13589_p11, %p17386_p8 }
 0x123   : > { %p13592_p12 = pneg %p13591_p10 }
 0x125   : > { %p13597_p1 = pnand %p13595_p0, %p13592_p12 }
 0x127   : > { %13600 = shalt.err (!%p13597_p1)
}
 0x128   : > { %s13601_s22 = scalar_lea.vmem %s589_s19, 16  ;;  %s13608_s15 = scalar_lea.vmem %s589_s19, 32 }
 0x129   : > { %p13602_p5 = scmp.ne.s32.totalorder %s589_s19, %s13601_s22  ;;  %p13609_p2 = scmp.lt.s32.totalorder %s589_s19, %s589_s19 }
 0x12a   : > { %p13610_p7 = scmp.lt.s32.totalorder %s13608_s15, %s13601_s22 }
 0x12b   : > { %p13604_p9 = pnand %p13602_p5, %p17386_p8 }
 0x12c   : > { %p13611_p13 = por %p13610_p7, %p13609_p2 }
 0x12d   : > { %p13605_p3 = pneg %p13604_p9 }
 0x12f   : > { %p13612_p4 = pnand %p13611_p13, %p13605_p3 }
 0x131   : > { %13615 = shalt.err (!%p13612_p4)
}
 0x132   : > { %12324 = dma.hbm_to_vmem [thread:$0]  (!%p17390_p6), %s17306_s9, 16, %s589_s19, [#allocation19]  }
 0x133   : > { %s13616_s16 = scalar_lea.hbm %s17308_s11, 16 }
 0x134   : > { %p13617_p11 = scmp.ne.s32.totalorder %s17308_s11, %s13616_s16  ;;  %p13623_p0 = scmp.lt.u32.totalorder %s13616_s16, %s17308_s11 }
 0x136   : > { %p13619_p10 = pnand %p13617_p11, %p17386_p8 }
 0x138   : > { %p13620_p12 = pneg %p13619_p10 }
 0x13a   : > { %p13625_p1 = pnand %p13623_p0, %p13620_p12 }
 0x13c   : > { %13628 = shalt.err (!%p13625_p1)
}
 0x13d   : > { %s13629_s12 = scalar_lea.vmem %s603_s27, 16  ;;  %s13636_s19 = scalar_lea.vmem %s603_s27, 32 }
 0x13e   : > { %p13630_p5 = scmp.ne.s32.totalorder %s603_s27, %s13629_s12  ;;  %p13637_p2 = scmp.lt.s32.totalorder %s603_s27, %s603_s27 }
 0x13f   : > { %p13638_p7 = scmp.lt.s32.totalorder %s13636_s19, %s13629_s12 }
 0x140   : > { %p13632_p9 = pnand %p13630_p5, %p17386_p8 }
 0x141   : > { %p13639_p13 = por %p13638_p7, %p13637_p2 }
 0x142   : > { %p13633_p3 = pneg %p13632_p9 }
 0x144   : > { %p13640_p4 = pnand %p13639_p13, %p13633_p3 }
 0x146   : > { %13643 = shalt.err (!%p13640_p4)
}
 0x147   : > { %12327 = dma.hbm_to_vmem [thread:$0]  (!%p17390_p6), %s17308_s11, 16, %s603_s27, [#allocation22]  }
 0x148   : > { %s13866_s15 = smov [#allocation26]   ;;  %s10628_s18 = sshll.u32 %s14091_s25, 1 }
 0x149   : > { %s616_s29 = sshll.u32 %s13866_s15, 4  ;;  %s17391_s16 = sld [smem:[#allocation63_spill]]  ;;  %s617_s29 = int_to_ptr.vmem [resolvable:$true] %s616_s29 }
 0x14f   : > { %s13644_s30 = scalar_lea.hbm %s17391_s16, 16 }
 0x150   : > { %p13645_p11 = scmp.ne.s32.totalorder %s17391_s16, %s13644_s30  ;;  %p13651_p0 = scmp.lt.u32.totalorder %s13644_s30, %s17391_s16 }
 0x152   : > { %p13647_p10 = pnand %p13645_p11, %p17386_p8 }
 0x154   : > { %p13648_p12 = pneg %p13647_p10 }
 0x156   : > { %p13653_p1 = pnand %p13651_p0, %p13648_p12 }
 0x158   : > { %13656 = shalt.err (!%p13653_p1)
}
 0x159   : > { %s13657_s27 = scalar_lea.vmem %s617_s29, 16  ;;  %s13664_s25 = scalar_lea.vmem %s617_s29, 32 }
 0x15a   : > { %p13658_p5 = scmp.ne.s32.totalorder %s617_s29, %s13657_s27  ;;  %p13665_p2 = scmp.lt.s32.totalorder %s617_s29, %s617_s29 }
 0x15b   : > { %p13666_p7 = scmp.lt.s32.totalorder %s13664_s25, %s13657_s27 }
 0x15c   : > { %p13660_p9 = pnand %p13658_p5, %p17386_p8 }
 0x15d   : > { %p13667_p13 = por %p13666_p7, %p13665_p2 }
 0x15e   : > { %p13661_p3 = pneg %p13660_p9 }
 0x160   : > { %p13668_p4 = pnand %p13667_p13, %p13661_p3 }
 0x162   : > { %13671 = shalt.err (!%p13668_p4)
}
 0x163   : > { %12330 = dma.hbm_to_vmem [thread:$0]  (!%p17390_p6), %s17391_s16, 16, %s617_s29, [#allocation10]  }
 0x164   : > { %s11424_s22 = sshll.u32 %s13850_s21, 5  ;;  %s673_s15 = scalar_lea.vmem [#allocation25], %s10628_s18 }
 0x165   : > { %s681_s26 = sshll.u32 %s673_s15, 4  ;;  %s17392_s30 = sld [smem:[#allocation61_spill]]  ;;  %s682_s26 = int_to_ptr.vmem [resolvable:$true] %s681_s26 }
 0x166   : > { %p17394_p11 = scmp.ne.s32.totalorder %s17384_s20, 0 }
 0x16b   : > { %s17393_s24 = smov %s17392_s30  ;;  %s679_s1 = scalar_lea.hbm %s17392_s30, %s11424_s22 }
 0x16c   : > { %s13672_s14 = scalar_lea.hbm %s679_s1, 32  ;;  %s13677_s27 = scalar_lea.hbm %s17393_s24, 128 }
 0x16d   : > { %p13673_p8 = scmp.ne.s32.totalorder %s679_s1, %s13672_s14  ;;  %p13678_p6 = scmp.lt.u32.totalorder %s679_s1, %s17393_s24 }
 0x16e   : > { %p13679_p0 = scmp.lt.u32.totalorder %s13677_s27, %s13672_s14  ;;  %p13681_p5 = scmp.lt.u32.totalorder %s13672_s14, %s679_s1 }
 0x16f   : > { %p13675_p10 = pnand %p13673_p8, %p17394_p11 }
 0x170   : > { %p13680_p1 = por %p13679_p0, %p13678_p6 }
 0x171   : > { %p13676_p12 = pneg %p13675_p10 }
 0x172   : > { %p13682_p9 = por %p13681_p5, %p13680_p1 }
 0x174   : > { %p13683_p3 = pnand %p13682_p9, %p13676_p12 }
 0x176   : > { %13686 = shalt.err (!%p13683_p3)
}
 0x177   : > { %s13687_s21 = scalar_lea.vmem %s682_s26, 32  ;;  %s13867_s29 = smov [#allocation25]  }
 0x178   : > { %p13688_p2 = scmp.ne.s32.totalorder %s682_s26, %s13687_s21  ;;  %s13692_s18 = sshll.u32 %s13867_s29, 4  ;;  %s13693_s18 = int_to_ptr.vmem [resolvable:$false] %s13692_s18 }
 0x179   : > { %s13694_s2 = scalar_lea.vmem %s13693_s18, 64  ;;  %p13695_p4 = scmp.lt.s32.totalorder %s682_s26, %s13693_s18 }
 0x17a   : > { %p13690_p7 = pnand %p13688_p2, %p17394_p11  ;;  %p13696_p8 = scmp.lt.s32.totalorder %s13694_s2, %s13687_s21 }
 0x17c   : > { %p13691_p13 = pneg %p13690_p7  ;;  %p13697_p10 = por %p13696_p8, %p13695_p4 }
 0x17e   : > { %p13698_p0 = pnand %p13697_p10, %p13691_p13 }
 0x180   : > { %13701 = shalt.err (!%p13698_p0)
}
 0x181   : > { %p17395_p6 = scmp.ne.s32.totalorder %s17382_s10, 0  ;;  %s17396_s22 = sld [smem:[#allocation44_spill]] }
 0x183   : > { %12340 = dma.hbm_to_vmem [thread:$0]  (!%p17395_p6), %s679_s1, 32, %s682_s26, %s14106_s28  }
 0x187   : > { %p17397_p12 = scmp.ne.s32.totalorder %s17396_s22, 0 }
 0x188   : > { %s17398_s15 = sld [smem:[#allocation43_spill]] (!%p17397_p12) }
 0x189   : > { %690 = sbr.rel (%p17397_p12) target bundleno = 2635 (0xa4b), region = 88 }
 0x18e   : > { %p17399_p1 = scmp.eq.s32.totalorder (!%p17397_p12), %s17398_s15, 0 }
 0x190   : > { %13797 = dma.done.wait (%p17399_p1), [#allocation7], 32   ;;  %p17400_p11 = pmov %p17399_p1 }
 0x191   : > { %p17401_p5 = pmov %p17399_p1 }
 0x192   : > { %13799 = vsyncadd (%p17400_p11), [#allocation7], 4294967264 }
 0x193   : > { %13801 = dma.done.wait (%p17401_p5), [#allocation10], 128   ;;  %p17402_p9 = pmov %p17399_p1 }
 0x194   : > { %p17403_p3 = pmov %p17399_p1 }
 0x195   : > { %13803 = vsyncadd (%p17402_p9), [#allocation10], 4294967168 }
 0x196   : > { %13805 = dma.done.wait (%p17403_p3), [#allocation13], 272   ;;  %p17404_p2 = pmov %p17399_p1 }
 0x197   : > { %p17405_p7 = pmov %p17399_p1 }
 0x198   : > { %13807 = vsyncadd (%p17404_p2), [#allocation13], 4294967024 }
 0x199   : > { %13809 = dma.done.wait (%p17405_p7), [#allocation16], 4624   ;;  %p17406_p13 = pmov %p17399_p1 }
 0x19a   : > { %p17407_p4 = pmov %p17399_p1 }
 0x19b   : > { %13811 = vsyncadd (%p17406_p13), [#allocation16], 4294962672 }
 0x19c   : > { %13813 = dma.done.wait (%p17407_p4), [#allocation19], 1040   ;;  %p17408_p8 = pmov %p17399_p1 }
 0x19d   : > { %p17409_p10 = pmov %p17399_p1 }
 0x19e   : > { %13815 = vsyncadd (%p17408_p8), [#allocation19], 4294966256 }
 0x19f   : > { %13817 = dma.done.wait (%p17409_p10), [#allocation22], 16   ;;  %p17410_p0 = pmov %p17399_p1 }
 0x1a0   : > { %s17411_s20 = sld [smem:[#allocation41_spill]]  ;;  %s17412_s28 = sld [smem:[#allocation47_spill]] }
 0x1a1   : > { %13819 = vsyncadd (%p17410_p0), [#allocation22], 4294967280  ;;  %s732_s10 = sand.u32 1, %s17398_s15  }
 0x1a2   : > { %s733_s0 = scalar_lea.sflag [#allocation7], %s732_s10 }
 0x1a6   : > { %s734_s26 = sand.u32 1, %s17411_s20   ;;  %p17413_p6 = scmp.ne.s32.totalorder %s17412_s28, 0 }
 0x1a7   : > { %s12234_s17 = smul.u32 4160, %s734_s26 }
 0x1a9   : > { %s14390_s30 = scalar_lea.vmem [#allocation23], %s12234_s17 }
 0x1aa   : > { %13821 = dma.done.wait (%p17413_p6), %s733_s0, 70688  }
 0x1ab   : > { %13823 = vsyncadd (%p17413_p6), %s733_s0, 4294896608  ;;  %s10642_s1 = sshll.u32 %s734_s26, 8  ;;  %s10643_s14 = sshll.u32 %s734_s26, 1 }
 0x1ac   : > { %s14396_s3 = scalar_lea.vmem [#allocation24], %s10642_s1  ;;  %s14398_s12 = scalar_lea.vmem [#allocation25], %s10643_s14 }
 0x1ad   : > { %p17414_p12 = pmov %p17410_p0 }
 0x1ae   : > { %p17415_p1 = pmov %p17410_p0 }
 0x1af   : > { %13825 = dma.done.wait (%p17414_p12), [#allocation10], 16  }
 0x1b0   : > { %13827 = vsyncadd (%p17415_p1), [#allocation10], 4294967280  ;;  %p17416_p11 = scmp.ne.s32.totalorder %s17398_s15, 0 }
 0x1b2   : > { %822 = sbr.rel (%p17416_p11) target bundleno = 1468 (0x5bc), region = 148 }
 0x1b9   : > { %vm823_vm0 = vcmask 7168   ;;  %vm825_vm1 = vcmask 1024   ;;  %s17417_s19 = sld [smem:[#allocation55_spill]]  ;;  %v13868_v2 = vmov 0   ;;  %v17354_v3 = vmov 0.0   ;;  %v2247_v59 = vld [vmem:[#allocation15 + $0x20] sm:$0xff] }
 0x1ba   : > { %12427 = vset.pattern.permute.xlu0 %v13868_v2  ;;  %824 = vst.msk [vmem:[#allocation2] sm:$0xff] %vm823_vm0, %v17354_v3  ;;  %827 = vst.msk [vmem:[#allocation2 + $0x10] sm:$0xff] %vm823_vm0, %v17354_v3  ;;  %12428 = vset.pattern.permute.xlu1 %v13868_v2  ;;  %vm2151_vm2 = vcmask 261120   ;;  %vm2153_vm3 = vcmask 254976   ;;  %v2248_v60 = vld [vmem:[#allocation15 + $0x28] sm:$0xff]  ;;  %v2249_v62 = vld [vmem:[#allocation15 + $0x30] sm:$0xff] }
 0x1bb   : > { %829 = vst.msk [vmem:[#allocation2 + $0x20] sm:$0xff] %vm823_vm0, %v17354_v3  ;;  %831 = vst.msk [vmem:[#allocation2 + $0x30] sm:$0xff] %vm823_vm0, %v17354_v3  ;;  %v11996_v61 = vpack.c.bf16 %v2248_v60, %v2247_v59  ;;  %v2250_v63 = vld [vmem:[#allocation15 + $0x38] sm:$0xff]  ;;  %vm13871_vm4 = vmmov 0   ;;  %vm5615_vm5 = vcmask 523264   ;;  %s17433_s21 = sld [smem:[#allocation59_spill]] }
 0x1bc   : > { %833 = vst.msk [vmem:[#allocation2 + $0x40] sm:$0xff] %vm823_vm0, %v17354_v3  ;;  %835 = vst.msk [vmem:[#allocation2 + $0x50] sm:$0xff] %vm823_vm0, %v17354_v3  ;;  %vm4288_vm6 = vcmask 516096   ;;  %vm4289_vm7 = vsmask.f32 256  ;;  %s13873_s18 = smov 64  }
 0x1bd   : > { %837 = vst.msk [vmem:[#allocation2 + $0x60] sm:$0xff] %vm823_vm0, %v17354_v3  ;;  %839 = vst.msk [vmem:[#allocation2 + $0x70] sm:$0xff] %vm823_vm0, %v17354_v3  ;;  %11997 = vmatprep.subr.bf16.mxu1 %v11996_v61  ;;  %vm4317_vm9 = vcmask 1040896   ;;  %vm4992_vm11 = vsmask.f32 7938 }
 0x1be   : > { %841 = vst.msk [vmem:[#allocation2 + $0x80] sm:$0xff] %vm823_vm0, %v17354_v3  ;;  %843 = vst.msk [vmem:[#allocation2 + $0x90] sm:$0xff] %vm823_vm0, %v17354_v3  ;;  %11999 = vmatpush3.bf16.msra.mxu1 %v11996_v61 }
 0x1bf   : > { %v866_v0 = vld [vmem:[%s17417_s19 + $0x8] sm:$0xff]  ;;  %v865_v1 = vld [vmem:[%s17417_s19] sm:$0xff]  ;;  %845 = vst.msk [vmem:[#allocation2 + $0xa0] sm:$0xff] %vm823_vm0, %v17354_v3  ;;  %847 = vst.msk [vmem:[#allocation2 + $0xb0] sm:$0xff] %vm823_vm0, %v17354_v3 }
 0x1c0   : > { %849 = vst.msk [vmem:[#allocation2 + $0xc0] sm:$0xff] %vm823_vm0, %v17354_v3  ;;  %851 = vst.msk [vmem:[#allocation2 + $0xd0] sm:$0xff] %vm823_vm0, %v17354_v3  ;;  %v882_v4 = vcvt.s32.f32 %v866_v0  ;;  %v881_v5 = vcvt.s32.f32 %v865_v1  ;;  %v867_v6 = vld [vmem:[%s17417_s19 + $0x10] sm:$0xff]  ;;  %v868_v7 = vld [vmem:[%s17417_s19 + $0x18] sm:$0xff]  ;;  %v12000_v0 = vpack.c.bf16 %v2250_v63, %v2249_v62 }
 0x1c1   : > { %853 = vst.msk [vmem:[#allocation2 + $0xe0] sm:$0xff] %vm823_vm0, %v17354_v3  ;;  %855 = vst.msk [vmem:[#allocation2 + $0xf0] sm:$0xff] %vm823_vm0, %v17354_v3  ;;  %v869_v8 = vld [vmem:[%s17417_s19 + $0x20] sm:$0xff]  ;;  %v883_v9 = vcvt.s32.f32 %v867_v6  ;;  %v884_v10 = vcvt.s32.f32 %v868_v7  ;;  %v870_v12 = vld [vmem:[%s17417_s19 + $0x28] sm:$0xff]  ;;  %s17434_s29 = smov %s17433_s21 }
 0x1c2   : > { %857 = vst.msk [vmem:[#allocation2 + $0x100] sm:$0xff] %vm823_vm0, %v17354_v3  ;;  %859 = vst.msk [vmem:[#allocation2 + $0x110] sm:$0xff] %vm823_vm0, %v17354_v3  ;;  %v885_v11 = vcvt.s32.f32 %v869_v8  ;;  %v871_v13 = vld [vmem:[%s17417_s19 + $0x30] sm:$0xff]  ;;  %v873_v14 = vld [vmem:[%s17417_s19 + $0x40] sm:$0xff]  ;;  %v886_v15 = vcvt.s32.f32 %v870_v12  ;;  %12001 = vmatprep.subr.bf16.mxu1 %v12000_v0 }
 0x1c3   : > { %861 = vst.msk [vmem:[#allocation2 + $0x120] sm:$0xff] %vm823_vm0, %v17354_v3  ;;  %863 = vst.msk [vmem:[#allocation2 + $0x130] sm:$0xff] %vm823_vm0, %v17354_v3  ;;  %v887_v16 = vcvt.s32.f32 %v871_v13  ;;  %v889_v17 = vcvt.s32.f32 %v873_v14  ;;  %v874_v18 = vld [vmem:[%s17417_s19 + $0x48] sm:$0xff]  ;;  %v875_v19 = vld [vmem:[%s17417_s19 + $0x50] sm:$0xff]  ;;  %12003 = vmatpush3.bf16.msra.mxu1 %v12000_v0 }
 0x1c4   : > { %830 = vst.msk [vmem:[#allocation2 + $0x28] sm:$0x3] %vm825_vm1, %v17354_v3  ;;  %826 = vst.msk [vmem:[#allocation2 + $0x8] sm:$0x3] %vm825_vm1, %v17354_v3  ;;  %v890_v20 = vcvt.s32.f32 %v874_v18  ;;  %v891_v21 = vcvt.s32.f32 %v875_v19  ;;  %v915_v22 = vld [vmem:[#allocation2] sm:$0xff]  ;;  %v872_v29 = vld [vmem:[%s17417_s19 + $0x38] sm:$0xff] }
 0x1c5   : > { %828 = vst.msk [vmem:[#allocation2 + $0x18] sm:$0x3] %vm825_vm1, %v17354_v3  ;;  %832 = vst.msk [vmem:[#allocation2 + $0x38] sm:$0x3] %vm825_vm1, %v17354_v3  ;;  %933 = vperm.xlu0 %12427, %v915_v22   ;;  %v888_v31 = vcvt.s32.f32 %v872_v29  ;;  %v876_v32 = vld [vmem:[%s17417_s19 + $0x58] sm:$0xff]  ;;  %v877_v44 = vld [vmem:[%s17417_s19 + $0x60] sm:$0xff] }
 0x1c6   : > { %834 = vst.msk [vmem:[#allocation2 + $0x48] sm:$0x3] %vm825_vm1, %v17354_v3  ;;  %836 = vst.msk [vmem:[#allocation2 + $0x58] sm:$0x3] %vm825_vm1, %v17354_v3  ;;  %v892_v33 = vcvt.s32.f32 %v876_v32  ;;  %v923_v34 = vld [vmem:[#allocation2 + $0xa0] sm:$0xff]  ;;  %v893_v45 = vcvt.s32.f32 %v877_v44  ;;  %v878_v48 = vld [vmem:[%s17417_s19 + $0x68] sm:$0xff] }
 0x1c7   : > { %838 = vst.msk [vmem:[#allocation2 + $0x68] sm:$0x3] %vm825_vm1, %v17354_v3  ;;  %840 = vst.msk [vmem:[#allocation2 + $0x78] sm:$0x3] %vm825_vm1, %v17354_v3  ;;  %v894_v49 = vcvt.s32.f32 %v878_v48  ;;  %v879_v55 = vld [vmem:[%s17417_s19 + $0x70] sm:$0xff]  ;;  %v880_v2 = vld [vmem:[%s17417_s19 + $0x78] sm:$0xff] }
 0x1c8   : > { %842 = vst.msk [vmem:[#allocation2 + $0x88] sm:$0x3] %vm825_vm1, %v17354_v3  ;;  %844 = vst.msk [vmem:[#allocation2 + $0x98] sm:$0x3] %vm825_vm1, %v17354_v3  ;;  %v895_v56 = vcvt.s32.f32 %v879_v55  ;;  %v3114_v7 = vld [vmem:[#allocation15 + $0x80] sm:$0xff]  ;;  %v3115_v8 = vld [vmem:[#allocation15 + $0x88] sm:$0xff] }
 0x1c9   : > { %846 = vst.msk [vmem:[#allocation2 + $0xa8] sm:$0x3] %vm825_vm1, %v17354_v3  ;;  %848 = vst.msk [vmem:[#allocation2 + $0xb8] sm:$0x3] %vm825_vm1, %v17354_v3  ;;  %v3117_v12 = vld [vmem:[#allocation15 + $0x98] sm:$0xff] }
 0x1ca   : > { %850 = vst.msk [vmem:[#allocation2 + $0xc8] sm:$0x3] %vm825_vm1, %v17354_v3  ;;  %852 = vst.msk [vmem:[#allocation2 + $0xd8] sm:$0x3] %vm825_vm1, %v17354_v3 }
 0x1cb   : > { %854 = vst.msk [vmem:[#allocation2 + $0xe8] sm:$0x3] %vm825_vm1, %v17354_v3  ;;  %856 = vst.msk [vmem:[#allocation2 + $0xf8] sm:$0x3] %vm825_vm1, %v17354_v3  ;;  %v1048_v38 = vld [vmem:[#allocation2 + $0x1] sm:$0xff] }
 0x1cc   : > { %858 = vst.msk [vmem:[#allocation2 + $0x108] sm:$0x3] %vm825_vm1, %v17354_v3  ;;  %860 = vst.msk [vmem:[#allocation2 + $0x118] sm:$0x3] %vm825_vm1, %v17354_v3  ;;  %v1181_v39 = vld [vmem:[#allocation2 + $0x2] sm:$0xff] }
 0x1cd   : > { %862 = vst.msk [vmem:[#allocation2 + $0x128] sm:$0x3] %vm825_vm1, %v17354_v3  ;;  %864 = vst.msk [vmem:[#allocation2 + $0x138] sm:$0x3] %vm825_vm1, %v17354_v3 }
 0x1ce   : > { %899 = vst.msk [vmem:[#allocation2 + $0x21] sm:$0xff] %vm823_vm0, %v882_v4  ;;  %898 = vst.msk [vmem:[#allocation2 + $0x11] sm:$0xff] %vm823_vm0, %v881_v5  ;;  %v896_v5 = vcvt.s32.f32 %v880_v2 }
 0x1cf   : > { %900 = vst.msk [vmem:[#allocation2 + $0x31] sm:$0xff] %vm823_vm0, %v883_v9  ;;  %901 = vst.msk [vmem:[#allocation2 + $0x41] sm:$0xff] %vm823_vm0, %v884_v10  ;;  %v12028_v10 = vpack.c.bf16 %v3115_v8, %v3114_v7 }
 0x1d0   : > { %902 = vst.msk [vmem:[#allocation2 + $0x51] sm:$0xff] %vm823_vm0, %v885_v11  ;;  %903 = vst.msk [vmem:[#allocation2 + $0x61] sm:$0xff] %vm823_vm0, %v886_v15  ;;  %v1056_v58 = vld [vmem:[#allocation2 + $0xa1] sm:$0xff] }
 0x1d1   : > { %904 = vst.msk [vmem:[#allocation2 + $0x71] sm:$0xff] %vm823_vm0, %v887_v16  ;;  %906 = vst.msk [vmem:[#allocation2 + $0xb1] sm:$0xff] %vm823_vm0, %v889_v17  ;;  %v1189_v4 = vld [vmem:[#allocation2 + $0xa2] sm:$0xff]  ;;  %12029 = vmatprep.subr.bf16.mxu0 %v12028_v10 }
 0x1d2   : > { %907 = vst.msk [vmem:[#allocation2 + $0xc1] sm:$0xff] %vm823_vm0, %v890_v20  ;;  %908 = vst.msk [vmem:[#allocation2 + $0xd1] sm:$0xff] %vm823_vm0, %v891_v21  ;;  %12031 = vmatpush3.bf16.msra.mxu0 %v12028_v10  ;;  %v3116_v11 = vld [vmem:[#allocation15 + $0x90] sm:$0xff] }
 0x1d3   : > { %905 = vst.msk [vmem:[#allocation2 + $0x81] sm:$0xff] %vm823_vm0, %v888_v31  ;;  %909 = vst.msk [vmem:[#allocation2 + $0xe1] sm:$0xff] %vm823_vm0, %v892_v33  ;;  %v12032_v13 = vpack.c.bf16 %v3117_v12, %v3116_v11  ;;  %v14845_v12 = vld [vmem:[#allocation12 + $0x3] ss:$0 sm:$0xff] }
 0x1d4   : > { %910 = vst.msk [vmem:[#allocation2 + $0xf1] sm:$0xff] %vm823_vm0, %v893_v45  ;;  %911 = vst.msk [vmem:[#allocation2 + $0x101] sm:$0xff] %vm823_vm0, %v894_v49 }
 0x1d5   : > { %v917_v23 = vld [vmem:[#allocation2 + $0x20] sm:$0xff]  ;;  %v916_v24 = vld [vmem:[#allocation2 + $0x10] sm:$0xff]  ;;  %912 = vst.msk [vmem:[#allocation2 + $0x111] sm:$0xff] %vm823_vm0, %v895_v56  ;;  %913 = vst.msk [vmem:[#allocation2 + $0x121] sm:$0xff] %vm823_vm0, %v896_v5  ;;  %12033 = vmatprep.subr.bf16.mxu0 %v12032_v13 }
 0x1d6   : > { %943 = vperm.xlu1 %12428, %v917_v23   ;;  %v14526_v25 = vld [vmem:[#allocation2 + $0x30] sm:$0xff]  ;;  %938 = vperm.xlu0 %12427, %v916_v24   ;;  %v14528_v26 = vld [vmem:[#allocation2 + $0x40] sm:$0xff]  ;;  %2155 = vst.msk [vmem:[#allocation3 + $0x10] sm:$0xff] %vm2151_vm2, %v17354_v3  ;;  %2152 = vst.msk [vmem:[#allocation3] sm:$0xff] %vm2151_vm2, %v17354_v3 }
 0x1d7   : > { %v14531_v27 = vld [vmem:[#allocation2 + $0x50] sm:$0xff]  ;;  %v14534_v28 = vld [vmem:[#allocation2 + $0x60] sm:$0xff]  ;;  %2156 = vst.msk [vmem:[#allocation3 + $0x18] sm:$0x3] %vm2153_vm3, %v17354_v3  ;;  %2154 = vst.msk [vmem:[#allocation3 + $0x8] sm:$0x3] %vm2153_vm3, %v17354_v3  ;;  %12035 = vmatpush3.bf16.msra.mxu0 %v12032_v13 }
 0x1d8   : > { %v14540_v30 = vld [vmem:[#allocation2 + $0x70] sm:$0xff]  ;;  %v1050_v41 = vld [vmem:[#allocation2 + $0x21] sm:$0xff]  ;;  %2157 = vst.msk [vmem:[#allocation3 + $0x20] sm:$0xff] %vm2151_vm2, %v17354_v3  ;;  %2159 = vst.msk [vmem:[#allocation3 + $0x30] sm:$0xff] %vm2151_vm2, %v17354_v3 }
 0x1d9   : > { %v14549_v35 = vld [vmem:[#allocation2 + $0xb0] sm:$0xff]  ;;  %v14551_v36 = vld [vmem:[#allocation2 + $0xc0] sm:$0xff]  ;;  %2158 = vst.msk [vmem:[#allocation3 + $0x28] sm:$0x3] %vm2153_vm3, %v17354_v3  ;;  %2160 = vst.msk [vmem:[#allocation3 + $0x38] sm:$0x3] %vm2153_vm3, %v17354_v3 }
 0x1da   : > { %948 = vperm.xlu1 %12428, %v14526_v25   ;;  %953 = vperm.xlu0 %12427, %v14528_v26   ;;  %v14554_v37 = vld [vmem:[#allocation2 + $0xd0] sm:$0xff]  ;;  %v1183_v43 = vld [vmem:[#allocation2 + $0x22] sm:$0xff]  ;;  %2161 = vst.msk [vmem:[#allocation3 + $0x40] sm:$0xff] %vm2151_vm2, %v17354_v3  ;;  %2163 = vst.msk [vmem:[#allocation3 + $0x50] sm:$0xff] %vm2151_vm2, %v17354_v3 }
 0x1db   : > { %v1049_v40 = vld [vmem:[#allocation2 + $0x11] sm:$0xff]  ;;  %v14565_v47 = vld [vmem:[#allocation2 + $0x41] sm:$0xff]  ;;  %2162 = vst.msk [vmem:[#allocation3 + $0x48] sm:$0x3] %vm2153_vm3, %v17354_v3  ;;  %2164 = vst.msk [vmem:[#allocation3 + $0x58] sm:$0x3] %vm2153_vm3, %v17354_v3 }
 0x1dc   : > { %v1182_v42 = vld [vmem:[#allocation2 + $0x12] sm:$0xff]  ;;  %v14576_v51 = vld [vmem:[#allocation2 + $0x42] sm:$0xff]  ;;  %2165 = vst.msk [vmem:[#allocation3 + $0x60] sm:$0xff] %vm2151_vm2, %v17354_v3  ;;  %2167 = vst.msk [vmem:[#allocation3 + $0x70] sm:$0xff] %vm2151_vm2, %v17354_v3 }
 0x1dd   : > { %v14561_v46 = vld [vmem:[#allocation2 + $0x31] sm:$0xff]  ;;  %v14584_v53 = vld [vmem:[#allocation2 + $0x61] sm:$0xff]  ;;  %2166 = vst.msk [vmem:[#allocation3 + $0x68] sm:$0x3] %vm2153_vm3, %v17354_v3  ;;  %2168 = vst.msk [vmem:[#allocation3 + $0x78] sm:$0x3] %vm2153_vm3, %v17354_v3 }
 0x1de   : > { %958 = vperm.xlu1 %12428, %v14531_v27   ;;  %963 = vperm.xlu0 %12427, %v14534_v28   ;;  %v14573_v50 = vld [vmem:[#allocation2 + $0x32] sm:$0xff]  ;;  %v14597_v57 = vld [vmem:[#allocation2 + $0x62] sm:$0xff]  ;;  %2169 = vst.msk [vmem:[#allocation3 + $0x80] sm:$0xff] %vm2151_vm2, %v17354_v3  ;;  %2171 = vst.msk [vmem:[#allocation3 + $0x90] sm:$0xff] %vm2151_vm2, %v17354_v3 }
 0x1df   : > { %v14580_v52 = vld [vmem:[#allocation2 + $0x51] sm:$0xff]  ;;  %2170 = vst.msk [vmem:[#allocation3 + $0x88] sm:$0x3] %vm2153_vm3, %v17354_v3  ;;  %2172 = vst.msk [vmem:[#allocation3 + $0x98] sm:$0x3] %vm2153_vm3, %v17354_v3  ;;  %v2230_v1 = vld [vmem:[#allocation3 + $0x1] sm:$0xff] }
 0x1e0   : > { %v14589_v54 = vld [vmem:[#allocation2 + $0x52] sm:$0xff]  ;;  %2173 = vst.msk [vmem:[#allocation3 + $0xa0] sm:$0xff] %vm2151_vm2, %v17354_v3  ;;  %2175 = vst.msk [vmem:[#allocation3 + $0xb0] sm:$0xff] %vm2151_vm2, %v17354_v3  ;;  %11662 = vmatprep.mubr.msk.f32.mxu1 %vm2151_vm2, %v2230_v1  ;;  %v14703_v14 = vld [vmem:[#allocation2 + $0xc1] sm:$0xff] }
 0x1e1   : > { %2174 = vst.msk [vmem:[#allocation3 + $0xa8] sm:$0x3] %vm2153_vm3, %v17354_v3  ;;  %2176 = vst.msk [vmem:[#allocation3 + $0xb8] sm:$0x3] %vm2153_vm3, %v17354_v3  ;;  %v14696_v6 = vld [vmem:[#allocation2 + $0x71] sm:$0xff]  ;;  %v14721_v21 = vld [vmem:[#allocation2 + $0xc2] sm:$0xff] }
 0x1e2   : > { %968 = vperm.xlu1 %12428, %v14540_v30   ;;  %973 = vperm.xlu0 %12427, %v923_v34   ;;  %2177 = vst.msk [vmem:[#allocation3 + $0xc0] sm:$0xff] %vm2151_vm2, %v17354_v3  ;;  %2179 = vst.msk [vmem:[#allocation3 + $0xd0] sm:$0xff] %vm2151_vm2, %v17354_v3  ;;  %v1057_v9 = vld [vmem:[#allocation2 + $0xb1] sm:$0xff]  ;;  %v14747_v31 = vld [vmem:[#allocation2 + $0xe0] sm:$0xff] }
 0x1e3   : > { %2178 = vst.msk [vmem:[#allocation3 + $0xc8] sm:$0x3] %vm2153_vm3, %v17354_v3  ;;  %2180 = vst.msk [vmem:[#allocation3 + $0xd8] sm:$0x3] %vm2153_vm3, %v17354_v3  ;;  %v14707_v15 = vld [vmem:[#allocation2 + $0x72] sm:$0xff]  ;;  %v14752_v33 = vld [vmem:[#allocation2 + $0xe1] sm:$0xff] }
 0x1e4   : > { %2181 = vst.msk [vmem:[#allocation3 + $0xe0] sm:$0xff] %vm2151_vm2, %v17354_v3  ;;  %2183 = vst.msk [vmem:[#allocation3 + $0xf0] sm:$0xff] %vm2151_vm2, %v17354_v3  ;;  %v1190_v17 = vld [vmem:[#allocation2 + $0xb2] sm:$0xff]  ;;  %v14774_v45 = vld [vmem:[#allocation2 + $0xe2] sm:$0xff] }
 0x1e5   : > { %2182 = vst.msk [vmem:[#allocation3 + $0xe8] sm:$0x3] %vm2153_vm3, %v17354_v3  ;;  %2184 = vst.msk [vmem:[#allocation3 + $0xf8] sm:$0x3] %vm2153_vm3, %v17354_v3  ;;  %v14783_v49 = vld [vmem:[#allocation2 + $0x82] sm:$0xff]  ;;  %v14819_v63 = vld [vmem:[#allocation2 + $0xf2] sm:$0xff] }
 0x1e6   : > { %978 = vperm.xlu1 %12428, %v14549_v35   ;;  %983 = vperm.xlu0 %12427, %v14551_v36   ;;  %2185 = vst.msk [vmem:[#allocation3 + $0x100] sm:$0xff] %vm2151_vm2, %v17354_v3  ;;  %2187 = vst.msk [vmem:[#allocation3 + $0x110] sm:$0xff] %vm2151_vm2, %v17354_v3  ;;  %v14802_v56 = vld [vmem:[#allocation2 + $0x100] sm:$0xff]  ;;  %v14825_v1 = vld [vmem:[#allocation12 + $0x1] ss:$0 sm:$0xff] }
 0x1e7   : > { %2186 = vst.msk [vmem:[#allocation3 + $0x108] sm:$0x3] %vm2153_vm3, %v17354_v3  ;;  %2188 = vst.msk [vmem:[#allocation3 + $0x118] sm:$0x3] %vm2153_vm3, %v17354_v3  ;;  %v14834_v7 = vld [vmem:[#allocation2 + $0x102] sm:$0xff] }
 0x1e8   : > { %2189 = vst.msk [vmem:[#allocation3 + $0x120] sm:$0xff] %vm2151_vm2, %v17354_v3  ;;  %2191 = vst.msk [vmem:[#allocation3 + $0x130] sm:$0xff] %vm2151_vm2, %v17354_v3 }
 0x1e9   : > { %2190 = vst.msk [vmem:[#allocation3 + $0x128] sm:$0x3] %vm2153_vm3, %v17354_v3  ;;  %2192 = vst.msk [vmem:[#allocation3 + $0x138] sm:$0x3] %vm2153_vm3, %v17354_v3 }
 0x1ea   : > { %988 = vperm.xlu1 %12428, %v14554_v37   ;;  %1066 = vperm.xlu0 %12427, %v1048_v38   ;;  %vm15696_vm8 = vmand %vm4288_vm6, %vm4289_vm7 }
 0x1eb   : > { %vm16157_vm10 = vmand %vm4317_vm9, %vm4289_vm7 }
 0x1ec   : > { %vm16181_vm12 = vmand %vm4288_vm6, %vm4992_vm11 }
 0x1ed   : > { %vm16336_vm13 = vmand %vm4317_vm9, %vm4992_vm11 }
 0x1ee   : > { %1199 = vperm.xlu1 %12428, %v1181_v39   ;;  %1071 = vperm.xlu0 %12427, %v1049_v40   ;;  %v14761_v39 = vld [vmem:[#allocation2 + $0x81] sm:$0xff] }
 0x1f2   : > { %1076 = vperm.xlu1 %12428, %v1050_v41   ;;  %1332 = vperm.xlu0 %12427, %v916_v24   ;;  %v14729_v24 = vld [vmem:[#allocation2 + $0x80] sm:$0xff] }
 0x1f6   : > { %1204 = vperm.xlu1 %12428, %v1182_v42   ;;  %1209 = vperm.xlu0 %12427, %v1183_v43  }
 0x1fa   : > { %1465 = vperm.xlu1 %12428, %v1049_v40   ;;  %1081 = vperm.xlu0 %12427, %v14561_v46  }
 0x1fe   : > { %1337 = vperm.xlu1 %12428, %v917_v23   ;;  %1086 = vperm.xlu0 %12427, %v14565_v47  }
 0x202   : > { %1342 = vperm.xlu1 %12428, %v14526_v25   ;;  %1598 = vperm.xlu0 %12427, %v1182_v42  }
 0x206   : > { %1214 = vperm.xlu1 %12428, %v14573_v50   ;;  %1470 = vperm.xlu0 %12427, %v1050_v41  }
 0x20a   : > { %1219 = vperm.xlu1 %12428, %v14576_v51   ;;  %1475 = vperm.xlu0 %12427, %v14561_v46  }
 0x20e   : > { %1732 = vperm.xlu1 %12428, %v917_v23   ;;  %1091 = vperm.xlu0 %12427, %v14580_v52  }
 0x212   : > { %1347 = vperm.xlu1 %12428, %v14528_v26   ;;  %1603 = vperm.xlu0 %12427, %v1183_v43  }
 0x216   : > { %1096 = vperm.xlu1 %12428, %v14584_v53   ;;  %1352 = vperm.xlu0 %12427, %v14531_v27  }
 0x21a   : > { %1608 = vperm.xlu1 %12428, %v14573_v50   ;;  %1865 = vperm.xlu0 %12427, %v1050_v41   ;;  %v14765_v41 = vld [vmem:[#allocation2 + $0xd2] sm:$0xff] }
 0x21e   : > { %1224 = vperm.xlu1 %12428, %v14589_v54   ;;  %1480 = vperm.xlu0 %12427, %v14565_v47  }
 0x222   : > { %1737 = vperm.xlu1 %12428, %v14526_v25   ;;  %1229 = vperm.xlu0 %12427, %v14597_v57  }
 0x226   : > { %1485 = vperm.xlu1 %12428, %v14580_v52   ;;  %1742 = vperm.xlu0 %12427, %v14528_v26  }
 0x22a   : > { %1998 = vperm.xlu1 %12428, %v1183_v43   ;;  %1357 = vperm.xlu0 %12427, %v14534_v28  }
 0x22e   : > { %1613 = vperm.xlu1 %12428, %v14576_v51   ;;  %1870 = vperm.xlu0 %12427, %v14561_v46  }
 0x232   : > { %1106 = vperm.xlu1 %12428, %v1056_v58   ;;  %1362 = vperm.xlu0 %12427, %v14540_v30   ;;  %v14807_v58 = vld [vmem:[#allocation2 + $0x101] sm:$0xff] }
 0x236   : > { %1618 = vperm.xlu1 %12428, %v14589_v54   ;;  %1875 = vperm.xlu0 %12427, %v14565_v47  }
 0x23a   : > { %1490 = vperm.xlu1 %12428, %v14584_v53   ;;  %1747 = vperm.xlu0 %12427, %v14531_v27   ;;  %v14736_v27 = vld [vmem:[#allocation2 + $0xd1] sm:$0xff] }
 0x23e   : > { %2003 = vperm.xlu1 %12428, %v14573_v50   ;;  %1239 = vperm.xlu0 %12427, %v1189_v4   ;;  %v14830_v4 = vld [vmem:[#allocation12] ss:$0 sm:$0xff] }
 0x242   : > { %1495 = vperm.xlu1 %12428, %v14696_v6   ;;  %1752 = vperm.xlu0 %12427, %v14534_v28  }
 0x244   : > { %v14711_v16 = vpop.permute.xlu0 %933 }
 0x245   : > { %v1015_v11 = vmul.f32 %v14830_v4, %v14711_v16  ;;  %v14856_v16 = vld [vmem:[#allocation12 + $0x5] ss:$0 sm:$0xff] }
 0x246   : > { %2008 = vperm.xlu1 %12428, %v14576_v51   ;;  %1111 = vperm.xlu0 %12427, %v1057_v9   ;;  %v14788_v51 = vld [vmem:[#allocation2 + $0xf0] sm:$0xff] }
 0x24a   : > { %1623 = vperm.xlu1 %12428, %v14597_v57   ;;  %1880 = vperm.xlu0 %12427, %v14580_v52  }
 0x24e   : > { %1116 = vperm.xlu1 %12428, %v14703_v14   ;;  %1372 = vperm.xlu0 %12427, %v14549_v35  }
 0x252   : > { %1628 = vperm.xlu1 %12428, %v14707_v15   ;;  %1885 = vperm.xlu0 %12427, %v14584_v53   ;;  %v14793_v53 = vld [vmem:[#allocation2 + $0xf1] sm:$0xff] }
 0x255   : > { %v14714_v18 = vpop.permute.xlu1 %943  ;;  %v14716_v19 = vpop.permute.xlu0 %938 }
 0x256   : > { %1244 = vperm.xlu1 %12428, %v1190_v17   ;;  %1757 = vperm.xlu0 %12427, %v14540_v30  }
 0x259   : > { %v14719_v20 = vpop.permute.xlu1 %948  ;;  %v14724_v22 = vpop.permute.xlu0 %953 }
 0x25a   : > { %2013 = vperm.xlu1 %12428, %v14589_v54   ;;  %1249 = vperm.xlu0 %12427, %v14721_v21  }
 0x25d   : > { %v14727_v23 = vpop.permute.xlu1 %958  ;;  %v14731_v25 = vpop.permute.xlu0 %963 }
 0x25e   : > { %1505 = vperm.xlu1 %12428, %v1057_v9   ;;  %17418 = vst [vmem:[#allocation48_spill] sm:$0xff] %v14731_v25  ;;  %1762 = vperm.xlu0 %12427, %v14729_v24   ;;  %v14838_v9 = vld [vmem:[#allocation12 + $0x2] ss:$0 sm:$0xff] }
 0x261   : > { %v14734_v26 = vpop.permute.xlu1 %968  ;;  %v14739_v28 = vpop.permute.xlu0 %973 }
 0x262   : > { %17419 = vst [vmem:[#allocation49_spill] sm:$0xff] %v14734_v26  ;;  %2018 = vperm.xlu1 %12428, %v14597_v57   ;;  %17420 = vst [vmem:[#allocation50_spill] sm:$0xff] %v14739_v28  ;;  %1121 = vperm.xlu0 %12427, %v14736_v27  }
 0x265   : > { %v14742_v29 = vpop.permute.xlu1 %978  ;;  %v14745_v30 = vpop.permute.xlu0 %983 }
 0x266   : > { %17421 = vst [vmem:[#allocation51_spill] sm:$0xff] %v14742_v29  ;;  %1377 = vperm.xlu1 %12428, %v14551_v36   ;;  %17422 = vst [vmem:[#allocation52_spill] sm:$0xff] %v14745_v30  ;;  %1890 = vperm.xlu0 %12427, %v14696_v6  }
 0x269   : > { %v14750_v32 = vpop.permute.xlu1 %988  ;;  %v1067_v34 = vpop.permute.xlu0 %1066 }
 0x26a   : > { %17423 = vst [vmem:[#allocation53_spill] sm:$0xff] %v14750_v32  ;;  %993 = vperm.xlu1 %12428, %v14747_v31   ;;  %1126 = vperm.xlu0 %12427, %v14752_v33   ;;  %v1148_v8 = vmul.f32 %v14825_v1, %v1067_v34  ;;  %v14850_v34 = vld [vmem:[#allocation12 + $0x4] ss:$0 sm:$0xff] }
 0x26d   : > { %v14756_v35 = vpop.permute.xlu1 %1199  ;;  %v14759_v38 = vpop.permute.xlu0 %1071 }
 0x26e   : > { %1382 = vperm.xlu1 %12428, %v14554_v37   ;;  %1638 = vperm.xlu0 %12427, %v1190_v17   ;;  %v1281_v17 = vmul.f32 %v14838_v9, %v14756_v35  ;;  %v14862_v35 = vld [vmem:[#allocation12 + $0x6] ss:$0 sm:$0xff] }
 0x271   : > { %v14763_v40 = vpop.permute.xlu1 %1076  ;;  %v1333_v42 = vpop.permute.xlu0 %1332 }
 0x272   : > { %1895 = vperm.xlu1 %12428, %v14761_v39   ;;  %1254 = vperm.xlu0 %12427, %v14765_v41   ;;  %v1414_v3 = vmul.f32 %v14845_v12, %v1333_v42  ;;  %v14866_v42 = vld [vmem:[#allocation12 + $0x7] ss:$0 sm:$0xff] }
 0x275   : > { %v14769_v43 = vpop.permute.xlu1 %1204  ;;  %v14772_v44 = vpop.permute.xlu0 %1209 }
 0x276   : > { %1510 = vperm.xlu1 %12428, %v14703_v14   ;;  %2023 = vperm.xlu0 %12427, %v14707_v15  }
 0x279   : > { %v1466_v46 = vpop.permute.xlu1 %1465  ;;  %v14778_v47 = vpop.permute.xlu0 %1081 }
 0x27a   : > { %1259 = vperm.xlu1 %12428, %v14774_v45   ;;  %1515 = vperm.xlu0 %12427, %v14736_v27  }
 0x27d   : > { %v14781_v48 = vpop.permute.xlu1 %1337  ;;  %v14786_v50 = vpop.permute.xlu0 %1086 }
 0x27e   : > { %1772 = vperm.xlu1 %12428, %v14551_v36   ;;  %2028 = vperm.xlu0 %12427, %v14783_v49  }
 0x281   : > { %v14791_v52 = vpop.permute.xlu1 %1342  ;;  %v1599_v54 = vpop.permute.xlu0 %1598 }
 0x282   : > { %998 = vperm.xlu1 %12428, %v14788_v51   ;;  %1131 = vperm.xlu0 %12427, %v14793_v53   ;;  %v1680_v29 = vmul.f32 %v14856_v16, %v1599_v54  ;;  %v14880_v54 = vld [vmem:[#allocation12 + $0x8] ss:$0 sm:$0xff] }
 0x285   : > { %v14797_v55 = vpop.permute.xlu1 %1214  ;;  %v14800_v36 = vpop.permute.xlu0 %1470 }
 0x286   : > { %1387 = vperm.xlu1 %12428, %v14747_v31   ;;  %1643 = vperm.xlu0 %12427, %v14721_v21  }
 0x289   : > { %v14805_v57 = vpop.permute.xlu1 %1219  ;;  %v14810_v59 = vpop.permute.xlu0 %1475 }
 0x28a   : > { %1003 = vperm.xlu1 %12428, %v14802_v56   ;;  %1136 = vperm.xlu0 %12427, %v14807_v58  }
 0x28d   : > { %v1733_v60 = vpop.permute.xlu1 %1732  ;;  %v14814_v61 = vpop.permute.xlu0 %1091 }
 0x28e   : > { %1392 = vperm.xlu1 %12428, %v14788_v51   ;;  %1648 = vperm.xlu0 %12427, %v14765_v41   ;;  %v1814_v25 = vmul.f32 %v14862_v35, %v1733_v60 }
 0x291   : > { %v14817_v62 = vpop.permute.xlu1 %1347  ;;  %v14822_v0 = vpop.permute.xlu0 %1603 }
 0x292   : > { %1905 = vperm.xlu1 %12428, %v14703_v14   ;;  %1264 = vperm.xlu0 %12427, %v14819_v63   ;;  %v1164_v14 = vadd.f32 %v1148_v8, %v1015_v11  ;;  %v1547_v8 = vmul.f32 %v14850_v34, %v1466_v46 }
 0x294   : > { %v1297_v32 = vadd.f32 %v1281_v17, %v1164_v14 }
 0x295   : > { %v14827_v2 = vpop.permute.xlu1 %1096  ;;  %v14832_v5 = vpop.permute.xlu0 %1352 }
 0x296   : > { %1520 = vperm.xlu1 %12428, %v14752_v33   ;;  %1777 = vperm.xlu0 %12427, %v14554_v37   ;;  %v1430_v30 = vadd.f32 %v1414_v3, %v1297_v32 }
 0x298   : > { %v1563_v28 = vadd.f32 %v1547_v8, %v1430_v30 }
 0x299   : > { %v14840_v10 = vpop.permute.xlu1 %1608  ;;  %v1866_v13 = vpop.permute.xlu0 %1865 }
 0x29a   : > { %1269 = vperm.xlu1 %12428, %v14834_v7   ;;  %1525 = vperm.xlu0 %12427, %v14793_v53   ;;  %v1696_v14 = vadd.f32 %v1680_v29, %v1563_v28  ;;  %v1947_v3 = vmul.f32 %v14866_v42, %v1866_v13 }
 0x29c   : > { %v1830_v17 = vadd.f32 %v1814_v25, %v1696_v14  ;;  %v1149_v25 = vmul.f32 %v14825_v1, %v14759_v38  ;;  %v1415_v38 = vmul.f32 %v14845_v12, %v14781_v48  ;;  %v1681_v48 = vmul.f32 %v14856_v16, %v14822_v0 }
 0x29d   : > { %v14852_v37 = vpop.permute.xlu1 %1224  ;;  %v14858_v26 = vpop.permute.xlu0 %1480  ;;  %v1416_v0 = vmul.f32 %v14845_v12, %v14791_v52 }
 0x29e   : > { %1782 = vperm.xlu1 %12428, %v14747_v31   ;;  %2038 = vperm.xlu0 %12427, %v14721_v21   ;;  %v14874_v21 = vld [vmem:[#allocation2 + $0x110] sm:$0xff]  ;;  %v1963_v60 = vadd.f32 %v1947_v3, %v1830_v17  ;;  %v1016_v3 = vmul.f32 %v14830_v4, %v14716_v19  ;;  %v1282_v17 = vmul.f32 %v14838_v9, %v14769_v43 }
 0x29f   : > { %v1548_v43 = vmul.f32 %v14850_v34, %v14800_v36  ;;  %v1283_v36 = vmul.f32 %v14838_v9, %v14772_v44  ;;  %v14937_v44 = vld [vmem:[#allocation2 + $0x112] sm:$0xff] }
 0x2a1   : > { %v1738_v11 = vpop.permute.xlu1 %1737  ;;  %v14868_v31 = vpop.permute.xlu0 %1229 }
 0x2a2   : > { %1397 = vperm.xlu1 %12428, %v14802_v56   ;;  %17424 = vst [vmem:[#allocation54_spill] sm:$0xff] %v14868_v31  ;;  %1653 = vperm.xlu0 %12427, %v14774_v45   ;;  %v14885_v31 = vld [vmem:[#allocation14] ss:$0 sm:$0xff] }
 0x2a5   : > { %v14872_v46 = vpop.permute.xlu1 %1485  ;;  %v14878_v32 = vpop.permute.xlu0 %1742 }
 0x2a6   : > { %1910 = vperm.xlu1 %12428, %v14736_v27   ;;  %1402 = vperm.xlu0 %12427, %v14874_v21  }
 0x2a9   : > { %v1999_v30 = vpop.permute.xlu1 %1998  ;;  %v14887_v28 = vpop.permute.xlu0 %1357 }
 0x2aa   : > { %v2080_v8 = vmul.f32 %v14880_v54, %v1999_v30  ;;  %1658 = vperm.xlu1 %12428, %v14819_v63   ;;  %1915 = vperm.xlu0 %12427, %v14752_v33  }
 0x2ac   : > { %v2096_v29 = vadd.f32 %v2080_v8, %v1963_v60  ;;  %v14903_v60 = vld [vmem:[#allocation2 + $0x111] sm:$0xff]  ;;  %v1165_v8 = vadd.f32 %v1149_v25, %v1016_v3 }
 0x2ad   : > { %v14890_v27 = vpop.permute.xlu1 %1613  ;;  %v1871_v14 = vpop.permute.xlu0 %1870 }
 0x2ae   : > { %v2119_v13 = vadd.f32 %v14885_v31, %v2096_v29  ;;  %1530 = vperm.xlu1 %12428, %v14807_v58   ;;  %1787 = vperm.xlu0 %12427, %v14788_v51   ;;  %v1298_v19 = vadd.f32 %v1282_v17, %v1165_v8  ;;  %v1150_v51 = vmul.f32 %v14825_v1, %v14763_v40 }
 0x2b0   : > { %v2135_v30 = vmax.f32 %v2119_v13, 0.0  ;;  %v1431_v25 = vadd.f32 %v1415_v38, %v1298_v19  ;;  %v1948_v19 = vmul.f32 %v14866_v42, %v1871_v14  ;;  %v1682_v14 = vmul.f32 %v14856_v16, %v14840_v10 }
 0x2b1   : > { %v14901_v33 = vpop.permute.xlu1 %1106  ;;  %v14909_v29 = vpop.permute.xlu0 %1362 }
 0x2b2   : > { %2194 = vst.msk [vmem:[#allocation3 + $0x11] sm:$0xff] %vm2151_vm2, %v2135_v30  ;;  %2043 = vperm.xlu1 %12428, %v14765_v41   ;;  %1535 = vperm.xlu0 %12427, %v14903_v60   ;;  %v1017_v41 = vmul.f32 %v14830_v4, %v14714_v18  ;;  %v1564_v17 = vadd.f32 %v1548_v43, %v1431_v25 }
 0x2b3   : > { %v1815_v30 = vmul.f32 %v14862_v35, %v1738_v11  ;;  %v1549_v11 = vmul.f32 %v14850_v34, %v14810_v59 }
 0x2b4   : > { %v1166_v40 = vadd.f32 %v1150_v51, %v1017_v41 }
 0x2b5   : > { %v14916_v13 = vpop.permute.xlu1 %1618  ;;  %v1876_v3 = vpop.permute.xlu0 %1875 }
 0x2b6   : > { %1792 = vperm.xlu1 %12428, %v14802_v56   ;;  %2048 = vperm.xlu0 %12427, %v14774_v45   ;;  %v1697_v56 = vadd.f32 %v1681_v48, %v1564_v17  ;;  %v1299_v45 = vadd.f32 %v1283_v36, %v1166_v40  ;;  %v1816_v36 = vmul.f32 %v14862_v35, %v14878_v32 }
 0x2b7   : > { %v1949_v40 = vmul.f32 %v14866_v42, %v1876_v3 }
 0x2b8   : > { %v1831_v43 = vadd.f32 %v1815_v30, %v1697_v56  ;;  %v1432_v51 = vadd.f32 %v1416_v0, %v1299_v45  ;;  %v14958_v0 = vld [vmem:[#allocation2 + $0x120] sm:$0xff] }
 0x2b9   : > { %v14927_v8 = vpop.permute.xlu1 %1490  ;;  %v2231_v38 = vld [vmem:[#allocation3 + $0x11] sm:$0xff]  ;;  %v14935_v18 = vpop.permute.xlu0 %1747 }
 0x2ba   : > { %1663 = vperm.xlu1 %12428, %v14834_v7   ;;  %11663 = vmatmul.mubr.msk.f32.vlgmr.msra.gmra.mrb[0].mxu1 %vm2151_vm2, %v2231_v38  ;;  %v1964_v25 = vadd.f32 %v1948_v19, %v1831_v43  ;;  %v1565_v17 = vadd.f32 %v1549_v11, %v1432_v51 }
 0x2bb   : > { %11790 = vmatprep.mubr.msk.f32.mxu0 %vm2151_vm2, %v2231_v38  ;;  %1920 = vperm.xlu0 %12427, %v14793_v53  }
 0x2bc   : > { %v1698_v30 = vadd.f32 %v1682_v14, %v1565_v17 }
 0x2bd   : > { %v2004_v52 = vpop.permute.xlu1 %2003  ;;  %v14946_v41 = vpop.permute.xlu0 %1239 }
 0x2be   : > { %v2081_v48 = vmul.f32 %v14880_v54, %v2004_v52  ;;  %1668 = vperm.xlu1 %12428, %v14937_v44   ;;  %v1832_v56 = vadd.f32 %v1816_v36, %v1698_v30  ;;  %v14969_v52 = vld [vmem:[#allocation2 + $0x121] sm:$0xff]  ;;  %v1417_v30 = vmul.f32 %v14845_v12, %v14817_v62 }
 0x2bf   : > { %1925 = vperm.xlu0 %12427, %v14807_v58  }
 0x2c0   : > { %v2097_v59 = vadd.f32 %v2081_v48, %v1964_v25  ;;  %v1965_v45 = vadd.f32 %v1949_v40, %v1832_v56  ;;  %v1018_v25 = vmul.f32 %v14830_v4, %v14719_v20  ;;  %v1284_v48 = vmul.f32 %v14838_v9, %v14797_v55 }
 0x2c1   : > { %v14951_v53 = vpop.permute.xlu1 %1495  ;;  %v14956_v38 = vpop.permute.xlu0 %1752  ;;  %v1550_v40 = vmul.f32 %v14850_v34, %v14858_v26  ;;  %v1285_v26 = vmul.f32 %v14838_v9, %v14805_v57 }
 0x2c2   : > { %v2120_v10 = vadd.f32 %v14885_v31, %v2097_v59  ;;  %1797 = vperm.xlu1 %12428, %v14874_v21   ;;  %v14982_v59 = vld [vmem:[#allocation2 + $0x122] sm:$0xff] }
 0x2c3   : > { %2053 = vperm.xlu0 %12427, %v14819_v63   ;;  %v1151_v63 = vmul.f32 %v14825_v1, %v14778_v47 }
 0x2c4   : > { %v2136_v19 = vmax.f32 %v2120_v10, 0.0  ;;  %v1152_v10 = vmul.f32 %v14825_v1, %v14786_v50 }
 0x2c5   : > { %v2009_v32 = vpop.permute.xlu1 %2008  ;;  %v14964_v3 = vpop.permute.xlu0 %1111  ;;  %v1167_v47 = vadd.f32 %v1151_v63, %v1018_v25 }
 0x2c6   : > { %2195 = vst.msk [vmem:[#allocation3 + $0x21] sm:$0xff] %vm2151_vm2, %v2136_v19  ;;  %v2082_v58 = vmul.f32 %v14880_v54, %v2009_v32  ;;  %1802 = vperm.xlu1 %12428, %v14958_v0   ;;  %v1683_v19 = vmul.f32 %v14856_v16, %v14890_v27  ;;  %v1019_v32 = vmul.f32 %v14830_v4, %v14724_v22 }
 0x2c7   : > { %2058 = vperm.xlu0 %12427, %v14834_v7   ;;  %v1300_v55 = vadd.f32 %v1284_v48, %v1167_v47  ;;  %v2226_v47 = vld [vmem:[#allocation15] sm:$0xff] }
 0x2c8   : > { %v2098_v11 = vadd.f32 %v2082_v58, %v1965_v45  ;;  %v1168_v50 = vadd.f32 %v1152_v10, %v1019_v32 }
 0x2c9   : > { %v14967_v43 = vpop.permute.xlu1 %1623  ;;  %v1881_v14 = vpop.permute.xlu0 %1880  ;;  %v1433_v56 = vadd.f32 %v1417_v30, %v1300_v55  ;;  %v2227_v30 = vld [vmem:[#allocation15 + $0x8] sm:$0xff] }
 0x2ca   : > { %v2121_v51 = vadd.f32 %v14885_v31, %v2098_v11  ;;  %1930 = vperm.xlu1 %12428, %v14903_v60   ;;  %v1817_v11 = vmul.f32 %v14862_v35, %v14935_v18  ;;  %v1950_v22 = vmul.f32 %v14866_v42, %v1881_v14  ;;  %v1301_v18 = vadd.f32 %v1285_v26, %v1168_v50 }
 0x2cb   : > { %1935 = vperm.xlu0 %12427, %v14969_v52   ;;  %v1566_v58 = vadd.f32 %v1550_v40, %v1433_v56  ;;  %v1684_v14 = vmul.f32 %v14856_v16, %v14916_v13  ;;  %v1854_v40 = vld [vmem:[#allocation2 + $0x91] sm:$0xff] }
 0x2cc   : > { %v2137_v17 = vmax.f32 %v2121_v51, 0.0  ;;  %v1987_v13 = vld [vmem:[#allocation2 + $0x92] sm:$0xff] }
 0x2cd   : > { %v14980_v7 = vpop.permute.xlu1 %1116  ;;  %v2232_v36 = vld [vmem:[#allocation3 + $0x21] sm:$0xff]  ;;  %v14990_v20 = vpop.permute.xlu0 %1372  ;;  %v1699_v27 = vadd.f32 %v1683_v19, %v1566_v58 }
 0x2ce   : > { %2196 = vst.msk [vmem:[#allocation3 + $0x31] sm:$0xff] %vm2151_vm2, %v2137_v17  ;;  %2063 = vperm.xlu1 %12428, %v14937_v44   ;;  %11665 = vmatprep.mubr.msk.f32.mxu1 %vm2151_vm2, %v2232_v36  ;;  %v2228_v58 = vld [vmem:[#allocation15 + $0x10] sm:$0xff] }
 0x2cf   : > { %11791 = vmatmul.mubr.msk.f32.vlgmr.msra.gmra.mrb[0].mxu0 %vm2151_vm2, %v2232_v36  ;;  %2068 = vperm.xlu0 %12427, %v14982_v59   ;;  %v1833_v25 = vadd.f32 %v1817_v11, %v1699_v27  ;;  %v2229_v11 = vld [vmem:[#allocation15 + $0x18] sm:$0xff] }
 0x2d1   : > { %v14997_v62 = vpop.permute.xlu1 %1628  ;;  %v1886_v45 = vpop.permute.xlu0 %1885 }
 0x2d2   : > { %1101 = vperm.xlu1 %12428, %v14696_v6   ;;  %v1418_v6 = vmul.f32 %v14845_v12, %v14832_v5  ;;  %v1721_v5 = vld [vmem:[#allocation2 + $0x90] sm:$0xff]  ;;  %v1951_v26 = vmul.f32 %v14866_v42, %v1886_v45 }
 0x2d3   : > { %1234 = vperm.xlu0 %12427, %v14707_v15   ;;  %v1551_v15 = vmul.f32 %v14850_v34, %v14872_v46  ;;  %v12004_v46 = vpack.c.bf16 %v2227_v30, %v2226_v47 }
 0x2d4   : > { %v1434_v17 = vadd.f32 %v1418_v6, %v1301_v18 }
 0x2d5   : > { %v15009_v63 = vpop.permute.xlu1 %1244  ;;  %v2233_v51 = vld [vmem:[#allocation3 + $0x31] sm:$0xff]  ;;  %v15017_v57 = vpop.permute.xlu0 %1757  ;;  %12005 = vmatprep.subr.bf16.mxu1 %v12004_v46 }
 0x2d6   : > { %1367 = vperm.xlu1 %12428, %v14729_v24   ;;  %11666 = vmatmul.mubr.msk.f32.gmra.mrb[2].mxu1 %vm2151_vm2, %v2233_v51  ;;  %v1966_v24 = vadd.f32 %v1950_v22, %v1833_v25  ;;  %v1567_v10 = vadd.f32 %v1551_v15, %v1434_v17  ;;  %v1153_v17 = vmul.f32 %v14825_v1, %v14814_v61 }
 0x2d7   : > { %11793 = vmatprep.mubr.msk.f32.mxu0 %vm2151_vm2, %v2233_v51  ;;  %1500 = vperm.xlu0 %12427, %v14761_v39   ;;  %v1818_v39 = vmul.f32 %v14862_v35, %v14956_v38  ;;  %v12008_v51 = vpack.c.bf16 %v2229_v11, %v2228_v58  ;;  %v17426_v11 = vld [vmem:[#allocation54_spill] sm:$0xff] }
 0x2d8   : > { %v1700_v32 = vadd.f32 %v1684_v14, %v1567_v10  ;;  %12007 = vmatpush3.bf16.msra.mxu1 %v12004_v46  ;;  %v1419_v46 = vmul.f32 %v14845_v12, %v14887_v28  ;;  %v1685_v28 = vmul.f32 %v14856_v16, %v14967_v43 }
 0x2d9   : > { %v2014_v48 = vpop.permute.xlu1 %2013  ;;  %v15026_v55 = vpop.permute.xlu0 %1249  ;;  %12009 = vmatprep.subr.bf16.mxu1 %v12008_v51 }
 0x2da   : > { %v2083_v36 = vmul.f32 %v14880_v54, %v2014_v48  ;;  %1633 = vperm.xlu1 %12428, %v14783_v49   ;;  %v1834_v6 = vadd.f32 %v1818_v39, %v1700_v32 }
 0x2db   : > { %1767 = vperm.xlu0 %12427, %v1721_v5  }
 0x2dc   : > { %v2099_v56 = vadd.f32 %v2083_v36, %v1966_v24  ;;  %v1967_v22 = vadd.f32 %v1951_v26, %v1834_v6  ;;  %12011 = vmatpush3.bf16.msra.mxu1 %v12008_v51  ;;  %v3345_v24 = vld [vmem:[#allocation15 + $0xa8] sm:$0xff]  ;;  %v1819_v6 = vmul.f32 %v14862_v35, %v15017_v57  ;;  %v1553_v57 = vmul.f32 %v14850_v34, %v14951_v53 }
 0x2dd   : > { %v15030_v19 = vpop.permute.xlu1 %1505  ;;  %v15034_v50 = vpop.permute.xlu0 %1762 }
 0x2de   : > { %v2122_v49 = vadd.f32 %v14885_v31, %v2099_v56  ;;  %1900 = vperm.xlu1 %12428, %v1854_v40   ;;  %v1286_v40 = vmul.f32 %v14838_v9, %v14852_v37  ;;  %v1862_v37 = vld [vmem:[#allocation2 + $0x131] sm:$0xff] }
 0x2df   : > { %2033 = vperm.xlu0 %12427, %v1987_v13   ;;  %v1995_v56 = vld [vmem:[#allocation2 + $0x132] sm:$0xff]  ;;  %v1154_v13 = vmul.f32 %v14825_v1, %v14827_v2 }
 0x2e0   : > { %v2138_v38 = vmax.f32 %v2122_v49, 0.0 }
 0x2e1   : > { %v2019_v27 = vpop.permute.xlu1 %2018  ;;  %v15039_v45 = vpop.permute.xlu0 %1121 }
 0x2e2   : > { %2197 = vst.msk [vmem:[#allocation3 + $0x41] sm:$0xff] %vm2151_vm2, %v2138_v38  ;;  %v2084_v18 = vmul.f32 %v14880_v54, %v2019_v27  ;;  %1008 = vperm.xlu1 %12428, %v14874_v21   ;;  %v3344_v21 = vld [vmem:[#allocation15 + $0xa0] sm:$0xff]  ;;  %v1420_v38 = vmul.f32 %v14845_v12, %v14909_v29 }
 0x2e3   : > { %1141 = vperm.xlu0 %12427, %v14903_v60   ;;  %v12036_v30 = vpack.c.bf16 %v3345_v24, %v3344_v21  ;;  %v1020_v60 = vmul.f32 %v14830_v4, %v14727_v23  ;;  %v1686_v21 = vmul.f32 %v14856_v16, %v14997_v62 }
 0x2e4   : > { %v2100_v15 = vadd.f32 %v2084_v18, %v1967_v22 }
 0x2e5   : > { %v15042_v25 = vpop.permute.xlu1 %1377  ;;  %v1891_v5 = vpop.permute.xlu0 %1890  ;;  %12037 = vmatprep.subr.bf16.mxu0 %v12036_v30 }
 0x2e6   : > { %v2123_v48 = vadd.f32 %v14885_v31, %v2100_v15  ;;  %1274 = vperm.xlu1 %12428, %v14937_v44   ;;  %v1729_v44 = vld [vmem:[#allocation2 + $0x130] sm:$0xff]  ;;  %12039 = vmatpush3.bf16.msra.mxu0 %v12036_v30  ;;  %v1952_v22 = vmul.f32 %v14866_v42, %v1891_v5  ;;  %v1820_v5 = vmul.f32 %v14862_v35, %v15034_v50 }
 0x2e7   : > { %1407 = vperm.xlu0 %12427, %v14958_v0   ;;  %v1169_v0 = vadd.f32 %v1153_v17, %v1020_v60 }
 0x2e8   : > { %v2139_v14 = vmax.f32 %v2123_v48, 0.0 }
 0x2e9   : > { %v15049_v36 = vpop.permute.xlu1 %993  ;;  %v2234_v47 = vld [vmem:[#allocation3 + $0x41] sm:$0xff]  ;;  %v15059_v61 = vpop.permute.xlu0 %1126  ;;  %v1302_v10 = vadd.f32 %v1286_v40, %v1169_v0  ;;  %v2654_v0 = vld [vmem:[#allocation15 + $0x40] sm:$0xff] }
 0x2ea   : > { %2198 = vst.msk [vmem:[#allocation3 + $0x51] sm:$0xff] %vm2151_vm2, %v2139_v14  ;;  %1540 = vperm.xlu1 %12428, %v14969_v52   ;;  %11668 = vmatprep.mubr.msk.f32.mxu1 %vm2151_vm2, %v2234_v47  ;;  %v1552_v52 = vmul.f32 %v14850_v34, %v14927_v8  ;;  %v1287_v8 = vmul.f32 %v14838_v9, %v17426_v11  ;;  %v3346_v40 = vld [vmem:[#allocation15 + $0xb0] sm:$0xff] }
 0x2eb   : > { %11794 = vmatmul.mubr.msk.f32.gmra.mrb[2].mxu0 %vm2151_vm2, %v2234_v47  ;;  %1673 = vperm.xlu0 %12427, %v14982_v59   ;;  %v1435_v32 = vadd.f32 %v1419_v46, %v1302_v10  ;;  %v17425_v59 = vld [vmem:[#allocation48_spill] sm:$0xff] }
 0x2ec   : > { %v1021_v26 = vmul.f32 %v14830_v4, %v17425_v59 }
 0x2ed   : > { %v15064_v23 = vpop.permute.xlu1 %1382  ;;  %v15068_v39 = vpop.permute.xlu0 %1638  ;;  %v1568_v51 = vadd.f32 %v1552_v52, %v1435_v32 }
 0x2ee   : > { %1807 = vperm.xlu1 %12428, %v1729_v44   ;;  %v1170_v43 = vadd.f32 %v1154_v13, %v1021_v26  ;;  %v3347_v44 = vld [vmem:[#allocation15 + $0xb8] sm:$0xff] }
 0x2ef   : > { %1940 = vperm.xlu0 %12427, %v1862_v37   ;;  %v1701_v27 = vadd.f32 %v1685_v28, %v1568_v51  ;;  %v12040_v46 = vpack.c.bf16 %v3347_v44, %v3346_v40  ;;  %v2655_v37 = vld [vmem:[#allocation15 + $0x48] sm:$0xff]  ;;  %v1289_v40 = vmul.f32 %v14838_v9, %v14946_v41 }
 0x2f0   : > { %v1303_v15 = vadd.f32 %v1287_v8, %v1170_v43  ;;  %v3576_v43 = vld [vmem:[#allocation15 + $0xc8] sm:$0xff] }
 0x2f1   : > { %v1896_v49 = vpop.permute.xlu1 %1895  ;;  %v2235_v58 = vld [vmem:[#allocation3 + $0x51] sm:$0xff]  ;;  %v15082_v2 = vpop.permute.xlu0 %1254  ;;  %v1835_v48 = vadd.f32 %v1819_v6, %v1701_v27  ;;  %12041 = vmatprep.subr.bf16.mxu0 %v12040_v46 }
 0x2f2   : > { %2073 = vperm.xlu1 %12428, %v1995_v56   ;;  %11669 = vmatmul.mubr.msk.f32.gmra.mrb[4].mxu1 %vm2151_vm2, %v2235_v58  ;;  %v1436_v14 = vadd.f32 %v1420_v38, %v1303_v15  ;;  %v1953_v62 = vmul.f32 %v14866_v42, %v1896_v49  ;;  %v15102_v56 = vpack.c.bf16 %v2655_v37, %v2654_v0  ;;  %v3575_v6 = vld [vmem:[#allocation15 + $0xc0] sm:$0xff] }
 0x2f3   : > { %11796 = vmatprep.mubr.msk.f32.mxu0 %vm2151_vm2, %v2235_v58  ;;  %v1968_v24 = vadd.f32 %v1952_v22, %v1835_v48  ;;  %12043 = vmatpush3.bf16.msra.mxu0 %v12040_v46  ;;  %v15114_v27 = vpack.c.bf16 %v3576_v43, %v3575_v6 }
 0x2f4   : > { %v1569_v29 = vadd.f32 %v1553_v57, %v1436_v14  ;;  %12013 = vmatprep.subr.bf16.mxu1 %v15102_v56  ;;  %v2238_v14 = vld [vmem:[#allocation3 + $0xa1] sm:$0xff] }
 0x2f5   : > { %v15087_v18 = vpop.permute.xlu1 %1510  ;;  %v2024_v17 = vpop.permute.xlu0 %2023  ;;  %12045 = vmatprep.subr.bf16.mxu0 %v15114_v27 }
 0x2f6   : > { %v2085_v47 = vmul.f32 %v14880_v54, %v2024_v17  ;;  %v1702_v10 = vadd.f32 %v1686_v21, %v1569_v29 }
 0x2f8   : > { %v2101_v60 = vadd.f32 %v2085_v47, %v1968_v24  ;;  %v1836_v32 = vadd.f32 %v1820_v5, %v1702_v10  ;;  %v1156_v47 = vmul.f32 %v14825_v1, %v14901_v33  ;;  %v17427_v5 = vld [vmem:[#allocation50_spill] sm:$0xff]  ;;  %v1422_v33 = vmul.f32 %v14845_v12, %v14990_v20 }
 0x2f9   : > { %v15094_v30 = vpop.permute.xlu1 %1259  ;;  %v15098_v53 = vpop.permute.xlu0 %1515  ;;  %v1555_v10 = vmul.f32 %v14850_v34, %v15030_v19 }
 0x2fa   : > { %v2124_v52 = vadd.f32 %v14885_v31, %v2101_v60  ;;  %v1969_v59 = vadd.f32 %v1953_v62, %v1836_v32  ;;  %v1023_v60 = vmul.f32 %v14830_v4, %v17427_v5  ;;  %v1688_v32 = vmul.f32 %v14856_v16, %v15068_v39 }
 0x2fb   : > { %v1157_v39 = vmul.f32 %v14825_v1, %v14964_v3  ;;  %v1158_v3 = vmul.f32 %v14825_v1, %v14980_v7  ;;  %v1424_v7 = vmul.f32 %v14845_v12, %v15064_v23 }
 0x2fc   : > { %v2140_v28 = vmax.f32 %v2124_v52, 0.0  ;;  %v1172_v0 = vadd.f32 %v1156_v47, %v1023_v60 }
 0x2fd   : > { %v1773_v13 = vpop.permute.xlu1 %1772  ;;  %v2029_v50 = vpop.permute.xlu0 %2028 }
 0x2fe   : > { %2199 = vst.msk [vmem:[#allocation3 + $0x61] sm:$0xff] %vm2151_vm2, %v2140_v28  ;;  %v2086_v26 = vmul.f32 %v14880_v54, %v2029_v50  ;;  %v1305_v37 = vadd.f32 %v1289_v40, %v1172_v0  ;;  %v1822_v50 = vmul.f32 %v14862_v35, %v1773_v13  ;;  %v17428_v13 = vld [vmem:[#allocation51_spill] sm:$0xff] }
 0x2ff   : > { %v1024_v5 = vmul.f32 %v14830_v4, %v17428_v13 }
 0x300   : > { %v2102_v49 = vadd.f32 %v2086_v26, %v1969_v59  ;;  %v1438_v52 = vadd.f32 %v1422_v33, %v1305_v37  ;;  %v1423_v33 = vmul.f32 %v14845_v12, %v15042_v25  ;;  %v1291_v25 = vmul.f32 %v14838_v9, %v15026_v55 }
 0x301   : > { %v15107_v58 = vpop.permute.xlu1 %998  ;;  %v15109_v11 = vpop.permute.xlu0 %1131  ;;  %v1173_v0 = vadd.f32 %v1157_v39, %v1024_v5 }
 0x302   : > { %v2125_v8 = vadd.f32 %v14885_v31, %v2102_v49  ;;  %v1571_v41 = vadd.f32 %v1555_v10, %v1438_v52 }
 0x304   : > { %v2141_v38 = vmax.f32 %v2125_v8, 0.0  ;;  %v1704_v26 = vadd.f32 %v1688_v32, %v1571_v41  ;;  %v1556_v32 = vmul.f32 %v14850_v34, %v15087_v18  ;;  %v17429_v41 = vld [vmem:[#allocation52_spill] sm:$0xff] }
 0x305   : > { %v15112_v51 = vpop.permute.xlu1 %1387  ;;  %v1644_v22 = vpop.permute.xlu0 %1643  ;;  %v15116_v15 = vld [vmem:[#allocation3 + $0x61] sm:$0xff] }
 0x306   : > { %2200 = vst.msk [vmem:[#allocation3 + $0x71] sm:$0xff] %vm2151_vm2, %v2141_v38  ;;  %11671 = vmatprep.mubr.msk.f32.mxu1 %vm2151_vm2, %v15116_v15  ;;  %11797 = vmatmul.mubr.msk.f32.gmra.mrb[4].mxu0 %vm2151_vm2, %v15116_v15  ;;  %v1838_v8 = vadd.f32 %v1822_v50, %v1704_v26  ;;  %v1025_v50 = vmul.f32 %v14830_v4, %v17429_v41  ;;  %v17430_v41 = vld [vmem:[#allocation53_spill] sm:$0xff] }
 0x309   : > { %v15123_v57 = vpop.permute.xlu1 %1003  ;;  %v15126_v48 = vpop.permute.xlu0 %1136 }
 0x30d   : > { %v15128_v17 = vpop.permute.xlu1 %1392  ;;  %v15130_v21 = vpop.permute.xlu0 %1648  ;;  %v15132_v24 = vld [vmem:[#allocation3 + $0x71] sm:$0xff] }
 0x30e   : > { %11672 = vmatmul.mubr.msk.f32.gmra.mrb[6].mxu1 %vm2151_vm2, %v15132_v24  ;;  %11799 = vmatprep.mubr.msk.f32.mxu0 %vm2151_vm2, %v15132_v24 }
 0x30f   : > { %11674 = vmatprep.mubr.msk.f32.mxu1 %vm2151_vm2, %v2238_v14 }
 0x311   : > { %v1906_v29 = vpop.permute.xlu1 %1905  ;;  %v15145_v44 = vpop.permute.xlu0 %1264 }
 0x312   : > { %v1955_v20 = vmul.f32 %v14866_v42, %v1906_v29  ;;  %v1290_v29 = vmul.f32 %v14838_v9, %v15009_v63 }
 0x314   : > { %v1971_v43 = vadd.f32 %v1955_v20, %v1838_v8  ;;  %v1306_v52 = vadd.f32 %v1290_v29, %v1173_v0  ;;  %v1689_v20 = vmul.f32 %v14856_v16, %v1644_v22 }
 0x315   : > { %v15149_v46 = vpop.permute.xlu1 %1520  ;;  %v1778_v62 = vpop.permute.xlu0 %1777 }
 0x316   : > { %v1439_v26 = vadd.f32 %v1423_v33, %v1306_v52  ;;  %v1823_v18 = vmul.f32 %v14862_v35, %v1778_v62 }
 0x319   : > { %v15155_v28 = vpop.permute.xlu1 %1269  ;;  %v15158_v59 = vpop.permute.xlu0 %1525 }
 0x31d   : > { %v1783_v49 = vpop.permute.xlu1 %1782  ;;  %v2039_v6 = vpop.permute.xlu0 %2038 }
 0x31e   : > { %v2088_v19 = vmul.f32 %v14880_v54, %v2039_v6  ;;  %v1174_v6 = vadd.f32 %v1158_v3, %v1025_v50  ;;  %v1824_v33 = vmul.f32 %v14862_v35, %v1783_v49  ;;  %v1026_v50 = vmul.f32 %v14830_v4, %v17430_v41 }
 0x320   : > { %v2104_v14 = vadd.f32 %v2088_v19, %v1971_v43  ;;  %v1572_v43 = vadd.f32 %v1556_v32, %v1439_v26  ;;  %v1307_v39 = vadd.f32 %v1291_v25, %v1174_v6  ;;  %v1292_v26 = vmul.f32 %v14838_v9, %v15082_v2 }
 0x321   : > { %v15162_v38 = vpop.permute.xlu1 %1397  ;;  %v15166_v47 = vpop.permute.xlu0 %1653  ;;  %v1293_v2 = vmul.f32 %v14838_v9, %v15094_v30 }
 0x322   : > { %v2127_v60 = vadd.f32 %v14885_v31, %v2104_v14  ;;  %v1557_v14 = vmul.f32 %v14850_v34, %v15098_v53  ;;  %v1705_v13 = vadd.f32 %v1689_v20, %v1572_v43  ;;  %v1440_v22 = vadd.f32 %v1424_v7, %v1307_v39 }
 0x323   : > { %v1425_v43 = vmul.f32 %v14845_v12, %v15112_v51 }
 0x324   : > { %v2143_v37 = vmax.f32 %v2127_v60, 0.0  ;;  %v1690_v60 = vmul.f32 %v14856_v16, %v15130_v21  ;;  %v1839_v23 = vadd.f32 %v1823_v18, %v1705_v13  ;;  %v1573_v0 = vadd.f32 %v1557_v14, %v1440_v22 }
 0x325   : > { %v1911_v40 = vpop.permute.xlu1 %1910  ;;  %v15175_v10 = vpop.permute.xlu0 %1402  ;;  %v1027_v14 = vmul.f32 %v14830_v4, %v15049_v36  ;;  %v1558_v22 = vmul.f32 %v14850_v34, %v15149_v46  ;;  %v1691_v36 = vmul.f32 %v14856_v16, %v15166_v47  ;;  %v1162_v47 = vmul.f32 %v14825_v1, %v15126_v48 }
 0x326   : > { %2202 = vst.msk [vmem:[#allocation3 + $0xb1] sm:$0xff] %vm2151_vm2, %v2143_v37  ;;  %v1956_v55 = vmul.f32 %v14866_v42, %v1911_v40  ;;  %v1159_v40 = vmul.f32 %v14825_v1, %v15039_v45  ;;  %v1706_v52 = vadd.f32 %v1690_v60, %v1573_v0  ;;  %v1160_v45 = vmul.f32 %v14825_v1, %v15059_v61 }
 0x327   : > { %v1295_v48 = vmul.f32 %v14838_v9, %v15155_v28 }
 0x328   : > { %v1972_v37 = vadd.f32 %v1956_v55, %v1839_v23  ;;  %v1840_v49 = vadd.f32 %v1824_v33, %v1706_v52  ;;  %v1175_v6 = vadd.f32 %v1159_v40, %v1026_v50  ;;  %v1176_v60 = vadd.f32 %v1160_v45, %v1027_v14 }
 0x329   : > { %v15182_v63 = vpop.permute.xlu1 %1658  ;;  %v1916_v8 = vpop.permute.xlu0 %1915  ;;  %v1161_v33 = vmul.f32 %v14825_v1, %v15109_v11 }
 0x32a   : > { %v1957_v32 = vmul.f32 %v14866_v42, %v1916_v8  ;;  %v1308_v55 = vadd.f32 %v1292_v26, %v1175_v6  ;;  %v1309_v30 = vadd.f32 %v1293_v2, %v1176_v60  ;;  %v1692_v50 = vmul.f32 %v14856_v16, %v15182_v63 }
 0x32c   : > { %v1973_v8 = vadd.f32 %v1957_v32, %v1840_v49  ;;  %v1441_v23 = vadd.f32 %v1425_v43, %v1308_v55  ;;  %v1294_v32 = vmul.f32 %v14838_v9, %v15145_v44  ;;  %v1427_v44 = vmul.f32 %v14845_v12, %v15162_v38 }
 0x32d   : > { %v15192_v19 = vpop.permute.xlu1 %1530  ;;  %v1788_v5 = vpop.permute.xlu0 %1787  ;;  %v15197_v29 = vld [vmem:[#allocation3 + $0xb1] sm:$0xff] }
 0x32e   : > { %11675 = vmatmul.mubr.msk.f32.gmra.mrb[8].mxu1 %vm2151_vm2, %v15197_v29  ;;  %v1574_v46 = vadd.f32 %v1558_v22, %v1441_v23  ;;  %v1825_v40 = vmul.f32 %v14862_v35, %v1788_v5  ;;  %v1560_v28 = vmul.f32 %v14850_v34, %v15192_v19 }
 0x330   : > { %v1707_v11 = vadd.f32 %v1691_v36, %v1574_v46 }
 0x331   : > { %v2044_v62 = vpop.permute.xlu1 %2043  ;;  %v15207_v3 = vpop.permute.xlu0 %1535 }
 0x332   : > { %v2089_v53 = vmul.f32 %v14880_v54, %v2044_v62  ;;  %v1426_v62 = vmul.f32 %v14845_v12, %v15128_v17  ;;  %v1028_v17 = vmul.f32 %v14830_v4, %v15107_v58  ;;  %v1029_v58 = vmul.f32 %v14830_v4, %v15123_v57 }
 0x333   : > { %v1841_v6 = vadd.f32 %v1825_v40, %v1707_v11  ;;  %v1428_v57 = vmul.f32 %v14845_v12, %v15175_v10  ;;  %v1561_v2 = vmul.f32 %v14850_v34, %v15207_v3 }
 0x334   : > { %v2105_v21 = vadd.f32 %v2089_v53, %v1972_v37  ;;  %v1559_v53 = vmul.f32 %v14850_v34, %v15158_v59  ;;  %v1442_v41 = vadd.f32 %v1426_v62, %v1309_v30  ;;  %v1177_v5 = vadd.f32 %v1161_v33, %v1028_v17 }
 0x335   : > { %v1793_v25 = vpop.permute.xlu1 %1792  ;;  %v2049_v7 = vpop.permute.xlu0 %2048  ;;  %v1178_v45 = vadd.f32 %v1162_v47, %v1029_v58 }
 0x336   : > { %v2128_v20 = vadd.f32 %v14885_v31, %v2105_v21  ;;  %v2090_v39 = vmul.f32 %v14880_v54, %v2049_v7  ;;  %v1826_v63 = vmul.f32 %v14862_v35, %v1793_v25  ;;  %v1310_v7 = vadd.f32 %v1294_v32, %v1177_v5 }
 0x337   : > { %v1311_v14 = vadd.f32 %v1295_v48, %v1178_v45 }
 0x338   : > { %v2144_v18 = vmax.f32 %v2128_v20, 0.0  ;;  %v2106_v61 = vadd.f32 %v2090_v39, %v1973_v8  ;;  %v1575_v20 = vadd.f32 %v1559_v53, %v1442_v41  ;;  %v1443_v25 = vadd.f32 %v1427_v44, %v1310_v7 }
 0x339   : > { %v1664_v13 = vpop.permute.xlu1 %1663  ;;  %v1444_v60 = vadd.f32 %v1428_v57, %v1311_v14 }
 0x33a   : > { %2203 = vst.msk [vmem:[#allocation3 + $0xc1] sm:$0xff] %vm2151_vm2, %v2144_v18  ;;  %v1921_v51 = vpop.permute.xlu0 %1920  ;;  %v2129_v0 = vadd.f32 %v14885_v31, %v2106_v61  ;;  %v1708_v38 = vadd.f32 %v1692_v50, %v1575_v20  ;;  %v1693_v55 = vmul.f32 %v14856_v16, %v1664_v13 }
 0x33b   : > { %v1958_v59 = vmul.f32 %v14866_v42, %v1921_v51  ;;  %v1576_v51 = vadd.f32 %v1560_v28, %v1443_v25  ;;  %v1577_v3 = vadd.f32 %v1561_v2, %v1444_v60 }
 0x33c   : > { %v2145_v52 = vmax.f32 %v2129_v0, 0.0  ;;  %v1842_v61 = vadd.f32 %v1826_v63, %v1708_v38  ;;  %v17431_v63 = vld [vmem:[#allocation49_spill] sm:$0xff] }
 0x33d   : > { %v1669_v37 = vpop.permute.xlu1 %1668  ;;  %v1974_v8 = vadd.f32 %v1958_v59, %v1841_v6  ;;  %v1709_v13 = vadd.f32 %v1693_v55, %v1576_v51  ;;  %v1022_v45 = vmul.f32 %v14830_v4, %v17431_v63 }
 0x33e   : > { %v1926_v21 = vpop.permute.xlu0 %1925  ;;  %2204 = vst.msk [vmem:[#allocation3 + $0xd1] sm:$0xff] %vm2151_vm2, %v2145_v52  ;;  %v1694_v19 = vmul.f32 %v14856_v16, %v1669_v37 }
 0x33f   : > { %v1959_v18 = vmul.f32 %v14866_v42, %v1926_v21 }
 0x340   : > { %v1710_v47 = vadd.f32 %v1694_v19, %v1577_v3 }
 0x341   : > { %v1798_v26 = vpop.permute.xlu1 %1797  ;;  %v15253_v49 = vld [vmem:[#allocation3 + $0xc1] sm:$0xff]  ;;  %v1975_v36 = vadd.f32 %v1959_v18, %v1842_v61 }
 0x342   : > { %11677 = vmatprep.mubr.msk.f32.mxu1 %vm2151_vm2, %v15253_v49  ;;  %v2054_v43 = vpop.permute.xlu0 %2053  ;;  %v1827_v0 = vmul.f32 %v14862_v35, %v1798_v26 }
 0x343   : > { %v2091_v39 = vmul.f32 %v14880_v54, %v2054_v43 }
 0x344   : > { %v1843_v32 = vadd.f32 %v1827_v0, %v1709_v13 }
 0x345   : > { %v1803_v22 = vpop.permute.xlu1 %1802  ;;  %v2107_v10 = vadd.f32 %v2091_v39, %v1974_v8  ;;  %v15268_v62 = vld [vmem:[#allocation3 + $0xd1] sm:$0xff] }
 0x346   : > { %v2059_v23 = vpop.permute.xlu0 %2058  ;;  %11678 = vmatmul.mubr.msk.f32.gmra.mrb[10].mxu1 %vm2151_vm2, %v15268_v62  ;;  %v1828_v40 = vmul.f32 %v14862_v35, %v1803_v22 }
 0x347   : > { %v2130_v30 = vadd.f32 %v14885_v31, %v2107_v10  ;;  %v2092_v33 = vmul.f32 %v14880_v54, %v2059_v23 }
 0x348   : > { %v1844_v50 = vadd.f32 %v1828_v40, %v1710_v47  ;;  %v2884_v47 = vld [vmem:[#allocation15 + $0x60] sm:$0xff] }
 0x349   : > { %v1931_v46 = vpop.permute.xlu1 %1930  ;;  %v2146_v53 = vmax.f32 %v2130_v30, 0.0  ;;  %v2108_v37 = vadd.f32 %v2092_v33, %v1975_v36 }
 0x34a   : > { %v1960_v52 = vmul.f32 %v14866_v42, %v1931_v46  ;;  %v1936_v17 = vpop.permute.xlu0 %1935  ;;  %v2656_v46 = vld [vmem:[#allocation15 + $0x50] sm:$0xff] }
 0x34b   : > { %2205 = vst.msk [vmem:[#allocation3 + $0xe1] sm:$0xff] %vm2151_vm2, %v2146_v53  ;;  %v2131_v21 = vadd.f32 %v14885_v31, %v2108_v37  ;;  %v1961_v41 = vmul.f32 %v14866_v42, %v1936_v17  ;;  %v2657_v53 = vld [vmem:[#allocation15 + $0x58] sm:$0xff]  ;;  %v15314_v17 = vld [vmem:[#allocation3 + $0x10] sm:$0xff] }
 0x34c   : > { %v1976_v5 = vadd.f32 %v1960_v52, %v1843_v32  ;;  %v2885_v32 = vld [vmem:[#allocation15 + $0x68] sm:$0xff] }
 0x34d   : > { %v2064_v11 = vpop.permute.xlu1 %2063  ;;  %v2147_v59 = vmax.f32 %v2131_v21, 0.0  ;;  %v1977_v44 = vadd.f32 %v1961_v41, %v1844_v50  ;;  %v12429_v41 = vld [vmem:[#allocation12] ss:$0 sm:$0xff]  ;;  %v12430_v50 = vld [vmem:[#allocation12 + $0x1] ss:$0 sm:$0xff] }
 0x34e   : > { %v2093_v58 = vmul.f32 %v14880_v54, %v2064_v11  ;;  %v2069_v48 = vpop.permute.xlu0 %2068 }
 0x34f   : > { %2206 = vst.msk [vmem:[#allocation3 + $0xf1] sm:$0xff] %vm2151_vm2, %v2147_v59  ;;  %v2094_v20 = vmul.f32 %v14880_v54, %v2069_v48 }
 0x350   : > { %v2109_v26 = vadd.f32 %v2093_v58, %v1976_v5 }
 0x351   : > { %v1102_v6 = vpop.permute.xlu1 %1101  ;;  %v2110_v57 = vadd.f32 %v2094_v20, %v1977_v44  ;;  %v12431_v44 = vld [vmem:[#allocation12 + $0x2] ss:$0 sm:$0xff] }
 0x352   : > { %v2132_v7 = vadd.f32 %v14885_v31, %v2109_v26  ;;  %v1155_v28 = vmul.f32 %v14825_v1, %v1102_v6  ;;  %v1235_v43 = vpop.permute.xlu0 %1234  ;;  %v15287_v38 = vld [vmem:[#allocation3 + $0xe1] sm:$0xff]  ;;  %v15326_v6 = vld [vmem:[#allocation3 + $0x30] sm:$0xff] }
 0x353   : > { %v2133_v18 = vadd.f32 %v14885_v31, %v2110_v57  ;;  %v1288_v14 = vmul.f32 %v14838_v9, %v1235_v43  ;;  %11680 = vmatprep.mubr.msk.f32.mxu1 %vm2151_vm2, %v15287_v38  ;;  %v15331_v57 = vld [vmem:[#allocation3 + $0x40] sm:$0xff]  ;;  %v12433_v43 = vld [vmem:[#allocation12 + $0x4] ss:$0 sm:$0xff] }
 0x354   : > { %v2148_v8 = vmax.f32 %v2132_v7, 0.0  ;;  %v1171_v39 = vadd.f32 %v1155_v28, %v1022_v45  ;;  %v12432_v45 = vld [vmem:[#allocation12 + $0x3] ss:$0 sm:$0xff] }
 0x355   : > { %v1368_v25 = vpop.permute.xlu1 %1367  ;;  %v2149_v4 = vmax.f32 %v2133_v18, 0.0 }
 0x356   : > { %2207 = vst.msk [vmem:[#allocation3 + $0x101] sm:$0xff] %vm2151_vm2, %v2148_v8  ;;  %v1304_v2 = vadd.f32 %v1288_v14, %v1171_v39  ;;  %v1421_v55 = vmul.f32 %v14845_v12, %v1368_v25  ;;  %v1501_v1 = vpop.permute.xlu0 %1500  ;;  %v15295_v22 = vld [vmem:[#allocation3 + $0xf1] sm:$0xff]  ;;  %v12434_v25 = vld [vmem:[#allocation12 + $0x5] ss:$0 sm:$0xff] }
 0x357   : > { %2208 = vst.msk [vmem:[#allocation3 + $0x111] sm:$0xff] %vm2151_vm2, %v2149_v4  ;;  %v1554_v10 = vmul.f32 %v14850_v34, %v1501_v1  ;;  %11681 = vmatmul.mubr.msk.f32.gmra.mrb[12].mxu1 %vm2151_vm2, %v15295_v22  ;;  %v2210_v34 = vld [vmem:[#allocation3] sm:$0xff]  ;;  %v15336_v39 = vld [vmem:[#allocation3 + $0x50] sm:$0xff] }
 0x358   : > { %v1437_v61 = vadd.f32 %v1421_v55, %v1304_v2  ;;  %v15340_v2 = vld [vmem:[#allocation3 + $0x60] sm:$0xff] }
 0x359   : > { %v1634_v9 = vpop.permute.xlu1 %1633 }
 0x35a   : > { %v1570_v60 = vadd.f32 %v1554_v10, %v1437_v61  ;;  %v1687_v51 = vmul.f32 %v14856_v16, %v1634_v9  ;;  %v1768_v19 = vpop.permute.xlu0 %1767  ;;  %v12435_v61 = vld [vmem:[#allocation12 + $0x6] ss:$0 sm:$0xff] }
 0x35b   : > { %v1821_v36 = vmul.f32 %v14862_v35, %v1768_v19  ;;  %v2218_v9 = vld [vmem:[#allocation3 + $0xa0] sm:$0xff] }
 0x35c   : > { %v1703_v23 = vadd.f32 %v1687_v51, %v1570_v60  ;;  %v15344_v51 = vld [vmem:[#allocation3 + $0x70] sm:$0xff] }
 0x35d   : > { %v1901_v12 = vpop.permute.xlu1 %1900  ;;  %v15303_v0 = vld [vmem:[#allocation3 + $0x101] sm:$0xff] }
 0x35e   : > { %v1837_v30 = vadd.f32 %v1821_v36, %v1703_v23  ;;  %v1954_v33 = vmul.f32 %v14866_v42, %v1901_v12  ;;  %11683 = vmatprep.mubr.msk.f32.mxu1 %vm2151_vm2, %v15303_v0  ;;  %v2034_v3 = vpop.permute.xlu0 %2033  ;;  %v15308_v13 = vld [vmem:[#allocation3 + $0x111] sm:$0xff]  ;;  %v12016_v42 = vpack.c.bf16 %v2657_v53, %v2656_v46  ;;  %v12436_v36 = vld [vmem:[#allocation12 + $0x7] ss:$0 sm:$0xff] }
 0x35f   : > { %v2087_v40 = vmul.f32 %v14880_v54, %v2034_v3  ;;  %11684 = vmatmul.mubr.msk.f32.gmra.mrb[14].mxu1 %vm2151_vm2, %v15308_v13  ;;  %v15319_v54 = vld [vmem:[#allocation3 + $0x20] sm:$0xff]  ;;  %v15355_v46 = vld [vmem:[#allocation3 + $0xb0] sm:$0xff] }
 0x360   : > { %v1970_v16 = vadd.f32 %v1954_v33, %v1837_v30  ;;  %11694 = vmatprep.mubr.msk.f32.mxu1 %vm2151_vm2, %v2210_v34  ;;  %v12437_v34 = vld [vmem:[#allocation12 + $0x8] ss:$0 sm:$0xff] }
 0x361   : > { %v1009_v35 = vpop.permute.xlu1 %1008 }
 0x362   : > { %v2103_v37 = vadd.f32 %v2087_v40, %v1970_v16  ;;  %v1142_v52 = vpop.permute.xlu0 %1141  ;;  %v1030_v11 = vmul.f32 %v12429_v41, %v1009_v35  ;;  %v15361_v16 = vld [vmem:[#allocation3 + $0xc0] sm:$0xff]  ;;  %v15367_v35 = vld [vmem:[#allocation3 + $0xd0] sm:$0xff] }
 0x363   : > { %v1163_v59 = vmul.f32 %v12430_v50, %v1142_v52  ;;  %11695 = vmatmul.mubr.msk.f32.vlgmr.msra.gmra.mrb[0].mxu1 %vm2151_vm2, %v15314_v17  ;;  %v15380_v52 = vld [vmem:[#allocation3 + $0xf0] sm:$0xff]  ;;  %v2886_v41 = vld [vmem:[#allocation15 + $0x70] sm:$0xff] }
 0x364   : > { %v2126_v21 = vadd.f32 %v14885_v31, %v2103_v37  ;;  %11697 = vmatprep.mubr.msk.f32.mxu1 %vm2151_vm2, %v15319_v54  ;;  %12015 = vmatpush3.bf16.msra.mxu1 %v15102_v56  ;;  %v15324_v31 = vpack.c.bf16 %v2885_v32, %v2884_v47  ;;  %v15386_v47 = vld [vmem:[#allocation3 + $0x100] sm:$0xff] }
 0x365   : > { %v1275_v5 = vpop.permute.xlu1 %1274  ;;  %v1179_v48 = vadd.f32 %v1163_v59, %v1030_v11  ;;  %12017 = vmatprep.subr.bf16.mxu1 %v12016_v42  ;;  %v2637_v32 = vld [vmem:[#allocation3 + $0x2] sm:$0xff] }
 0x366   : > { %v2142_v58 = vmax.f32 %v2126_v21, 0.0  ;;  %v1296_v26 = vmul.f32 %v12431_v44, %v1275_v5  ;;  %v1408_v20 = vpop.permute.xlu0 %1407  ;;  %v15392_v21 = vld [vmem:[#allocation3 + $0x110] sm:$0xff]  ;;  %v2887_v11 = vld [vmem:[#allocation15 + $0x78] sm:$0xff]  ;;  %v3577_v59 = vld [vmem:[#allocation15 + $0xd0] sm:$0xff] }
 0x367   : > { %v1429_v7 = vmul.f32 %v12432_v45, %v1408_v20  ;;  %11698 = vmatmul.mubr.msk.f32.gmra.mrb[2].mxu1 %vm2151_vm2, %v15326_v6  ;;  %v3578_v5 = vld [vmem:[#allocation15 + $0xd8] sm:$0xff]  ;;  %v3805_v20 = vld [vmem:[#allocation15 + $0xe0] sm:$0xff] }
 0x368   : > { %2201 = vst.msk [vmem:[#allocation3 + $0x81] sm:$0xff] %vm2151_vm2, %v2142_v58  ;;  %v1312_v63 = vadd.f32 %v1296_v26, %v1179_v48  ;;  %11700 = vmatprep.mubr.msk.f32.mxu1 %vm2151_vm2, %v15331_v57  ;;  %12019 = vmatpush3.bf16.msra.mxu1 %v12016_v42  ;;  %v15373_v42 = vld [vmem:[#allocation3 + $0xe0] sm:$0xff]  ;;  %v3327_v58 = vld [vmem:[#allocation3 + $0x12] sm:$0xff]  ;;  %v12024_v48 = vpack.c.bf16 %v2887_v11, %v2886_v41 }
 0x369   : > { %v1541_v56 = vpop.permute.xlu1 %1540  ;;  %12021 = vmatprep.subr.bf16.mxu1 %v15324_v31  ;;  %v15403_v44 = vld [vmem:[#allocation3 + $0x22] sm:$0xff]  ;;  %v12048_v26 = vpack.c.bf16 %v3578_v5, %v3577_v59  ;;  %v15410_v45 = vld [vmem:[#allocation3 + $0x32] sm:$0xff] }
 0x36a   : > { %v1445_v28 = vadd.f32 %v1429_v7, %v1312_v63  ;;  %v1562_v8 = vmul.f32 %v12433_v43, %v1541_v56  ;;  %v1674_v18 = vpop.permute.xlu0 %1673  ;;  %v3806_v63 = vld [vmem:[#allocation15 + $0xe8] sm:$0xff]  ;;  %v15417_v7 = vld [vmem:[#allocation3 + $0x42] sm:$0xff] }
 0x36b   : > { %v1695_v4 = vmul.f32 %v12434_v25, %v1674_v18  ;;  %11701 = vmatmul.mubr.msk.f32.gmra.mrb[4].mxu1 %vm2151_vm2, %v15336_v39  ;;  %v15425_v56 = vld [vmem:[#allocation3 + $0x52] sm:$0xff]  ;;  %v15452_v25 = vld [vmem:[#allocation3 + $0xc2] sm:$0xff] }
 0x36c   : > { %v1578_v14 = vadd.f32 %v1562_v8, %v1445_v28  ;;  %11703 = vmatprep.mubr.msk.f32.mxu1 %vm2151_vm2, %v15340_v2  ;;  %v15432_v28 = vld [vmem:[#allocation3 + $0x62] sm:$0xff]  ;;  %v15439_v43 = vld [vmem:[#allocation3 + $0x72] sm:$0xff] }
 0x36d   : > { %v1808_v55 = vpop.permute.xlu1 %1807  ;;  %v2645_v8 = vld [vmem:[#allocation3 + $0xa2] sm:$0xff]  ;;  %v3565_v11 = vld [vmem:[#allocation3 + $0x90] sm:$0xff] }
 0x36e   : > { %v1711_v1 = vadd.f32 %v1695_v4, %v1578_v14  ;;  %v1829_v10 = vmul.f32 %v12435_v61, %v1808_v55  ;;  %v1941_v60 = vpop.permute.xlu0 %1940  ;;  %v3335_v14 = vld [vmem:[#allocation3 + $0xb2] sm:$0xff]  ;;  %v15464_v55 = vld [vmem:[#allocation3 + $0xe2] sm:$0xff] }
 0x36f   : > { %v15346_v19 = vld [vmem:[#allocation3 + $0x81] sm:$0xff]  ;;  %v1962_v12 = vmul.f32 %v12436_v36, %v1941_v60  ;;  %11704 = vmatmul.mubr.msk.f32.gmra.mrb[6].mxu1 %vm2151_vm2, %v15344_v51  ;;  %v15458_v4 = vld [vmem:[#allocation3 + $0xd2] sm:$0xff] }
 0x370   : > { %v1845_v23 = vadd.f32 %v1829_v10, %v1711_v1  ;;  %11800 = vmatmul.mubr.msk.f32.gmra.mrb[6].mxu0 %vm2151_vm2, %v15346_v19  ;;  %11706 = vmatprep.mubr.msk.f32.mxu1 %vm2151_vm2, %v2218_v9  ;;  %v15445_v18 = vld [vmem:[#allocation3 + $0x82] sm:$0xff]  ;;  %v15470_v1 = vld [vmem:[#allocation3 + $0xf2] sm:$0xff] }
 0x371   : > { %v2074_v30 = vpop.permute.xlu1 %2073  ;;  %11802 = vmatprep.mubr.msk.f32.mxu0 %vm2151_vm2, %v15197_v29  ;;  %v12438_v29 = vld [vmem:[#allocation14] ss:$0 sm:$0xff]  ;;  %v15476_v61 = vld [vmem:[#allocation3 + $0x102] sm:$0xff]  ;;  %v15482_v10 = vld [vmem:[#allocation3 + $0x112] sm:$0xff] }
 0x372   : > { %v1978_v33 = vadd.f32 %v1962_v12, %v1845_v23  ;;  %v2095_v3 = vmul.f32 %v12437_v34, %v2074_v30  ;;  %v5600_v9 = vld [vmem:[#allocation18] sm:$0xff]  ;;  %v5601_v60 = vld [vmem:[#allocation18 + $0x8] sm:$0xff]  ;;  %v3808_v12 = vld [vmem:[#allocation15 + $0xf8] sm:$0xff] }
 0x373   : > { %11707 = vmatmul.mubr.msk.f32.gmra.mrb[8].mxu1 %vm2151_vm2, %v15355_v46  ;;  %v3807_v36 = vld [vmem:[#allocation15 + $0xf0] sm:$0xff]  ;;  %v12069_v30 = vpack.c.bf16 %v5601_v60, %v5600_v9  ;;  %v5603_v34 = vld [vmem:[#allocation18 + $0x18] sm:$0xff]  ;;  %v12439_v5 = vld [vmem:[#allocation3 + $0x51] sm:$0xff] }
 0x374   : > { %v2111_v53 = vadd.f32 %v2095_v3, %v1978_v33  ;;  %11803 = vmatmul.mubr.msk.f32.gmra.mrb[8].mxu0 %vm2151_vm2, %v15253_v49  ;;  %11709 = vmatprep.mubr.msk.f32.mxu1 %vm2151_vm2, %v15361_v16  ;;  %v5602_v33 = vld [vmem:[#allocation18 + $0x10] sm:$0xff]  ;;  %v12056_v3 = vpack.c.bf16 %v3808_v12, %v3807_v36  ;;  %v5607_v41 = vld [vmem:[#allocation18 + $0x38] sm:$0xff] }
 0x375   : > { %11805 = vmatprep.mubr.msk.f32.mxu0 %vm2151_vm2, %v15268_v62  ;;  %v3790_v59 = vld [vmem:[#allocation3 + $0x41] sm:$0xff] }
 0x376   : > { %v2134_v40 = vadd.f32 %v12438_v29, %v2111_v53  ;;  %v4036_v53 = vld [vmem:[#allocation15 + $0x108] sm:$0xff]  ;;  %v12072_v29 = vpack.c.bf16 %v5603_v34, %v5602_v33 }
 0x377   : > { %11710 = vmatmul.mubr.msk.f32.gmra.mrb[10].mxu1 %vm2151_vm2, %v15367_v35 }
 0x378   : > { %v2150_v37 = vmax.f32 %v2134_v40, 0.0  ;;  %11806 = vmatmul.mubr.msk.f32.gmra.mrb[10].mxu0 %vm2151_vm2, %v15287_v38  ;;  %11712 = vmatprep.mubr.msk.f32.mxu1 %vm2151_vm2, %v15373_v42  ;;  %v5604_v40 = vld [vmem:[#allocation18 + $0x20] sm:$0xff] }
 0x379   : > { %11808 = vmatprep.mubr.msk.f32.mxu0 %vm2151_vm2, %v15295_v22 }
 0x37a   : > { %2209 = vst.msk [vmem:[#allocation3 + $0x121] sm:$0xff] %vm2151_vm2, %v2150_v37  ;;  %v5605_v37 = vld [vmem:[#allocation18 + $0x28] sm:$0xff] }
 0x37b   : > { %11713 = vmatmul.mubr.msk.f32.gmra.mrb[12].mxu1 %vm2151_vm2, %v15380_v52 }
 0x37c   : > { %11809 = vmatmul.mubr.msk.f32.gmra.mrb[12].mxu0 %vm2151_vm2, %v15303_v0  ;;  %11715 = vmatprep.mubr.msk.f32.mxu1 %vm2151_vm2, %v15386_v47 }
 0x37d   : > { %11811 = vmatprep.mubr.msk.f32.mxu0 %vm2151_vm2, %v15308_v13 }
 0x37f   : > { %11716 = vmatmul.mubr.msk.f32.gmra.mrb[14].mxu1 %vm2151_vm2, %v15392_v21 }
 0x380   : > { %11726 = vmatprep.mubr.msk.f32.mxu1 %vm2151_vm2, %v2637_v32  ;;  %v12075_v32 = vpack.c.bf16 %v5605_v37, %v5604_v40  ;;  %v10833_v40 = vld [vmem:[#allocation20] ss:$0 sm:$0xff] }
 0x381   : > { %v15396_v50 = vld [vmem:[#allocation3 + $0x121] sm:$0xff] }
 0x382   : > { %11812 = vmatmul.mubr.msk.f32.gmra.mrb[14].mxu0 %vm2151_vm2, %v15396_v50  ;;  %v15490_v23 = vld [vmem:[#allocation3 + $0x122] sm:$0xff] }
 0x383   : > { %11822 = vmatprep.mubr.msk.f32.mxu0 %vm2151_vm2, %v3327_v58  ;;  %11727 = vmatmul.mubr.msk.f32.vlgmr.msra.gmra.mrb[0].mxu1 %vm2151_vm2, %v3327_v58  ;;  %v3795_v58 = vld [vmem:[#allocation3 + $0x91] sm:$0xff] }
 0x384   : > { %11729 = vmatprep.mubr.msk.f32.mxu1 %vm2151_vm2, %v15403_v44  ;;  %12023 = vmatpush3.bf16.msra.mxu1 %v15324_v31  ;;  %v15419_v31 = vpack.c.bf16 %v3806_v63, %v3805_v20  ;;  %v5697_v20 = vld [vmem:[%s17434_s29 + $0x38] sm:$0xff] }
 0x385   : > { %12025 = vmatprep.subr.bf16.mxu1 %v12024_v48 }
 0x386   : > { %11823 = vmatmul.mubr.msk.f32.vlgmr.msra.gmra.mrb[0].mxu0 %vm2151_vm2, %v15403_v44 }
 0x387   : > { %12047 = vmatpush3.bf16.msra.mxu0 %v15114_v27  ;;  %11825 = vmatprep.mubr.msk.f32.mxu0 %vm2151_vm2, %v15410_v45  ;;  %v13870_v27 = vmov 0.0|0.0  }
 0x388   : > { %11730 = vmatmul.mubr.msk.f32.gmra.mrb[2].mxu1 %vm2151_vm2, %v15410_v45  ;;  %12049 = vmatprep.subr.bf16.mxu0 %v12048_v26 }
 0x389   : > { %11732 = vmatprep.mubr.msk.f32.mxu1 %vm2151_vm2, %v15417_v7  ;;  %12027 = vmatpush3.bf16.msra.mxu1 %v12024_v48  ;;  %v5695_v48 = vld [vmem:[%s17434_s29 + $0x28] sm:$0xff] }
 0x38a   : > { %11826 = vmatmul.mubr.msk.f32.gmra.mrb[2].mxu0 %vm2151_vm2, %v15417_v7  ;;  %12068 = vmatprep.subr.bf16.mxu1 %v13870_v27 }
 0x38b   : > { %11828 = vmatprep.mubr.msk.f32.mxu0 %vm2151_vm2, %v15425_v56  ;;  %12051 = vmatpush3.bf16.msra.mxu0 %v12048_v26  ;;  %v5696_v26 = vld [vmem:[%s17434_s29 + $0x30] sm:$0xff] }
 0x38c   : > { %11733 = vmatmul.mubr.msk.f32.gmra.mrb[4].mxu1 %vm2151_vm2, %v15425_v56  ;;  %12053 = vmatprep.subr.bf16.mxu0 %v15419_v31  ;;  %v12090_v63 = vpack.c.bf16 %v5697_v20, %v5696_v26 }
 0x38d   : > { %11735 = vmatprep.mubr.msk.f32.mxu1 %vm2151_vm2, %v15432_v28 }
 0x38e   : > { %11829 = vmatmul.mubr.msk.f32.gmra.mrb[4].mxu0 %vm2151_vm2, %v15432_v28 }
 0x38f   : > { %11831 = vmatprep.mubr.msk.f32.mxu0 %vm2151_vm2, %v15439_v43 }
 0x390   : > { %11736 = vmatmul.mubr.msk.f32.gmra.mrb[6].mxu1 %vm2151_vm2, %v15439_v43 }
 0x391   : > { %11738 = vmatprep.mubr.msk.f32.mxu1 %vm2151_vm2, %v2645_v8  ;;  %v5702_v8 = vld [vmem:[%s17434_s29 + $0x60] sm:$0xff] }
 0x392   : > { %11832 = vmatmul.mubr.msk.f32.gmra.mrb[6].mxu0 %vm2151_vm2, %v15445_v18 }
 0x393   : > { %11834 = vmatprep.mubr.msk.f32.mxu0 %vm2151_vm2, %v3335_v14 }
 0x394   : > { %11739 = vmatmul.mubr.msk.f32.gmra.mrb[8].mxu1 %vm2151_vm2, %v3335_v14 }
 0x395   : > { %11741 = vmatprep.mubr.msk.f32.mxu1 %vm2151_vm2, %v15452_v25 }
 0x396   : > { %11835 = vmatmul.mubr.msk.f32.gmra.mrb[8].mxu0 %vm2151_vm2, %v15452_v25 }
 0x397   : > { %11837 = vmatprep.mubr.msk.f32.mxu0 %vm2151_vm2, %v15458_v4 }
 0x398   : > { %11742 = vmatmul.mubr.msk.f32.gmra.mrb[10].mxu1 %vm2151_vm2, %v15458_v4 }
 0x399   : > { %11744 = vmatprep.mubr.msk.f32.mxu1 %vm2151_vm2, %v15464_v55 }
 0x39a   : > { %11838 = vmatmul.mubr.msk.f32.gmra.mrb[10].mxu0 %vm2151_vm2, %v15464_v55 }
 0x39b   : > { %11840 = vmatprep.mubr.msk.f32.mxu0 %vm2151_vm2, %v15470_v1 }
 0x39c   : > { %11745 = vmatmul.mubr.msk.f32.gmra.mrb[12].mxu1 %vm2151_vm2, %v15470_v1 }
 0x39d   : > { %11747 = vmatprep.mubr.msk.f32.mxu1 %vm2151_vm2, %v15476_v61 }
 0x39e   : > { %11841 = vmatmul.mubr.msk.f32.gmra.mrb[12].mxu0 %vm2151_vm2, %v15476_v61 }
 0x39f   : > { %11843 = vmatprep.mubr.msk.f32.mxu0 %vm2151_vm2, %v15482_v10 }
 0x3a0   : > { %11748 = vmatmul.mubr.msk.f32.gmra.mrb[14].mxu1 %vm2151_vm2, %v15482_v10 }
 0x3a1   : > { %11758 = vmatprep.mubr.msk.f32.mxu1 %vm2151_vm2, %v15314_v17  ;;  %v4035_v17 = vld [vmem:[#allocation15 + $0x100] sm:$0xff] }
 0x3a2   : > { %11844 = vmatmul.mubr.msk.f32.gmra.mrb[14].mxu0 %vm2151_vm2, %v15490_v23 }
 0x3a3   : > { %11854 = vmatprep.mubr.msk.f32.mxu0 %vm2151_vm2, %v15319_v54 }
 0x3a4   : > { %11759 = vmatmul.mubr.msk.f32.vlgmr.msra.gmra.mrb[0].mxu1 %vm2151_vm2, %v15319_v54  ;;  %v12060_v54 = vpack.c.bf16 %v4036_v53, %v4035_v17 }
 0x3a5   : > { %11761 = vmatprep.mubr.msk.f32.mxu1 %vm2151_vm2, %v15326_v6  ;;  %12070 = vmatpush3.bf16.msra.mxu1 %v12069_v30 }
 0x3a6   : > { %11855 = vmatmul.mubr.msk.f32.vlgmr.msra.gmra.mrb[0].mxu0 %vm2151_vm2, %v15326_v6  ;;  %12071 = vmatprep.subr.bf16.mxu1 %v13870_v27  ;;  %v5606_v6 = vld [vmem:[#allocation18 + $0x30] sm:$0xff] }
 0x3a7   : > { %12055 = vmatpush3.bf16.msra.mxu0 %v15419_v31  ;;  %11857 = vmatprep.mubr.msk.f32.mxu0 %vm2151_vm2, %v15331_v57 }
 0x3a8   : > { %11762 = vmatmul.mubr.msk.f32.gmra.mrb[2].mxu1 %vm2151_vm2, %v15331_v57  ;;  %12057 = vmatprep.subr.bf16.mxu0 %v12056_v3  ;;  %v12078_v57 = vpack.c.bf16 %v5607_v41, %v5606_v6  ;;  %v13872_v41 = vmov 1966171168  }
 0x3a9   : > { %11764 = vmatprep.mubr.msk.f32.mxu1 %vm2151_vm2, %v15336_v39  ;;  %12073 = vmatpush3.bf16.msra.mxu1 %v12072_v29 }
 0x3aa   : > { %11858 = vmatmul.mubr.msk.f32.gmra.mrb[2].mxu0 %vm2151_vm2, %v15336_v39  ;;  %12074 = vmatprep.subr.bf16.mxu1 %v13870_v27  ;;  %v3564_v39 = vld [vmem:[#allocation3 + $0x80] sm:$0xff] }
 0x3ab   : > { %11860 = vmatprep.mubr.msk.f32.mxu0 %vm2151_vm2, %v15340_v2  ;;  %12059 = vmatpush3.bf16.msra.mxu0 %v12056_v3 }
 0x3ac   : > { %11765 = vmatmul.mubr.msk.f32.gmra.mrb[4].mxu1 %vm2151_vm2, %v15340_v2  ;;  %12061 = vmatprep.subr.bf16.mxu0 %v12060_v54  ;;  %v3572_v2 = vld [vmem:[#allocation3 + $0x120] sm:$0xff] }
 0x3ad   : > { %11767 = vmatprep.mubr.msk.f32.mxu1 %vm2151_vm2, %v15344_v51  ;;  %12076 = vmatpush3.bf16.msra.mxu1 %v12075_v32 }
 0x3ae   : > { %11861 = vmatmul.mubr.msk.f32.gmra.mrb[4].mxu0 %vm2151_vm2, %v15344_v51  ;;  %12077 = vmatprep.subr.bf16.mxu1 %v13870_v27  ;;  %v3573_v51 = vld [vmem:[#allocation3 + $0x130] sm:$0xff] }
 0x3af   : > { %11863 = vmatprep.mubr.msk.f32.mxu0 %vm2151_vm2, %v3564_v39 }
 0x3b0   : > { %11768 = vmatmul.mubr.msk.f32.gmra.mrb[6].mxu1 %vm2151_vm2, %v3564_v39  ;;  %v4298_v39 = vlaneseq }
 0x3b1   : > { %11770 = vmatprep.mubr.msk.f32.mxu1 %vm2151_vm2, %v15355_v46  ;;  %12079 = vmatpush3.bf16.msra.mxu1 %v12078_v57  ;;  %v4037_v46 = vld [vmem:[#allocation15 + $0x110] sm:$0xff]  ;;  %v4296_v57 = vunpack.c.l.s4 %v13872_v41 }
 0x3b2   : > { %11864 = vmatmul.mubr.msk.f32.gmra.mrb[6].mxu0 %vm2151_vm2, %v3565_v11  ;;  %12080 = vmatprep.subr.bf16.mxu1 %v13870_v27 }
 0x3b3   : > { %11866 = vmatprep.mubr.msk.f32.mxu0 %vm2151_vm2, %v15361_v16 }
 0x3b4   : > { %11771 = vmatmul.mubr.msk.f32.gmra.mrb[8].mxu1 %vm2151_vm2, %v15361_v16  ;;  %v4038_v16 = vld [vmem:[#allocation15 + $0x118] sm:$0xff] }
 0x3b5   : > { %11773 = vmatprep.mubr.msk.f32.mxu1 %vm2151_vm2, %v15367_v35 }
 0x3b6   : > { %11867 = vmatmul.mubr.msk.f32.gmra.mrb[8].mxu0 %vm2151_vm2, %v15367_v35  ;;  %v17432_v35 = vmov 0.0  }
 0x3b7   : > { %11869 = vmatprep.mubr.msk.f32.mxu0 %vm2151_vm2, %v15373_v42 }
 0x3b8   : > { %11774 = vmatmul.mubr.msk.f32.gmra.mrb[10].mxu1 %vm2151_vm2, %v15373_v42  ;;  %v5599_v42 = vld [vmem:[#allocation6] sm:$0x3] }
 0x3b9   : > { %11776 = vmatprep.mubr.msk.f32.mxu1 %vm2151_vm2, %v15380_v52 }
 0x3ba   : > { %11870 = vmatmul.mubr.msk.f32.gmra.mrb[10].mxu0 %vm2151_vm2, %v15380_v52  ;;  %v3788_v52 = vld [vmem:[#allocation3 + $0x21] sm:$0xff] }
 0x3bb   : > { %11872 = vmatprep.mubr.msk.f32.mxu0 %vm2151_vm2, %v15386_v47 }
 0x3bc   : > { %11777 = vmatmul.mubr.msk.f32.gmra.mrb[12].mxu1 %vm2151_vm2, %v15386_v47  ;;  %v12064_v47 = vpack.c.bf16 %v4038_v16, %v4037_v46  ;;  %v4297_v46 = vunpack.c.0.s8 %v4296_v57  ;;  %v4299_v16 = vshrl.u32 %v4298_v39, 7 }
 0x3bd   : > { %11779 = vmatprep.mubr.msk.f32.mxu1 %vm2151_vm2, %v15392_v21 }
 0x3be   : > { %11873 = vmatmul.mubr.msk.f32.gmra.mrb[12].mxu0 %vm2151_vm2, %v15392_v21  ;;  %v3789_v21 = vld [vmem:[#allocation3 + $0x31] sm:$0xff] }
 0x3bf   : > { %11875 = vmatprep.mubr.msk.f32.mxu0 %vm2151_vm2, %v3572_v2 }
 0x3c0   : > { %11780 = vmatmul.mubr.msk.f32.gmra.mrb[14].mxu1 %vm2151_vm2, %v3572_v2  ;;  %v15688_v2 = vld [vmem:[#allocation17] ss:$0 sm:$0xff] }
 0x3c1   : > { %11958 = vmatprep.mubr.msk.f32.mxu1 %vm13871_vm4, %v17432_v35 }
 0x3c2   : > { %11876 = vmatmul.mubr.msk.f32.gmra.mrb[14].mxu0 %vm2151_vm2, %v3573_v51 }
 0x3c3   : > { %11886 = vmatprep.mubr.msk.f32.mxu0 %vm2151_vm2, %v3788_v52 }
 0x3c4   : > { %11959 = vmatmul.mubr.msk.f32.vlgmr.msra.gmra.mrb[16].mxu1 %vm5615_vm5, %v5599_v42 }
 0x3c5   : > { %11993 = vmatprep.mubr.msk.f32.mxu1 %vm13871_vm4, %v17432_v35 }
 0x3c6   : > { %11887 = vmatmul.mubr.msk.f32.vlgmr.msra.gmra.mrb[0].mxu0 %vm2151_vm2, %v3789_v21 }
 0x3c7   : > { %12063 = vmatpush3.bf16.msra.mxu0 %v12060_v54  ;;  %11889 = vmatprep.mubr.msk.f32.mxu0 %vm2151_vm2, %v3790_v59 }
 0x3c8   : > { %12065 = vmatprep.subr.bf16.mxu0 %v12064_v47 }
 0x3ca   : > { %11890 = vmatmul.mubr.msk.f32.gmra.mrb[2].mxu0 %vm2151_vm2, %v12439_v5  ;;  %v15692_v5 = vsub.s32 %v4297_v46, %v4299_v16 }
 0x3cb   : > { %11892 = vmatprep.mubr.msk.f32.mxu0 %vm2151_vm2, %v15116_v15  ;;  %12067 = vmatpush3.bf16.msra.mxu0 %v12064_v47  ;;  %v3803_v15 = vld [vmem:[#allocation3 + $0x131] sm:$0xff] }
 0x3ce   : > { %11893 = vmatmul.mubr.msk.f32.gmra.mrb[4].mxu0 %vm2151_vm2, %v15132_v24  ;;  %v4025_v24 = vld [vmem:[#allocation3 + $0x92] sm:$0xff] }
 0x3cf   : > { %11895 = vmatprep.mubr.msk.f32.mxu0 %vm2151_vm2, %v15346_v19 }
 0x3d2   : > { %11896 = vmatmul.mubr.msk.f32.gmra.mrb[6].mxu0 %vm2151_vm2, %v3795_v58 }
 0x3d3   : > { %11898 = vmatprep.mubr.msk.f32.mxu0 %vm2151_vm2, %v15253_v49  ;;  %v4033_v49 = vld [vmem:[#allocation3 + $0x132] sm:$0xff] }
 0x3d6   : > { %11899 = vmatmul.mubr.msk.f32.gmra.mrb[8].mxu0 %vm2151_vm2, %v15268_v62  ;;  %v5690_v62 = vld [vmem:[%s17433_s21] sm:$0xff] }
 0x3d7   : > { %11901 = vmatprep.mubr.msk.f32.mxu0 %vm2151_vm2, %v15287_v38  ;;  %v5691_v38 = vld [vmem:[%s17434_s29 + $0x8] sm:$0xff] }
 0x3da   : > { %11902 = vmatmul.mubr.msk.f32.gmra.mrb[10].mxu0 %vm2151_vm2, %v15295_v22  ;;  %v12081_v22 = vpack.c.bf16 %v5691_v38, %v5690_v62 }
 0x3db   : > { %11904 = vmatprep.mubr.msk.f32.mxu0 %vm2151_vm2, %v15303_v0  ;;  %v5692_v0 = vld [vmem:[%s17434_s29 + $0x10] sm:$0xff] }
 0x3dc   : > { %12082 = vmatpush3.bf16.msra.mxu1 %v12081_v22 }
 0x3dd   : > { %12083 = vmatprep.subr.bf16.mxu1 %v13870_v27 }
 0x3de   : > { %11905 = vmatmul.mubr.msk.f32.gmra.mrb[12].mxu0 %vm2151_vm2, %v15308_v13  ;;  %v5693_v13 = vld [vmem:[%s17434_s29 + $0x18] sm:$0xff] }
 0x3df   : > { %11907 = vmatprep.mubr.msk.f32.mxu0 %vm2151_vm2, %v15396_v50  ;;  %v12084_v19 = vpack.c.bf16 %v5693_v13, %v5692_v0  ;;  %v5694_v50 = vld [vmem:[%s17434_s29 + $0x20] sm:$0xff] }
 0x3e0   : > { %v4291_v0 = vld [vmem:[#allocation4] sm:$0x1] }
 0x3e1   : > { %12085 = vmatpush3.bf16.msra.mxu1 %v12084_v19 }
 0x3e2   : > { %11908 = vmatmul.mubr.msk.f32.gmra.mrb[14].mxu0 %vm2151_vm2, %v3803_v15  ;;  %12086 = vmatprep.subr.bf16.mxu1 %v13870_v27 }
 0x3e3   : > { %11918 = vmatprep.mubr.msk.f32.mxu0 %vm2151_vm2, %v15403_v44  ;;  %v12087_v44 = vpack.c.bf16 %v5695_v48, %v5694_v50 }
 0x3e5   : > { %12088 = vmatpush3.bf16.msra.mxu1 %v12087_v44 }
 0x3e6   : > { %11919 = vmatmul.mubr.msk.f32.vlgmr.msra.gmra.mrb[0].mxu0 %vm2151_vm2, %v15410_v45  ;;  %12089 = vmatprep.subr.bf16.mxu1 %v13870_v27  ;;  %v5698_v45 = vld [vmem:[%s17434_s29 + $0x40] sm:$0xff] }
 0x3e7   : > { %11921 = vmatprep.mubr.msk.f32.mxu0 %vm2151_vm2, %v15417_v7  ;;  %v5699_v7 = vld [vmem:[%s17434_s29 + $0x48] sm:$0xff] }
 0x3e8   : > { %v12093_v31 = vpack.c.bf16 %v5699_v7, %v5698_v45 }
 0x3e9   : > { %12091 = vmatpush3.bf16.msra.mxu1 %v12090_v63 }
 0x3ea   : > { %11922 = vmatmul.mubr.msk.f32.gmra.mrb[2].mxu0 %vm2151_vm2, %v15425_v56  ;;  %12092 = vmatprep.subr.bf16.mxu1 %v13870_v27  ;;  %v5700_v56 = vld [vmem:[%s17434_s29 + $0x50] sm:$0xff] }
 0x3eb   : > { %11924 = vmatprep.mubr.msk.f32.mxu0 %vm2151_vm2, %v15432_v28  ;;  %v5701_v28 = vld [vmem:[%s17434_s29 + $0x58] sm:$0xff] }
 0x3ed   : > { %12094 = vmatpush3.bf16.msra.mxu1 %v12093_v31  ;;  %v4548_v31 = vld [vmem:[#allocation4 + $0xc] sm:$0x1] }
 0x3ee   : > { %11925 = vmatmul.mubr.msk.f32.gmra.mrb[4].mxu0 %vm2151_vm2, %v15439_v43  ;;  %12095 = vmatprep.subr.bf16.mxu1 %v13870_v27  ;;  %v12096_v43 = vpack.c.bf16 %v5701_v28, %v5700_v56 }
 0x3ef   : > { %11927 = vmatprep.mubr.msk.f32.mxu0 %vm2151_vm2, %v15445_v18  ;;  %v5703_v18 = vld [vmem:[%s17434_s29 + $0x68] sm:$0xff] }
 0x3f0   : > { %v12099_v14 = vpack.c.bf16 %v5703_v18, %v5702_v8  ;;  %v4463_v8 = vld [vmem:[#allocation4 + $0x8] sm:$0x1] }
 0x3f1   : > { %12097 = vmatpush3.bf16.msra.mxu1 %v12096_v43 }
 0x3f2   : > { %11928 = vmatmul.mubr.msk.f32.gmra.mrb[6].mxu0 %vm2151_vm2, %v4025_v24  ;;  %12098 = vmatprep.subr.bf16.mxu1 %v13870_v27 }
 0x3f3   : > { %11930 = vmatprep.mubr.msk.f32.mxu0 %vm2151_vm2, %v15452_v25  ;;  %v5704_v25 = vld [vmem:[%s17434_s29 + $0x70] sm:$0xff] }
 0x3f5   : > { %12100 = vmatpush3.bf16.msra.mxu1 %v12099_v14 }
 0x3f6   : > { %11931 = vmatmul.mubr.msk.f32.gmra.mrb[8].mxu0 %vm2151_vm2, %v15458_v4  ;;  %v5705_v4 = vld [vmem:[%s17434_s29 + $0x78] sm:$0xff]  ;;  %12101 = vmatprep.subr.bf16.mxu1 %v13870_v27 }
 0x3f7   : > { %11933 = vmatprep.mubr.msk.f32.mxu0 %vm2151_vm2, %v15464_v55  ;;  %v12102_v55 = vpack.c.bf16 %v5705_v4, %v5704_v25 }
 0x3f9   : > { %12103 = vmatpush3.bf16.msra.mxu1 %v12102_v55 }
 0x3fa   : > { %11934 = vmatmul.mubr.msk.f32.gmra.mrb[10].mxu0 %vm2151_vm2, %v15470_v1 }
 0x3fb   : > { %11936 = vmatprep.mubr.msk.f32.mxu0 %vm2151_vm2, %v15476_v61 }
 0x3fe   : > { %11937 = vmatmul.mubr.msk.f32.gmra.mrb[12].mxu0 %vm2151_vm2, %v15482_v10 }
 0x3ff   : > { %11939 = vmatprep.mubr.msk.f32.mxu0 %vm2151_vm2, %v15490_v23 }
 0x402   : > { %11940 = vmatmul.mubr.msk.f32.gmra.mrb[14].mxu0 %vm2151_vm2, %v4033_v49  ;;  %v4378_v49 = vld [vmem:[#allocation4 + $0x4] sm:$0x1] }
 0x477   : > { %v11760_v1 = vpop.f32.mrb[0].mxu1 }
 0x478   : > { %v3002_v61 = vpop.f32.mrb[1].mxu1 }
 0x47b   : > { %v11763_v10 = vpop.f32.mrb[2].mxu1 }
 0x47c   : > { %v3012_v9 = vpop.f32.mrb[3].mxu1 }
 0x47f   : > { %v11766_v60 = vpop.f32.mrb[4].mxu1 }
 0x480   : > { %v3022_v23 = vpop.f32.mrb[5].mxu1 }
 0x483   : > { %v15668_v36 = vpop.f32.mrb[6].mxu1 }
 0x484   : > { %v15670_v12 = vpop.f32.mrb[7].mxu1 }
 0x487   : > { %v15672_v30 = vpop.f32.mrb[8].mxu1 }
 0x488   : > { %v15674_v33 = vpop.f32.mrb[9].mxu1 }
 0x48b   : > { %v15676_v34 = vpop.f32.mrb[10].mxu1 }
 0x48c   : > { %v15678_v3 = vpop.f32.mrb[11].mxu1 }
 0x48f   : > { %v15680_v27 = vpop.f32.mrb[12].mxu1 }
 0x490   : > { %v15682_v17 = vpop.f32.mrb[13].mxu1 }
 0x493   : > { %v15684_v53 = vpop.f32.mrb[14].mxu1 }
 0x494   : > { %v15686_v29 = vpop.f32.mrb[15].mxu1 }
 0x497   : > { %v5685_v37 = vpop.f32.mrb[16].mxu1 }
 0x498   : > { %v5686_v54 = vadd.f32 %v10833_v40, %v5685_v37  ;;  %v11960_v32 = vpop.f32.mrb[17].mxu1 }
 0x499   : > { %v4633_v32 = vld [vmem:[#allocation4 + $0x10] sm:$0x1] }
 0x49a   : > { %v5689_v6 = vmax.f32 %v5686_v54, 0.0 }
 0x49c   : > { %11994 = vmatmul.mubr.f32.vlgmr.msra.gmra.mrb[18].mxu1 %v5689_v6 }
 0x4b9   : > { %v11920_v11 = vpop.f32.mrb[0].mxu0 }
 0x4ba   : > { %v12104_v51 = vadd.f32 %v11920_v11, %v11760_v1  ;;  %v4153_v35 = vpop.f32.mrb[1].mxu0 }
 0x4bb   : > { %v12105_v42 = vadd.f32 %v4153_v35, %v3002_v61 }
 0x4bc   : > { %v4256_v52 = vadd.f32 %v12104_v51, %v15688_v2 }
 0x4bd   : > { %v4255_v47 = vadd.f32 %v12105_v42, %v15688_v2  ;;  %v11923_v21 = vpop.f32.mrb[2].mxu0 }
 0x4be   : > { %v4272_v59 = vmax.f32 %v4256_v52, 0.0  ;;  %v12106_v58 = vadd.f32 %v11923_v21, %v11763_v10  ;;  %v4163_v15 = vpop.f32.mrb[3].mxu0  ;;  %v4888_v21 = vld [vmem:[#allocation4 + $0x1c] sm:$0x1] }
 0x4bf   : > { %v4271_v62 = vmax.f32 %v4255_v47, 0.0  ;;  %v12107_v38 = vadd.f32 %v4163_v15, %v3012_v9 }
 0x4c0   : > { %v4377_v22 = vpack.c.bf16 %v4272_v59, %v4272_v59  ;;  %v4258_v13 = vadd.f32 %v12106_v58, %v15688_v2 }
 0x4c1   : > { %v4287_v19 = vpack.c.bf16 %v4271_v62, %v4271_v62  ;;  %v4257_v50 = vadd.f32 %v12107_v38, %v15688_v2  ;;  %v11926_v48 = vpop.f32.mrb[4].mxu0  ;;  %v4803_v38 = vld [vmem:[#allocation4 + $0x18] sm:$0x1] }
 0x4c2   : > { %v4379_v44 = vsel %vm15696_vm8, %v4377_v22, %v4378_v49  ;;  %v4388_v26 = vrot.slane %v4377_v22, %v15692_v5  ;;  %v4274_v20 = vmax.f32 %v4258_v13, 0.0  ;;  %v12108_v63 = vadd.f32 %v11926_v48, %v11766_v60  ;;  %v4173_v45 = vpop.f32.mrb[5].mxu0 }
 0x4c3   : > { %4380 = vst [vmem:[#allocation4 + $0x4] sm:$0x1] %v4379_v44  ;;  %v4292_v7 = vsel %vm15696_vm8, %v4287_v19, %v4291_v0  ;;  %v4273_v56 = vmax.f32 %v4257_v50, 0.0  ;;  %v12109_v28 = vadd.f32 %v4173_v45, %v3022_v23  ;;  %v4301_v1 = vrot.slane %v4287_v19, %v15692_v5  ;;  %v4718_v23 = vld [vmem:[#allocation4 + $0x14] sm:$0x1] }
 0x4c4   : > { %4293 = vst [vmem:[#allocation4] sm:$0x1] %v4292_v7  ;;  %v15707_v43 = vpack.c.bf16 %v4274_v20, %v4274_v20  ;;  %v4260_v18 = vadd.f32 %v12108_v63, %v15688_v2  ;;  %v4407_v55 = vcombine.high %v4388_v26, %v4388_v26  ;;  %v4395_v37 = vrot.slane %v4388_v26, %v15692_v5 }
 0x4c5   : > { %v15710_v14 = vpack.c.bf16 %v4273_v56, %v4273_v56  ;;  %v4259_v25 = vadd.f32 %v12109_v28, %v15688_v2  ;;  %v11929_v4 = vpop.f32.mrb[6].mxu0  ;;  %v4322_v51 = vcombine.high %v4301_v1, %v4301_v1 }
 0x4c6   : > { %v4549_v61 = vsel %vm15696_vm8, %v15707_v43, %v4548_v31  ;;  %v4276_v10 = vmax.f32 %v4260_v18, 0.0  ;;  %v4183_v9 = vpop.f32.mrb[7].mxu0  ;;  %v12110_v6 = vadd.f32 %v11929_v4, %v15668_v36  ;;  %v15728_v11 = vrot.slane %v4407_v55, %v15692_v5 }
 0x4c7   : > { %4550 = vst [vmem:[#allocation4 + $0xc] sm:$0x1] %v4549_v61  ;;  %v4464_v60 = vsel %vm15696_vm8, %v15710_v14, %v4463_v8  ;;  %v4275_v40 = vmax.f32 %v4259_v25, 0.0  ;;  %v12111_v57 = vadd.f32 %v4183_v9, %v15670_v12  ;;  %v4308_v12 = vrot.slane %v4301_v1, %v15692_v5 }
 0x4c8   : > { %4465 = vst [vmem:[#allocation4 + $0x8] sm:$0x1] %v4464_v60  ;;  %v15721_v54 = vpack.c.bf16 %v4276_v10, %v4276_v10  ;;  %v4262_v16 = vadd.f32 %v12110_v6, %v15688_v2  ;;  %v4397_v47 = vshrl.u32 %v4395_v37, 16  ;;  %v15741_v49 = vrot.slane %v4322_v51, %v15692_v5 }
 0x4c9   : > { %v15724_v41 = vpack.c.bf16 %v4275_v40, %v4275_v40  ;;  %v11932_v39 = vpop.f32.mrb[8].mxu0  ;;  %v4261_v42 = vadd.f32 %v12111_v57, %v15688_v2  ;;  %v4420_v22 = vshrl.u32 %v15728_v11, 16  ;;  %v4310_v44 = vshrl.u32 %v4308_v12, 16 }
 0x4ca   : > { %v4719_v46 = vsel %vm15696_vm8, %v15721_v54, %v4718_v23  ;;  %v4193_v35 = vpop.f32.mrb[9].mxu0  ;;  %v4278_v52 = vmax.f32 %v4262_v16, 0.0  ;;  %v12112_v58 = vadd.f32 %v11932_v39, %v15672_v30  ;;  %4401 = vrot.lane.b32.xlu0 %v4397_v47, %s13873_s18  ;;  %v4335_v31 = vshrl.u32 %v15741_v49, 16 }
 0x4cb   : > { %4720 = vst [vmem:[#allocation4 + $0x14] sm:$0x1] %v4719_v46  ;;  %v4634_v36 = vsel %vm15696_vm8, %v15724_v41, %v4633_v32  ;;  %v4277_v59 = vmax.f32 %v4261_v42, 0.0  ;;  %v12113_v0 = vadd.f32 %v4193_v35, %v15674_v33  ;;  %4424 = vrot.lane.b32.xlu1 %v4420_v22, %s13873_s18  ;;  %v15767_v4 = vcombine.high %v4395_v37, %v4395_v37 }
 0x4cc   : > { %4635 = vst [vmem:[#allocation4 + $0x10] sm:$0x1] %v4634_v36  ;;  %v15743_v62 = vpack.c.bf16 %v4278_v52, %v4278_v52  ;;  %v4264_v50 = vadd.f32 %v12112_v58, %v15688_v2  ;;  %v15780_v60 = vcombine.high %v15728_v11, %v15728_v11  ;;  %v4473_v40 = vrot.slane %v15710_v14, %v15692_v5 }
 0x4cd   : > { %v11935_v15 = vpop.f32.mrb[10].mxu0  ;;  %v15748_v19 = vpack.c.bf16 %v4277_v59, %v4277_v59  ;;  %v4263_v48 = vadd.f32 %v12113_v0, %v15688_v2  ;;  %v15791_v51 = vcombine.high %v4308_v12, %v4308_v12  ;;  %v15800_v42 = vcombine.high %v15741_v49, %v15741_v49 }
 0x4ce   : > { %v4203_v13 = vpop.f32.mrb[11].mxu0  ;;  %v4889_v30 = vsel %vm15696_vm8, %v15743_v62, %v4888_v21  ;;  %v12114_v26 = vadd.f32 %v11935_v15, %v15676_v34  ;;  %v4280_v20 = vmax.f32 %v4264_v50, 0.0  ;;  %4314 = vrot.lane.b32.xlu0 %v4310_v44, %s13873_s18  ;;  %v4558_v34 = vrot.slane %v15707_v43, %v15692_v5 }
 0x4cf   : > { %4890 = vst [vmem:[#allocation4 + $0x1c] sm:$0x1] %v4889_v30  ;;  %v4804_v33 = vsel %vm15696_vm8, %v15748_v19, %v4803_v38  ;;  %v4279_v45 = vmax.f32 %v4263_v48, 0.0  ;;  %v12115_v8 = vadd.f32 %v4203_v13, %v15678_v3  ;;  %4339 = vrot.lane.b32.xlu1 %v4335_v31, %s13873_s18  ;;  %v4436_v43 = vshrl.u32 %v15767_v4, 16 }
 0x4d0   : > { %4805 = vst [vmem:[#allocation4 + $0x18] sm:$0x1] %v4804_v33  ;;  %v4266_v7 = vadd.f32 %v12114_v26, %v15688_v2  ;;  %v5053_v28 = vpack.c.bf16 %v4280_v20, %v4280_v20  ;;  %v4577_v6 = vcombine.high %v4558_v34, %v4558_v34  ;;  %v4452_v39 = vshrl.u32 %v15780_v60, 16 }
 0x4d1   : > { %v11938_v63 = vpop.f32.mrb[12].mxu0  ;;  %v4972_v18 = vpack.c.bf16 %v4279_v45, %v4279_v45  ;;  %v4265_v1 = vadd.f32 %v12115_v8, %v15688_v2  ;;  %v4565_v36 = vrot.slane %v4558_v34, %v15692_v5  ;;  %v4492_v58 = vcombine.high %v4473_v40, %v4473_v40 }
 0x4d2   : > { %v4213_v56 = vpop.f32.mrb[13].mxu0  ;;  %v4282_v25 = vmax.f32 %v4266_v7, 0.0  ;;  %v15770_v55 = vrot.slane %v5053_v28, %v15692_v5  ;;  %v12116_v61 = vadd.f32 %v11938_v63, %v15680_v27  ;;  %4440 = vrot.lane.b32.xlu0 %v4436_v43, %s13873_s18  ;;  %v4367_v15 = vshrl.u32 %v15800_v42, 16 }
 0x4d3   : > { %v15775_v9 = vrot.slane %v4972_v18, %v15692_v5  ;;  %v4281_v37 = vmax.f32 %v4265_v1, 0.0  ;;  %v12117_v27 = vadd.f32 %v4213_v56, %v15682_v17  ;;  %4456 = vrot.lane.b32.xlu1 %v4452_v39, %s13873_s18  ;;  %v4351_v17 = vshrl.u32 %v15791_v51, 16 }
 0x4d4   : > { %v5209_v3 = vpack.c.bf16 %v4282_v25, %v4282_v25  ;;  %v4268_v32 = vadd.f32 %v12116_v61, %v15688_v2  ;;  %v4480_v13 = vrot.slane %v4473_v40, %v15692_v5  ;;  %v4567_v30 = vshrl.u32 %v4565_v36, 16 }
 0x4d5   : > { %v11941_v10 = vpop.f32.mrb[14].mxu0  ;;  %v5131_v46 = vpack.c.bf16 %v4281_v37, %v4281_v37  ;;  %v4267_v35 = vadd.f32 %v12117_v27, %v15688_v2  ;;  %v15816_v26 = vrot.slane %v4492_v58, %v15692_v5  ;;  %v4728_v63 = vrot.slane %v15721_v54, %v15692_v5 }
 0x4d6   : > { %v4223_v23 = vpop.f32.mrb[15].mxu0  ;;  %v15787_v57 = vrot.slane %v5209_v3, %v15692_v5  ;;  %v4284_v16 = vmax.f32 %v4268_v32, 0.0  ;;  %v12118_v14 = vadd.f32 %v11941_v10, %v15684_v53  ;;  %v15806_v53 = vrot.slane %v4577_v6, %v15692_v5  ;;  %4355 = vrot.lane.b32.xlu0 %v4351_v17, %s13873_s18 }
 0x4d7   : > { %v12119_v52 = vadd.f32 %v4223_v23, %v15686_v29  ;;  %v5139_v12 = vrot.slane %v5131_v46, %v15692_v5  ;;  %v4283_v21 = vmax.f32 %v4267_v35, 0.0  ;;  %4371 = vrot.lane.b32.xlu1 %v4367_v15, %s13873_s18  ;;  %v4482_v7 = vshrl.u32 %v4480_v13, 16 }
 0x4d8   : > { %v5365_v47 = vpack.c.bf16 %v4284_v16, %v4284_v16  ;;  %v4270_v59 = vadd.f32 %v12118_v14, %v15688_v2  ;;  %v15829_v31 = vcombine.high %v4565_v36, %v4565_v36  ;;  %v5082_v56 = vcombine.high %v15770_v55, %v15770_v55 }
 0x4d9   : > { %v4269_v38 = vadd.f32 %v12119_v52, %v15688_v2  ;;  %v5287_v0 = vpack.c.bf16 %v4283_v21, %v4283_v21  ;;  %v4590_v2 = vshrl.u32 %v15806_v53, 16  ;;  %v5004_v28 = vcombine.high %v15775_v9, %v15775_v9 }
 0x4da   : > { %v5373_v22 = vrot.slane %v5365_v47, %v15692_v5  ;;  %v4286_v29 = vmax.f32 %v4270_v59, 0.0  ;;  %4571 = vrot.lane.b32.xlu0 %v4567_v30, %s13873_s18  ;;  %v4505_v8 = vshrl.u32 %v15816_v26, 16  ;;  %v15839_v54 = vcombine.high %v15806_v53, %v15806_v53 }
 0x4db   : > { %v4285_v50 = vmax.f32 %v4269_v38, 0.0  ;;  %v5295_v48 = vrot.slane %v5287_v0, %v15692_v5  ;;  %4594 = vrot.lane.b32.xlu1 %v4590_v2, %s13873_s18  ;;  %v4747_v34 = vcombine.high %v4728_v63, %v4728_v63  ;;  %v4643_v18 = vrot.slane %v15724_v41, %v15692_v5  ;;  %v4416_v0 = vld [vmem:[#allocation4 + $0x5] sm:$0x1]  ;;  %v4331_v2 = vld [vmem:[#allocation4 + $0x1] sm:$0x1] }
 0x4dc   : > { %v5521_v44 = vpack.c.bf16 %v4286_v29, %v4286_v29  ;;  %v4606_v25 = vshrl.u32 %v15829_v31, 16  ;;  %v15845_v1 = vcombine.high %v4480_v13, %v4480_v13  ;;  %v5238_v61 = vcombine.high %v15787_v57, %v15787_v57 }
 0x4dd   : > { %v5443_v33 = vpack.c.bf16 %v4285_v50, %v4285_v50  ;;  %v15851_v10 = vcombine.high %v15816_v26, %v15816_v26  ;;  %v15855_v3 = vrot.slane %v15770_v55, %v15692_v5  ;;  %v15858_v43 = vrot.slane %v5082_v56, %v15692_v5 }
 0x4de   : > { %v15821_v20 = vrot.slane %v5521_v44, %v15692_v5  ;;  %4486 = vrot.lane.b32.xlu0 %v4482_v7, %s13873_s18  ;;  %v5160_v41 = vcombine.high %v5139_v12, %v5139_v12  ;;  %v4622_v23 = vshrl.u32 %v15839_v54, 16  ;;  %v15864_v40 = vrot.slane %v15775_v9, %v15692_v5 }
 0x4df   : > { %v15826_v45 = vrot.slane %v5443_v33, %v15692_v5  ;;  %4509 = vrot.lane.b32.xlu1 %v4505_v8, %s13873_s18  ;;  %v15867_v37 = vrot.slane %v5004_v28, %v15692_v5  ;;  %v4735_v32 = vrot.slane %v4728_v63, %v15692_v5  ;;  %v4662_v27 = vcombine.high %v4643_v18, %v4643_v18  ;;  %v4432_v63 = vld [vmem:[#allocation4 + $0x6] sm:$0x1] }
 0x4e0   : > { %v4521_v55 = vshrl.u32 %v15845_v1, 16  ;;  %v15873_v6 = vrot.slane %v4747_v34, %v15692_v5  ;;  %v5394_v39 = vcombine.high %v5373_v22, %v5373_v22  ;;  %v5316_v46 = vcombine.high %v5295_v48, %v5295_v48  ;;  %v4448_v34 = vld [vmem:[#allocation4 + $0x7] sm:$0x1] }
 0x4e1   : > { %v4537_v16 = vshrl.u32 %v15851_v10, 16  ;;  %v15879_v9 = vrot.slane %v15787_v57, %v15692_v5  ;;  %v15882_v35 = vrot.slane %v5238_v61, %v15692_v5  ;;  %v15885_v14 = vrot.slane %v5139_v12, %v15692_v5 }
 0x4e2   : > { %4610 = vrot.lane.b32.xlu0 %v4606_v25, %s13873_s18  ;;  %v15888_v36 = vrot.slane %v5160_v41, %v15692_v5  ;;  %v4898_v17 = vrot.slane %v15743_v62, %v15692_v5  ;;  %v4650_v52 = vrot.slane %v4643_v18, %v15692_v5  ;;  %v4813_v47 = vrot.slane %v15748_v19, %v15692_v5  ;;  %v4347_v18 = vld [vmem:[#allocation4 + $0x2] sm:$0x1]  ;;  %v4363_v25 = vld [vmem:[#allocation4 + $0x3] sm:$0x1]  ;;  %v4501_v41 = vld [vmem:[#allocation4 + $0x9] sm:$0x1] }
 0x4e3   : > { %4626 = vrot.lane.b32.xlu1 %v4622_v23, %s13873_s18  ;;  %v4737_v57 = vshrl.u32 %v4735_v32, 16  ;;  %v15897_v21 = vrot.slane %v4662_v27, %v15692_v5  ;;  %v5550_v12 = vcombine.high %v15821_v20, %v15821_v20  ;;  %v4760_v59 = vshrl.u32 %v15873_v6, 16  ;;  %v4602_v23 = vld [vmem:[#allocation4 + $0xe] sm:$0x1] }
 0x4e4   : > { %v15904_v62 = vrot.slane %v5373_v22, %v15692_v5  ;;  %v15907_v58 = vrot.slane %v5394_v39, %v15692_v5  ;;  %v15910_v19 = vrot.slane %v5295_v48, %v15692_v5  ;;  %v15913_v15 = vrot.slane %v5316_v46, %v15692_v5  ;;  %v4517_v39 = vld [vmem:[#allocation4 + $0xa] sm:$0x1]  ;;  %v4533_v46 = vld [vmem:[#allocation4 + $0xb] sm:$0x1] }
 0x4e5   : > { %v4917_v38 = vcombine.high %v4898_v17, %v4898_v17  ;;  %v4832_v29 = vcombine.high %v4813_v47, %v4813_v47  ;;  %v5472_v13 = vcombine.high %v15826_v45, %v15826_v45  ;;  %v4652_v50 = vshrl.u32 %v4650_v52, 16 }
 0x4e6   : > { %4525 = vrot.lane.b32.xlu0 %v4521_v55, %s13873_s18  ;;  %v15918_v22 = vcombine.high %v4735_v32, %v4735_v32  ;;  %v15921_v30 = vrot.slane %v4898_v17, %v15692_v5  ;;  %v4675_v48 = vshrl.u32 %v15897_v21, 16  ;;  %v15926_v44 = vcombine.high %v15873_v6, %v15873_v6  ;;  %v4618_v55 = vld [vmem:[#allocation4 + $0xf] sm:$0x1] }
 0x4e7   : > { %4541 = vrot.lane.b32.xlu1 %v4537_v16, %s13873_s18  ;;  %v15928_v33 = vcombine.high %v4650_v52, %v4650_v52  ;;  %v15933_v7 = vrot.slane %v15821_v20, %v15692_v5  ;;  %v15936_v56 = vrot.slane %v5550_v12, %v15692_v5  ;;  %v4417_v28 = vsel %vm15696_vm8, %v15728_v11, %v4416_v0  ;;  %v4586_v20 = vld [vmem:[#allocation4 + $0xd] sm:$0x1]  ;;  %v4772_v12 = vld [vmem:[#allocation4 + $0x16] sm:$0x1] }
 0x4e8   : > { %v15943_v8 = vrot.slane %v15826_v45, %v15692_v5  ;;  %v15946_v61 = vrot.slane %v4917_v38, %v15692_v5  ;;  %4418 = vst [vmem:[#allocation4 + $0x5] sm:$0x1] %v4417_v28  ;;  %v15949_v32 = vrot.slane %v4813_v47, %v15692_v5  ;;  %v15952_v27 = vrot.slane %v4832_v29, %v15692_v5  ;;  %v4841_v28 = vld [vmem:[#allocation4 + $0x19] sm:$0x1] }
 0x4e9   : > { %v4776_v11 = vshrl.u32 %v15918_v22, 16  ;;  %v15957_v45 = vrot.slane %v5472_v13, %v15692_v5  ;;  %v4701_v16 = vcombine.high %v15897_v21, %v15897_v21  ;;  %v4332_v17 = vsel %vm15696_vm8, %v15741_v49, %v4331_v2  ;;  %v4756_v5 = vld [vmem:[#allocation4 + $0x15] sm:$0x1]  ;;  %v4926_v2 = vld [vmem:[#allocation4 + $0x1d] sm:$0x1] }
 0x4ea   : > { %4741 = vrot.lane.b32.xlu0 %v4737_v57, %s13873_s18  ;;  %v4433_v52 = vsel %vm15696_vm8, %v15767_v4, %v4432_v63  ;;  %v4449_v47 = vsel %vm15696_vm8, %v15780_v60, %v4448_v34  ;;  %v4671_v57 = vld [vmem:[#allocation4 + $0x11] sm:$0x1]  ;;  %v4691_v38 = vshrl.u32 %v15928_v33, 16  ;;  %v4907_v0 = vshrl.u32 %v15921_v30, 16  ;;  %4333 = vst [vmem:[#allocation4 + $0x1] sm:$0x1] %v4332_v17 }
 0x4eb   : > { %4764 = vrot.lane.b32.xlu1 %v4760_v59, %s13873_s18  ;;  %v4792_v59 = vshrl.u32 %v15926_v44, 16  ;;  %4434 = vst [vmem:[#allocation4 + $0x6] sm:$0x1] %v4433_v52  ;;  %4450 = vst [vmem:[#allocation4 + $0x7] sm:$0x1] %v4449_v47  ;;  %v4348_v49 = vsel %vm15696_vm8, %v15791_v51, %v4347_v18  ;;  %v15979_v60 = vcombine.high %v15921_v30, %v15921_v30  ;;  %v4822_v17 = vshrl.u32 %v15949_v32, 16 }
 0x4ec   : > { %v4687_v4 = vld [vmem:[#allocation4 + $0x12] sm:$0x1]  ;;  %v15983_v29 = vcombine.high %v15946_v61, %v15946_v61  ;;  %4349 = vst [vmem:[#allocation4 + $0x2] sm:$0x1] %v4348_v49  ;;  %v4364_v13 = vsel %vm15696_vm8, %v15800_v42, %v4363_v25  ;;  %v4703_v51 = vld [vmem:[#allocation4 + $0x13] sm:$0x1]  ;;  %v4855_v30 = vcombine.high %v15949_v32, %v15949_v32  ;;  %v4871_v63 = vcombine.high %v15952_v27, %v15952_v27 }
 0x4ed   : > { %4365 = vst [vmem:[#allocation4 + $0x3] sm:$0x1] %v4364_v13  ;;  %v4502_v42 = vsel %vm15696_vm8, %v15816_v26, %v4501_v41  ;;  %v4942_v34 = vld [vmem:[#allocation4 + $0x1e] sm:$0x1]  ;;  %v4857_v18 = vld [vmem:[#allocation4 + $0x1a] sm:$0x1]  ;;  %v4534_v26 = vsel %vm15696_vm8, %v15851_v10, %v4533_v46  ;;  %v16119_v49 = vcombine.high %v15888_v36, %v15888_v36  ;;  %v16151_v13 = vcombine.high %v15913_v15, %v15913_v15 }
 0x4ee   : > { %4656 = vrot.lane.b32.xlu0 %v4652_v50, %s13873_s18  ;;  %v4587_v50 = vsel %vm15696_vm8, %v15806_v53, %v4586_v20  ;;  %v4603_v53 = vsel %vm15696_vm8, %v15829_v31, %v4602_v23  ;;  %v4707_v25 = vshrl.u32 %v4701_v16, 16  ;;  %4503 = vst [vmem:[#allocation4 + $0x9] sm:$0x1] %v4502_v42  ;;  %v4619_v20 = vsel %vm15696_vm8, %v15839_v54, %v4618_v55  ;;  %v4958_v41 = vld [vmem:[#allocation4 + $0x1f] sm:$0x1] }
 0x4ef   : > { %4679 = vrot.lane.b32.xlu1 %v4675_v48, %s13873_s18  ;;  %v4788_v48 = vld [vmem:[#allocation4 + $0x17] sm:$0x1]  ;;  %4588 = vst [vmem:[#allocation4 + $0xd] sm:$0x1] %v4587_v50  ;;  %4604 = vst [vmem:[#allocation4 + $0xe] sm:$0x1] %v4603_v53  ;;  %v4757_v23 = vsel %vm15696_vm8, %v15873_v6, %v4756_v5  ;;  %v4672_v54 = vsel %vm15696_vm8, %v15897_v21, %v4671_v57  ;;  %v4688_v6 = vsel %vm15696_vm8, %v15928_v33, %v4687_v4 }
 0x4f0   : > { %v4873_v31 = vld [vmem:[#allocation4 + $0x1b] sm:$0x1]  ;;  %4620 = vst [vmem:[#allocation4 + $0xf] sm:$0x1] %v4619_v20  ;;  %4535 = vst [vmem:[#allocation4 + $0xb] sm:$0x1] %v4534_v26  ;;  %v4789_v10 = vsel %vm15696_vm8, %v15926_v44, %v4788_v48  ;;  %v4704_v55 = vsel %vm15696_vm8, %v4701_v16, %v4703_v51  ;;  %v4927_v21 = vsel %vm15696_vm8, %v15946_v61, %v4926_v2 }
 0x4f1   : > { %4758 = vst [vmem:[#allocation4 + $0x15] sm:$0x1] %v4757_v23  ;;  %4673 = vst [vmem:[#allocation4 + $0x11] sm:$0x1] %v4672_v54  ;;  %v4943_v44 = vsel %vm15696_vm8, %v15979_v60, %v4942_v34  ;;  %v4959_v33 = vsel %vm15696_vm8, %v15983_v29, %v4958_v41  ;;  %v4874_v46 = vsel %vm15696_vm8, %v4871_v63, %v4873_v31  ;;  %v4930_v16 = vshrl.u32 %v15946_v61, 16 }
 0x4f2   : > { %4780 = vrot.lane.b32.xlu0 %v4776_v11, %s13873_s18  ;;  %v4518_v11 = vsel %vm15696_vm8, %v15845_v1, %v4517_v39  ;;  %v4773_v1 = vsel %vm15696_vm8, %v15918_v22, %v4772_v12  ;;  %4790 = vst [vmem:[#allocation4 + $0x17] sm:$0x1] %v4789_v10  ;;  %v4842_v22 = vsel %vm15696_vm8, %v15952_v27, %v4841_v28  ;;  %4689 = vst [vmem:[#allocation4 + $0x12] sm:$0x1] %v4688_v6  ;;  %v4404_v51 = vld [vmem:[#allocation4 + $0x4] sm:$0x1] }
 0x4f3   : > { %4796 = vrot.lane.b32.xlu1 %v4792_v59, %s13873_s18  ;;  %4519 = vst [vmem:[#allocation4 + $0xa] sm:$0x1] %v4518_v11  ;;  %4774 = vst [vmem:[#allocation4 + $0x16] sm:$0x1] %v4773_v1  ;;  %v4858_v39 = vsel %vm15696_vm8, %v4855_v30, %v4857_v18  ;;  %v4845_v52 = vshrl.u32 %v15952_v27, 16  ;;  %v4946_v24 = vshrl.u32 %v15979_v60, 16  ;;  %v16069_v27 = vcombine.high %v15855_v3, %v15855_v3 }
 0x4f4   : > { %4705 = vst [vmem:[#allocation4 + $0x13] sm:$0x1] %v4704_v55  ;;  %4928 = vst [vmem:[#allocation4 + $0x1d] sm:$0x1] %v4927_v21  ;;  %v4962_v47 = vshrl.u32 %v15983_v29, 16  ;;  %v4861_v61 = vshrl.u32 %v4855_v30, 16  ;;  %v16075_v5 = vcombine.high %v15858_v43, %v15858_v43  ;;  %v16081_v57 = vcombine.high %v15864_v40, %v15864_v40 }
 0x4f5   : > { %4843 = vst [vmem:[#allocation4 + $0x19] sm:$0x1] %v4842_v22  ;;  %4944 = vst [vmem:[#allocation4 + $0x1e] sm:$0x1] %v4943_v44  ;;  %v4877_v32 = vshrl.u32 %v4871_v63, 16  ;;  %v16087_v12 = vcombine.high %v15867_v37, %v15867_v37  ;;  %v16101_v59 = vcombine.high %v15879_v9, %v15879_v9  ;;  %v16133_v4 = vcombine.high %v15904_v62, %v15904_v62 }
 0x4f6   : > { %4695 = vrot.lane.b32.xlu0 %v4691_v38, %s13873_s18  ;;  %4960 = vst [vmem:[#allocation4 + $0x1f] sm:$0x1] %v4959_v33  ;;  %4859 = vst [vmem:[#allocation4 + $0x1a] sm:$0x1] %v4858_v39  ;;  %v16107_v38 = vcombine.high %v15882_v35, %v15882_v35  ;;  %v16139_v60 = vcombine.high %v15907_v58, %v15907_v58  ;;  %v16145_v29 = vcombine.high %v15910_v19, %v15910_v19  ;;  %v4427_v63 = vld [vmem:[#allocation4 + $0x5] sm:$0x1] }
 0x4f7   : > { %4711 = vrot.lane.b32.xlu1 %v4707_v25, %s13873_s18  ;;  %4875 = vst [vmem:[#allocation4 + $0x1b] sm:$0x1] %v4874_v46  ;;  %v4319_v28 = vld [vmem:[#allocation4] sm:$0x1]  ;;  %v4342_v25 = vld [vmem:[#allocation4 + $0x1] sm:$0x1]  ;;  %v16177_v20 = vcombine.high %v15943_v8, %v15943_v8  ;;  %v16192_v31 = vcombine.high %v15957_v45, %v15957_v45  ;;  %v16212_v39 = vcombine.high %v15936_v56, %v15936_v56 }
 0x4f8   : > { %v5070_v41 = vshll.u32 %v15855_v3, 16  ;;  %v5091_v54 = vshll.u32 %v15858_v43, 16  ;;  %v4443_v10 = vld [vmem:[#allocation4 + $0x6] sm:$0x1]  ;;  %v4989_v22 = vshll.u32 %v15864_v40, 16 }
 0x4f9   : > { %v4459_v44 = vld [vmem:[#allocation4 + $0x7] sm:$0x1] }
 0x4fa   : > { %4911 = vrot.lane.b32.xlu0 %v4907_v0, %s13873_s18  ;;  %v16113_v0 = vcombine.high %v15885_v14, %v15885_v14 }
 0x4fb   : > { %4934 = vrot.lane.b32.xlu1 %v4930_v16, %s13873_s18 }
 0x4fe   : > { %4826 = vrot.lane.b32.xlu0 %v4822_v17, %s13873_s18 }
 0x4ff   : > { %4849 = vrot.lane.b32.xlu1 %v4845_v52, %s13873_s18  ;;  %v4358_v52 = vld [vmem:[#allocation4 + $0x2] sm:$0x1] }
 0x502   : > { %4950 = vrot.lane.b32.xlu0 %v4946_v24, %s13873_s18 }
 0x503   : > { %4966 = vrot.lane.b32.xlu1 %v4962_v47, %s13873_s18 }
 0x506   : > { %5076 = vrot.lane.b32.xlu0 %v15855_v3, %s13873_s18  ;;  %v16201_v3 = vcombine.high %v15933_v7, %v15933_v7 }
 0x507   : > { %5097 = vrot.lane.b32.xlu1 %v15858_v43, %s13873_s18 }
 0x50a   : > { %4865 = vrot.lane.b32.xlu0 %v4861_v61, %s13873_s18 }
 0x50b   : > { %4881 = vrot.lane.b32.xlu1 %v4877_v32, %s13873_s18 }
 0x50e   : > { %4997 = vrot.lane.b32.xlu0 %v15864_v40, %s13873_s18  ;;  %v5013_v40 = vshll.u32 %v15867_v37, 16 }
 0x50f   : > { %5019 = vrot.lane.b32.xlu1 %v15867_v37, %s13873_s18 }
 0x512   : > { %5111 = vrot.lane.b32.xlu0 %v16069_v27, %s13873_s18 }
 0x513   : > { %5125 = vrot.lane.b32.xlu1 %v16075_v5, %s13873_s18 }
 0x516   : > { %5033 = vrot.lane.b32.xlu0 %v16081_v57, %s13873_s18 }
 0x517   : > { %5047 = vrot.lane.b32.xlu1 %v16087_v12, %s13873_s18 }
 0x51a   : > { %5232 = vrot.lane.b32.xlu0 %v15879_v9, %s13873_s18 }
 0x51b   : > { %5253 = vrot.lane.b32.xlu1 %v15882_v35, %s13873_s18 }
 0x51e   : > { %5154 = vrot.lane.b32.xlu0 %v15885_v14, %s13873_s18 }
 0x51f   : > { %5175 = vrot.lane.b32.xlu1 %v15888_v36, %s13873_s18 }
 0x522   : > { %5267 = vrot.lane.b32.xlu0 %v16101_v59, %s13873_s18 }
 0x523   : > { %5281 = vrot.lane.b32.xlu1 %v16107_v38, %s13873_s18 }
 0x526   : > { %5189 = vrot.lane.b32.xlu0 %v16113_v0, %s13873_s18 }
 0x527   : > { %5203 = vrot.lane.b32.xlu1 %v16119_v49, %s13873_s18 }
 0x52a   : > { %5388 = vrot.lane.b32.xlu0 %v15904_v62, %s13873_s18 }
 0x52b   : > { %5409 = vrot.lane.b32.xlu1 %v15907_v58, %s13873_s18 }
 0x52e   : > { %5310 = vrot.lane.b32.xlu0 %v15910_v19, %s13873_s18 }
 0x52f   : > { %5331 = vrot.lane.b32.xlu1 %v15913_v15, %s13873_s18 }
 0x532   : > { %5423 = vrot.lane.b32.xlu0 %v16133_v4, %s13873_s18 }
 0x533   : > { %5437 = vrot.lane.b32.xlu1 %v16139_v60, %s13873_s18 }
 0x536   : > { %5345 = vrot.lane.b32.xlu0 %v16145_v29, %s13873_s18 }
 0x537   : > { %5359 = vrot.lane.b32.xlu1 %v16151_v13, %s13873_s18 }
 0x53a   : > { %5544 = vrot.lane.b32.xlu0 %v15933_v7, %s13873_s18 }
 0x53b   : > { %5565 = vrot.lane.b32.xlu1 %v15936_v56, %s13873_s18 }
 0x53c   : > { %v4402_v48 = vpop.permute.xlu0 %4401 }
 0x53d   : > { %v4405_v2 = vsel %vm16157_vm10, %v4402_v48, %v4404_v51  ;;  %v4425_v30 = vpop.permute.xlu1 %4424  ;;  %v4374_v48 = vld [vmem:[#allocation4 + $0x3] sm:$0x1] }
 0x53e   : > { %4406 = vst [vmem:[#allocation4 + $0x4] sm:$0x1] %v4405_v2  ;;  %v4428_v42 = vsel %vm16157_vm10, %v4425_v30, %v4427_v63  ;;  %5466 = vrot.lane.b32.xlu0 %v15943_v8, %s13873_s18  ;;  %v5105_v2 = vshll.u32 %v16069_v27, 16  ;;  %v4574_v63 = vld [vmem:[#allocation4 + $0xc] sm:$0x1] }
 0x53f   : > { %4429 = vst [vmem:[#allocation4 + $0x5] sm:$0x1] %v4428_v42  ;;  %5487 = vrot.lane.b32.xlu1 %v15957_v45, %s13873_s18 }
 0x540   : > { %v4315_v53 = vpop.permute.xlu0 %4314 }
 0x541   : > { %v4320_v34 = vsel %vm16157_vm10, %v4315_v53, %v4319_v28  ;;  %v4340_v18 = vpop.permute.xlu1 %4339  ;;  %v5119_v28 = vshll.u32 %v16075_v5, 16 }
 0x542   : > { %4321 = vst [vmem:[#allocation4] sm:$0x1] %v4320_v34  ;;  %v4343_v26 = vsel %vm16157_vm10, %v4340_v18, %v4342_v25  ;;  %5501 = vrot.lane.b32.xlu0 %v16177_v20, %s13873_s18  ;;  %v4597_v25 = vld [vmem:[#allocation4 + $0xd] sm:$0x1] }
 0x543   : > { %4344 = vst [vmem:[#allocation4 + $0x1] sm:$0x1] %v4343_v26  ;;  %5515 = vrot.lane.b32.xlu1 %v16192_v31, %s13873_s18 }
 0x544   : > { %v4441_v6 = vpop.permute.xlu0 %4440 }
 0x545   : > { %v5073_v23 = vld [vmem:[#allocation4 + $0x4] sm:$0x1]  ;;  %v4444_v21 = vsel %vm16157_vm10, %v4441_v6, %v4443_v10  ;;  %v4457_v33 = vpop.permute.xlu1 %4456  ;;  %v5041_v6 = vshll.u32 %v16087_v12, 16 }
 0x546   : > { %v5074_v1 = vsel %vm16181_vm12, %v5070_v41, %v5073_v23  ;;  %v5094_v55 = vld [vmem:[#allocation4 + $0x5] sm:$0x1]  ;;  %4445 = vst [vmem:[#allocation4 + $0x6] sm:$0x1] %v4444_v21  ;;  %5579 = vrot.lane.b32.xlu0 %v16201_v3, %s13873_s18  ;;  %v4460_v16 = vsel %vm16157_vm10, %v4457_v33, %v4459_v44  ;;  %v5027_v41 = vshll.u32 %v16081_v57, 16  ;;  %v5226_v44 = vshll.u32 %v15879_v9, 16 }
 0x547   : > { %5075 = vst [vmem:[#allocation4 + $0x4] sm:$0x1] %v5074_v1  ;;  %v5095_v43 = vsel %vm16181_vm12, %v5091_v54, %v5094_v55  ;;  %4461 = vst [vmem:[#allocation4 + $0x7] sm:$0x1] %v4460_v16  ;;  %5593 = vrot.lane.b32.xlu1 %v16212_v39, %s13873_s18  ;;  %v4489_v1 = vld [vmem:[#allocation4 + $0x8] sm:$0x1] }
 0x548   : > { %5096 = vst [vmem:[#allocation4 + $0x5] sm:$0x1] %v5095_v43  ;;  %v4356_v24 = vpop.permute.xlu0 %4355 }
 0x549   : > { %v4994_v46 = vld [vmem:[#allocation4] sm:$0x1]  ;;  %v4359_v61 = vsel %vm16157_vm10, %v4356_v24, %v4358_v52  ;;  %v4372_v37 = vpop.permute.xlu1 %4371  ;;  %v4629_v24 = vld [vmem:[#allocation4 + $0xf] sm:$0x1] }
 0x54a   : > { %v4995_v17 = vsel %vm16181_vm12, %v4989_v22, %v4994_v46  ;;  %v5016_v47 = vld [vmem:[#allocation4 + $0x1] sm:$0x1]  ;;  %4360 = vst [vmem:[#allocation4 + $0x2] sm:$0x1] %v4359_v61  ;;  %v4375_v51 = vsel %vm16157_vm10, %v4372_v37, %v4374_v48  ;;  %v4512_v22 = vld [vmem:[#allocation4 + $0x9] sm:$0x1] }
 0x54b   : > { %4996 = vst [vmem:[#allocation4] sm:$0x1] %v4995_v17  ;;  %v5017_v32 = vsel %vm16181_vm12, %v5013_v40, %v5016_v47  ;;  %4376 = vst [vmem:[#allocation4 + $0x3] sm:$0x1] %v4375_v51  ;;  %v4613_v46 = vld [vmem:[#allocation4 + $0xe] sm:$0x1] }
 0x54c   : > { %5018 = vst [vmem:[#allocation4 + $0x1] sm:$0x1] %v5017_v32  ;;  %v4572_v30 = vpop.permute.xlu0 %4571  ;;  %v5247_v17 = vshll.u32 %v15882_v35, 16  ;;  %v5148_v32 = vshll.u32 %v15885_v14, 16  ;;  %v4528_v37 = vld [vmem:[#allocation4 + $0xa] sm:$0x1] }
 0x54d   : > { %v5108_v42 = vld [vmem:[#allocation4 + $0x6] sm:$0x1]  ;;  %v4575_v53 = vsel %vm16157_vm10, %v4572_v30, %v4574_v63  ;;  %v4595_v18 = vpop.permute.xlu1 %4594  ;;  %v5169_v30 = vshll.u32 %v15888_v36, 16 }
 0x54e   : > { %v5109_v34 = vsel %vm16181_vm12, %v5105_v2, %v5108_v42  ;;  %4576 = vst [vmem:[#allocation4 + $0xc] sm:$0x1] %v4575_v53  ;;  %v5122_v26 = vld [vmem:[#allocation4 + $0x7] sm:$0x1]  ;;  %v4598_v27 = vsel %vm16157_vm10, %v4595_v18, %v4597_v25  ;;  %v4544_v42 = vld [vmem:[#allocation4 + $0xb] sm:$0x1] }
 0x54f   : > { %5110 = vst [vmem:[#allocation4 + $0x6] sm:$0x1] %v5109_v34  ;;  %v5123_v23 = vsel %vm16181_vm12, %v5119_v28, %v5122_v26  ;;  %4599 = vst [vmem:[#allocation4 + $0xd] sm:$0x1] %v4598_v27  ;;  %v5261_v34 = vshll.u32 %v16101_v59, 16 }
 0x550   : > { %v4487_v54 = vpop.permute.xlu0 %4486  ;;  %5124 = vst [vmem:[#allocation4 + $0x7] sm:$0x1] %v5123_v23  ;;  %v4744_v26 = vld [vmem:[#allocation4 + $0x14] sm:$0x1] }
 0x551   : > { %v5030_v5 = vld [vmem:[#allocation4 + $0x2] sm:$0x1]  ;;  %v4490_v10 = vsel %vm16157_vm10, %v4487_v54, %v4489_v1  ;;  %v4510_v21 = vpop.permute.xlu1 %4509  ;;  %v4767_v1 = vld [vmem:[#allocation4 + $0x15] sm:$0x1] }
 0x552   : > { %v5031_v55 = vsel %vm16181_vm12, %v5027_v41, %v5030_v5  ;;  %4491 = vst [vmem:[#allocation4 + $0x8] sm:$0x1] %v4490_v10  ;;  %v5044_v57 = vld [vmem:[#allocation4 + $0x3] sm:$0x1]  ;;  %v4513_v43 = vsel %vm16157_vm10, %v4510_v21, %v4512_v22  ;;  %v5275_v41 = vshll.u32 %v16107_v38, 16  ;;  %v5183_v10 = vshll.u32 %v16113_v0, 16 }
 0x553   : > { %5032 = vst [vmem:[#allocation4 + $0x2] sm:$0x1] %v5031_v55  ;;  %v5045_v33 = vsel %vm16181_vm12, %v5041_v6, %v5044_v57  ;;  %4514 = vst [vmem:[#allocation4 + $0x9] sm:$0x1] %v4513_v43  ;;  %v4659_v21 = vld [vmem:[#allocation4 + $0x10] sm:$0x1] }
 0x554   : > { %v4611_v16 = vpop.permute.xlu0 %4610  ;;  %5046 = vst [vmem:[#allocation4 + $0x3] sm:$0x1] %v5045_v33  ;;  %v5197_v57 = vshll.u32 %v16119_v49, 16  ;;  %v4682_v33 = vld [vmem:[#allocation4 + $0x11] sm:$0x1] }
 0x555   : > { %v5229_v12 = vld [vmem:[#allocation4 + $0xc] sm:$0x1]  ;;  %v4614_v40 = vsel %vm16157_vm10, %v4611_v16, %v4613_v46  ;;  %v4627_v47 = vpop.permute.xlu1 %4626  ;;  %v5382_v16 = vshll.u32 %v15904_v62, 16 }
 0x556   : > { %v5230_v52 = vsel %vm16181_vm12, %v5226_v44, %v5229_v12  ;;  %4615 = vst [vmem:[#allocation4 + $0xe] sm:$0x1] %v4614_v40  ;;  %v5250_v9 = vld [vmem:[#allocation4 + $0xd] sm:$0x1]  ;;  %v4630_v61 = vsel %vm16157_vm10, %v4627_v47, %v4629_v24  ;;  %v4783_v40 = vld [vmem:[#allocation4 + $0x16] sm:$0x1] }
 0x557   : > { %5231 = vst [vmem:[#allocation4 + $0xc] sm:$0x1] %v5230_v52  ;;  %v5251_v48 = vsel %vm16181_vm12, %v5247_v17, %v5250_v9  ;;  %4631 = vst [vmem:[#allocation4 + $0xf] sm:$0x1] %v4630_v61  ;;  %v5403_v24 = vshll.u32 %v15907_v58, 16 }
 0x558   : > { %v4526_v51 = vpop.permute.xlu0 %4525  ;;  %5252 = vst [vmem:[#allocation4 + $0xd] sm:$0x1] %v5251_v48  ;;  %v4799_v9 = vld [vmem:[#allocation4 + $0x17] sm:$0x1]  ;;  %v10835_v48 = vld [vmem:[#allocation21] ss:$0 sm:$0xff] }
 0x559   : > { %v5151_v35 = vld [vmem:[#allocation4 + $0x8] sm:$0x1]  ;;  %v4529_v2 = vsel %vm16157_vm10, %v4526_v51, %v4528_v37  ;;  %v4542_v53 = vpop.permute.xlu1 %4541  ;;  %v5304_v37 = vshll.u32 %v15910_v19, 16  ;;  %v5114_v50 = vld [vmem:[#allocation4 + $0x6] sm:$0x1] }
 0x55a   : > { %v5152_v63 = vsel %vm16181_vm12, %v5148_v32, %v5151_v35  ;;  %4530 = vst [vmem:[#allocation4 + $0xa] sm:$0x1] %v4529_v2  ;;  %v5172_v14 = vld [vmem:[#allocation4 + $0x9] sm:$0x1]  ;;  %v4545_v28 = vsel %vm16157_vm10, %v4542_v53, %v4544_v42  ;;  %v4698_v35 = vld [vmem:[#allocation4 + $0x12] sm:$0x1] }
 0x55b   : > { %5153 = vst [vmem:[#allocation4 + $0x8] sm:$0x1] %v5152_v63  ;;  %v5173_v18 = vsel %vm16181_vm12, %v5169_v30, %v5172_v14  ;;  %4546 = vst [vmem:[#allocation4 + $0xb] sm:$0x1] %v4545_v28  ;;  %v5325_v42 = vshll.u32 %v15913_v15, 16 }
 0x55c   : > { %v4742_v25 = vpop.permute.xlu0 %4741  ;;  %5174 = vst [vmem:[#allocation4 + $0x9] sm:$0x1] %v5173_v18  ;;  %v4714_v14 = vld [vmem:[#allocation4 + $0x13] sm:$0x1] }
 0x55d   : > { %v5264_v36 = vld [vmem:[#allocation4 + $0xe] sm:$0x1]  ;;  %v4745_v27 = vsel %vm16157_vm10, %v4742_v25, %v4744_v26  ;;  %v4765_v54 = vpop.permute.xlu1 %4764  ;;  %v5417_v26 = vshll.u32 %v16133_v4, 16  ;;  %v4937_v4 = vld [vmem:[#allocation4 + $0x1d] sm:$0x1] }
 0x55e   : > { %v5265_v23 = vsel %vm16181_vm12, %v5261_v34, %v5264_v36  ;;  %4746 = vst [vmem:[#allocation4 + $0x14] sm:$0x1] %v4745_v27  ;;  %v5278_v59 = vld [vmem:[#allocation4 + $0xf] sm:$0x1]  ;;  %v4768_v5 = vsel %vm16157_vm10, %v4765_v54, %v4767_v1  ;;  %v4914_v27 = vld [vmem:[#allocation4 + $0x1c] sm:$0x1] }
 0x55f   : > { %5266 = vst [vmem:[#allocation4 + $0xe] sm:$0x1] %v5265_v23  ;;  %v5279_v6 = vsel %vm16181_vm12, %v5275_v41, %v5278_v59  ;;  %4769 = vst [vmem:[#allocation4 + $0x15] sm:$0x1] %v4768_v5  ;;  %v5431_v1 = vshll.u32 %v16139_v60, 16 }
 0x560   : > { %v4657_v55 = vpop.permute.xlu0 %4656  ;;  %5280 = vst [vmem:[#allocation4 + $0xf] sm:$0x1] %v5279_v6  ;;  %v4829_v60 = vld [vmem:[#allocation4 + $0x18] sm:$0x1] }
 0x561   : > { %v5186_v38 = vld [vmem:[#allocation4 + $0xa] sm:$0x1]  ;;  %v4660_v22 = vsel %vm16157_vm10, %v4657_v55, %v4659_v21  ;;  %v4680_v44 = vpop.permute.xlu1 %4679  ;;  %v5339_v21 = vshll.u32 %v16145_v29, 16 }
 0x562   : > { %v5187_v43 = vsel %vm16181_vm12, %v5183_v10, %v5186_v38  ;;  %4661 = vst [vmem:[#allocation4 + $0x10] sm:$0x1] %v4660_v22  ;;  %v5200_v0 = vld [vmem:[#allocation4 + $0xb] sm:$0x1]  ;;  %v4683_v46 = vsel %vm16157_vm10, %v4680_v44, %v4682_v33  ;;  %v5353_v44 = vshll.u32 %v16151_v13, 16 }
 0x563   : > { %5188 = vst [vmem:[#allocation4 + $0xa] sm:$0x1] %v5187_v43  ;;  %v5201_v12 = vsel %vm16181_vm12, %v5197_v57, %v5200_v0  ;;  %4684 = vst [vmem:[#allocation4 + $0x11] sm:$0x1] %v4683_v46  ;;  %v4852_v0 = vld [vmem:[#allocation4 + $0x19] sm:$0x1] }
 0x564   : > { %v4781_v17 = vpop.permute.xlu0 %4780  ;;  %5202 = vst [vmem:[#allocation4 + $0xb] sm:$0x1] %v5201_v12  ;;  %v5538_v12 = vshll.u32 %v15933_v7, 16 }
 0x565   : > { %v5385_v49 = vld [vmem:[#allocation4 + $0x14] sm:$0x1]  ;;  %v4784_v52 = vsel %vm16157_vm10, %v4781_v17, %v4783_v40  ;;  %v4797_v61 = vpop.permute.xlu1 %4796  ;;  %v4953_v17 = vld [vmem:[#allocation4 + $0x1e] sm:$0x1] }
 0x566   : > { %v5386_v47 = vsel %vm16181_vm12, %v5382_v16, %v5385_v49  ;;  %4785 = vst [vmem:[#allocation4 + $0x16] sm:$0x1] %v4784_v52  ;;  %v5406_v62 = vld [vmem:[#allocation4 + $0x15] sm:$0x1]  ;;  %v4800_v32 = vsel %vm16157_vm10, %v4797_v61, %v4799_v9  ;;  %v4969_v9 = vld [vmem:[#allocation4 + $0x1f] sm:$0x1] }
 0x567   : > { %5387 = vst [vmem:[#allocation4 + $0x14] sm:$0x1] %v5386_v47  ;;  %v5407_v51 = vsel %vm16181_vm12, %v5403_v24, %v5406_v62  ;;  %4801 = vst [vmem:[#allocation4 + $0x17] sm:$0x1] %v4800_v32  ;;  %v5559_v24 = vshll.u32 %v15936_v56, 16 }
 0x568   : > { %v4696_v58 = vpop.permute.xlu0 %4695  ;;  %5408 = vst [vmem:[#allocation4 + $0x15] sm:$0x1] %v5407_v51  ;;  %v5079_v51 = vld [vmem:[#allocation4 + $0x4] sm:$0x1] }
 0x569   : > { %v5307_v2 = vld [vmem:[#allocation4 + $0x10] sm:$0x1]  ;;  %v4699_v30 = vsel %vm16157_vm10, %v4696_v58, %v4698_v35  ;;  %v4712_v19 = vpop.permute.xlu1 %4711 }
 0x56a   : > { %v5308_v53 = vsel %vm16181_vm12, %v5304_v37, %v5307_v2  ;;  %4700 = vst [vmem:[#allocation4 + $0x12] sm:$0x1] %v4699_v30  ;;  %v5328_v18 = vld [vmem:[#allocation4 + $0x11] sm:$0x1]  ;;  %v4715_v25 = vsel %vm16157_vm10, %v4712_v19, %v4714_v14  ;;  %v5481_v2 = vshll.u32 %v15957_v45, 16  ;;  %v5573_v14 = vshll.u32 %v16201_v3, 16 }
 0x56b   : > { %5309 = vst [vmem:[#allocation4 + $0x10] sm:$0x1] %v5308_v53  ;;  %v5329_v36 = vsel %vm16181_vm12, %v5325_v42, %v5328_v18  ;;  %4716 = vst [vmem:[#allocation4 + $0x13] sm:$0x1] %v4715_v25  ;;  %v5100_v42 = vld [vmem:[#allocation4 + $0x5] sm:$0x1] }
 0x56c   : > { %v4912_v15 = vpop.permute.xlu0 %4911  ;;  %5330 = vst [vmem:[#allocation4 + $0x11] sm:$0x1] %v5329_v36  ;;  %v5587_v25 = vshll.u32 %v16212_v39, 16  ;;  %v4884_v36 = vld [vmem:[#allocation4 + $0x1b] sm:$0x1] }
 0x56d   : > { %v5420_v23 = vld [vmem:[#allocation4 + $0x16] sm:$0x1]  ;;  %v4915_v54 = vsel %vm16157_vm10, %v4912_v15, %v4914_v27  ;;  %v4935_v5 = vpop.permute.xlu1 %4934 }
 0x56e   : > { %v5421_v59 = vsel %vm16181_vm12, %v5417_v26, %v5420_v23  ;;  %4916 = vst [vmem:[#allocation4 + $0x1c] sm:$0x1] %v4915_v54  ;;  %v5434_v6 = vld [vmem:[#allocation4 + $0x17] sm:$0x1]  ;;  %v4938_v55 = vsel %vm16157_vm10, %v4935_v5, %v4937_v4  ;;  %v5001_v54 = vld [vmem:[#allocation4] sm:$0x1] }
 0x56f   : > { %v5779_v63 = vpop.f32.mrb[18].mxu1  ;;  %5422 = vst [vmem:[#allocation4 + $0x16] sm:$0x1] %v5421_v59  ;;  %v5435_v38 = vsel %vm16181_vm12, %v5431_v1, %v5434_v6  ;;  %4939 = vst [vmem:[#allocation4 + $0x1d] sm:$0x1] %v4938_v55  ;;  %v5495_v4 = vshll.u32 %v16177_v20, 16 }
 0x570   : > { %v5780_v28 = vadd.f32 %v10835_v48, %v5779_v63  ;;  %v11995_v34 = vpop.f32.mrb[19].mxu1  ;;  %v4827_v22 = vpop.permute.xlu0 %4826  ;;  %5436 = vst [vmem:[#allocation4 + $0x17] sm:$0x1] %v5435_v38  ;;  %v5460_v48 = vshll.u32 %v15943_v8, 16  ;;  %v5022_v59 = vld [vmem:[#allocation4 + $0x1] sm:$0x1] }
 0x571   : > { %v5342_v57 = vld [vmem:[#allocation4 + $0x12] sm:$0x1]  ;;  %v4830_v43 = vsel %vm16157_vm10, %v4827_v22, %v4829_v60  ;;  %v4850_v29 = vpop.permute.xlu1 %4849  ;;  %v5128_v22 = vld [vmem:[#allocation4 + $0x7] sm:$0x1] }
 0x572   : > { %v5783_v41 = vmax.f32 %v5780_v28, 0.0  ;;  %v5343_v33 = vsel %vm16181_vm12, %v5339_v21, %v5342_v57  ;;  %4831 = vst [vmem:[#allocation4 + $0x18] sm:$0x1] %v4830_v43  ;;  %v5356_v46 = vld [vmem:[#allocation4 + $0x13] sm:$0x1]  ;;  %v4853_v16 = vsel %vm16157_vm10, %v4850_v29, %v4852_v0  ;;  %v5509_v21 = vshll.u32 %v16192_v31, 16 }
 0x573   : > { %5344 = vst [vmem:[#allocation4 + $0x12] sm:$0x1] %v5343_v33  ;;  %v5357_v40 = vsel %vm16181_vm12, %v5353_v44, %v5356_v46  ;;  %4854 = vst [vmem:[#allocation4 + $0x19] sm:$0x1] %v4853_v16  ;;  %v4868_v28 = vld [vmem:[#allocation4 + $0x1a] sm:$0x1] }
 0x574   : > { %v5784_v10 = vpack.c.bf16 %v5783_v41, %v5783_v41  ;;  %v4951_v49 = vpop.permute.xlu0 %4950  ;;  %5358 = vst [vmem:[#allocation4 + $0x13] sm:$0x1] %v5357_v40  ;;  %v5036_v33 = vld [vmem:[#allocation4 + $0x2] sm:$0x1]  ;;  %v5050_v0 = vld [vmem:[#allocation4 + $0x3] sm:$0x1] }
 0x575   : > { %v5541_v13 = vld [vmem:[#allocation4 + $0x1c] sm:$0x1]  ;;  %v4954_v52 = vsel %vm16157_vm10, %v4951_v49, %v4953_v17  ;;  %v4967_v61 = vpop.permute.xlu1 %4966  ;;  %v5256_v17 = vld [vmem:[#allocation4 + $0xd] sm:$0x1] }
 0x576   : > { %5786 = vst.msk [vmem:[#allocation4 + $0x20] sm:$0x1] %vm4288_vm6, %v5784_v10  ;;  %v5542_v47 = vsel %vm16181_vm12, %v5538_v12, %v5541_v13  ;;  %4955 = vst [vmem:[#allocation4 + $0x1e] sm:$0x1] %v4954_v52  ;;  %v5562_v62 = vld [vmem:[#allocation4 + $0x1d] sm:$0x1]  ;;  %v4970_v32 = vsel %vm16157_vm10, %v4967_v61, %v4969_v9 }
 0x577   : > { %5543 = vst [vmem:[#allocation4 + $0x1c] sm:$0x1] %v5542_v47  ;;  %v5563_v56 = vsel %vm16181_vm12, %v5559_v24, %v5562_v62  ;;  %4971 = vst [vmem:[#allocation4 + $0x1f] sm:$0x1] %v4970_v32  ;;  %v5235_v12 = vld [vmem:[#allocation4 + $0xc] sm:$0x1] }
 0x578   : > { %v5077_v37 = vpop.permute.xlu0 %5076  ;;  %5564 = vst [vmem:[#allocation4 + $0x1d] sm:$0x1] %v5563_v56  ;;  %v5157_v52 = vld [vmem:[#allocation4 + $0x8] sm:$0x1]  ;;  %v5178_v9 = vld [vmem:[#allocation4 + $0x9] sm:$0x1] }
 0x579   : > { %v5463_v35 = vld [vmem:[#allocation4 + $0x18] sm:$0x1]  ;;  %v5080_v58 = vsel %vm16336_vm13, %v5077_v37, %v5079_v51  ;;  %v5098_v63 = vpop.permute.xlu1 %5097  ;;  %v5270_v62 = vld [vmem:[#allocation4 + $0xe] sm:$0x1]  ;;  %v5284_v56 = vld [vmem:[#allocation4 + $0xf] sm:$0x1] }
 0x57a   : > { %v5464_v30 = vsel %vm16181_vm12, %v5460_v48, %v5463_v35  ;;  %5081 = vst [vmem:[#allocation4 + $0x4] sm:$0x1] %v5080_v58  ;;  %v5484_v8 = vld [vmem:[#allocation4 + $0x19] sm:$0x1]  ;;  %v5101_v53 = vsel %vm16336_vm13, %v5098_v63, %v5100_v42  ;;  %v5192_v58 = vld [vmem:[#allocation4 + $0xa] sm:$0x1] }
 0x57b   : > { %5465 = vst [vmem:[#allocation4 + $0x18] sm:$0x1] %v5464_v30  ;;  %v5485_v19 = vsel %vm16181_vm12, %v5481_v2, %v5484_v8  ;;  %5102 = vst [vmem:[#allocation4 + $0x5] sm:$0x1] %v5101_v53  ;;  %v5206_v63 = vld [vmem:[#allocation4 + $0xb] sm:$0x1] }
 0x57c   : > { %v4866_v34 = vpop.permute.xlu0 %4865  ;;  %5486 = vst [vmem:[#allocation4 + $0x19] sm:$0x1] %v5485_v19  ;;  %v5391_v53 = vld [vmem:[#allocation4 + $0x14] sm:$0x1] }
 0x57d   : > { %v5576_v45 = vld [vmem:[#allocation4 + $0x1e] sm:$0x1]  ;;  %v4869_v18 = vsel %vm16157_vm10, %v4866_v34, %v4868_v28  ;;  %v4882_v15 = vpop.permute.xlu1 %4881  ;;  %v5412_v28 = vld [vmem:[#allocation4 + $0x15] sm:$0x1] }
 0x57e   : > { %v5577_v26 = vsel %vm16181_vm12, %v5573_v14, %v5576_v45  ;;  %4870 = vst [vmem:[#allocation4 + $0x1a] sm:$0x1] %v4869_v18  ;;  %v5590_v3 = vld [vmem:[#allocation4 + $0x1f] sm:$0x1]  ;;  %v4885_v27 = vsel %vm16157_vm10, %v4882_v15, %v4884_v36  ;;  %v5313_v18 = vld [vmem:[#allocation4 + $0x10] sm:$0x1] }
 0x57f   : > { %5578 = vst [vmem:[#allocation4 + $0x1e] sm:$0x1] %v5577_v26  ;;  %v5591_v41 = vsel %vm16181_vm12, %v5587_v25, %v5590_v3  ;;  %4886 = vst [vmem:[#allocation4 + $0x1b] sm:$0x1] %v4885_v27  ;;  %v5334_v36 = vld [vmem:[#allocation4 + $0x11] sm:$0x1] }
 0x580   : > { %v4998_v23 = vpop.permute.xlu0 %4997  ;;  %5592 = vst [vmem:[#allocation4 + $0x1f] sm:$0x1] %v5591_v41  ;;  %v5426_v3 = vld [vmem:[#allocation4 + $0x16] sm:$0x1] }
 0x581   : > { %v5002_v39 = vsel %vm16336_vm13, %v4998_v23, %v5001_v54  ;;  %v5020_v1 = vpop.permute.xlu1 %5019  ;;  %v5440_v23 = vld [vmem:[#allocation4 + $0x17] sm:$0x1] }
 0x582   : > { %5003 = vst [vmem:[#allocation4] sm:$0x1] %v5002_v39  ;;  %v5023_v5 = vsel %vm16336_vm13, %v5020_v1, %v5022_v59  ;;  %v5348_v59 = vld [vmem:[#allocation4 + $0x12] sm:$0x1] }
 0x583   : > { %5024 = vst [vmem:[#allocation4 + $0x1] sm:$0x1] %v5023_v5 }
 0x584   : > { %v5112_v10 = vpop.permute.xlu0 %5111 }
 0x585   : > { %v5498_v6 = vld [vmem:[#allocation4 + $0x1a] sm:$0x1]  ;;  %v5115_v55 = vsel %vm16336_vm13, %v5112_v10, %v5114_v50  ;;  %v5126_v60 = vpop.permute.xlu1 %5125  ;;  %v5362_v50 = vld [vmem:[#allocation4 + $0x13] sm:$0x1] }
 0x586   : > { %v5499_v38 = vsel %vm16181_vm12, %v5495_v4, %v5498_v6  ;;  %5116 = vst [vmem:[#allocation4 + $0x6] sm:$0x1] %v5115_v55  ;;  %v5512_v57 = vld [vmem:[#allocation4 + $0x1b] sm:$0x1]  ;;  %v5129_v20 = vsel %vm16336_vm13, %v5126_v60, %v5128_v22  ;;  %v5547_v55 = vld [vmem:[#allocation4 + $0x1c] sm:$0x1] }
 0x587   : > { %5500 = vst [vmem:[#allocation4 + $0x1a] sm:$0x1] %v5499_v38  ;;  %v5513_v43 = vsel %vm16181_vm12, %v5509_v21, %v5512_v57  ;;  %5130 = vst [vmem:[#allocation4 + $0x7] sm:$0x1] %v5129_v20  ;;  %v5568_v22 = vld [vmem:[#allocation4 + $0x1d] sm:$0x1] }
 0x588   : > { %v5034_v44 = vpop.permute.xlu0 %5033  ;;  %5514 = vst [vmem:[#allocation4 + $0x1b] sm:$0x1] %v5513_v43  ;;  %v5469_v20 = vld [vmem:[#allocation4 + $0x18] sm:$0x1] }
 0x589   : > { %v5037_v31 = vsel %vm16336_vm13, %v5034_v44, %v5036_v33  ;;  %v5048_v29 = vpop.permute.xlu1 %5047  ;;  %v5490_v33 = vld [vmem:[#allocation4 + $0x19] sm:$0x1] }
 0x58a   : > { %5038 = vst [vmem:[#allocation4 + $0x2] sm:$0x1] %v5037_v31  ;;  %v5051_v46 = vsel %vm16336_vm13, %v5048_v29, %v5050_v0 }
 0x58b   : > { %5052 = vst [vmem:[#allocation4 + $0x3] sm:$0x1] %v5051_v46 }
 0x58c   : > { %v5233_v16 = vpop.permute.xlu0 %5232 }
 0x58d   : > { %v5236_v11 = vsel %vm16336_vm13, %v5233_v16, %v5235_v12  ;;  %v5254_v40 = vpop.permute.xlu1 %5253 }
 0x58e   : > { %5237 = vst [vmem:[#allocation4 + $0xc] sm:$0x1] %v5236_v11  ;;  %v5257_v49 = vsel %vm16336_vm13, %v5254_v40, %v5256_v17  ;;  %v5504_v0 = vld [vmem:[#allocation4 + $0x1a] sm:$0x1]  ;;  %v5582_v40 = vld [vmem:[#allocation4 + $0x1e] sm:$0x1] }
 0x58f   : > { %5258 = vst [vmem:[#allocation4 + $0xd] sm:$0x1] %v5257_v49  ;;  %v5518_v12 = vld [vmem:[#allocation4 + $0x1b] sm:$0x1] }
 0x590   : > { %v5155_v13 = vpop.permute.xlu0 %5154 }
 0x591   : > { %v5158_v24 = vsel %vm16336_vm13, %v5155_v13, %v5157_v52  ;;  %v5176_v47 = vpop.permute.xlu1 %5175  ;;  %v5596_v13 = vld [vmem:[#allocation4 + $0x1f] sm:$0x1] }
 0x592   : > { %5159 = vst [vmem:[#allocation4 + $0x8] sm:$0x1] %v5158_v24  ;;  %v5179_v61 = vsel %vm16336_vm13, %v5176_v47, %v5178_v9 }
 0x593   : > { %5180 = vst [vmem:[#allocation4 + $0x9] sm:$0x1] %v5179_v61 }
 0x594   : > { %v5268_v32 = vpop.permute.xlu0 %5267 }
 0x595   : > { %v5271_v48 = vsel %vm16336_vm13, %v5268_v32, %v5270_v62  ;;  %v5282_v37 = vpop.permute.xlu1 %5281 }
 0x596   : > { %5272 = vst [vmem:[#allocation4 + $0xe] sm:$0x1] %v5271_v48  ;;  %v5285_v51 = vsel %vm16336_vm13, %v5282_v37, %v5284_v56 }
 0x597   : > { %5286 = vst [vmem:[#allocation4 + $0xf] sm:$0x1] %v5285_v51 }
 0x598   : > { %v5190_v35 = vpop.permute.xlu0 %5189 }
 0x599   : > { %v5193_v2 = vsel %vm16336_vm13, %v5190_v35, %v5192_v58  ;;  %v5204_v30 = vpop.permute.xlu1 %5203 }
 0x59a   : > { %5194 = vst [vmem:[#allocation4 + $0xa] sm:$0x1] %v5193_v2  ;;  %v5207_v42 = vsel %vm16336_vm13, %v5204_v30, %v5206_v63 }
 0x59b   : > { %5208 = vst [vmem:[#allocation4 + $0xb] sm:$0x1] %v5207_v42 }
 0x59c   : > { %v5389_v8 = vpop.permute.xlu0 %5388 }
 0x59d   : > { %v5392_v14 = vsel %vm16336_vm13, %v5389_v8, %v5391_v53  ;;  %v5410_v19 = vpop.permute.xlu1 %5409 }
 0x59e   : > { %5393 = vst [vmem:[#allocation4 + $0x14] sm:$0x1] %v5392_v14  ;;  %v5413_v34 = vsel %vm16336_vm13, %v5410_v19, %v5412_v28 }
 0x59f   : > { %5414 = vst [vmem:[#allocation4 + $0x15] sm:$0x1] %v5413_v34 }
 0x5a0   : > { %v5311_v45 = vpop.permute.xlu0 %5310 }
 0x5a1   : > { %v5314_v25 = vsel %vm16336_vm13, %v5311_v45, %v5313_v18  ;;  %v5332_v26 = vpop.permute.xlu1 %5331 }
 0x5a2   : > { %5315 = vst [vmem:[#allocation4 + $0x10] sm:$0x1] %v5314_v25  ;;  %v5335_v15 = vsel %vm16336_vm13, %v5332_v26, %v5334_v36 }
 0x5a3   : > { %5336 = vst [vmem:[#allocation4 + $0x11] sm:$0x1] %v5335_v15 }
 0x5a4   : > { %v5424_v27 = vpop.permute.xlu0 %5423 }
 0x5a5   : > { %v5427_v41 = vsel %vm16336_vm13, %v5424_v27, %v5426_v3  ;;  %v5438_v54 = vpop.permute.xlu1 %5437 }
 0x5a6   : > { %5428 = vst [vmem:[#allocation4 + $0x16] sm:$0x1] %v5427_v41  ;;  %v5441_v39 = vsel %vm16336_vm13, %v5438_v54, %v5440_v23 }
 0x5a7   : > { %5442 = vst [vmem:[#allocation4 + $0x17] sm:$0x1] %v5441_v39 }
 0x5a8   : > { %v5346_v1 = vpop.permute.xlu0 %5345 }
 0x5a9   : > { %v5349_v5 = vsel %vm16336_vm13, %v5346_v1, %v5348_v59  ;;  %v5360_v4 = vpop.permute.xlu1 %5359 }
 0x5aa   : > { %5350 = vst [vmem:[#allocation4 + $0x12] sm:$0x1] %v5349_v5  ;;  %v5363_v10 = vsel %vm16336_vm13, %v5360_v4, %v5362_v50 }
 0x5ab   : > { %5364 = vst [vmem:[#allocation4 + $0x13] sm:$0x1] %v5363_v10 }
 0x5ac   : > { %v5545_v6 = vpop.permute.xlu0 %5544 }
 0x5ad   : > { %v5548_v21 = vsel %vm16336_vm13, %v5545_v6, %v5547_v55  ;;  %v5566_v38 = vpop.permute.xlu1 %5565 }
 0x5ae   : > { %5549 = vst [vmem:[#allocation4 + $0x1c] sm:$0x1] %v5548_v21  ;;  %v5569_v60 = vsel %vm16336_vm13, %v5566_v38, %v5568_v22 }
 0x5af   : > { %5570 = vst [vmem:[#allocation4 + $0x1d] sm:$0x1] %v5569_v60 }
 0x5b0   : > { %v5467_v57 = vpop.permute.xlu0 %5466 }
 0x5b1   : > { %v5470_v43 = vsel %vm16336_vm13, %v5467_v57, %v5469_v20  ;;  %v5488_v44 = vpop.permute.xlu1 %5487 }
 0x5b2   : > { %5471 = vst [vmem:[#allocation4 + $0x18] sm:$0x1] %v5470_v43  ;;  %v5491_v31 = vsel %vm16336_vm13, %v5488_v44, %v5490_v33 }
 0x5b3   : > { %5492 = vst [vmem:[#allocation4 + $0x19] sm:$0x1] %v5491_v31 }
 0x5b4   : > { %v5502_v29 = vpop.permute.xlu0 %5501 }
 0x5b5   : > { %v5505_v46 = vsel %vm16336_vm13, %v5502_v29, %v5504_v0  ;;  %v5516_v16 = vpop.permute.xlu1 %5515 }
 0x5b6   : > { %5506 = vst [vmem:[#allocation4 + $0x1a] sm:$0x1] %v5505_v46  ;;  %v5519_v11 = vsel %vm16336_vm13, %v5516_v16, %v5518_v12 }
 0x5b7   : > { %5520 = vst [vmem:[#allocation4 + $0x1b] sm:$0x1] %v5519_v11 }
 0x5b8   : > { %v5580_v17 = vpop.permute.xlu0 %5579 }
 0x5b9   : > { %v5583_v49 = vsel %vm16336_vm13, %v5580_v17, %v5582_v40  ;;  %v5594_v52 = vpop.permute.xlu1 %5593 }
 0x5ba   : > { %5584 = vst [vmem:[#allocation4 + $0x1e] sm:$0x1] %v5583_v49  ;;  %v5597_v24 = vsel %vm16336_vm13, %v5594_v52, %v5596_v13 }
 0x5bb   : > { %5598 = vst [vmem:[#allocation4 + $0x1f] sm:$0x1] %v5597_v24 }
 0x5bc PF: > { %v12440_v47 = vld [vmem:[%s14396_s3 + $0x4] ss:$8 sps:$4 sm:$0xff]   ;;  %v12444_v61 = vld [vmem:[%s14396_s3] ss:$8 sps:$4 sm:$0xff]   ;;  %v12446_v62 = vld [vmem:[%s14396_s3 + $0x14] ss:$8 sps:$4 sm:$0xff]   ;;  %v6568_v50 = vlaneseq }
 0x5bd   : > { %v12442_v9 = vld [vmem:[%s14390_s30 + $0x4] ss:$8 sps:$4 sm:$0xff]   ;;  %6518 = vmatprep.subr.bf16.mxu0 %v12440_v47  ;;  %v12445_v7 = vld [vmem:[%s14390_s30] ss:$8 sps:$4 sm:$0xff]   ;;  %v12448_v32 = vld [vmem:[%s14390_s30 + $0x14] ss:$8 sps:$4 sm:$0xff]  }
 0x5be   : > { %9410 = vmatprep.subr.bf16.mxu1 %v12442_v9  ;;  %6519 = vmatpush1.bf16.msra.mxu0 %v12444_v61  ;;  %v12450_v48 = vld [vmem:[%s14396_s3 + $0x10] ss:$8 sps:$4 sm:$0xff]   ;;  %v12452_v37 = vld [vmem:[%s14396_s3 + $0x24] ss:$8 sps:$4 sm:$0xff]   ;;  %v12456_v35 = vld [vmem:[%s14396_s3 + $0x20] ss:$8 sps:$4 sm:$0xff]  }
 0x5bf   : > { %9411 = vmatpush1.bf16.msra.mxu1 %v12445_v7  ;;  %6520 = vmatprep.subr.bf16.mxu0 %v12446_v62  ;;  %v12451_v56 = vld [vmem:[%s14390_s30 + $0x10] ss:$8 sps:$4 sm:$0xff]   ;;  %v12454_v51 = vld [vmem:[%s14390_s30 + $0x24] ss:$8 sps:$4 sm:$0xff]   ;;  %v12457_v58 = vld [vmem:[%s14390_s30 + $0x20] ss:$8 sps:$4 sm:$0xff]  }
 0x5c0   : > { %9412 = vmatprep.subr.bf16.mxu1 %v12448_v32  ;;  %v12458_v2 = vld [vmem:[%s14396_s3 + $0x34] ss:$8 sps:$4 sm:$0xff]   ;;  %v12462_v63 = vld [vmem:[%s14396_s3 + $0x30] ss:$8 sps:$4 sm:$0xff]   ;;  %v12464_v8 = vld [vmem:[%s14396_s3 + $0x44] ss:$8 sps:$4 sm:$0xff]  }
 0x5c1   : > { %v12460_v30 = vld [vmem:[%s14390_s30 + $0x34] ss:$8 sps:$4 sm:$0xff]   ;;  %v12463_v42 = vld [vmem:[%s14390_s30 + $0x30] ss:$8 sps:$4 sm:$0xff]   ;;  %v12466_v53 = vld [vmem:[%s14390_s30 + $0x44] ss:$8 sps:$4 sm:$0xff]  }
 0x5c2   : > { %6521 = vmatpush1.bf16.msra.mxu0 %v12450_v48  ;;  %v12468_v14 = vld [vmem:[%s14396_s3 + $0x40] ss:$8 sps:$4 sm:$0xff]   ;;  %v12470_v28 = vld [vmem:[%s14396_s3 + $0x54] ss:$8 sps:$4 sm:$0xff]   ;;  %v12474_v45 = vld [vmem:[%s14396_s3 + $0x50] ss:$8 sps:$4 sm:$0xff]  }
 0x5c3   : > { %9413 = vmatpush1.bf16.msra.mxu1 %v12451_v56  ;;  %6522 = vmatprep.subr.bf16.mxu0 %v12452_v37  ;;  %v12469_v19 = vld [vmem:[%s14390_s30 + $0x40] ss:$8 sps:$4 sm:$0xff]   ;;  %v12472_v34 = vld [vmem:[%s14390_s30 + $0x54] ss:$8 sps:$4 sm:$0xff]   ;;  %v12475_v18 = vld [vmem:[%s14390_s30 + $0x50] ss:$8 sps:$4 sm:$0xff]  }
 0x5c4   : > { %9414 = vmatprep.subr.bf16.mxu1 %v12454_v51  ;;  %v12476_v25 = vld [vmem:[%s14396_s3 + $0x64] ss:$8 sps:$4 sm:$0xff]   ;;  %v12480_v36 = vld [vmem:[%s14396_s3 + $0x60] ss:$8 sps:$4 sm:$0xff]   ;;  %v12482_v3 = vld [vmem:[%s14396_s3 + $0x74] ss:$8 sps:$4 sm:$0xff]  }
 0x5c5   : > { %v12478_v26 = vld [vmem:[%s14390_s30 + $0x64] ss:$8 sps:$4 sm:$0xff]   ;;  %v12481_v15 = vld [vmem:[%s14390_s30 + $0x60] ss:$8 sps:$4 sm:$0xff]   ;;  %v12484_v27 = vld [vmem:[%s14390_s30 + $0x74] ss:$8 sps:$4 sm:$0xff]  }
 0x5c6   : > { %6523 = vmatpush1.bf16.msra.mxu0 %v12456_v35  ;;  %v12486_v41 = vld [vmem:[%s14396_s3 + $0x70] ss:$8 sps:$4 sm:$0xff]   ;;  %v12488_v54 = vld [vmem:[%s14396_s3 + $0x84] ss:$8 sps:$4 sm:$0xff]   ;;  %v12492_v1 = vld [vmem:[%s14396_s3 + $0x80] ss:$8 sps:$4 sm:$0xff]  }
 0x5c7   : > { %9415 = vmatpush1.bf16.msra.mxu1 %v12457_v58  ;;  %6524 = vmatprep.subr.bf16.mxu0 %v12458_v2  ;;  %v12487_v23 = vld [vmem:[%s14390_s30 + $0x70] ss:$8 sps:$4 sm:$0xff]   ;;  %v12490_v39 = vld [vmem:[%s14390_s30 + $0x84] ss:$8 sps:$4 sm:$0xff]   ;;  %v12493_v59 = vld [vmem:[%s14390_s30 + $0x80] ss:$8 sps:$4 sm:$0xff]  }
 0x5c8   : > { %9416 = vmatprep.subr.bf16.mxu1 %v12460_v30  ;;  %v13874_v5 = vmov 1966171168   ;;  %v12494_v10 = vld [vmem:[%s14396_s3 + $0x94] ss:$8 sps:$4 sm:$0xff]   ;;  %v12498_v55 = vld [vmem:[%s14396_s3 + $0x90] ss:$8 sps:$4 sm:$0xff]  }
 0x5c9   : > { %v6566_v4 = vunpack.c.l.s4 %v13874_v5  ;;  %v12496_v6 = vld [vmem:[%s14390_s30 + $0x94] ss:$8 sps:$4 sm:$0xff]   ;;  %v16469_v38 = vshrl.u32 %v6568_v50, 7  ;;  %v12499_v22 = vld [vmem:[%s14390_s30 + $0x90] ss:$8 sps:$4 sm:$0xff]   ;;  %vm9406_vm14 = vcmask 523264  }
 0x5ca   : > { %6525 = vmatpush1.bf16.msra.mxu0 %v12462_v63  ;;  %v12500_v60 = vld [vmem:[%s14396_s3 + $0xa4] ss:$8 sps:$4 sm:$0xff]   ;;  %v12504_v20 = vld [vmem:[%s14396_s3 + $0xa0] ss:$8 sps:$4 sm:$0xff]   ;;  %v12506_v33 = vld [vmem:[%s14396_s3 + $0xb4] ss:$8 sps:$4 sm:$0xff]  }
 0x5cb   : > { %9417 = vmatpush1.bf16.msra.mxu1 %v12463_v42  ;;  %6526 = vmatprep.subr.bf16.mxu0 %v12464_v8  ;;  %v6567_v21 = vunpack.c.0.s8 %v6566_v4  ;;  %v12502_v57 = vld [vmem:[%s14390_s30 + $0xa4] ss:$8 sps:$4 sm:$0xff]   ;;  %v12505_v43 = vld [vmem:[%s14390_s30 + $0xa0] ss:$8 sps:$4 sm:$0xff]   ;;  %v12508_v31 = vld [vmem:[%s14390_s30 + $0xb4] ss:$8 sps:$4 sm:$0xff]  }
 0x5cc   : > { %9418 = vmatprep.subr.bf16.mxu1 %v12466_v53  ;;  %v5787_v29 = vld [vmem:[#allocation4] sm:$0xff]  ;;  %v16481_v0 = vld.sshfl [vmem:[#allocation9] sm:$0x33 pattern:$0x76325410] }
 0x5cd   : > { %v16477_v44 = vsub.s32 %v6567_v21, %v16469_v38  ;;  %v12510_v16 = vld [vmem:[%s14396_s3 + $0xb0] ss:$8 sps:$4 sm:$0xff]   ;;  %v6321_v11 = vcombine.high %v16481_v0, %v16481_v0  ;;  %v12512_v40 = vld [vmem:[%s14396_s3 + $0xc4] ss:$8 sps:$4 sm:$0xff]   ;;  %v12516_v24 = vld [vmem:[%s14396_s3 + $0xc0] ss:$8 sps:$4 sm:$0xff]   ;;  %v6564_v56 = vcombine.high %v5787_v29, %v5787_v29 }
 0x5ce   : > { %6527 = vmatpush1.bf16.msra.mxu0 %v12468_v14  ;;  %v12511_v12 = vld [vmem:[%s14390_s30 + $0xb0] ss:$8 sps:$4 sm:$0xff]   ;;  %v12514_v17 = vld [vmem:[%s14390_s30 + $0xc4] ss:$8 sps:$4 sm:$0xff]   ;;  %v12517_v47 = vld [vmem:[%s14390_s30 + $0xc0] ss:$8 sps:$4 sm:$0xff]   ;;  %v6324_v14 = vpack.c.bf16 %v16481_v0, %v16481_v0 }
 0x5cf   : > { %9419 = vmatpush1.bf16.msra.mxu1 %v12469_v19  ;;  %6528 = vmatprep.subr.bf16.mxu0 %v12470_v28  ;;  %v6571_v46 = vrot.slane %v5787_v29, %v16477_v44  ;;  %v6325_v13 = vpack.c.bf16 %v6321_v11, %v6321_v11  ;;  %v12518_v9 = vld [vmem:[%s14396_s3 + $0xd4] ss:$8 sps:$4 sm:$0xff]   ;;  %v12522_v7 = vld [vmem:[%s14396_s3 + $0xd0] ss:$8 sps:$4 sm:$0xff]   ;;  %v12524_v32 = vld [vmem:[%s14396_s3 + $0xe4] ss:$8 sps:$4 sm:$0xff]   ;;  %v16504_v2 = vrot.slane %v6564_v56, %v16477_v44 }
 0x5d0   : > { %9420 = vmatprep.subr.bf16.mxu1 %v12472_v34  ;;  %v12520_v61 = vld [vmem:[%s14390_s30 + $0xd4] ss:$8 sps:$4 sm:$0xff]   ;;  %v12523_v62 = vld [vmem:[%s14390_s30 + $0xd0] ss:$8 sps:$4 sm:$0xff]   ;;  %v12526_v48 = vld [vmem:[%s14390_s30 + $0xe4] ss:$8 sps:$4 sm:$0xff]  }
 0x5d1   : > { %v6579_v49 = vcombine.high %v6571_v46, %v6571_v46  ;;  %6550 = vmatprep.mubr.bf16.mxu0 %v6325_v13  ;;  %v12528_v37 = vld [vmem:[%s14396_s3 + $0xe0] ss:$8 sps:$4 sm:$0xff]   ;;  %v12530_v35 = vld [vmem:[%s14396_s3 + $0xf4] ss:$8 sps:$4 sm:$0xff]   ;;  %v12534_v30 = vld [vmem:[%s14396_s3 + $0xf0] ss:$8 sps:$4 sm:$0xff]   ;;  %v6580_v53 = vcombine.high %v16504_v2, %v16504_v2  ;;  %v16515_v19 = vrot.slane %v6571_v46, %v16477_v44 }
 0x5d2   : > { %6529 = vmatpush1.bf16.msra.mxu0 %v12474_v45  ;;  %v12529_v51 = vld [vmem:[%s14390_s30 + $0xe0] ss:$8 sps:$4 sm:$0xff]   ;;  %v12532_v58 = vld [vmem:[%s14390_s30 + $0xf4] ss:$8 sps:$4 sm:$0xff]   ;;  %v12535_v63 = vld [vmem:[%s14390_s30 + $0xf0] ss:$8 sps:$4 sm:$0xff]  }
 0x5d3   : > { %9421 = vmatpush1.bf16.msra.mxu1 %v12475_v18  ;;  %6530 = vmatprep.subr.bf16.mxu0 %v12476_v25  ;;  %v6601_v52 = vrot.slane %v6579_v49, %v16477_v44  ;;  %v12539_v42 = vld [vmem:[%s14390_s30 + $0x104] ss:$8 sps:$4 sm:$0xff]   ;;  %v12537_v28 = vld [vmem:[%s14390_s30 + $0x100] ss:$8 sps:$4 sm:$0xff]   ;;  %v12545_v45 = vld [vmem:[%s14390_s30 + $0x114] ss:$8 sps:$4 sm:$0xff]  }
 0x5d4   : > { %9422 = vmatprep.subr.bf16.mxu1 %v12478_v26  ;;  %v12542_v8 = vld [vmem:[%s14390_s30 + $0x204] ss:$8 sps:$4 sm:$0xff]   ;;  %v12540_v34 = vld [vmem:[%s14390_s30 + $0x200] ss:$8 sps:$4 sm:$0xff]   ;;  %v12548_v18 = vld [vmem:[%s14390_s30 + $0x214] ss:$8 sps:$4 sm:$0xff]   ;;  %v16522_v26 = vrot.slane %v6580_v53, %v16477_v44 }
 0x5d5   : > { %9442 = vmatprep.mubr.bf16.mxu1 %v6601_v52  ;;  %v6611_v25 = vcombine.high %v6601_v52, %v6601_v52  ;;  %v12563_v5 = vld [vmem:[%s14390_s30 + $0x144] ss:$8 sps:$4 sm:$0xff]   ;;  %v12561_v50 = vld [vmem:[%s14390_s30 + $0x140] ss:$8 sps:$4 sm:$0xff]   ;;  %v12567_v21 = vld [vmem:[%s14390_s30 + $0x150] ss:$8 sps:$4 sm:$0xff]  }
 0x5d6   : > { %6531 = vmatpush1.bf16.msra.mxu0 %v12480_v36  ;;  %v12543_v36 = vld [vmem:[%s14390_s30 + $0x110] ss:$8 sps:$4 sm:$0xff]   ;;  %v12566_v4 = vld [vmem:[%s14390_s30 + $0x244] ss:$8 sps:$4 sm:$0xff]   ;;  %v12588_v11 = vld [vmem:[%s14390_s30 + $0x280] ss:$8 sps:$4 sm:$0xff]  }
 0x5d7   : > { %9423 = vmatpush1.bf16.msra.mxu1 %v12481_v15  ;;  %6532 = vmatprep.subr.bf16.mxu0 %v12482_v3  ;;  %v12546_v15 = vld [vmem:[%s14390_s30 + $0x210] ss:$8 sps:$4 sm:$0xff]   ;;  %v12551_v3 = vld [vmem:[%s14390_s30 + $0x124] ss:$8 sps:$4 sm:$0xff]   ;;  %v12621_v53 = vld [vmem:[%s14390_s30 + $0x1e0] ss:$8 sps:$4 sm:$0xff]  }
 0x5d8   : > { %9424 = vmatprep.subr.bf16.mxu1 %v12484_v27  ;;  %v12554_v27 = vld [vmem:[%s14390_s30 + $0x224] ss:$8 sps:$4 sm:$0xff]   ;;  %v12579_v29 = vld [vmem:[%s14390_s30 + $0x170] ss:$8 sps:$4 sm:$0xff]  }
 0x5d9   : > { %v12582_v0 = vld [vmem:[%s14390_s30 + $0x270] ss:$8 sps:$4 sm:$0xff]   ;;  %v12587_v46 = vld [vmem:[%s14390_s30 + $0x184] ss:$8 sps:$4 sm:$0xff]  }
 0x5da   : > { %6533 = vmatpush1.bf16.msra.mxu0 %v12486_v41  ;;  %v12549_v41 = vld [vmem:[%s14390_s30 + $0x120] ss:$8 sps:$4 sm:$0xff]   ;;  %v12591_v49 = vld [vmem:[%s14390_s30 + $0x190] ss:$8 sps:$4 sm:$0xff]   ;;  %v12599_v52 = vld [vmem:[%s14390_s30 + $0x1a4] ss:$8 sps:$4 sm:$0xff]  }
 0x5db   : > { %9425 = vmatpush1.bf16.msra.mxu1 %v12487_v23  ;;  %6534 = vmatprep.subr.bf16.mxu0 %v12488_v54  ;;  %v12552_v23 = vld [vmem:[%s14390_s30 + $0x220] ss:$8 sps:$4 sm:$0xff]   ;;  %v12557_v54 = vld [vmem:[%s14390_s30 + $0x134] ss:$8 sps:$4 sm:$0xff]   ;;  %v12594_v13 = vld [vmem:[%s14390_s30 + $0x290] ss:$8 sps:$4 sm:$0xff]  }
 0x5dc   : > { %9426 = vmatprep.subr.bf16.mxu1 %v12490_v39  ;;  %v12560_v39 = vld [vmem:[%s14390_s30 + $0x234] ss:$8 sps:$4 sm:$0xff]   ;;  %v12614_v56 = vld [vmem:[%s14390_s30 + $0x2c4] ss:$8 sps:$4 sm:$0xff]  }
 0x5de   : > { %6535 = vmatpush1.bf16.msra.mxu0 %v12492_v1  ;;  %v12555_v1 = vld [vmem:[%s14390_s30 + $0x130] ss:$8 sps:$4 sm:$0xff]  }
 0x5df   : > { %9427 = vmatpush1.bf16.msra.mxu1 %v12493_v59  ;;  %6536 = vmatprep.subr.bf16.mxu0 %v12494_v10  ;;  %v12558_v59 = vld [vmem:[%s14390_s30 + $0x230] ss:$8 sps:$4 sm:$0xff]   ;;  %v12564_v10 = vld [vmem:[%s14390_s30 + $0x240] ss:$8 sps:$4 sm:$0xff]  }
 0x5e0   : > { %9428 = vmatprep.subr.bf16.mxu1 %v12496_v6  ;;  %v12569_v6 = vld [vmem:[%s14390_s30 + $0x154] ss:$8 sps:$4 sm:$0xff]  }
 0x5e2   : > { %6537 = vmatpush1.bf16.msra.mxu0 %v12498_v55  ;;  %v12572_v55 = vld [vmem:[%s14390_s30 + $0x254] ss:$8 sps:$4 sm:$0xff]  }
 0x5e3   : > { %9429 = vmatpush1.bf16.msra.mxu1 %v12499_v22  ;;  %6538 = vmatprep.subr.bf16.mxu0 %v12500_v60  ;;  %v12570_v22 = vld [vmem:[%s14390_s30 + $0x250] ss:$8 sps:$4 sm:$0xff]   ;;  %v12575_v60 = vld [vmem:[%s14390_s30 + $0x164] ss:$8 sps:$4 sm:$0xff]  }
 0x5e4   : > { %9430 = vmatprep.subr.bf16.mxu1 %v12502_v57  ;;  %v12578_v57 = vld [vmem:[%s14390_s30 + $0x264] ss:$8 sps:$4 sm:$0xff]  }
 0x5e6   : > { %6539 = vmatpush1.bf16.msra.mxu0 %v12504_v20  ;;  %v12573_v20 = vld [vmem:[%s14390_s30 + $0x160] ss:$8 sps:$4 sm:$0xff]  }
 0x5e7   : > { %9431 = vmatpush1.bf16.msra.mxu1 %v12505_v43  ;;  %6540 = vmatprep.subr.bf16.mxu0 %v12506_v33  ;;  %v12576_v43 = vld [vmem:[%s14390_s30 + $0x260] ss:$8 sps:$4 sm:$0xff]   ;;  %v12581_v33 = vld [vmem:[%s14390_s30 + $0x174] ss:$8 sps:$4 sm:$0xff]  }
 0x5e8   : > { %9432 = vmatprep.subr.bf16.mxu1 %v12508_v31  ;;  %v12584_v31 = vld [vmem:[%s14390_s30 + $0x274] ss:$8 sps:$4 sm:$0xff]  }
 0x5ea   : > { %6541 = vmatpush1.bf16.msra.mxu0 %v12510_v16  ;;  %v12590_v16 = vld [vmem:[%s14390_s30 + $0x284] ss:$8 sps:$4 sm:$0xff]  }
 0x5eb   : > { %9433 = vmatpush1.bf16.msra.mxu1 %v12511_v12  ;;  %6542 = vmatprep.subr.bf16.mxu0 %v12512_v40  ;;  %v12585_v12 = vld [vmem:[%s14390_s30 + $0x180] ss:$8 sps:$4 sm:$0xff]   ;;  %v12593_v40 = vld [vmem:[%s14390_s30 + $0x194] ss:$8 sps:$4 sm:$0xff]  }
 0x5ec   : > { %9434 = vmatprep.subr.bf16.mxu1 %v12514_v17  ;;  %v12596_v17 = vld [vmem:[%s14390_s30 + $0x294] ss:$8 sps:$4 sm:$0xff]  }
 0x5ee   : > { %6543 = vmatpush1.bf16.msra.mxu0 %v12516_v24  ;;  %v12602_v24 = vld [vmem:[%s14390_s30 + $0x2a4] ss:$8 sps:$4 sm:$0xff]  }
 0x5ef   : > { %9435 = vmatpush1.bf16.msra.mxu1 %v12517_v47  ;;  %6544 = vmatprep.subr.bf16.mxu0 %v12518_v9  ;;  %v12597_v47 = vld [vmem:[%s14390_s30 + $0x1a0] ss:$8 sps:$4 sm:$0xff]  }
 0x5f0   : > { %9436 = vmatprep.subr.bf16.mxu1 %v12520_v61  ;;  %v12600_v9 = vld [vmem:[%s14390_s30 + $0x2a0] ss:$8 sps:$4 sm:$0xff]   ;;  %v12605_v61 = vld [vmem:[%s14390_s30 + $0x1b4] ss:$8 sps:$4 sm:$0xff]  }
 0x5f2   : > { %6545 = vmatpush1.bf16.msra.mxu0 %v12522_v7  ;;  %v12608_v7 = vld [vmem:[%s14390_s30 + $0x2b4] ss:$8 sps:$4 sm:$0xff]  }
 0x5f3   : > { %9437 = vmatpush1.bf16.msra.mxu1 %v12523_v62  ;;  %6546 = vmatprep.subr.bf16.mxu0 %v12524_v32  ;;  %v12603_v62 = vld [vmem:[%s14390_s30 + $0x1b0] ss:$8 sps:$4 sm:$0xff]  }
 0x5f4   : > { %9438 = vmatprep.subr.bf16.mxu1 %v12526_v48  ;;  %v12606_v32 = vld [vmem:[%s14390_s30 + $0x2b0] ss:$8 sps:$4 sm:$0xff]   ;;  %v12611_v48 = vld [vmem:[%s14390_s30 + $0x1c4] ss:$8 sps:$4 sm:$0xff]  }
 0x5f6   : > { %6547 = vmatpush1.bf16.msra.mxu0 %v12528_v37  ;;  %v12609_v37 = vld [vmem:[%s14390_s30 + $0x1c0] ss:$8 sps:$4 sm:$0xff]  }
 0x5f7   : > { %9439 = vmatpush1.bf16.msra.mxu1 %v12529_v51  ;;  %6548 = vmatprep.subr.bf16.mxu0 %v12530_v35  ;;  %v12612_v51 = vld [vmem:[%s14390_s30 + $0x2c0] ss:$8 sps:$4 sm:$0xff]   ;;  %v12617_v35 = vld [vmem:[%s14390_s30 + $0x1d4] ss:$8 sps:$4 sm:$0xff]  }
 0x5f8   : > { %9440 = vmatprep.subr.bf16.mxu1 %v12532_v58  ;;  %v12620_v58 = vld [vmem:[%s14390_s30 + $0x2d4] ss:$8 sps:$4 sm:$0xff]  }
 0x5fa   : > { %6549 = vmatpush1.bf16.msra.mxu0 %v12534_v30  ;;  %v12615_v30 = vld [vmem:[%s14390_s30 + $0x1d0] ss:$8 sps:$4 sm:$0xff]  }
 0x5fb   : > { %9441 = vmatpush1.bf16.msra.mxu1 %v12535_v63  ;;  %9451 = vmatprep.subr.bf16.mxu0 %v12539_v42  ;;  %v12618_v63 = vld [vmem:[%s14390_s30 + $0x2d0] ss:$8 sps:$4 sm:$0xff]   ;;  %v12623_v42 = vld [vmem:[%s14390_s30 + $0x1e4] ss:$8 sps:$4 sm:$0xff]  }
 0x5fc   : > { %9492 = vmatprep.subr.bf16.mxu1 %v12542_v8  ;;  %v12626_v8 = vld [vmem:[%s14390_s30 + $0x2e4] ss:$8 sps:$4 sm:$0xff]  }
 0x5fd   : > { %6551 = vmatmul.mubr.bf16.vlgmr.msra.gmra.mrb[0].mxu0 %v6324_v14  ;;  %v12624_v14 = vld [vmem:[%s14390_s30 + $0x2e0] ss:$8 sps:$4 sm:$0xff]  }
 0x5fe   : > { %9443 = vmatmul.mubr.bf16.vlgmr.msra.gmra.mrb[0].mxu1 %v16515_v19  ;;  %9452 = vmatpush1.bf16.msra.mxu0 %v12537_v28  ;;  %v12629_v28 = vld [vmem:[%s14390_s30 + $0x1f4] ss:$8 sps:$4 sm:$0xff]  }
 0x5ff   : > { %9493 = vmatpush1.bf16.msra.mxu1 %v12540_v34  ;;  %9453 = vmatprep.subr.bf16.mxu0 %v12545_v45  ;;  %v12632_v34 = vld [vmem:[%s14390_s30 + $0x2f4] ss:$8 sps:$4 sm:$0xff]   ;;  %v12627_v45 = vld [vmem:[%s14390_s30 + $0x1f0] ss:$8 sps:$4 sm:$0xff]  }
 0x600   : > { %9494 = vmatprep.subr.bf16.mxu1 %v12548_v18  ;;  %9483 = vmatprep.mubr.bf16.mxu0 %v6611_v25  ;;  %v12630_v18 = vld [vmem:[%s14390_s30 + $0x2f0] ss:$8 sps:$4 sm:$0xff]   ;;  %v12635_v25 = vld [vmem:[%s14390_s30 + $0x304] ss:$8 sps:$4 sm:$0xff]  }
 0x601   : > { %9524 = vmatprep.mubr.bf16.mxu1 %v16522_v26 }
 0x602   : > { %9454 = vmatpush1.bf16.msra.mxu0 %v12543_v36  ;;  %v12638_v36 = vld [vmem:[%s14390_s30 + $0x404] ss:$8 sps:$4 sm:$0xff]  }
 0x603   : > { %9495 = vmatpush1.bf16.msra.mxu1 %v12546_v15  ;;  %9455 = vmatprep.subr.bf16.mxu0 %v12551_v3  ;;  %v6609_v15 = vcombine.high %v16515_v19, %v16515_v19  ;;  %v16590_v3 = vrot.slane %v16504_v2, %v16477_v44  ;;  %v16598_v19 = vld [vmem:[#allocation4 + $0x8] sm:$0xff] }
 0x604   : > { %9496 = vmatprep.subr.bf16.mxu1 %v12554_v27  ;;  %v12633_v27 = vld [vmem:[%s14390_s30 + $0x300] ss:$8 sps:$4 sm:$0xff]   ;;  %v12639_v2 = vld [vmem:[%s14390_s30 + $0x310] ss:$8 sps:$4 sm:$0xff]  }
 0x606   : > { %9456 = vmatpush1.bf16.msra.mxu0 %v12549_v41  ;;  %v12636_v41 = vld [vmem:[%s14390_s30 + $0x400] ss:$8 sps:$4 sm:$0xff]  }
 0x607   : > { %9497 = vmatpush1.bf16.msra.mxu1 %v12552_v23  ;;  %9457 = vmatprep.subr.bf16.mxu0 %v12557_v54  ;;  %v12641_v23 = vld [vmem:[%s14390_s30 + $0x314] ss:$8 sps:$4 sm:$0xff]  }
 0x608   : > { %9498 = vmatprep.subr.bf16.mxu1 %v12560_v39  ;;  %v12644_v54 = vld [vmem:[%s14390_s30 + $0x414] ss:$8 sps:$4 sm:$0xff]   ;;  %v6612_v39 = vcombine.high %v16522_v26, %v16522_v26  ;;  %v12650_v26 = vld [vmem:[%s14390_s30 + $0x424] ss:$8 sps:$4 sm:$0xff]  }
 0x60a   : > { %9458 = vmatpush1.bf16.msra.mxu0 %v12555_v1  ;;  %v16604_v1 = vrot.slane %v16598_v19, %v16477_v44 }
 0x60b   : > { %9499 = vmatpush1.bf16.msra.mxu1 %v12558_v59  ;;  %9459 = vmatprep.subr.bf16.mxu0 %v12563_v5  ;;  %v12642_v59 = vld [vmem:[%s14390_s30 + $0x410] ss:$8 sps:$4 sm:$0xff]   ;;  %v12647_v5 = vld [vmem:[%s14390_s30 + $0x324] ss:$8 sps:$4 sm:$0xff]  }
 0x60c   : > { %9500 = vmatprep.subr.bf16.mxu1 %v12566_v4  ;;  %v6628_v4 = vcombine.high %v16604_v1, %v16604_v1 }
 0x60e   : > { %9460 = vmatpush1.bf16.msra.mxu0 %v12561_v50  ;;  %v12645_v50 = vld [vmem:[%s14390_s30 + $0x320] ss:$8 sps:$4 sm:$0xff]  }
 0x60f   : > { %9501 = vmatpush1.bf16.msra.mxu1 %v12564_v10  ;;  %9461 = vmatprep.subr.bf16.mxu0 %v12569_v6  ;;  %v16613_v10 = vrot.slane %v6628_v4, %v16477_v44  ;;  %v12648_v6 = vld [vmem:[%s14390_s30 + $0x420] ss:$8 sps:$4 sm:$0xff]  }
 0x610   : > { %9502 = vmatprep.subr.bf16.mxu1 %v12572_v55  ;;  %v12653_v55 = vld [vmem:[%s14390_s30 + $0x334] ss:$8 sps:$4 sm:$0xff]  }
 0x612   : > { %9462 = vmatpush1.bf16.msra.mxu0 %v12567_v21  ;;  %v12656_v21 = vld [vmem:[%s14390_s30 + $0x434] ss:$8 sps:$4 sm:$0xff]  }
 0x613   : > { %9503 = vmatpush1.bf16.msra.mxu1 %v12570_v22  ;;  %9463 = vmatprep.subr.bf16.mxu0 %v12575_v60  ;;  %v12651_v22 = vld [vmem:[%s14390_s30 + $0x330] ss:$8 sps:$4 sm:$0xff]  }
 0x614   : > { %9504 = vmatprep.subr.bf16.mxu1 %v12578_v57  ;;  %v12654_v60 = vld [vmem:[%s14390_s30 + $0x430] ss:$8 sps:$4 sm:$0xff]   ;;  %v12659_v57 = vld [vmem:[%s14390_s30 + $0x344] ss:$8 sps:$4 sm:$0xff]  }
 0x616   : > { %9464 = vmatpush1.bf16.msra.mxu0 %v12573_v20  ;;  %v12662_v20 = vld [vmem:[%s14390_s30 + $0x444] ss:$8 sps:$4 sm:$0xff]  }
 0x617   : > { %9505 = vmatpush1.bf16.msra.mxu1 %v12576_v43  ;;  %9465 = vmatprep.subr.bf16.mxu0 %v12581_v33  ;;  %v12657_v43 = vld [vmem:[%s14390_s30 + $0x340] ss:$8 sps:$4 sm:$0xff]  }
 0x618   : > { %9506 = vmatprep.subr.bf16.mxu1 %v12584_v31  ;;  %v12660_v33 = vld [vmem:[%s14390_s30 + $0x440] ss:$8 sps:$4 sm:$0xff]   ;;  %v12665_v31 = vld [vmem:[%s14390_s30 + $0x354] ss:$8 sps:$4 sm:$0xff]  }
 0x61a   : > { %9466 = vmatpush1.bf16.msra.mxu0 %v12579_v29  ;;  %v12668_v29 = vld [vmem:[%s14390_s30 + $0x454] ss:$8 sps:$4 sm:$0xff]  }
 0x61b   : > { %9507 = vmatpush1.bf16.msra.mxu1 %v12582_v0  ;;  %9467 = vmatprep.subr.bf16.mxu0 %v12587_v46  ;;  %v12663_v0 = vld [vmem:[%s14390_s30 + $0x350] ss:$8 sps:$4 sm:$0xff]  }
 0x61c   : > { %9508 = vmatprep.subr.bf16.mxu1 %v12590_v16  ;;  %v12666_v46 = vld [vmem:[%s14390_s30 + $0x450] ss:$8 sps:$4 sm:$0xff]   ;;  %v12671_v16 = vld [vmem:[%s14390_s30 + $0x364] ss:$8 sps:$4 sm:$0xff]  }
 0x61e   : > { %9468 = vmatpush1.bf16.msra.mxu0 %v12585_v12  ;;  %v12674_v12 = vld [vmem:[%s14390_s30 + $0x464] ss:$8 sps:$4 sm:$0xff]  }
 0x61f   : > { %9509 = vmatpush1.bf16.msra.mxu1 %v12588_v11  ;;  %9469 = vmatprep.subr.bf16.mxu0 %v12593_v40  ;;  %v12669_v11 = vld [vmem:[%s14390_s30 + $0x360] ss:$8 sps:$4 sm:$0xff]  }
 0x620   : > { %9510 = vmatprep.subr.bf16.mxu1 %v12596_v17  ;;  %v12672_v40 = vld [vmem:[%s14390_s30 + $0x460] ss:$8 sps:$4 sm:$0xff]   ;;  %v12677_v17 = vld [vmem:[%s14390_s30 + $0x374] ss:$8 sps:$4 sm:$0xff]  }
 0x622   : > { %9470 = vmatpush1.bf16.msra.mxu0 %v12591_v49  ;;  %v12680_v49 = vld [vmem:[%s14390_s30 + $0x474] ss:$8 sps:$4 sm:$0xff]  }
 0x623   : > { %9511 = vmatpush1.bf16.msra.mxu1 %v12594_v13  ;;  %9471 = vmatprep.subr.bf16.mxu0 %v12599_v52  ;;  %v12675_v13 = vld [vmem:[%s14390_s30 + $0x370] ss:$8 sps:$4 sm:$0xff]  }
 0x624   : > { %9512 = vmatprep.subr.bf16.mxu1 %v12602_v24  ;;  %v12678_v52 = vld [vmem:[%s14390_s30 + $0x470] ss:$8 sps:$4 sm:$0xff]   ;;  %v12683_v24 = vld [vmem:[%s14390_s30 + $0x384] ss:$8 sps:$4 sm:$0xff]  }
 0x626   : > { %9472 = vmatpush1.bf16.msra.mxu0 %v12597_v47  ;;  %v12686_v47 = vld [vmem:[%s14390_s30 + $0x484] ss:$8 sps:$4 sm:$0xff]  }
 0x627   : > { %9513 = vmatpush1.bf16.msra.mxu1 %v12600_v9  ;;  %9473 = vmatprep.subr.bf16.mxu0 %v12605_v61  ;;  %v12681_v9 = vld [vmem:[%s14390_s30 + $0x380] ss:$8 sps:$4 sm:$0xff]  }
 0x628   : > { %9514 = vmatprep.subr.bf16.mxu1 %v12608_v7  ;;  %v12684_v61 = vld [vmem:[%s14390_s30 + $0x480] ss:$8 sps:$4 sm:$0xff]   ;;  %v12689_v7 = vld [vmem:[%s14390_s30 + $0x394] ss:$8 sps:$4 sm:$0xff]  }
 0x62a   : > { %9474 = vmatpush1.bf16.msra.mxu0 %v12603_v62  ;;  %v12692_v62 = vld [vmem:[%s14390_s30 + $0x494] ss:$8 sps:$4 sm:$0xff]  }
 0x62b   : > { %9515 = vmatpush1.bf16.msra.mxu1 %v12606_v32  ;;  %9475 = vmatprep.subr.bf16.mxu0 %v12611_v48  ;;  %v12687_v32 = vld [vmem:[%s14390_s30 + $0x390] ss:$8 sps:$4 sm:$0xff]  }
 0x62c   : > { %9516 = vmatprep.subr.bf16.mxu1 %v12614_v56  ;;  %v12690_v48 = vld [vmem:[%s14390_s30 + $0x490] ss:$8 sps:$4 sm:$0xff]   ;;  %v12695_v56 = vld [vmem:[%s14390_s30 + $0x3a4] ss:$8 sps:$4 sm:$0xff]  }
 0x62e   : > { %9476 = vmatpush1.bf16.msra.mxu0 %v12609_v37  ;;  %v12698_v37 = vld [vmem:[%s14390_s30 + $0x4a4] ss:$8 sps:$4 sm:$0xff]  }
 0x62f   : > { %9517 = vmatpush1.bf16.msra.mxu1 %v12612_v51  ;;  %9477 = vmatprep.subr.bf16.mxu0 %v12617_v35  ;;  %v12693_v51 = vld [vmem:[%s14390_s30 + $0x3a0] ss:$8 sps:$4 sm:$0xff]  }
 0x630   : > { %9518 = vmatprep.subr.bf16.mxu1 %v12620_v58  ;;  %v12696_v35 = vld [vmem:[%s14390_s30 + $0x4a0] ss:$8 sps:$4 sm:$0xff]   ;;  %v12701_v58 = vld [vmem:[%s14390_s30 + $0x3b4] ss:$8 sps:$4 sm:$0xff]  }
 0x632   : > { %9478 = vmatpush1.bf16.msra.mxu0 %v12615_v30  ;;  %v12704_v30 = vld [vmem:[%s14390_s30 + $0x4b4] ss:$8 sps:$4 sm:$0xff]  }
 0x633   : > { %9519 = vmatpush1.bf16.msra.mxu1 %v12618_v63  ;;  %9479 = vmatprep.subr.bf16.mxu0 %v12623_v42  ;;  %v12699_v63 = vld [vmem:[%s14390_s30 + $0x3b0] ss:$8 sps:$4 sm:$0xff]  }
 0x634   : > { %9520 = vmatprep.subr.bf16.mxu1 %v12626_v8  ;;  %v12702_v42 = vld [vmem:[%s14390_s30 + $0x4b0] ss:$8 sps:$4 sm:$0xff]   ;;  %v12707_v8 = vld [vmem:[%s14390_s30 + $0x3c4] ss:$8 sps:$4 sm:$0xff]  }
 0x636   : > { %9480 = vmatpush1.bf16.msra.mxu0 %v12621_v53  ;;  %v12710_v53 = vld [vmem:[%s14390_s30 + $0x4c4] ss:$8 sps:$4 sm:$0xff]  }
 0x637   : > { %9521 = vmatpush1.bf16.msra.mxu1 %v12624_v14  ;;  %9481 = vmatprep.subr.bf16.mxu0 %v12629_v28  ;;  %v12705_v14 = vld [vmem:[%s14390_s30 + $0x3c0] ss:$8 sps:$4 sm:$0xff]  }
 0x638   : > { %9522 = vmatprep.subr.bf16.mxu1 %v12632_v34  ;;  %v12708_v28 = vld [vmem:[%s14390_s30 + $0x4c0] ss:$8 sps:$4 sm:$0xff]   ;;  %v12713_v34 = vld [vmem:[%s14390_s30 + $0x3d4] ss:$8 sps:$4 sm:$0xff]  }
 0x63a   : > { %9482 = vmatpush1.bf16.msra.mxu0 %v12627_v45  ;;  %v12716_v45 = vld [vmem:[%s14390_s30 + $0x4d4] ss:$8 sps:$4 sm:$0xff]  }
 0x63b   : > { %9523 = vmatpush1.bf16.msra.mxu1 %v12630_v18  ;;  %9533 = vmatprep.subr.bf16.mxu0 %v12635_v25  ;;  %v12711_v18 = vld [vmem:[%s14390_s30 + $0x3d0] ss:$8 sps:$4 sm:$0xff]  }
 0x63c   : > { %9574 = vmatprep.subr.bf16.mxu1 %v12638_v36  ;;  %v12714_v25 = vld [vmem:[%s14390_s30 + $0x4d0] ss:$8 sps:$4 sm:$0xff]   ;;  %v12719_v36 = vld [vmem:[%s14390_s30 + $0x3e4] ss:$8 sps:$4 sm:$0xff]  }
 0x63d   : > { %9484 = vmatmul.mubr.bf16.vlgmr.msra.gmra.mrb[4].mxu0 %v6609_v15  ;;  %v12722_v15 = vld [vmem:[%s14390_s30 + $0x4e4] ss:$8 sps:$4 sm:$0xff]  }
 0x63e   : > { %9525 = vmatmul.mubr.bf16.vlgmr.msra.gmra.mrb[4].mxu1 %v16590_v3  ;;  %9534 = vmatpush1.bf16.msra.mxu0 %v12633_v27  ;;  %v6613_v27 = vcombine.high %v16598_v19, %v16598_v19  ;;  %v12726_v19 = vld [vmem:[%s14390_s30 + $0x4f0] ss:$8 sps:$4 sm:$0xff]  }
 0x63f   : > { %9575 = vmatpush1.bf16.msra.mxu1 %v12636_v41  ;;  %9535 = vmatprep.subr.bf16.mxu0 %v12641_v23  ;;  %v12717_v41 = vld [vmem:[%s14390_s30 + $0x3e0] ss:$8 sps:$4 sm:$0xff]  }
 0x640   : > { %9576 = vmatprep.subr.bf16.mxu1 %v12644_v54  ;;  %9565 = vmatprep.mubr.bf16.mxu0 %v6612_v39  ;;  %v12720_v23 = vld [vmem:[%s14390_s30 + $0x4e0] ss:$8 sps:$4 sm:$0xff]   ;;  %v12725_v54 = vld [vmem:[%s14390_s30 + $0x3f4] ss:$8 sps:$4 sm:$0xff]  }
 0x641   : > { %9606 = vmatprep.mubr.bf16.mxu1 %v16613_v10  ;;  %v12728_v39 = vld [vmem:[%s14390_s30 + $0x4f4] ss:$8 sps:$4 sm:$0xff]  }
 0x642   : > { %9536 = vmatpush1.bf16.msra.mxu0 %v12639_v2  ;;  %v16670_v2 = vrot.slane %v6613_v27, %v16477_v44  ;;  %v12806_v27 = vld [vmem:[%s14390_s30 + $0x6c4] ss:$8 sps:$4 sm:$0xff]  }
 0x643   : > { %9577 = vmatpush1.bf16.msra.mxu1 %v12642_v59  ;;  %9537 = vmatprep.subr.bf16.mxu0 %v12647_v5  ;;  %v12723_v59 = vld [vmem:[%s14390_s30 + $0x3f0] ss:$8 sps:$4 sm:$0xff]   ;;  %v12731_v5 = vld [vmem:[%s14390_s30 + $0x504] ss:$8 sps:$4 sm:$0xff]  }
 0x644   : > { %9578 = vmatprep.subr.bf16.mxu1 %v12650_v26  ;;  %v12734_v26 = vld [vmem:[%s14390_s30 + $0x604] ss:$8 sps:$4 sm:$0xff]   ;;  %v6629_v4 = vcombine.high %v16670_v2, %v16670_v2 }
 0x646   : > { %9538 = vmatpush1.bf16.msra.mxu0 %v12645_v50  ;;  %v6610_v50 = vcombine.high %v16590_v3, %v16590_v3  ;;  %v16691_v3 = vrot.slane %v6629_v4, %v16477_v44  ;;  %v12813_v4 = vld [vmem:[%s14390_s30 + $0x5e0] ss:$8 sps:$4 sm:$0xff]  }
 0x647   : > { %9579 = vmatpush1.bf16.msra.mxu1 %v12648_v6  ;;  %9539 = vmatprep.subr.bf16.mxu0 %v12653_v55  ;;  %v12729_v6 = vld [vmem:[%s14390_s30 + $0x500] ss:$8 sps:$4 sm:$0xff]   ;;  %v16683_v55 = vrot.slane %v16604_v1, %v16477_v44  ;;  %v12735_v1 = vld [vmem:[%s14390_s30 + $0x510] ss:$8 sps:$4 sm:$0xff]  }
 0x648   : > { %9580 = vmatprep.subr.bf16.mxu1 %v12656_v21  ;;  %v12732_v21 = vld [vmem:[%s14390_s30 + $0x600] ss:$8 sps:$4 sm:$0xff]  }
 0x64a   : > { %9540 = vmatpush1.bf16.msra.mxu0 %v12651_v22  ;;  %v12737_v22 = vld [vmem:[%s14390_s30 + $0x514] ss:$8 sps:$4 sm:$0xff]  }
 0x64b   : > { %9581 = vmatpush1.bf16.msra.mxu1 %v12654_v60  ;;  %9541 = vmatprep.subr.bf16.mxu0 %v12659_v57  ;;  %v12740_v60 = vld [vmem:[%s14390_s30 + $0x614] ss:$8 sps:$4 sm:$0xff]   ;;  %v6660_v57 = vcombine.high %v16613_v10, %v16613_v10  ;;  %v12746_v10 = vld [vmem:[%s14390_s30 + $0x624] ss:$8 sps:$4 sm:$0xff]  }
 0x64c   : > { %9582 = vmatprep.subr.bf16.mxu1 %v12662_v20  ;;  %v12738_v20 = vld [vmem:[%s14390_s30 + $0x610] ss:$8 sps:$4 sm:$0xff]  }
 0x64e   : > { %9542 = vmatpush1.bf16.msra.mxu0 %v12657_v43  ;;  %v12743_v43 = vld [vmem:[%s14390_s30 + $0x524] ss:$8 sps:$4 sm:$0xff]  }
 0x64f   : > { %9583 = vmatpush1.bf16.msra.mxu1 %v12660_v33  ;;  %9543 = vmatprep.subr.bf16.mxu0 %v12665_v31  ;;  %v12741_v33 = vld [vmem:[%s14390_s30 + $0x520] ss:$8 sps:$4 sm:$0xff]  }
 0x650   : > { %9584 = vmatprep.subr.bf16.mxu1 %v12668_v29  ;;  %v12744_v31 = vld [vmem:[%s14390_s30 + $0x620] ss:$8 sps:$4 sm:$0xff]   ;;  %v12749_v29 = vld [vmem:[%s14390_s30 + $0x534] ss:$8 sps:$4 sm:$0xff]  }
 0x652   : > { %9544 = vmatpush1.bf16.msra.mxu0 %v12663_v0  ;;  %v12752_v0 = vld [vmem:[%s14390_s30 + $0x634] ss:$8 sps:$4 sm:$0xff]  }
 0x653   : > { %9585 = vmatpush1.bf16.msra.mxu1 %v12666_v46  ;;  %9545 = vmatprep.subr.bf16.mxu0 %v12671_v16  ;;  %v12747_v46 = vld [vmem:[%s14390_s30 + $0x530] ss:$8 sps:$4 sm:$0xff]  }
 0x654   : > { %9586 = vmatprep.subr.bf16.mxu1 %v12674_v12  ;;  %v12750_v16 = vld [vmem:[%s14390_s30 + $0x630] ss:$8 sps:$4 sm:$0xff]   ;;  %v12755_v12 = vld [vmem:[%s14390_s30 + $0x544] ss:$8 sps:$4 sm:$0xff]  }
 0x656   : > { %9546 = vmatpush1.bf16.msra.mxu0 %v12669_v11  ;;  %v12758_v11 = vld [vmem:[%s14390_s30 + $0x644] ss:$8 sps:$4 sm:$0xff]  }
 0x657   : > { %9587 = vmatpush1.bf16.msra.mxu1 %v12672_v40  ;;  %9547 = vmatprep.subr.bf16.mxu0 %v12677_v17  ;;  %v12753_v40 = vld [vmem:[%s14390_s30 + $0x540] ss:$8 sps:$4 sm:$0xff]  }
 0x658   : > { %9588 = vmatprep.subr.bf16.mxu1 %v12680_v49  ;;  %v12756_v17 = vld [vmem:[%s14390_s30 + $0x640] ss:$8 sps:$4 sm:$0xff]   ;;  %v12761_v49 = vld [vmem:[%s14390_s30 + $0x554] ss:$8 sps:$4 sm:$0xff]  }
 0x65a   : > { %9548 = vmatpush1.bf16.msra.mxu0 %v12675_v13  ;;  %v12764_v13 = vld [vmem:[%s14390_s30 + $0x654] ss:$8 sps:$4 sm:$0xff]  }
 0x65b   : > { %9589 = vmatpush1.bf16.msra.mxu1 %v12678_v52  ;;  %9549 = vmatprep.subr.bf16.mxu0 %v12683_v24  ;;  %v12759_v52 = vld [vmem:[%s14390_s30 + $0x550] ss:$8 sps:$4 sm:$0xff]  }
 0x65c   : > { %9590 = vmatprep.subr.bf16.mxu1 %v12686_v47  ;;  %v12762_v24 = vld [vmem:[%s14390_s30 + $0x650] ss:$8 sps:$4 sm:$0xff]   ;;  %v12767_v47 = vld [vmem:[%s14390_s30 + $0x564] ss:$8 sps:$4 sm:$0xff]  }
 0x65e   : > { %9550 = vmatpush1.bf16.msra.mxu0 %v12681_v9  ;;  %v12770_v9 = vld [vmem:[%s14390_s30 + $0x664] ss:$8 sps:$4 sm:$0xff]  }
 0x65f   : > { %9591 = vmatpush1.bf16.msra.mxu1 %v12684_v61  ;;  %9551 = vmatprep.subr.bf16.mxu0 %v12689_v7  ;;  %v12765_v61 = vld [vmem:[%s14390_s30 + $0x560] ss:$8 sps:$4 sm:$0xff]  }
 0x660   : > { %9592 = vmatprep.subr.bf16.mxu1 %v12692_v62  ;;  %v12768_v7 = vld [vmem:[%s14390_s30 + $0x660] ss:$8 sps:$4 sm:$0xff]   ;;  %v12773_v62 = vld [vmem:[%s14390_s30 + $0x574] ss:$8 sps:$4 sm:$0xff]  }
 0x662   : > { %9552 = vmatpush1.bf16.msra.mxu0 %v12687_v32  ;;  %v12776_v32 = vld [vmem:[%s14390_s30 + $0x674] ss:$8 sps:$4 sm:$0xff]  }
 0x663   : > { %9593 = vmatpush1.bf16.msra.mxu1 %v12690_v48  ;;  %9553 = vmatprep.subr.bf16.mxu0 %v12695_v56  ;;  %v12771_v48 = vld [vmem:[%s14390_s30 + $0x570] ss:$8 sps:$4 sm:$0xff]  }
 0x664   : > { %9594 = vmatprep.subr.bf16.mxu1 %v12698_v37  ;;  %v12774_v56 = vld [vmem:[%s14390_s30 + $0x670] ss:$8 sps:$4 sm:$0xff]   ;;  %v12779_v37 = vld [vmem:[%s14390_s30 + $0x584] ss:$8 sps:$4 sm:$0xff]  }
 0x666   : > { %9554 = vmatpush1.bf16.msra.mxu0 %v12693_v51  ;;  %v12782_v51 = vld [vmem:[%s14390_s30 + $0x684] ss:$8 sps:$4 sm:$0xff]  }
 0x667   : > { %9595 = vmatpush1.bf16.msra.mxu1 %v12696_v35  ;;  %9555 = vmatprep.subr.bf16.mxu0 %v12701_v58  ;;  %v12777_v35 = vld [vmem:[%s14390_s30 + $0x580] ss:$8 sps:$4 sm:$0xff]  }
 0x668   : > { %9596 = vmatprep.subr.bf16.mxu1 %v12704_v30  ;;  %v12780_v58 = vld [vmem:[%s14390_s30 + $0x680] ss:$8 sps:$4 sm:$0xff]   ;;  %v12785_v30 = vld [vmem:[%s14390_s30 + $0x594] ss:$8 sps:$4 sm:$0xff]  }
 0x66a   : > { %9556 = vmatpush1.bf16.msra.mxu0 %v12699_v63  ;;  %v12788_v63 = vld [vmem:[%s14390_s30 + $0x694] ss:$8 sps:$4 sm:$0xff]  }
 0x66b   : > { %9597 = vmatpush1.bf16.msra.mxu1 %v12702_v42  ;;  %9557 = vmatprep.subr.bf16.mxu0 %v12707_v8  ;;  %v12783_v42 = vld [vmem:[%s14390_s30 + $0x590] ss:$8 sps:$4 sm:$0xff]  }
 0x66c   : > { %9598 = vmatprep.subr.bf16.mxu1 %v12710_v53  ;;  %v12786_v8 = vld [vmem:[%s14390_s30 + $0x690] ss:$8 sps:$4 sm:$0xff]   ;;  %v12791_v53 = vld [vmem:[%s14390_s30 + $0x5a4] ss:$8 sps:$4 sm:$0xff]  }
 0x66e   : > { %9558 = vmatpush1.bf16.msra.mxu0 %v12705_v14  ;;  %v12794_v14 = vld [vmem:[%s14390_s30 + $0x6a4] ss:$8 sps:$4 sm:$0xff]  }
 0x66f   : > { %9599 = vmatpush1.bf16.msra.mxu1 %v12708_v28  ;;  %9559 = vmatprep.subr.bf16.mxu0 %v12713_v34  ;;  %v12789_v28 = vld [vmem:[%s14390_s30 + $0x5a0] ss:$8 sps:$4 sm:$0xff]  }
 0x670   : > { %9600 = vmatprep.subr.bf16.mxu1 %v12716_v45  ;;  %v12792_v34 = vld [vmem:[%s14390_s30 + $0x6a0] ss:$8 sps:$4 sm:$0xff]   ;;  %v12797_v45 = vld [vmem:[%s14390_s30 + $0x5b4] ss:$8 sps:$4 sm:$0xff]  }
 0x672   : > { %9560 = vmatpush1.bf16.msra.mxu0 %v12711_v18  ;;  %v12800_v18 = vld [vmem:[%s14390_s30 + $0x6b4] ss:$8 sps:$4 sm:$0xff]  }
 0x673   : > { %9601 = vmatpush1.bf16.msra.mxu1 %v12714_v25  ;;  %9561 = vmatprep.subr.bf16.mxu0 %v12719_v36  ;;  %v12795_v25 = vld [vmem:[%s14390_s30 + $0x5b0] ss:$8 sps:$4 sm:$0xff]  }
 0x674   : > { %9602 = vmatprep.subr.bf16.mxu1 %v12722_v15  ;;  %v12798_v36 = vld [vmem:[%s14390_s30 + $0x6b0] ss:$8 sps:$4 sm:$0xff]   ;;  %v12803_v15 = vld [vmem:[%s14390_s30 + $0x5c4] ss:$8 sps:$4 sm:$0xff]  }
 0x676   : > { %9562 = vmatpush1.bf16.msra.mxu0 %v12717_v41  ;;  %v12801_v41 = vld [vmem:[%s14390_s30 + $0x5c0] ss:$8 sps:$4 sm:$0xff]  }
 0x677   : > { %9603 = vmatpush1.bf16.msra.mxu1 %v12720_v23  ;;  %9563 = vmatprep.subr.bf16.mxu0 %v12725_v54  ;;  %v12804_v23 = vld [vmem:[%s14390_s30 + $0x6c0] ss:$8 sps:$4 sm:$0xff]   ;;  %v12809_v54 = vld [vmem:[%s14390_s30 + $0x5d4] ss:$8 sps:$4 sm:$0xff]  }
 0x678   : > { %9604 = vmatprep.subr.bf16.mxu1 %v12728_v39  ;;  %v12812_v39 = vld [vmem:[%s14390_s30 + $0x6d4] ss:$8 sps:$4 sm:$0xff]  }
 0x67a   : > { %9564 = vmatpush1.bf16.msra.mxu0 %v12723_v59  ;;  %v12807_v59 = vld [vmem:[%s14390_s30 + $0x5d0] ss:$8 sps:$4 sm:$0xff]  }
 0x67b   : > { %9605 = vmatpush1.bf16.msra.mxu1 %v12726_v19  ;;  %9615 = vmatprep.subr.bf16.mxu0 %v12731_v5  ;;  %v12810_v19 = vld [vmem:[%s14390_s30 + $0x6d0] ss:$8 sps:$4 sm:$0xff]   ;;  %v12815_v5 = vld [vmem:[%s14390_s30 + $0x5e4] ss:$8 sps:$4 sm:$0xff]  }
 0x67c   : > { %9656 = vmatprep.subr.bf16.mxu1 %v12734_v26  ;;  %v12818_v26 = vld [vmem:[%s14390_s30 + $0x6e4] ss:$8 sps:$4 sm:$0xff]  }
 0x67d   : > { %9566 = vmatmul.mubr.bf16.vlgmr.msra.gmra.mrb[8].mxu0 %v6610_v50  ;;  %v12816_v50 = vld [vmem:[%s14390_s30 + $0x6e0] ss:$8 sps:$4 sm:$0xff]  }
 0x67e   : > { %9607 = vmatmul.mubr.bf16.vlgmr.msra.gmra.mrb[8].mxu1 %v16683_v55  ;;  %9616 = vmatpush1.bf16.msra.mxu0 %v12729_v6  ;;  %v16749_v6 = vld [vmem:[#allocation4 + $0x10] sm:$0xff] }
 0x67f   : > { %9657 = vmatpush1.bf16.msra.mxu1 %v12732_v21  ;;  %9617 = vmatprep.subr.bf16.mxu0 %v12737_v22  ;;  %v12821_v21 = vld [vmem:[%s14390_s30 + $0x5f4] ss:$8 sps:$4 sm:$0xff]  }
 0x680   : > { %9658 = vmatprep.subr.bf16.mxu1 %v12740_v60  ;;  %9647 = vmatprep.mubr.bf16.mxu0 %v6660_v57  ;;  %v12824_v22 = vld [vmem:[%s14390_s30 + $0x6f4] ss:$8 sps:$4 sm:$0xff]   ;;  %v16755_v60 = vrot.slane %v16749_v6, %v16477_v44  ;;  %v12819_v57 = vld [vmem:[%s14390_s30 + $0x5f0] ss:$8 sps:$4 sm:$0xff]  }
 0x681   : > { %9688 = vmatprep.mubr.bf16.mxu1 %v16691_v3 }
 0x682   : > { %9618 = vmatpush1.bf16.msra.mxu0 %v12735_v1  ;;  %v12822_v1 = vld [vmem:[%s14390_s30 + $0x6f0] ss:$8 sps:$4 sm:$0xff]  }
 0x683   : > { %9659 = vmatpush1.bf16.msra.mxu1 %v12738_v20  ;;  %9619 = vmatprep.subr.bf16.mxu0 %v12743_v43  ;;  %v12827_v20 = vld [vmem:[%s14390_s30 + $0x704] ss:$8 sps:$4 sm:$0xff]  }
 0x684   : > { %9660 = vmatprep.subr.bf16.mxu1 %v12746_v10  ;;  %v12831_v43 = vld [vmem:[%s14390_s30 + $0x804] ss:$8 sps:$4 sm:$0xff]   ;;  %v6677_v10 = vcombine.high %v16755_v60, %v16755_v60 }
 0x686   : > { %9620 = vmatpush1.bf16.msra.mxu0 %v12741_v33  ;;  %v6658_v33 = vcombine.high %v16683_v55, %v16683_v55  ;;  %v16776_v55 = vrot.slane %v6677_v10, %v16477_v44  ;;  %v12895_v10 = vld [vmem:[%s14390_s30 + $0x8b0] ss:$8 sps:$4 sm:$0xff]  }
 0x687   : > { %9661 = vmatpush1.bf16.msra.mxu1 %v12744_v31  ;;  %9621 = vmatprep.subr.bf16.mxu0 %v12749_v29  ;;  %v12825_v31 = vld [vmem:[%s14390_s30 + $0x700] ss:$8 sps:$4 sm:$0xff]   ;;  %v16768_v29 = vrot.slane %v16670_v2, %v16477_v44  ;;  %v12832_v2 = vld [vmem:[%s14390_s30 + $0x710] ss:$8 sps:$4 sm:$0xff]  }
 0x688   : > { %9662 = vmatprep.subr.bf16.mxu1 %v12752_v0  ;;  %v12829_v0 = vld [vmem:[%s14390_s30 + $0x800] ss:$8 sps:$4 sm:$0xff]  }
 0x68a   : > { %9622 = vmatpush1.bf16.msra.mxu0 %v12747_v46  ;;  %v12834_v46 = vld [vmem:[%s14390_s30 + $0x714] ss:$8 sps:$4 sm:$0xff]  }
 0x68b   : > { %9663 = vmatpush1.bf16.msra.mxu1 %v12750_v16  ;;  %9623 = vmatprep.subr.bf16.mxu0 %v12755_v12  ;;  %v12837_v16 = vld [vmem:[%s14390_s30 + $0x814] ss:$8 sps:$4 sm:$0xff]   ;;  %v6661_v12 = vcombine.high %v16691_v3, %v16691_v3  ;;  %v12843_v3 = vld [vmem:[%s14390_s30 + $0x824] ss:$8 sps:$4 sm:$0xff]  }
 0x68c   : > { %9664 = vmatprep.subr.bf16.mxu1 %v12758_v11  ;;  %v12835_v11 = vld [vmem:[%s14390_s30 + $0x810] ss:$8 sps:$4 sm:$0xff]  }
 0x68e   : > { %9624 = vmatpush1.bf16.msra.mxu0 %v12753_v40  ;;  %v12840_v40 = vld [vmem:[%s14390_s30 + $0x724] ss:$8 sps:$4 sm:$0xff]  }
 0x68f   : > { %9665 = vmatpush1.bf16.msra.mxu1 %v12756_v17  ;;  %9625 = vmatprep.subr.bf16.mxu0 %v12761_v49  ;;  %v12838_v17 = vld [vmem:[%s14390_s30 + $0x720] ss:$8 sps:$4 sm:$0xff]  }
 0x690   : > { %9666 = vmatprep.subr.bf16.mxu1 %v12764_v13  ;;  %v12841_v49 = vld [vmem:[%s14390_s30 + $0x820] ss:$8 sps:$4 sm:$0xff]   ;;  %v12846_v13 = vld [vmem:[%s14390_s30 + $0x734] ss:$8 sps:$4 sm:$0xff]  }
 0x692   : > { %9626 = vmatpush1.bf16.msra.mxu0 %v12759_v52  ;;  %v12849_v52 = vld [vmem:[%s14390_s30 + $0x834] ss:$8 sps:$4 sm:$0xff]  }
 0x693   : > { %9667 = vmatpush1.bf16.msra.mxu1 %v12762_v24  ;;  %9627 = vmatprep.subr.bf16.mxu0 %v12767_v47  ;;  %v12844_v24 = vld [vmem:[%s14390_s30 + $0x730] ss:$8 sps:$4 sm:$0xff]  }
 0x694   : > { %9668 = vmatprep.subr.bf16.mxu1 %v12770_v9  ;;  %v12847_v47 = vld [vmem:[%s14390_s30 + $0x830] ss:$8 sps:$4 sm:$0xff]   ;;  %v12852_v9 = vld [vmem:[%s14390_s30 + $0x744] ss:$8 sps:$4 sm:$0xff]  }
 0x696   : > { %9628 = vmatpush1.bf16.msra.mxu0 %v12765_v61  ;;  %v12855_v61 = vld [vmem:[%s14390_s30 + $0x844] ss:$8 sps:$4 sm:$0xff]  }
 0x697   : > { %9669 = vmatpush1.bf16.msra.mxu1 %v12768_v7  ;;  %9629 = vmatprep.subr.bf16.mxu0 %v12773_v62  ;;  %v12850_v7 = vld [vmem:[%s14390_s30 + $0x740] ss:$8 sps:$4 sm:$0xff]  }
 0x698   : > { %9670 = vmatprep.subr.bf16.mxu1 %v12776_v32  ;;  %v12853_v62 = vld [vmem:[%s14390_s30 + $0x840] ss:$8 sps:$4 sm:$0xff]   ;;  %v12858_v32 = vld [vmem:[%s14390_s30 + $0x754] ss:$8 sps:$4 sm:$0xff]  }
 0x69a   : > { %9630 = vmatpush1.bf16.msra.mxu0 %v12771_v48  ;;  %v12861_v48 = vld [vmem:[%s14390_s30 + $0x854] ss:$8 sps:$4 sm:$0xff]  }
 0x69b   : > { %9671 = vmatpush1.bf16.msra.mxu1 %v12774_v56  ;;  %9631 = vmatprep.subr.bf16.mxu0 %v12779_v37  ;;  %v12856_v56 = vld [vmem:[%s14390_s30 + $0x750] ss:$8 sps:$4 sm:$0xff]  }
 0x69c   : > { %9672 = vmatprep.subr.bf16.mxu1 %v12782_v51  ;;  %v12859_v37 = vld [vmem:[%s14390_s30 + $0x850] ss:$8 sps:$4 sm:$0xff]   ;;  %v12864_v51 = vld [vmem:[%s14390_s30 + $0x764] ss:$8 sps:$4 sm:$0xff]  }
 0x69e   : > { %9632 = vmatpush1.bf16.msra.mxu0 %v12777_v35  ;;  %v12867_v35 = vld [vmem:[%s14390_s30 + $0x864] ss:$8 sps:$4 sm:$0xff]  }
 0x69f   : > { %9673 = vmatpush1.bf16.msra.mxu1 %v12780_v58  ;;  %9633 = vmatprep.subr.bf16.mxu0 %v12785_v30 }
 0x6a0   : > { %9674 = vmatprep.subr.bf16.mxu1 %v12788_v63  ;;  %v12862_v63 = vld [vmem:[%s14390_s30 + $0x760] ss:$8 sps:$4 sm:$0xff]  }
 0x6a2   : > { %9634 = vmatpush1.bf16.msra.mxu0 %v12783_v42 }
 0x6a3   : > { %9675 = vmatpush1.bf16.msra.mxu1 %v12786_v8  ;;  %9635 = vmatprep.subr.bf16.mxu0 %v12791_v53 }
 0x6a4   : > { %9676 = vmatprep.subr.bf16.mxu1 %v12794_v14  ;;  %v12865_v14 = vld [vmem:[%s14390_s30 + $0x860] ss:$8 sps:$4 sm:$0xff]  }
 0x6a6   : > { %9636 = vmatpush1.bf16.msra.mxu0 %v12789_v28 }
 0x6a7   : > { %9677 = vmatpush1.bf16.msra.mxu1 %v12792_v34  ;;  %9637 = vmatprep.subr.bf16.mxu0 %v12797_v45  ;;  %v12870_v45 = vld [vmem:[%s14390_s30 + $0x774] ss:$8 sps:$4 sm:$0xff]  }
 0x6a8   : > { %9678 = vmatprep.subr.bf16.mxu1 %v12800_v18 }
 0x6aa   : > { %9638 = vmatpush1.bf16.msra.mxu0 %v12795_v25 }
 0x6ab   : > { %9679 = vmatpush1.bf16.msra.mxu1 %v12798_v36  ;;  %9639 = vmatprep.subr.bf16.mxu0 %v12803_v15  ;;  %v12873_v36 = vld [vmem:[%s14390_s30 + $0x874] ss:$8 sps:$4 sm:$0xff]  }
 0x6ac   : > { %9680 = vmatprep.subr.bf16.mxu1 %v12806_v27  ;;  %v12868_v27 = vld [vmem:[%s14390_s30 + $0x770] ss:$8 sps:$4 sm:$0xff]  }
 0x6ae   : > { %9640 = vmatpush1.bf16.msra.mxu0 %v12801_v41  ;;  %v12871_v41 = vld [vmem:[%s14390_s30 + $0x870] ss:$8 sps:$4 sm:$0xff]  }
 0x6af   : > { %9681 = vmatpush1.bf16.msra.mxu1 %v12804_v23  ;;  %9641 = vmatprep.subr.bf16.mxu0 %v12809_v54  ;;  %v12876_v23 = vld [vmem:[%s14390_s30 + $0x784] ss:$8 sps:$4 sm:$0xff]  }
 0x6b0   : > { %9682 = vmatprep.subr.bf16.mxu1 %v12812_v39  ;;  %v12879_v54 = vld [vmem:[%s14390_s30 + $0x884] ss:$8 sps:$4 sm:$0xff]   ;;  %v12874_v39 = vld [vmem:[%s14390_s30 + $0x780] ss:$8 sps:$4 sm:$0xff]  }
 0x6b2   : > { %9642 = vmatpush1.bf16.msra.mxu0 %v12807_v59  ;;  %v12877_v59 = vld [vmem:[%s14390_s30 + $0x880] ss:$8 sps:$4 sm:$0xff]  }
 0x6b3   : > { %9683 = vmatpush1.bf16.msra.mxu1 %v12810_v19  ;;  %9643 = vmatprep.subr.bf16.mxu0 %v12815_v5  ;;  %v12882_v19 = vld [vmem:[%s14390_s30 + $0x794] ss:$8 sps:$4 sm:$0xff]  }
 0x6b4   : > { %9684 = vmatprep.subr.bf16.mxu1 %v12818_v26  ;;  %v12885_v5 = vld [vmem:[%s14390_s30 + $0x894] ss:$8 sps:$4 sm:$0xff]   ;;  %v12880_v26 = vld [vmem:[%s14390_s30 + $0x790] ss:$8 sps:$4 sm:$0xff]  }
 0x6b6   : > { %9644 = vmatpush1.bf16.msra.mxu0 %v12813_v4  ;;  %v12883_v4 = vld [vmem:[%s14390_s30 + $0x890] ss:$8 sps:$4 sm:$0xff]  }
 0x6b7   : > { %9685 = vmatpush1.bf16.msra.mxu1 %v12816_v50  ;;  %9645 = vmatprep.subr.bf16.mxu0 %v12821_v21  ;;  %v12888_v50 = vld [vmem:[%s14390_s30 + $0x7a4] ss:$8 sps:$4 sm:$0xff]  }
 0x6b8   : > { %9686 = vmatprep.subr.bf16.mxu1 %v12824_v22  ;;  %v12891_v21 = vld [vmem:[%s14390_s30 + $0x8a4] ss:$8 sps:$4 sm:$0xff]   ;;  %v12886_v22 = vld [vmem:[%s14390_s30 + $0x7a0] ss:$8 sps:$4 sm:$0xff]  }
 0x6ba   : > { %9646 = vmatpush1.bf16.msra.mxu0 %v12819_v57  ;;  %v12889_v57 = vld [vmem:[%s14390_s30 + $0x8a0] ss:$8 sps:$4 sm:$0xff]  }
 0x6bb   : > { %9687 = vmatpush1.bf16.msra.mxu1 %v12822_v1  ;;  %9697 = vmatprep.subr.bf16.mxu0 %v12827_v20  ;;  %v12894_v1 = vld [vmem:[%s14390_s30 + $0x7b4] ss:$8 sps:$4 sm:$0xff]  }
 0x6bc   : > { %9738 = vmatprep.subr.bf16.mxu1 %v12831_v43  ;;  %v12897_v20 = vld [vmem:[%s14390_s30 + $0x8b4] ss:$8 sps:$4 sm:$0xff]   ;;  %v12892_v43 = vld [vmem:[%s14390_s30 + $0x7b0] ss:$8 sps:$4 sm:$0xff]  }
 0x6bd   : > { %9648 = vmatmul.mubr.bf16.vlgmr.msra.gmra.mrb[12].mxu0 %v6658_v33  ;;  %v12900_v33 = vld [vmem:[%s14390_s30 + $0x7c4] ss:$8 sps:$4 sm:$0xff]  }
 0x6be   : > { %9689 = vmatmul.mubr.bf16.vlgmr.msra.gmra.mrb[12].mxu1 %v16768_v29  ;;  %9698 = vmatpush1.bf16.msra.mxu0 %v12825_v31  ;;  %v12903_v31 = vld [vmem:[%s14390_s30 + $0x8c4] ss:$8 sps:$4 sm:$0xff]  }
 0x6bf   : > { %9739 = vmatpush1.bf16.msra.mxu1 %v12829_v0  ;;  %9699 = vmatprep.subr.bf16.mxu0 %v12834_v46  ;;  %v12898_v0 = vld [vmem:[%s14390_s30 + $0x7c0] ss:$8 sps:$4 sm:$0xff]  }
 0x6c0   : > { %9740 = vmatprep.subr.bf16.mxu1 %v12837_v16  ;;  %9729 = vmatprep.mubr.bf16.mxu0 %v6661_v12  ;;  %v12901_v46 = vld [vmem:[%s14390_s30 + $0x8c0] ss:$8 sps:$4 sm:$0xff]   ;;  %v12906_v16 = vld [vmem:[%s14390_s30 + $0x7d4] ss:$8 sps:$4 sm:$0xff]  }
 0x6c1   : > { %9770 = vmatprep.mubr.bf16.mxu1 %v16776_v55  ;;  %v12909_v12 = vld [vmem:[%s14390_s30 + $0x8d4] ss:$8 sps:$4 sm:$0xff]  }
 0x6c2   : > { %9700 = vmatpush1.bf16.msra.mxu0 %v12832_v2  ;;  %v12904_v2 = vld [vmem:[%s14390_s30 + $0x7d0] ss:$8 sps:$4 sm:$0xff]  }
 0x6c3   : > { %9741 = vmatpush1.bf16.msra.mxu1 %v12835_v11  ;;  %9701 = vmatprep.subr.bf16.mxu0 %v12840_v40  ;;  %v12907_v11 = vld [vmem:[%s14390_s30 + $0x8d0] ss:$8 sps:$4 sm:$0xff]   ;;  %v12912_v40 = vld [vmem:[%s14390_s30 + $0x7e4] ss:$8 sps:$4 sm:$0xff]  }
 0x6c4   : > { %9742 = vmatprep.subr.bf16.mxu1 %v12843_v3  ;;  %v12915_v3 = vld [vmem:[%s14390_s30 + $0x8e4] ss:$8 sps:$4 sm:$0xff]  }
 0x6c6   : > { %9702 = vmatpush1.bf16.msra.mxu0 %v12838_v17  ;;  %v6662_v17 = vcombine.high %v16749_v6, %v16749_v6  ;;  %v12919_v6 = vld [vmem:[%s14390_s30 + $0x8f0] ss:$8 sps:$4 sm:$0xff]  }
 0x6c7   : > { %9743 = vmatpush1.bf16.msra.mxu1 %v12841_v49  ;;  %9703 = vmatprep.subr.bf16.mxu0 %v12846_v13  ;;  %v12910_v49 = vld [vmem:[%s14390_s30 + $0x7e0] ss:$8 sps:$4 sm:$0xff]  }
 0x6c8   : > { %9744 = vmatprep.subr.bf16.mxu1 %v12849_v52  ;;  %v12913_v13 = vld [vmem:[%s14390_s30 + $0x8e0] ss:$8 sps:$4 sm:$0xff]   ;;  %v12918_v52 = vld [vmem:[%s14390_s30 + $0x7f4] ss:$8 sps:$4 sm:$0xff]  }
 0x6ca   : > { %9704 = vmatpush1.bf16.msra.mxu0 %v12844_v24  ;;  %v12921_v24 = vld [vmem:[%s14390_s30 + $0x8f4] ss:$8 sps:$4 sm:$0xff]  }
 0x6cb   : > { %9745 = vmatpush1.bf16.msra.mxu1 %v12847_v47  ;;  %9705 = vmatprep.subr.bf16.mxu0 %v12852_v9  ;;  %v16843_v47 = vrot.slane %v6662_v17, %v16477_v44  ;;  %v12916_v9 = vld [vmem:[%s14390_s30 + $0x7f0] ss:$8 sps:$4 sm:$0xff]   ;;  %v12981_v17 = vld [vmem:[%s14390_s30 + $0xa94] ss:$8 sps:$4 sm:$0xff]  }
 0x6cc   : > { %9746 = vmatprep.subr.bf16.mxu1 %v12855_v61  ;;  %v12924_v61 = vld [vmem:[%s14390_s30 + $0x904] ss:$8 sps:$4 sm:$0xff]  }
 0x6ce   : > { %9706 = vmatpush1.bf16.msra.mxu0 %v12850_v7  ;;  %v12927_v7 = vld [vmem:[%s14390_s30 + $0xa04] ss:$8 sps:$4 sm:$0xff]  }
 0x6cf   : > { %9747 = vmatpush1.bf16.msra.mxu1 %v12853_v62  ;;  %9707 = vmatprep.subr.bf16.mxu0 %v12858_v32  ;;  %v12922_v62 = vld [vmem:[%s14390_s30 + $0x900] ss:$8 sps:$4 sm:$0xff]   ;;  %v6678_v32 = vcombine.high %v16843_v47, %v16843_v47 }
 0x6d0   : > { %9748 = vmatprep.subr.bf16.mxu1 %v12861_v48  ;;  %v6552_v58 = vpop.f32.mrb[0].mxu0  ;;  %v6659_v48 = vcombine.high %v16768_v29, %v16768_v29 }
 0x6d1   : > { %v9444_v30 = vpop.f32.mrb[0].mxu1  ;;  %v6554_v8 = vpop.f32.mrb[1].mxu0  ;;  %v16864_v29 = vrot.slane %v6678_v32, %v16477_v44  ;;  %v12991_v32 = vld [vmem:[%s14390_s30 + $0xab0] ss:$8 sps:$4 sm:$0xff]  }
 0x6d2   : > { %v16801_v42 = vadd.f32 %v9444_v30, %v6552_v58  ;;  %v9446_v53 = vpop.f32.mrb[1].mxu1  ;;  %v6556_v34 = vpop.f32.mrb[2].mxu0  ;;  %9708 = vmatpush1.bf16.msra.mxu0 %v12856_v56  ;;  %v16856_v56 = vrot.slane %v16755_v60, %v16477_v44  ;;  %v6709_v58 = vcombine.high %v16776_v55, %v16776_v55  ;;  %v12928_v60 = vld [vmem:[%s14390_s30 + $0x910] ss:$8 sps:$4 sm:$0xff]   ;;  %v12934_v55 = vld [vmem:[%s14390_s30 + $0x920] ss:$8 sps:$4 sm:$0xff]  }
 0x6d3   : > { %v16804_v28 = vadd.f32 %v9446_v53, %v6554_v8  ;;  %9749 = vmatpush1.bf16.msra.mxu1 %v12859_v37  ;;  %v9448_v18 = vpop.f32.mrb[2].mxu1  ;;  %v6557_v25 = vpop.f32.mrb[3].mxu0  ;;  %9709 = vmatprep.subr.bf16.mxu0 %v12864_v51  ;;  %v12925_v37 = vld [vmem:[%s14390_s30 + $0xa00] ss:$8 sps:$4 sm:$0xff]   ;;  %v12930_v51 = vld [vmem:[%s14390_s30 + $0x914] ss:$8 sps:$4 sm:$0xff]  }
 0x6d4   : > { %9750 = vmatprep.subr.bf16.mxu1 %v12867_v35  ;;  %v9449_v15 = vpop.f32.mrb[3].mxu1  ;;  %v12933_v35 = vld [vmem:[%s14390_s30 + $0xa14] ss:$8 sps:$4 sm:$0xff]   ;;  %v12931_v30 = vld [vmem:[%s14390_s30 + $0xa10] ss:$8 sps:$4 sm:$0xff]  }
 0x6d5   : > { %v12939_v8 = vld [vmem:[%s14390_s30 + $0xa24] ss:$8 sps:$4 sm:$0xff]   ;;  %v12937_v53 = vld [vmem:[%s14390_s30 + $0xa20] ss:$8 sps:$4 sm:$0xff]   ;;  %v12945_v34 = vld [vmem:[%s14390_s30 + $0xa34] ss:$8 sps:$4 sm:$0xff]  }
 0x6d6   : > { %9710 = vmatpush1.bf16.msra.mxu0 %v12862_v63  ;;  %v12936_v63 = vld [vmem:[%s14390_s30 + $0x924] ss:$8 sps:$4 sm:$0xff]   ;;  %v12943_v18 = vld [vmem:[%s14390_s30 + $0xa30] ss:$8 sps:$4 sm:$0xff]   ;;  %v12946_v15 = vld [vmem:[%s14390_s30 + $0x940] ss:$8 sps:$4 sm:$0xff]  }
 0x6d7   : > { %9751 = vmatpush1.bf16.msra.mxu1 %v12865_v14  ;;  %9711 = vmatprep.subr.bf16.mxu0 %v12870_v45  ;;  %v12942_v14 = vld [vmem:[%s14390_s30 + $0x934] ss:$8 sps:$4 sm:$0xff]   ;;  %v12940_v45 = vld [vmem:[%s14390_s30 + $0x930] ss:$8 sps:$4 sm:$0xff]   ;;  %v12948_v25 = vld [vmem:[%s14390_s30 + $0x944] ss:$8 sps:$4 sm:$0xff]  }
 0x6d8   : > { %9752 = vmatprep.subr.bf16.mxu1 %v12873_v36  ;;  %v12951_v36 = vld [vmem:[%s14390_s30 + $0xa44] ss:$8 sps:$4 sm:$0xff]  }
 0x6da   : > { %9712 = vmatpush1.bf16.msra.mxu0 %v12868_v27  ;;  %v12949_v27 = vld [vmem:[%s14390_s30 + $0xa40] ss:$8 sps:$4 sm:$0xff]  }
 0x6db   : > { %9753 = vmatpush1.bf16.msra.mxu1 %v12871_v41  ;;  %9713 = vmatprep.subr.bf16.mxu0 %v12876_v23  ;;  %v12954_v41 = vld [vmem:[%s14390_s30 + $0x954] ss:$8 sps:$4 sm:$0xff]  }
 0x6dc   : > { %9754 = vmatprep.subr.bf16.mxu1 %v12879_v54  ;;  %v12957_v23 = vld [vmem:[%s14390_s30 + $0xa54] ss:$8 sps:$4 sm:$0xff]   ;;  %v12952_v54 = vld [vmem:[%s14390_s30 + $0x950] ss:$8 sps:$4 sm:$0xff]  }
 0x6de   : > { %9714 = vmatpush1.bf16.msra.mxu0 %v12874_v39  ;;  %v12955_v39 = vld [vmem:[%s14390_s30 + $0xa50] ss:$8 sps:$4 sm:$0xff]  }
 0x6df   : > { %9755 = vmatpush1.bf16.msra.mxu1 %v12877_v59  ;;  %9715 = vmatprep.subr.bf16.mxu0 %v12882_v19  ;;  %v12960_v59 = vld [vmem:[%s14390_s30 + $0x964] ss:$8 sps:$4 sm:$0xff]  }
 0x6e0   : > { %9756 = vmatprep.subr.bf16.mxu1 %v12885_v5  ;;  %v12963_v19 = vld [vmem:[%s14390_s30 + $0xa64] ss:$8 sps:$4 sm:$0xff]  }
 0x6e2   : > { %9716 = vmatpush1.bf16.msra.mxu0 %v12880_v26 }
 0x6e3   : > { %9757 = vmatpush1.bf16.msra.mxu1 %v12883_v4  ;;  %9717 = vmatprep.subr.bf16.mxu0 %v12888_v50 }
 0x6e4   : > { %9758 = vmatprep.subr.bf16.mxu1 %v12891_v21 }
 0x6e6   : > { %9718 = vmatpush1.bf16.msra.mxu0 %v12886_v22 }
 0x6e7   : > { %9759 = vmatpush1.bf16.msra.mxu1 %v12889_v57  ;;  %9719 = vmatprep.subr.bf16.mxu0 %v12894_v1  ;;  %v12958_v1 = vld [vmem:[%s14390_s30 + $0x960] ss:$8 sps:$4 sm:$0xff]  }
 0x6e8   : > { %9760 = vmatprep.subr.bf16.mxu1 %v12897_v20  ;;  %v12961_v20 = vld [vmem:[%s14390_s30 + $0xa60] ss:$8 sps:$4 sm:$0xff]  }
 0x6ea   : > { %9720 = vmatpush1.bf16.msra.mxu0 %v12892_v43 }
 0x6eb   : > { %9761 = vmatpush1.bf16.msra.mxu1 %v12895_v10  ;;  %9721 = vmatprep.subr.bf16.mxu0 %v12900_v33 }
 0x6ec   : > { %9762 = vmatprep.subr.bf16.mxu1 %v12903_v31  ;;  %v12969_v31 = vld [vmem:[%s14390_s30 + $0xa74] ss:$8 sps:$4 sm:$0xff]  }
 0x6ee   : > { %9722 = vmatpush1.bf16.msra.mxu0 %v12898_v0 }
 0x6ef   : > { %9763 = vmatpush1.bf16.msra.mxu1 %v12901_v46  ;;  %9723 = vmatprep.subr.bf16.mxu0 %v12906_v16  ;;  %v12964_v46 = vld [vmem:[%s14390_s30 + $0x970] ss:$8 sps:$4 sm:$0xff]  }
 0x6f0   : > { %9764 = vmatprep.subr.bf16.mxu1 %v12909_v12  ;;  %v12967_v16 = vld [vmem:[%s14390_s30 + $0xa70] ss:$8 sps:$4 sm:$0xff]   ;;  %v12972_v12 = vld [vmem:[%s14390_s30 + $0x984] ss:$8 sps:$4 sm:$0xff]  }
 0x6f2   : > { %9724 = vmatpush1.bf16.msra.mxu0 %v12904_v2  ;;  %v12975_v2 = vld [vmem:[%s14390_s30 + $0xa84] ss:$8 sps:$4 sm:$0xff]  }
 0x6f3   : > { %9765 = vmatpush1.bf16.msra.mxu1 %v12907_v11  ;;  %9725 = vmatprep.subr.bf16.mxu0 %v12912_v40  ;;  %v12970_v11 = vld [vmem:[%s14390_s30 + $0x980] ss:$8 sps:$4 sm:$0xff]  }
 0x6f4   : > { %9766 = vmatprep.subr.bf16.mxu1 %v12915_v3  ;;  %v12973_v40 = vld [vmem:[%s14390_s30 + $0xa80] ss:$8 sps:$4 sm:$0xff]   ;;  %v12978_v3 = vld [vmem:[%s14390_s30 + $0x994] ss:$8 sps:$4 sm:$0xff]  }
 0x6f6   : > { %9726 = vmatpush1.bf16.msra.mxu0 %v12910_v49  ;;  %v12976_v49 = vld [vmem:[%s14390_s30 + $0x990] ss:$8 sps:$4 sm:$0xff]  }
 0x6f7   : > { %9767 = vmatpush1.bf16.msra.mxu1 %v12913_v13  ;;  %9727 = vmatprep.subr.bf16.mxu0 %v12918_v52  ;;  %v12979_v13 = vld [vmem:[%s14390_s30 + $0xa90] ss:$8 sps:$4 sm:$0xff]   ;;  %v12984_v52 = vld [vmem:[%s14390_s30 + $0x9a4] ss:$8 sps:$4 sm:$0xff]  }
 0x6f8   : > { %9768 = vmatprep.subr.bf16.mxu1 %v12921_v24  ;;  %v12987_v24 = vld [vmem:[%s14390_s30 + $0xaa4] ss:$8 sps:$4 sm:$0xff]  }
 0x6fa   : > { %9728 = vmatpush1.bf16.msra.mxu0 %v12916_v9  ;;  %v12982_v9 = vld [vmem:[%s14390_s30 + $0x9a0] ss:$8 sps:$4 sm:$0xff]  }
 0x6fb   : > { %9769 = vmatpush1.bf16.msra.mxu1 %v12919_v6  ;;  %9779 = vmatprep.subr.bf16.mxu0 %v12924_v61  ;;  %v12985_v6 = vld [vmem:[%s14390_s30 + $0xaa0] ss:$8 sps:$4 sm:$0xff]   ;;  %v12990_v61 = vld [vmem:[%s14390_s30 + $0x9b4] ss:$8 sps:$4 sm:$0xff]  }
 0x6fc   : > { %9820 = vmatprep.subr.bf16.mxu1 %v12927_v7  ;;  %v12993_v7 = vld [vmem:[%s14390_s30 + $0xab4] ss:$8 sps:$4 sm:$0xff]  }
 0x6fd   : > { %9730 = vmatmul.mubr.bf16.vlgmr.msra.gmra.mrb[16].mxu0 %v6659_v48  ;;  %v12996_v48 = vld [vmem:[%s14390_s30 + $0x9c4] ss:$8 sps:$4 sm:$0xff]  }
 0x6fe   : > { %9771 = vmatmul.mubr.bf16.vlgmr.msra.gmra.mrb[16].mxu1 %v16856_v56  ;;  %9780 = vmatpush1.bf16.msra.mxu0 %v12922_v62  ;;  %v12988_v62 = vld [vmem:[%s14390_s30 + $0x9b0] ss:$8 sps:$4 sm:$0xff]  }
 0x6ff   : > { %9821 = vmatpush1.bf16.msra.mxu1 %v12925_v37  ;;  %9781 = vmatprep.subr.bf16.mxu0 %v12930_v51  ;;  %v12999_v37 = vld [vmem:[%s14390_s30 + $0xac4] ss:$8 sps:$4 sm:$0xff]   ;;  %v12994_v51 = vld [vmem:[%s14390_s30 + $0x9c0] ss:$8 sps:$4 sm:$0xff]  }
 0x700   : > { %9822 = vmatprep.subr.bf16.mxu1 %v12933_v35  ;;  %9811 = vmatprep.mubr.bf16.mxu0 %v6709_v58  ;;  %v12997_v35 = vld [vmem:[%s14390_s30 + $0xac0] ss:$8 sps:$4 sm:$0xff]   ;;  %v13002_v58 = vld [vmem:[%s14390_s30 + $0x9d4] ss:$8 sps:$4 sm:$0xff]  }
 0x701   : > { %9852 = vmatprep.mubr.bf16.mxu1 %v16864_v29 }
 0x702   : > { %9782 = vmatpush1.bf16.msra.mxu0 %v12928_v60  ;;  %v13005_v60 = vld [vmem:[%s14390_s30 + $0xad4] ss:$8 sps:$4 sm:$0xff]  }
 0x703   : > { %9823 = vmatpush1.bf16.msra.mxu1 %v12931_v30  ;;  %9783 = vmatprep.subr.bf16.mxu0 %v12936_v63  ;;  %v13000_v30 = vld [vmem:[%s14390_s30 + $0x9d0] ss:$8 sps:$4 sm:$0xff]  }
 0x704   : > { %9824 = vmatprep.subr.bf16.mxu1 %v12939_v8  ;;  %v13003_v63 = vld [vmem:[%s14390_s30 + $0xad0] ss:$8 sps:$4 sm:$0xff]   ;;  %v13008_v8 = vld [vmem:[%s14390_s30 + $0x9e4] ss:$8 sps:$4 sm:$0xff]  }
 0x706   : > { %9784 = vmatpush1.bf16.msra.mxu0 %v12934_v55  ;;  %v13011_v55 = vld [vmem:[%s14390_s30 + $0xae4] ss:$8 sps:$4 sm:$0xff]  }
 0x707   : > { %9825 = vmatpush1.bf16.msra.mxu1 %v12937_v53  ;;  %9785 = vmatprep.subr.bf16.mxu0 %v12942_v14  ;;  %v16926_v53 = vld [vmem:[#allocation4 + $0x18] sm:$0xff] }
 0x708   : > { %9826 = vmatprep.subr.bf16.mxu1 %v12945_v34  ;;  %v13006_v14 = vld [vmem:[%s14390_s30 + $0x9e0] ss:$8 sps:$4 sm:$0xff]  }
 0x709   : > { %v13009_v34 = vld [vmem:[%s14390_s30 + $0xae0] ss:$8 sps:$4 sm:$0xff]  }
 0x70a   : > { %9786 = vmatpush1.bf16.msra.mxu0 %v12940_v45  ;;  %v13014_v45 = vld [vmem:[%s14390_s30 + $0x9f4] ss:$8 sps:$4 sm:$0xff]  }
 0x70b   : > { %9827 = vmatpush1.bf16.msra.mxu1 %v12943_v18  ;;  %9787 = vmatprep.subr.bf16.mxu0 %v12948_v25  ;;  %v13017_v18 = vld [vmem:[%s14390_s30 + $0xaf4] ss:$8 sps:$4 sm:$0xff]   ;;  %v16934_v25 = vrot.slane %v16926_v53, %v16477_v44 }
 0x70c   : > { %9828 = vmatprep.subr.bf16.mxu1 %v12951_v36  ;;  %v13012_v36 = vld [vmem:[%s14390_s30 + $0x9f0] ss:$8 sps:$4 sm:$0xff]  }
 0x70e   : > { %9788 = vmatpush1.bf16.msra.mxu0 %v12946_v15  ;;  %v13015_v15 = vld [vmem:[%s14390_s30 + $0xaf0] ss:$8 sps:$4 sm:$0xff]  }
 0x70f   : > { %9829 = vmatpush1.bf16.msra.mxu1 %v12949_v27  ;;  %9789 = vmatprep.subr.bf16.mxu0 %v12954_v41  ;;  %v13020_v27 = vld [vmem:[%s14390_s30 + $0xb04] ss:$8 sps:$4 sm:$0xff]  }
 0x710   : > { %9830 = vmatprep.subr.bf16.mxu1 %v12957_v23  ;;  %v9485_v5 = vpop.f32.mrb[4].mxu0  ;;  %v13024_v41 = vld [vmem:[%s14390_s30 + $0xc04] ss:$8 sps:$4 sm:$0xff]   ;;  %v6726_v23 = vcombine.high %v16934_v25, %v16934_v25 }
 0x711   : > { %v9526_v26 = vpop.f32.mrb[4].mxu1  ;;  %v9486_v4 = vadd.f32 %v9485_v5, %v16801_v42  ;;  %v9487_v50 = vpop.f32.mrb[5].mxu0  ;;  %v12966_v42 = vld [vmem:[%s14390_s30 + $0x974] ss:$8 sps:$4 sm:$0xff]  }
 0x712   : > { %v9528_v21 = vpop.f32.mrb[5].mxu1  ;;  %v9488_v22 = vadd.f32 %v9487_v50, %v16804_v28  ;;  %v9489_v57 = vpop.f32.mrb[6].mxu0  ;;  %9790 = vmatpush1.bf16.msra.mxu0 %v12952_v54  ;;  %v6707_v54 = vcombine.high %v16856_v56, %v16856_v56  ;;  %v13027_v5 = vld [vmem:[%s14390_s30 + $0xb14] ss:$8 sps:$4 sm:$0xff]   ;;  %v16955_v56 = vrot.slane %v6726_v23, %v16477_v44  ;;  %v13028_v50 = vld [vmem:[%s14390_s30 + $0xc10] ss:$8 sps:$4 sm:$0xff]  }
 0x713   : > { %9831 = vmatpush1.bf16.msra.mxu1 %v12955_v39  ;;  %v9530_v43 = vpop.f32.mrb[6].mxu1  ;;  %v16892_v10 = vadd.f32 %v9526_v26, %v9486_v4  ;;  %v9490_v33 = vpop.f32.mrb[7].mxu0  ;;  %9791 = vmatprep.subr.bf16.mxu0 %v12960_v59  ;;  %v16946_v39 = vrot.slane %v16843_v47, %v16477_v44  ;;  %v13018_v59 = vld [vmem:[%s14390_s30 + $0xb00] ss:$8 sps:$4 sm:$0xff]   ;;  %v13030_v26 = vld [vmem:[%s14390_s30 + $0xc14] ss:$8 sps:$4 sm:$0xff]   ;;  %v6710_v4 = vcombine.high %v16864_v29, %v16864_v29 }
 0x714   : > { %9832 = vmatprep.subr.bf16.mxu1 %v12963_v19  ;;  %v9531_v28 = vpop.f32.mrb[7].mxu1  ;;  %v16896_v0 = vadd.f32 %v9528_v21, %v9488_v22  ;;  %v13022_v19 = vld [vmem:[%s14390_s30 + $0xc00] ss:$8 sps:$4 sm:$0xff]   ;;  %v13025_v47 = vld [vmem:[%s14390_s30 + $0xb10] ss:$8 sps:$4 sm:$0xff]  }
 0x715   : > { %v13033_v21 = vld [vmem:[%s14390_s30 + $0xb24] ss:$8 sps:$4 sm:$0xff]   ;;  %v13031_v22 = vld [vmem:[%s14390_s30 + $0xb20] ss:$8 sps:$4 sm:$0xff]   ;;  %v13037_v43 = vld [vmem:[%s14390_s30 + $0xb30] ss:$8 sps:$4 sm:$0xff]  }
 0x716   : > { %9792 = vmatpush1.bf16.msra.mxu0 %v12958_v1  ;;  %v13036_v29 = vld [vmem:[%s14390_s30 + $0xc24] ss:$8 sps:$4 sm:$0xff]   ;;  %v13034_v57 = vld [vmem:[%s14390_s30 + $0xc20] ss:$8 sps:$4 sm:$0xff]   ;;  %v13039_v1 = vld [vmem:[%s14390_s30 + $0xb34] ss:$8 sps:$4 sm:$0xff]  }
 0x717   : > { %9833 = vmatpush1.bf16.msra.mxu1 %v12961_v20  ;;  %9793 = vmatprep.subr.bf16.mxu0 %v12966_v42  ;;  %v13042_v20 = vld [vmem:[%s14390_s30 + $0xc34] ss:$8 sps:$4 sm:$0xff]   ;;  %v13040_v33 = vld [vmem:[%s14390_s30 + $0xc30] ss:$8 sps:$4 sm:$0xff]   ;;  %v13045_v42 = vld [vmem:[%s14390_s30 + $0xb44] ss:$8 sps:$4 sm:$0xff]  }
 0x718   : > { %9834 = vmatprep.subr.bf16.mxu1 %v12969_v31  ;;  %v13048_v31 = vld [vmem:[%s14390_s30 + $0xc44] ss:$8 sps:$4 sm:$0xff]   ;;  %v13043_v28 = vld [vmem:[%s14390_s30 + $0xb40] ss:$8 sps:$4 sm:$0xff]   ;;  %v13090_v23 = vld [vmem:[%s14390_s30 + $0xcb4] ss:$8 sps:$4 sm:$0xff]  }
 0x71a   : > { %9794 = vmatpush1.bf16.msra.mxu0 %v12964_v46  ;;  %v13046_v46 = vld [vmem:[%s14390_s30 + $0xc40] ss:$8 sps:$4 sm:$0xff]  }
 0x71b   : > { %9835 = vmatpush1.bf16.msra.mxu1 %v12967_v16  ;;  %9795 = vmatprep.subr.bf16.mxu0 %v12972_v12  ;;  %v13051_v16 = vld [vmem:[%s14390_s30 + $0xb54] ss:$8 sps:$4 sm:$0xff]  }
 0x71c   : > { %9836 = vmatprep.subr.bf16.mxu1 %v12975_v2  ;;  %v13054_v12 = vld [vmem:[%s14390_s30 + $0xc54] ss:$8 sps:$4 sm:$0xff]   ;;  %v13049_v2 = vld [vmem:[%s14390_s30 + $0xb50] ss:$8 sps:$4 sm:$0xff]  }
 0x71e   : > { %9796 = vmatpush1.bf16.msra.mxu0 %v12970_v11  ;;  %v13052_v11 = vld [vmem:[%s14390_s30 + $0xc50] ss:$8 sps:$4 sm:$0xff]  }
 0x71f   : > { %9837 = vmatpush1.bf16.msra.mxu1 %v12973_v40  ;;  %9797 = vmatprep.subr.bf16.mxu0 %v12978_v3  ;;  %v13057_v40 = vld [vmem:[%s14390_s30 + $0xb64] ss:$8 sps:$4 sm:$0xff]  }
 0x720   : > { %9838 = vmatprep.subr.bf16.mxu1 %v12981_v17  ;;  %v13060_v3 = vld [vmem:[%s14390_s30 + $0xc64] ss:$8 sps:$4 sm:$0xff]  }
 0x722   : > { %9798 = vmatpush1.bf16.msra.mxu0 %v12976_v49 }
 0x723   : > { %9839 = vmatpush1.bf16.msra.mxu1 %v12979_v13  ;;  %9799 = vmatprep.subr.bf16.mxu0 %v12984_v52 }
 0x724   : > { %9840 = vmatprep.subr.bf16.mxu1 %v12987_v24 }
 0x726   : > { %9800 = vmatpush1.bf16.msra.mxu0 %v12982_v9 }
 0x727   : > { %9841 = vmatpush1.bf16.msra.mxu1 %v12985_v6  ;;  %9801 = vmatprep.subr.bf16.mxu0 %v12990_v61  ;;  %v13055_v61 = vld [vmem:[%s14390_s30 + $0xb60] ss:$8 sps:$4 sm:$0xff]  }
 0x728   : > { %9842 = vmatprep.subr.bf16.mxu1 %v12993_v7  ;;  %v13058_v7 = vld [vmem:[%s14390_s30 + $0xc60] ss:$8 sps:$4 sm:$0xff]  }
 0x72a   : > { %9802 = vmatpush1.bf16.msra.mxu0 %v12988_v62 }
 0x72b   : > { %9843 = vmatpush1.bf16.msra.mxu1 %v12991_v32  ;;  %9803 = vmatprep.subr.bf16.mxu0 %v12996_v48 }
 0x72c   : > { %9844 = vmatprep.subr.bf16.mxu1 %v12999_v37  ;;  %v13066_v37 = vld [vmem:[%s14390_s30 + $0xc74] ss:$8 sps:$4 sm:$0xff]  }
 0x72e   : > { %9804 = vmatpush1.bf16.msra.mxu0 %v12994_v51 }
 0x72f   : > { %9845 = vmatpush1.bf16.msra.mxu1 %v12997_v35  ;;  %9805 = vmatprep.subr.bf16.mxu0 %v13002_v58  ;;  %v13061_v35 = vld [vmem:[%s14390_s30 + $0xb70] ss:$8 sps:$4 sm:$0xff]  }
 0x730   : > { %9846 = vmatprep.subr.bf16.mxu1 %v13005_v60  ;;  %v13064_v58 = vld [vmem:[%s14390_s30 + $0xc70] ss:$8 sps:$4 sm:$0xff]   ;;  %v13069_v60 = vld [vmem:[%s14390_s30 + $0xb84] ss:$8 sps:$4 sm:$0xff]  }
 0x732   : > { %9806 = vmatpush1.bf16.msra.mxu0 %v13000_v30  ;;  %v13072_v30 = vld [vmem:[%s14390_s30 + $0xc84] ss:$8 sps:$4 sm:$0xff]  }
 0x733   : > { %9847 = vmatpush1.bf16.msra.mxu1 %v13003_v63  ;;  %9807 = vmatprep.subr.bf16.mxu0 %v13008_v8  ;;  %v13067_v63 = vld [vmem:[%s14390_s30 + $0xb80] ss:$8 sps:$4 sm:$0xff]  }
 0x734   : > { %9848 = vmatprep.subr.bf16.mxu1 %v13011_v55  ;;  %v13070_v8 = vld [vmem:[%s14390_s30 + $0xc80] ss:$8 sps:$4 sm:$0xff]   ;;  %v13075_v55 = vld [vmem:[%s14390_s30 + $0xb94] ss:$8 sps:$4 sm:$0xff]  }
 0x736   : > { %9808 = vmatpush1.bf16.msra.mxu0 %v13006_v14  ;;  %v13078_v14 = vld [vmem:[%s14390_s30 + $0xc94] ss:$8 sps:$4 sm:$0xff]  }
 0x737   : > { %9849 = vmatpush1.bf16.msra.mxu1 %v13009_v34  ;;  %9809 = vmatprep.subr.bf16.mxu0 %v13014_v45  ;;  %v13073_v34 = vld [vmem:[%s14390_s30 + $0xb90] ss:$8 sps:$4 sm:$0xff]  }
 0x738   : > { %9850 = vmatprep.subr.bf16.mxu1 %v13017_v18  ;;  %v13076_v45 = vld [vmem:[%s14390_s30 + $0xc90] ss:$8 sps:$4 sm:$0xff]   ;;  %v13081_v18 = vld [vmem:[%s14390_s30 + $0xba4] ss:$8 sps:$4 sm:$0xff]  }
 0x73a   : > { %9810 = vmatpush1.bf16.msra.mxu0 %v13012_v36  ;;  %v13084_v36 = vld [vmem:[%s14390_s30 + $0xca4] ss:$8 sps:$4 sm:$0xff]  }
 0x73b   : > { %9851 = vmatpush1.bf16.msra.mxu1 %v13015_v15  ;;  %9861 = vmatprep.subr.bf16.mxu0 %v13020_v27  ;;  %v13079_v15 = vld [vmem:[%s14390_s30 + $0xba0] ss:$8 sps:$4 sm:$0xff]  }
 0x73c   : > { %9902 = vmatprep.subr.bf16.mxu1 %v13024_v41  ;;  %v13082_v27 = vld [vmem:[%s14390_s30 + $0xca0] ss:$8 sps:$4 sm:$0xff]   ;;  %v13087_v41 = vld [vmem:[%s14390_s30 + $0xbb4] ss:$8 sps:$4 sm:$0xff]  }
 0x73d   : > { %9812 = vmatmul.mubr.bf16.vlgmr.msra.gmra.mrb[20].mxu0 %v6707_v54  ;;  %v13085_v54 = vld [vmem:[%s14390_s30 + $0xbb0] ss:$8 sps:$4 sm:$0xff]  }
 0x73e   : > { %9853 = vmatmul.mubr.bf16.vlgmr.msra.gmra.mrb[20].mxu1 %v16946_v39  ;;  %9862 = vmatpush1.bf16.msra.mxu0 %v13018_v59  ;;  %v13088_v59 = vld [vmem:[%s14390_s30 + $0xcb0] ss:$8 sps:$4 sm:$0xff]  }
 0x73f   : > { %9903 = vmatpush1.bf16.msra.mxu1 %v13022_v19  ;;  %9863 = vmatprep.subr.bf16.mxu0 %v13027_v5  ;;  %v13093_v19 = vld [vmem:[%s14390_s30 + $0xbc4] ss:$8 sps:$4 sm:$0xff]  }
 0x740   : > { %9904 = vmatprep.subr.bf16.mxu1 %v13030_v26  ;;  %9893 = vmatprep.mubr.bf16.mxu0 %v6710_v4  ;;  %v13096_v5 = vld [vmem:[%s14390_s30 + $0xcc4] ss:$8 sps:$4 sm:$0xff]   ;;  %v13091_v26 = vld [vmem:[%s14390_s30 + $0xbc0] ss:$8 sps:$4 sm:$0xff]  }
 0x741   : > { %9934 = vmatprep.mubr.bf16.mxu1 %v16955_v56  ;;  %v13094_v4 = vld [vmem:[%s14390_s30 + $0xcc0] ss:$8 sps:$4 sm:$0xff]  }
 0x742   : > { %9864 = vmatpush1.bf16.msra.mxu0 %v13025_v47  ;;  %v13099_v47 = vld [vmem:[%s14390_s30 + $0xbd4] ss:$8 sps:$4 sm:$0xff]  }
 0x743   : > { %9905 = vmatpush1.bf16.msra.mxu1 %v13028_v50  ;;  %9865 = vmatprep.subr.bf16.mxu0 %v13033_v21  ;;  %v13102_v50 = vld [vmem:[%s14390_s30 + $0xcd4] ss:$8 sps:$4 sm:$0xff]   ;;  %v13097_v21 = vld [vmem:[%s14390_s30 + $0xbd0] ss:$8 sps:$4 sm:$0xff]  }
 0x744   : > { %9906 = vmatprep.subr.bf16.mxu1 %v13036_v29  ;;  %v13100_v29 = vld [vmem:[%s14390_s30 + $0xcd0] ss:$8 sps:$4 sm:$0xff]  }
 0x746   : > { %9866 = vmatpush1.bf16.msra.mxu0 %v13031_v22  ;;  %v13105_v22 = vld [vmem:[%s14390_s30 + $0xbe4] ss:$8 sps:$4 sm:$0xff]  }
 0x747   : > { %9907 = vmatpush1.bf16.msra.mxu1 %v13034_v57  ;;  %9867 = vmatprep.subr.bf16.mxu0 %v13039_v1  ;;  %v13108_v57 = vld [vmem:[%s14390_s30 + $0xce4] ss:$8 sps:$4 sm:$0xff]   ;;  %v6711_v1 = vcombine.high %v16926_v53, %v16926_v53  ;;  %v13112_v53 = vld [vmem:[%s14390_s30 + $0xcf0] ss:$8 sps:$4 sm:$0xff]  }
 0x748   : > { %9908 = vmatprep.subr.bf16.mxu1 %v13042_v20  ;;  %v13103_v20 = vld [vmem:[%s14390_s30 + $0xbe0] ss:$8 sps:$4 sm:$0xff]  }
 0x74a   : > { %9868 = vmatpush1.bf16.msra.mxu0 %v13037_v43  ;;  %v13106_v43 = vld [vmem:[%s14390_s30 + $0xce0] ss:$8 sps:$4 sm:$0xff]  }
 0x74b   : > { %9909 = vmatpush1.bf16.msra.mxu1 %v13040_v33  ;;  %9869 = vmatprep.subr.bf16.mxu0 %v13045_v42  ;;  %v13111_v33 = vld [vmem:[%s14390_s30 + $0xbf4] ss:$8 sps:$4 sm:$0xff]  }
 0x74c   : > { %9910 = vmatprep.subr.bf16.mxu1 %v13048_v31  ;;  %v13114_v42 = vld [vmem:[%s14390_s30 + $0xcf4] ss:$8 sps:$4 sm:$0xff]   ;;  %v17024_v31 = vrot.slane %v6711_v1, %v16477_v44 }
 0x74d   : > { %v13174_v1 = vld [vmem:[%s14390_s30 + $0xe94] ss:$8 sps:$4 sm:$0xff]  }
 0x74e   : > { %9870 = vmatpush1.bf16.msra.mxu0 %v13043_v28  ;;  %v13109_v28 = vld [vmem:[%s14390_s30 + $0xbf0] ss:$8 sps:$4 sm:$0xff]  }
 0x74f   : > { %9911 = vmatpush1.bf16.msra.mxu1 %v13046_v46  ;;  %9871 = vmatprep.subr.bf16.mxu0 %v13051_v16  ;;  %v13117_v46 = vld [vmem:[%s14390_s30 + $0xd04] ss:$8 sps:$4 sm:$0xff]  }
 0x750   : > { %9912 = vmatprep.subr.bf16.mxu1 %v13054_v12  ;;  %v9567_v17 = vpop.f32.mrb[8].mxu0  ;;  %v13120_v16 = vld [vmem:[%s14390_s30 + $0xe04] ss:$8 sps:$4 sm:$0xff]   ;;  %v6727_v12 = vcombine.high %v17024_v31, %v17024_v31 }
 0x751   : > { %v9608_v49 = vpop.f32.mrb[8].mxu1  ;;  %v9568_v13 = vadd.f32 %v9567_v17, %v16892_v10  ;;  %v9569_v52 = vpop.f32.mrb[9].mxu0  ;;  %v13063_v10 = vld [vmem:[%s14390_s30 + $0xb74] ss:$8 sps:$4 sm:$0xff]  }
 0x752   : > { %v9610_v24 = vpop.f32.mrb[9].mxu1  ;;  %v9570_v9 = vadd.f32 %v9569_v52, %v16896_v0  ;;  %v9571_v6 = vpop.f32.mrb[10].mxu0  ;;  %9872 = vmatpush1.bf16.msra.mxu0 %v13049_v2  ;;  %v6708_v2 = vcombine.high %v16946_v39, %v16946_v39  ;;  %v13123_v17 = vld [vmem:[%s14390_s30 + $0xd14] ss:$8 sps:$4 sm:$0xff]   ;;  %v17045_v39 = vrot.slane %v6727_v12, %v16477_v44  ;;  %v13124_v52 = vld [vmem:[%s14390_s30 + $0xe10] ss:$8 sps:$4 sm:$0xff]  }
 0x753   : > { %9913 = vmatpush1.bf16.msra.mxu1 %v13052_v11  ;;  %v9612_v62 = vpop.f32.mrb[10].mxu1  ;;  %v16983_v32 = vadd.f32 %v9608_v49, %v9568_v13  ;;  %v9572_v48 = vpop.f32.mrb[11].mxu0  ;;  %9873 = vmatprep.subr.bf16.mxu0 %v13057_v40  ;;  %v17036_v11 = vrot.slane %v16934_v25, %v16477_v44  ;;  %v13115_v40 = vld [vmem:[%s14390_s30 + $0xd00] ss:$8 sps:$4 sm:$0xff]   ;;  %v13126_v49 = vld [vmem:[%s14390_s30 + $0xe14] ss:$8 sps:$4 sm:$0xff]   ;;  %v6758_v13 = vcombine.high %v16955_v56, %v16955_v56 }
 0x754   : > { %9914 = vmatprep.subr.bf16.mxu1 %v13060_v3  ;;  %v9613_v0 = vpop.f32.mrb[11].mxu1  ;;  %v16987_v51 = vadd.f32 %v9610_v24, %v9570_v9  ;;  %v13118_v3 = vld [vmem:[%s14390_s30 + $0xe00] ss:$8 sps:$4 sm:$0xff]   ;;  %v13121_v25 = vld [vmem:[%s14390_s30 + $0xd10] ss:$8 sps:$4 sm:$0xff]  }
 0x755   : > { %v13129_v24 = vld [vmem:[%s14390_s30 + $0xd24] ss:$8 sps:$4 sm:$0xff]   ;;  %v13127_v9 = vld [vmem:[%s14390_s30 + $0xd20] ss:$8 sps:$4 sm:$0xff]   ;;  %v13133_v62 = vld [vmem:[%s14390_s30 + $0xd30] ss:$8 sps:$4 sm:$0xff]  }
 0x756   : > { %9874 = vmatpush1.bf16.msra.mxu0 %v13055_v61  ;;  %v13132_v56 = vld [vmem:[%s14390_s30 + $0xe24] ss:$8 sps:$4 sm:$0xff]   ;;  %v13130_v6 = vld [vmem:[%s14390_s30 + $0xe20] ss:$8 sps:$4 sm:$0xff]   ;;  %v13135_v61 = vld [vmem:[%s14390_s30 + $0xd34] ss:$8 sps:$4 sm:$0xff]  }
 0x757   : > { %9915 = vmatpush1.bf16.msra.mxu1 %v13058_v7  ;;  %9875 = vmatprep.subr.bf16.mxu0 %v13063_v10  ;;  %v13138_v7 = vld [vmem:[%s14390_s30 + $0xe34] ss:$8 sps:$4 sm:$0xff]   ;;  %v13136_v48 = vld [vmem:[%s14390_s30 + $0xe30] ss:$8 sps:$4 sm:$0xff]   ;;  %v13141_v10 = vld [vmem:[%s14390_s30 + $0xd44] ss:$8 sps:$4 sm:$0xff]  }
 0x758   : > { %9916 = vmatprep.subr.bf16.mxu1 %v13066_v37  ;;  %v13144_v37 = vld [vmem:[%s14390_s30 + $0xe44] ss:$8 sps:$4 sm:$0xff]   ;;  %v13139_v0 = vld [vmem:[%s14390_s30 + $0xd40] ss:$8 sps:$4 sm:$0xff]   ;;  %v13181_v12 = vld [vmem:[%s14390_s30 + $0xdb0] ss:$8 sps:$4 sm:$0xff]  }
 0x75a   : > { %9876 = vmatpush1.bf16.msra.mxu0 %v13061_v35  ;;  %v13142_v35 = vld [vmem:[%s14390_s30 + $0xe40] ss:$8 sps:$4 sm:$0xff]  }
 0x75b   : > { %9917 = vmatpush1.bf16.msra.mxu1 %v13064_v58  ;;  %9877 = vmatprep.subr.bf16.mxu0 %v13069_v60  ;;  %v13147_v58 = vld [vmem:[%s14390_s30 + $0xd54] ss:$8 sps:$4 sm:$0xff]  }
 0x75c   : > { %9918 = vmatprep.subr.bf16.mxu1 %v13072_v30  ;;  %v13150_v60 = vld [vmem:[%s14390_s30 + $0xe54] ss:$8 sps:$4 sm:$0xff]   ;;  %v13145_v30 = vld [vmem:[%s14390_s30 + $0xd50] ss:$8 sps:$4 sm:$0xff]  }
 0x75e   : > { %9878 = vmatpush1.bf16.msra.mxu0 %v13067_v63  ;;  %v13148_v63 = vld [vmem:[%s14390_s30 + $0xe50] ss:$8 sps:$4 sm:$0xff]  }
 0x75f   : > { %9919 = vmatpush1.bf16.msra.mxu1 %v13070_v8  ;;  %9879 = vmatprep.subr.bf16.mxu0 %v13075_v55  ;;  %v13153_v8 = vld [vmem:[%s14390_s30 + $0xd64] ss:$8 sps:$4 sm:$0xff]  }
 0x760   : > { %9920 = vmatprep.subr.bf16.mxu1 %v13078_v14  ;;  %v13156_v55 = vld [vmem:[%s14390_s30 + $0xe64] ss:$8 sps:$4 sm:$0xff]  }
 0x762   : > { %9880 = vmatpush1.bf16.msra.mxu0 %v13073_v34 }
 0x763   : > { %9921 = vmatpush1.bf16.msra.mxu1 %v13076_v45  ;;  %9881 = vmatprep.subr.bf16.mxu0 %v13081_v18 }
 0x764   : > { %9922 = vmatprep.subr.bf16.mxu1 %v13084_v36 }
 0x766   : > { %9882 = vmatpush1.bf16.msra.mxu0 %v13079_v15 }
 0x767   : > { %9923 = vmatpush1.bf16.msra.mxu1 %v13082_v27  ;;  %9883 = vmatprep.subr.bf16.mxu0 %v13087_v41  ;;  %v13151_v41 = vld [vmem:[%s14390_s30 + $0xd60] ss:$8 sps:$4 sm:$0xff]  }
 0x768   : > { %9924 = vmatprep.subr.bf16.mxu1 %v13090_v23  ;;  %v13154_v23 = vld [vmem:[%s14390_s30 + $0xe60] ss:$8 sps:$4 sm:$0xff]  }
 0x76a   : > { %9884 = vmatpush1.bf16.msra.mxu0 %v13085_v54 }
 0x76b   : > { %9925 = vmatpush1.bf16.msra.mxu1 %v13088_v59  ;;  %9885 = vmatprep.subr.bf16.mxu0 %v13093_v19 }
 0x76c   : > { %9926 = vmatprep.subr.bf16.mxu1 %v13096_v5  ;;  %v13162_v5 = vld [vmem:[%s14390_s30 + $0xe74] ss:$8 sps:$4 sm:$0xff]  }
 0x76e   : > { %9886 = vmatpush1.bf16.msra.mxu0 %v13091_v26 }
 0x76f   : > { %9927 = vmatpush1.bf16.msra.mxu1 %v13094_v4  ;;  %9887 = vmatprep.subr.bf16.mxu0 %v13099_v47  ;;  %v13157_v4 = vld [vmem:[%s14390_s30 + $0xd70] ss:$8 sps:$4 sm:$0xff]  }
 0x770   : > { %9928 = vmatprep.subr.bf16.mxu1 %v13102_v50  ;;  %v13160_v47 = vld [vmem:[%s14390_s30 + $0xe70] ss:$8 sps:$4 sm:$0xff]   ;;  %v13165_v50 = vld [vmem:[%s14390_s30 + $0xd84] ss:$8 sps:$4 sm:$0xff]  }
 0x772   : > { %9888 = vmatpush1.bf16.msra.mxu0 %v13097_v21  ;;  %v13168_v21 = vld [vmem:[%s14390_s30 + $0xe84] ss:$8 sps:$4 sm:$0xff]  }
 0x773   : > { %9929 = vmatpush1.bf16.msra.mxu1 %v13100_v29  ;;  %9889 = vmatprep.subr.bf16.mxu0 %v13105_v22  ;;  %v13163_v29 = vld [vmem:[%s14390_s30 + $0xd80] ss:$8 sps:$4 sm:$0xff]  }
 0x774   : > { %9930 = vmatprep.subr.bf16.mxu1 %v13108_v57  ;;  %v13166_v22 = vld [vmem:[%s14390_s30 + $0xe80] ss:$8 sps:$4 sm:$0xff]   ;;  %v13171_v57 = vld [vmem:[%s14390_s30 + $0xd94] ss:$8 sps:$4 sm:$0xff]  }
 0x776   : > { %9890 = vmatpush1.bf16.msra.mxu0 %v13103_v20  ;;  %v13169_v20 = vld [vmem:[%s14390_s30 + $0xd90] ss:$8 sps:$4 sm:$0xff]  }
 0x777   : > { %9931 = vmatpush1.bf16.msra.mxu1 %v13106_v43  ;;  %9891 = vmatprep.subr.bf16.mxu0 %v13111_v33  ;;  %v13172_v43 = vld [vmem:[%s14390_s30 + $0xe90] ss:$8 sps:$4 sm:$0xff]   ;;  %v13177_v33 = vld [vmem:[%s14390_s30 + $0xda4] ss:$8 sps:$4 sm:$0xff]  }
 0x778   : > { %9932 = vmatprep.subr.bf16.mxu1 %v13114_v42  ;;  %v13180_v42 = vld [vmem:[%s14390_s30 + $0xea4] ss:$8 sps:$4 sm:$0xff]  }
 0x77a   : > { %9892 = vmatpush1.bf16.msra.mxu0 %v13109_v28  ;;  %v13175_v28 = vld [vmem:[%s14390_s30 + $0xda0] ss:$8 sps:$4 sm:$0xff]  }
 0x77b   : > { %9933 = vmatpush1.bf16.msra.mxu1 %v13112_v53  ;;  %9943 = vmatprep.subr.bf16.mxu0 %v13117_v46  ;;  %v13178_v53 = vld [vmem:[%s14390_s30 + $0xea0] ss:$8 sps:$4 sm:$0xff]   ;;  %v13183_v46 = vld [vmem:[%s14390_s30 + $0xdb4] ss:$8 sps:$4 sm:$0xff]  }
 0x77c   : > { %9984 = vmatprep.subr.bf16.mxu1 %v13120_v16  ;;  %v13186_v16 = vld [vmem:[%s14390_s30 + $0xeb4] ss:$8 sps:$4 sm:$0xff]  }
 0x77d   : > { %9894 = vmatmul.mubr.bf16.vlgmr.msra.gmra.mrb[24].mxu0 %v6708_v2  ;;  %v13184_v2 = vld [vmem:[%s14390_s30 + $0xeb0] ss:$8 sps:$4 sm:$0xff]  }
 0x77e   : > { %9935 = vmatmul.mubr.bf16.vlgmr.msra.gmra.mrb[24].mxu1 %v17036_v11  ;;  %9944 = vmatpush1.bf16.msra.mxu0 %v13115_v40  ;;  %v13189_v40 = vld [vmem:[%s14390_s30 + $0xdc4] ss:$8 sps:$4 sm:$0xff]  }
 0x77f   : > { %9985 = vmatpush1.bf16.msra.mxu1 %v13118_v3  ;;  %9945 = vmatprep.subr.bf16.mxu0 %v13123_v17  ;;  %v13192_v3 = vld [vmem:[%s14390_s30 + $0xec4] ss:$8 sps:$4 sm:$0xff]   ;;  %v13187_v17 = vld [vmem:[%s14390_s30 + $0xdc0] ss:$8 sps:$4 sm:$0xff]  }
 0x780   : > { %9986 = vmatprep.subr.bf16.mxu1 %v13126_v49  ;;  %9975 = vmatprep.mubr.bf16.mxu0 %v6758_v13  ;;  %v13190_v49 = vld [vmem:[%s14390_s30 + $0xec0] ss:$8 sps:$4 sm:$0xff]   ;;  %v13195_v13 = vld [vmem:[%s14390_s30 + $0xdd4] ss:$8 sps:$4 sm:$0xff]  }
 0x781   : > { %10016 = vmatprep.mubr.bf16.mxu1 %v17045_v39 }
 0x782   : > { %9946 = vmatpush1.bf16.msra.mxu0 %v13121_v25  ;;  %v13198_v25 = vld [vmem:[%s14390_s30 + $0xed4] ss:$8 sps:$4 sm:$0xff]  }
 0x783   : > { %9987 = vmatpush1.bf16.msra.mxu1 %v13124_v52  ;;  %9947 = vmatprep.subr.bf16.mxu0 %v13129_v24  ;;  %v13193_v52 = vld [vmem:[%s14390_s30 + $0xdd0] ss:$8 sps:$4 sm:$0xff]  }
 0x784   : > { %9988 = vmatprep.subr.bf16.mxu1 %v13132_v56  ;;  %v13196_v24 = vld [vmem:[%s14390_s30 + $0xed0] ss:$8 sps:$4 sm:$0xff]   ;;  %v13201_v56 = vld [vmem:[%s14390_s30 + $0xde4] ss:$8 sps:$4 sm:$0xff]  }
 0x786   : > { %9948 = vmatpush1.bf16.msra.mxu0 %v13127_v9  ;;  %v13204_v9 = vld [vmem:[%s14390_s30 + $0xee4] ss:$8 sps:$4 sm:$0xff]  }
 0x787   : > { %9989 = vmatpush1.bf16.msra.mxu1 %v13130_v6  ;;  %9949 = vmatprep.subr.bf16.mxu0 %v13135_v61  ;;  %v13199_v6 = vld [vmem:[%s14390_s30 + $0xde0] ss:$8 sps:$4 sm:$0xff]  }
 0x788   : > { %9990 = vmatprep.subr.bf16.mxu1 %v13138_v7  ;;  %v13202_v61 = vld [vmem:[%s14390_s30 + $0xee0] ss:$8 sps:$4 sm:$0xff]   ;;  %v13207_v7 = vld [vmem:[%s14390_s30 + $0xdf4] ss:$8 sps:$4 sm:$0xff]  }
 0x78a   : > { %9950 = vmatpush1.bf16.msra.mxu0 %v13133_v62  ;;  %v13210_v62 = vld [vmem:[%s14390_s30 + $0xef4] ss:$8 sps:$4 sm:$0xff]  }
 0x78b   : > { %9991 = vmatpush1.bf16.msra.mxu1 %v13136_v48  ;;  %9951 = vmatprep.subr.bf16.mxu0 %v13141_v10  ;;  %v13205_v48 = vld [vmem:[%s14390_s30 + $0xdf0] ss:$8 sps:$4 sm:$0xff]  }
 0x78c   : > { %9992 = vmatprep.subr.bf16.mxu1 %v13144_v37  ;;  %v13208_v10 = vld [vmem:[%s14390_s30 + $0xef0] ss:$8 sps:$4 sm:$0xff]   ;;  %v13213_v37 = vld [vmem:[%s14390_s30 + $0xf04] ss:$8 sps:$4 sm:$0xff]  }
 0x78e   : > { %9952 = vmatpush1.bf16.msra.mxu0 %v13139_v0  ;;  %v13250_v0 = vld [vmem:[%s14390_s30 + $0x1004] ss:$8 sps:$4 sm:$0xff]  }
 0x78f   : > { %9993 = vmatpush1.bf16.msra.mxu1 %v13142_v35  ;;  %9953 = vmatprep.subr.bf16.mxu0 %v13147_v58  ;;  %v6756_v35 = vcombine.high %v17036_v11, %v17036_v11  ;;  %v17119_v58 = vrot.slane %v17024_v31, %v16477_v44  ;;  %v13215_v31 = vld [vmem:[%s14390_s30 + $0xf10] ss:$8 sps:$4 sm:$0xff]  }
 0x790   : > { %9994 = vmatprep.subr.bf16.mxu1 %v13150_v60  ;;  %v9649_v14 = vpop.f32.mrb[12].mxu0  ;;  %v13211_v60 = vld [vmem:[%s14390_s30 + $0xf00] ss:$8 sps:$4 sm:$0xff]   ;;  %v13254_v11 = vld [vmem:[%s14390_s30 + $0x1010] ss:$8 sps:$4 sm:$0xff]  }
 0x791   : > { %v9690_v34 = vpop.f32.mrb[12].mxu1  ;;  %v9650_v45 = vadd.f32 %v9649_v14, %v16983_v32  ;;  %v9651_v18 = vpop.f32.mrb[13].mxu0  ;;  %v13159_v32 = vld [vmem:[%s14390_s30 + $0xd74] ss:$8 sps:$4 sm:$0xff]   ;;  %v13220_v14 = vld [vmem:[%s14390_s30 + $0xf24] ss:$8 sps:$4 sm:$0xff]  }
 0x792   : > { %v9692_v36 = vpop.f32.mrb[13].mxu1  ;;  %v9652_v15 = vadd.f32 %v9651_v18, %v16987_v51  ;;  %v9653_v27 = vpop.f32.mrb[14].mxu0  ;;  %9954 = vmatpush1.bf16.msra.mxu0 %v13145_v30  ;;  %v13248_v30 = vld [vmem:[%s14390_s30 + $0x1000] ss:$8 sps:$4 sm:$0xff]  }
 0x793   : > { %9995 = vmatpush1.bf16.msra.mxu1 %v13148_v63  ;;  %v9694_v54 = vpop.f32.mrb[14].mxu1  ;;  %v17073_v59 = vadd.f32 %v9690_v34, %v9650_v45  ;;  %v9654_v19 = vpop.f32.mrb[15].mxu0  ;;  %9955 = vmatprep.subr.bf16.mxu0 %v13153_v8  ;;  %v13217_v63 = vld [vmem:[%s14390_s30 + $0xf14] ss:$8 sps:$4 sm:$0xff]   ;;  %v13262_v34 = vld [vmem:[%s14390_s30 + $0x1024] ss:$8 sps:$4 sm:$0xff]  }
 0x794   : > { %9996 = vmatprep.subr.bf16.mxu1 %v13156_v55  ;;  %v9695_v51 = vpop.f32.mrb[15].mxu1  ;;  %v17077_v26 = vadd.f32 %v9692_v36, %v9652_v15  ;;  %v13256_v8 = vld [vmem:[%s14390_s30 + $0x1014] ss:$8 sps:$4 sm:$0xff]   ;;  %v6759_v55 = vcombine.high %v17045_v39, %v17045_v39  ;;  %v13875_v45 = vmov 0   ;;  %v13218_v39 = vld [vmem:[%s14390_s30 + $0xf20] ss:$8 sps:$4 sm:$0xff]  }
 0x795   : > { %v13260_v18 = vld [vmem:[%s14390_s30 + $0x1020] ss:$8 sps:$4 sm:$0xff]   ;;  %v13223_v36 = vld [vmem:[%s14390_s30 + $0xf34] ss:$8 sps:$4 sm:$0xff]   ;;  %v13221_v27 = vld [vmem:[%s14390_s30 + $0xf30] ss:$8 sps:$4 sm:$0xff]  }
 0x796   : > { %9956 = vmatpush1.bf16.msra.mxu0 %v13151_v41  ;;  %v13268_v15 = vld [vmem:[%s14390_s30 + $0x1034] ss:$8 sps:$4 sm:$0xff]   ;;  %v13266_v41 = vld [vmem:[%s14390_s30 + $0x1030] ss:$8 sps:$4 sm:$0xff]   ;;  %v13226_v54 = vld [vmem:[%s14390_s30 + $0xf44] ss:$8 sps:$4 sm:$0xff]  }
 0x797   : > { %9997 = vmatpush1.bf16.msra.mxu1 %v13154_v23  ;;  %9957 = vmatprep.subr.bf16.mxu0 %v13159_v32  ;;  %v10869_v23 = vld.sshfl [vmem:[#allocation4 + $0x20] sm:$0x1 pattern:$0x75316420]  ;;  %v13224_v32 = vld [vmem:[%s14390_s30 + $0xf40] ss:$8 sps:$4 sm:$0xff]  }
 0x798   : > { %9998 = vmatprep.subr.bf16.mxu1 %v13162_v5  ;;  %v6773_v19 = vrot.slane %v10869_v23, %v16477_v44  ;;  %v13229_v5 = vld [vmem:[%s14390_s30 + $0xf54] ss:$8 sps:$4 sm:$0xff]   ;;  %v13227_v51 = vld [vmem:[%s14390_s30 + $0xf50] ss:$8 sps:$4 sm:$0xff]  }
 0x79a   : > { %9958 = vmatpush1.bf16.msra.mxu0 %v13157_v4  ;;  %v13232_v4 = vld [vmem:[%s14390_s30 + $0xf64] ss:$8 sps:$4 sm:$0xff]  }
 0x79b   : > { %9999 = vmatpush1.bf16.msra.mxu1 %v13160_v47  ;;  %9959 = vmatprep.subr.bf16.mxu0 %v13165_v50 }
 0x79c   : > { %10000 = vmatprep.subr.bf16.mxu1 %v13168_v21 }
 0x79e   : > { %9960 = vmatpush1.bf16.msra.mxu0 %v13163_v29 }
 0x79f   : > { %10001 = vmatpush1.bf16.msra.mxu1 %v13166_v22  ;;  %9961 = vmatprep.subr.bf16.mxu0 %v13171_v57 }
 0x7a0   : > { %10002 = vmatprep.subr.bf16.mxu1 %v13174_v1  ;;  %v13230_v1 = vld [vmem:[%s14390_s30 + $0xf60] ss:$8 sps:$4 sm:$0xff]  }
 0x7a2   : > { %9962 = vmatpush1.bf16.msra.mxu0 %v13169_v20 }
 0x7a3   : > { %10003 = vmatpush1.bf16.msra.mxu1 %v13172_v43  ;;  %9963 = vmatprep.subr.bf16.mxu0 %v13177_v33 }
 0x7a4   : > { %10004 = vmatprep.subr.bf16.mxu1 %v13180_v42  ;;  %v13235_v42 = vld [vmem:[%s14390_s30 + $0xf74] ss:$8 sps:$4 sm:$0xff]  }
 0x7a6   : > { %9964 = vmatpush1.bf16.msra.mxu0 %v13175_v28 }
 0x7a7   : > { %10005 = vmatpush1.bf16.msra.mxu1 %v13178_v53  ;;  %9965 = vmatprep.subr.bf16.mxu0 %v13183_v46  ;;  %v13233_v53 = vld [vmem:[%s14390_s30 + $0xf70] ss:$8 sps:$4 sm:$0xff]   ;;  %v13236_v46 = vld [vmem:[%s14390_s30 + $0xf80] ss:$8 sps:$4 sm:$0xff]  }
 0x7a8   : > { %10006 = vmatprep.subr.bf16.mxu1 %v13186_v16  ;;  %v13241_v16 = vld [vmem:[%s14390_s30 + $0xf94] ss:$8 sps:$4 sm:$0xff]  }
 0x7aa   : > { %9966 = vmatpush1.bf16.msra.mxu0 %v13181_v12  ;;  %v13239_v12 = vld [vmem:[%s14390_s30 + $0xf90] ss:$8 sps:$4 sm:$0xff]  }
 0x7ab   : > { %10007 = vmatpush1.bf16.msra.mxu1 %v13184_v2  ;;  %9967 = vmatprep.subr.bf16.mxu0 %v13189_v40  ;;  %v13244_v2 = vld [vmem:[%s14390_s30 + $0xfa4] ss:$8 sps:$4 sm:$0xff]   ;;  %v13242_v40 = vld [vmem:[%s14390_s30 + $0xfa0] ss:$8 sps:$4 sm:$0xff]  }
 0x7ac   : > { %10008 = vmatprep.subr.bf16.mxu1 %v13192_v3  ;;  %v13247_v3 = vld [vmem:[%s14390_s30 + $0xfb4] ss:$8 sps:$4 sm:$0xff]  }
 0x7ae   : > { %9968 = vmatpush1.bf16.msra.mxu0 %v13187_v17  ;;  %v13245_v17 = vld [vmem:[%s14390_s30 + $0xfb0] ss:$8 sps:$4 sm:$0xff]  }
 0x7af   : > { %10009 = vmatpush1.bf16.msra.mxu1 %v13190_v49  ;;  %9969 = vmatprep.subr.bf16.mxu0 %v13195_v13  ;;  %v13253_v49 = vld [vmem:[%s14390_s30 + $0xfc4] ss:$8 sps:$4 sm:$0xff]   ;;  %v13251_v13 = vld [vmem:[%s14390_s30 + $0xfc0] ss:$8 sps:$4 sm:$0xff]  }
 0x7b0   : > { %10010 = vmatprep.subr.bf16.mxu1 %v13198_v25  ;;  %v13259_v25 = vld [vmem:[%s14390_s30 + $0xfd4] ss:$8 sps:$4 sm:$0xff]  }
 0x7b2   : > { %9970 = vmatpush1.bf16.msra.mxu0 %v13193_v52  ;;  %v13257_v52 = vld [vmem:[%s14390_s30 + $0xfd0] ss:$8 sps:$4 sm:$0xff]  }
 0x7b3   : > { %10011 = vmatpush1.bf16.msra.mxu1 %v13196_v24  ;;  %9971 = vmatprep.subr.bf16.mxu0 %v13201_v56  ;;  %v13265_v24 = vld [vmem:[%s14390_s30 + $0xfe4] ss:$8 sps:$4 sm:$0xff]   ;;  %v13263_v56 = vld [vmem:[%s14390_s30 + $0xfe0] ss:$8 sps:$4 sm:$0xff]  }
 0x7b4   : > { %10012 = vmatprep.subr.bf16.mxu1 %v13204_v9  ;;  %v13271_v9 = vld [vmem:[%s14390_s30 + $0xff4] ss:$8 sps:$4 sm:$0xff]  }
 0x7b6   : > { %9972 = vmatpush1.bf16.msra.mxu0 %v13199_v6  ;;  %v13269_v6 = vld [vmem:[%s14390_s30 + $0xff0] ss:$8 sps:$4 sm:$0xff]  }
 0x7b7   : > { %10013 = vmatpush1.bf16.msra.mxu1 %v13202_v61  ;;  %9973 = vmatprep.subr.bf16.mxu0 %v13207_v7  ;;  %v6757_v61 = vcombine.high %v17119_v58, %v17119_v58 }
 0x7b8   : > { %10014 = vmatprep.subr.bf16.mxu1 %v13210_v62 }
 0x7ba   : > { %9974 = vmatpush1.bf16.msra.mxu0 %v13205_v48 }
 0x7bb   : > { %10015 = vmatpush1.bf16.msra.mxu1 %v13208_v10  ;;  %10025 = vmatprep.subr.bf16.mxu0 %v13213_v37 }
 0x7bc   : > { %10066 = vmatprep.subr.bf16.mxu1 %v13250_v0 }
 0x7bd   : > { %9976 = vmatmul.mubr.bf16.vlgmr.msra.gmra.mrb[28].mxu0 %v6756_v35 }
 0x7be   : > { %10017 = vmatmul.mubr.bf16.vlgmr.msra.gmra.mrb[28].mxu1 %v17119_v58  ;;  %10026 = vmatpush1.bf16.msra.mxu0 %v13211_v60 }
 0x7bf   : > { %10067 = vmatpush1.bf16.msra.mxu1 %v13248_v30  ;;  %10027 = vmatprep.subr.bf16.mxu0 %v13217_v63 }
 0x7c0   : > { %10068 = vmatprep.subr.bf16.mxu1 %v13256_v8  ;;  %10098 = vmatprep.mubr.bf16.mxu1 %v13875_v45 }
 0x7c1   : > { %10057 = vmatprep.mubr.bf16.mxu0 %v6759_v55 }
 0x7c2   : > { %10028 = vmatpush1.bf16.msra.mxu0 %v13215_v31 }
 0x7c3   : > { %10069 = vmatpush1.bf16.msra.mxu1 %v13254_v11  ;;  %10029 = vmatprep.subr.bf16.mxu0 %v13220_v14 }
 0x7c4   : > { %10070 = vmatprep.subr.bf16.mxu1 %v13262_v34 }
 0x7c6   : > { %10030 = vmatpush1.bf16.msra.mxu0 %v13218_v39 }
 0x7c7   : > { %10071 = vmatpush1.bf16.msra.mxu1 %v13260_v18  ;;  %10031 = vmatprep.subr.bf16.mxu0 %v13223_v36 }
 0x7c8   : > { %10072 = vmatprep.subr.bf16.mxu1 %v13268_v15 }
 0x7ca   : > { %10032 = vmatpush1.bf16.msra.mxu0 %v13221_v27 }
 0x7cb   : > { %10073 = vmatpush1.bf16.msra.mxu1 %v13266_v41  ;;  %10033 = vmatprep.subr.bf16.mxu0 %v13226_v54 }
 0x7ce   : > { %11390 = vmatmul.mubr.msk.bf16.vlgmr.msra.gmra.mrb[32].mxu1 %vm9406_vm14, %v6773_v19  ;;  %10034 = vmatpush1.bf16.msra.mxu0 %v13224_v32 }
 0x7cf   : > { %10035 = vmatprep.subr.bf16.mxu0 %v13229_v5 }
 0x7d0   : > { %v9731_v47 = vpop.f32.mrb[16].mxu0 }
 0x7d1   : > { %v9772_v50 = vpop.f32.mrb[16].mxu1  ;;  %v9732_v21 = vadd.f32 %v9731_v47, %v17073_v59  ;;  %v9733_v29 = vpop.f32.mrb[17].mxu0 }
 0x7d2   : > { %v9774_v44 = vpop.f32.mrb[17].mxu1  ;;  %v9734_v22 = vadd.f32 %v9733_v29, %v17077_v26  ;;  %v9735_v57 = vpop.f32.mrb[18].mxu0  ;;  %10036 = vmatpush1.bf16.msra.mxu0 %v13227_v51  ;;  %v13238_v26 = vld [vmem:[%s14390_s30 + $0xf84] ss:$8 sps:$4 sm:$0xff]   ;;  %s17443_s30 = sld [smem:[#allocation43_spill]] }
 0x7d3   : > { %v9776_v20 = vpop.f32.mrb[18].mxu1  ;;  %v9773_v43 = vadd.f32 %v9772_v50, %v9732_v21  ;;  %v9736_v33 = vpop.f32.mrb[19].mxu0  ;;  %10037 = vmatprep.subr.bf16.mxu0 %v13232_v4 }
 0x7d4   : > { %v9777_v28 = vpop.f32.mrb[19].mxu1  ;;  %v9775_v59 = vadd.f32 %v9774_v44, %v9734_v22  ;;  %v10107_v33 = vld [vmem:[%s14398_s12] sm:$0x3] }
 0x7d6   : > { %10038 = vmatpush1.bf16.msra.mxu0 %v13230_v1 }
 0x7d7   : > { %10039 = vmatprep.subr.bf16.mxu0 %v13235_v42  ;;  %v10115_v42 = vsub.s32 1, %v16469_v38 }
 0x7d8   : > { %s11425_s3 = sshll.u32 %s17443_s30, 2  ;;  %p11394_p5 = scmp.ne.s32.totalorder %s17443_s30, 3 }
 0x7d9   : > { %s10134_s2 = scalar_lea.vmem [#allocation5], %s11425_s3  ;;  %s17444_s15 = sld [smem:[#allocation62_spill]] (!%p11394_p5)  ;;  %vm10362_vm15 = vcmask (!%p11394_p5), 74752  }
 0x7da   : > { %10040 = vmatpush1.bf16.msra.mxu0 %v13233_v53 }
 0x7db   : > { %10041 = vmatprep.subr.bf16.mxu0 %v13238_v26 }
 0x7de   : > { %10042 = vmatpush1.bf16.msra.mxu0 %v13236_v46 }
 0x7df   : > { %10043 = vmatprep.subr.bf16.mxu0 %v13241_v16  ;;  %v10116_v16 = vrot.slane %v10107_v33, %v10115_v42 }
 0x7e2   : > { %10044 = vmatpush1.bf16.msra.mxu0 %v13239_v12 }
 0x7e3   : > { %10045 = vmatprep.subr.bf16.mxu0 %v13244_v2 }
 0x7e6   : > { %10046 = vmatpush1.bf16.msra.mxu0 %v13242_v40 }
 0x7e7   : > { %10047 = vmatprep.subr.bf16.mxu0 %v13247_v3 }
 0x7ea   : > { %10048 = vmatpush1.bf16.msra.mxu0 %v13245_v17 }
 0x7eb   : > { %10049 = vmatprep.subr.bf16.mxu0 %v13253_v49 }
 0x7ee   : > { %10050 = vmatpush1.bf16.msra.mxu0 %v13251_v13 }
 0x7ef   : > { %10051 = vmatprep.subr.bf16.mxu0 %v13259_v25  ;;  %v13272_v25 = vld [vmem:[%s17444_s15 + $0x40] sm:$0xff] (!%p11394_p5)  }
 0x7f2   : > { %10052 = vmatpush1.bf16.msra.mxu0 %v13257_v52  ;;  %v13273_v52 = vld [vmem:[%s17444_s15] sm:$0xff] (!%p11394_p5)  }
 0x7f3   : > { %10053 = vmatprep.subr.bf16.mxu0 %v13265_v24  ;;  %v13274_v24 = vld [vmem:[%s17444_s15 + $0x48] sm:$0xff] (!%p11394_p5)  }
 0x7f6   : > { %10054 = vmatpush1.bf16.msra.mxu0 %v13263_v56  ;;  %v13275_v56 = vld [vmem:[%s17444_s15 + $0x8] sm:$0xff] (!%p11394_p5)  }
 0x7f7   : > { %10055 = vmatprep.subr.bf16.mxu0 %v13271_v9  ;;  %v13276_v9 = vld [vmem:[%s17444_s15 + $0x50] sm:$0xff] (!%p11394_p5)  }
 0x7fa   : > { %10056 = vmatpush1.bf16.msra.mxu0 %v13269_v6  ;;  %v13277_v6 = vld [vmem:[%s17444_s15 + $0x10] sm:$0xff] (!%p11394_p5)  }
 0x7fb   : > { %11632 = vmatprep.subr.bf16.mxu0 (!%p11394_p5), %v13272_v25 }
 0x7fd   : > { %10058 = vmatmul.mubr.bf16.vlgmr.msra.gmra.mrb[32].mxu0 %v6757_v61  ;;  %v13278_v61 = vld [vmem:[%s17444_s15 + $0x58] sm:$0xff] (!%p11394_p5)  }
 0x7fe   : > { %11633 = vmatpush3.bf16.msra.mxu0 (!%p11394_p5), %v13273_v52 }
 0x7ff   : > { %11634 = vmatprep.subr.bf16.mxu0 (!%p11394_p5), %v13274_v24 }
 0x802   : > { %11635 = vmatpush3.bf16.msra.mxu0 (!%p11394_p5), %v13275_v56 }
 0x803   : > { %11636 = vmatprep.subr.bf16.mxu0 (!%p11394_p5), %v13276_v9 }
 0x806   : > { %11637 = vmatpush3.bf16.msra.mxu0 (!%p11394_p5), %v13277_v6 }
 0x807   : > { %11638 = vmatprep.subr.bf16.mxu0 (!%p11394_p5), %v13278_v61 }
 0x810   : > { %v9813_v7 = vpop.f32.mrb[20].mxu0 }
 0x811   : > { %v9854_v62 = vpop.f32.mrb[20].mxu1  ;;  %v9814_v48 = vadd.f32 %v9813_v7, %v9773_v43  ;;  %v9815_v10 = vpop.f32.mrb[21].mxu0  ;;  %v10111_v43 = vsub.s32 0, %v16469_v38  ;;  %v13279_v7 = vld [vmem:[%s17444_s15 + $0x18] sm:$0xff] (!%p11394_p5)  }
 0x812   : > { %v9856_v37 = vpop.f32.mrb[21].mxu1  ;;  %v9816_v0 = vadd.f32 %v9815_v10, %v9775_v59  ;;  %v9817_v35 = vpop.f32.mrb[22].mxu0  ;;  %11639 = vmatpush3.bf16.msra.mxu0 (!%p11394_p5), %v13279_v7  ;;  %v13282_v10 = vld [vmem:[%s17444_s15 + $0x68] sm:$0xff] (!%p11394_p5)  }
 0x813   : > { %v9858_v60 = vpop.f32.mrb[22].mxu1  ;;  %v9855_v30 = vadd.f32 %v9854_v62, %v9814_v48  ;;  %v9818_v63 = vpop.f32.mrb[23].mxu0  ;;  %v10112_v53 = vrot.slane %v10107_v33, %v10111_v43  ;;  %v13280_v62 = vld [vmem:[%s17444_s15 + $0x60] sm:$0xff] (!%p11394_p5)   ;;  %v11398_v33 = vld [vmem:[#allocation26] ss:$0 sm:$0xff] (!%p11394_p5) }
 0x814   : > { %v9859_v8 = vpop.f32.mrb[23].mxu1  ;;  %v9857_v55 = vadd.f32 %v9856_v37, %v9816_v0  ;;  %v13281_v48 = vld [vmem:[%s17444_s15 + $0x20] sm:$0xff] (!%p11394_p5)   ;;  %11640 = vmatprep.subr.bf16.mxu0 (!%p11394_p5), %v13280_v62  ;;  %v13284_v63 = vld [vmem:[%s17444_s15 + $0x70] sm:$0xff] (!%p11394_p5)  }
 0x816   : > { %11641 = vmatpush3.bf16.msra.mxu0 (!%p11394_p5), %v13281_v48 }
 0x817   : > { %11642 = vmatprep.subr.bf16.mxu0 (!%p11394_p5), %v13282_v10 }
 0x850   : > { %v9895_v31 = vpop.f32.mrb[24].mxu0 }
 0x851   : > { %v9936_v11 = vpop.f32.mrb[24].mxu1  ;;  %v9896_v14 = vadd.f32 %v9895_v31, %v9855_v30  ;;  %v9897_v34 = vpop.f32.mrb[25].mxu0  ;;  %v13283_v30 = vld [vmem:[%s17444_s15 + $0x28] sm:$0xff] (!%p11394_p5)   ;;  %v13286_v31 = vld [vmem:[%s17444_s15 + $0x78] sm:$0xff] (!%p11394_p5)  }
 0x852   : > { %v9938_v45 = vpop.f32.mrb[25].mxu1  ;;  %v9898_v58 = vadd.f32 %v9897_v34, %v9857_v55  ;;  %v9899_v39 = vpop.f32.mrb[26].mxu0  ;;  %11643 = vmatpush3.bf16.msra.mxu0 (!%p11394_p5), %v13283_v30  ;;  %v13285_v55 = vld [vmem:[%s17444_s15 + $0x30] sm:$0xff] (!%p11394_p5)  }
 0x853   : > { %v9940_v18 = vpop.f32.mrb[26].mxu1  ;;  %v9937_v36 = vadd.f32 %v9936_v11, %v9896_v14  ;;  %v9900_v15 = vpop.f32.mrb[27].mxu0  ;;  %11644 = vmatprep.subr.bf16.mxu0 (!%p11394_p5), %v13284_v63  ;;  %v13287_v14 = vld [vmem:[%s17444_s15 + $0x38] sm:$0xff] (!%p11394_p5)  }
 0x854   : > { %v9941_v27 = vpop.f32.mrb[27].mxu1  ;;  %v9939_v41 = vadd.f32 %v9938_v45, %v9898_v58 }
 0x855   : > { %v10166_v27 = vld [vmem:[#allocation11] sm:$0xf] (!%p11394_p5) }
 0x856   : > { %11645 = vmatpush3.bf16.msra.mxu0 (!%p11394_p5), %v13285_v55 }
 0x857   : > { %11646 = vmatprep.subr.bf16.mxu0 (!%p11394_p5), %v13286_v31 }
 0x85a   : > { %11647 = vmatpush3.bf16.msra.mxu0 (!%p11394_p5), %v13287_v14 }
 0x890   : > { %v9977_v23 = vpop.f32.mrb[28].mxu0 }
 0x891   : > { %v10018_v54 = vpop.f32.mrb[28].mxu1  ;;  %v9978_v19 = vadd.f32 %v9977_v23, %v9937_v36  ;;  %v9979_v32 = vpop.f32.mrb[29].mxu0 }
 0x892   : > { %v10020_v5 = vpop.f32.mrb[29].mxu1  ;;  %v9980_v51 = vadd.f32 %v9979_v32, %v9939_v41  ;;  %v9981_v4 = vpop.f32.mrb[30].mxu0 }
 0x893   : > { %v10022_v47 = vpop.f32.mrb[30].mxu1  ;;  %v10019_v50 = vadd.f32 %v10018_v54, %v9978_v19  ;;  %v9982_v21 = vpop.f32.mrb[31].mxu0 }
 0x894   : > { %v10023_v29 = vpop.f32.mrb[31].mxu1  ;;  %v10021_v44 = vadd.f32 %v10020_v5, %v9980_v51  ;;  %v13876_v51 = vmov (!%p11394_p5), 1983009808  }
 0x895   : > { %v10176_v4 = vunpack.c.l.s4 (!%p11394_p5), %v13876_v51 }
 0x897   : > { %v10177_v47 = vunpack.c.0.s8 (!%p11394_p5), %v10176_v4 }
 0x899   : > { %v10180_v21 = vsub.s32 (!%p11394_p5), %v10177_v47, %v16469_v38 }
 0x8a1   : > { %v10100_v22 = vpop.f32.mrb[32].mxu1 }
 0x8a2   : > { %v10102_v57 = vpop.f32.mrb[33].mxu1 }
 0x8a3   : > { %v10104_v1 = vpop.f32.mrb[34].mxu1 }
 0x8a4   : > { %v10105_v20 = vpop.f32.mrb[35].mxu1 }
 0x8d0   : > { %v10059_v28 = vpop.f32.mrb[32].mxu0 }
 0x8d1   : > { %v10060_v59 = vadd.f32 %v10059_v28, %v10019_v50  ;;  %v10061_v26 = vpop.f32.mrb[33].mxu0 }
 0x8d2   : > { %v10062_v46 = vadd.f32 %v10061_v26, %v10021_v44  ;;  %v10063_v12 = vpop.f32.mrb[34].mxu0 }
 0x8d3   : > { %v10101_v2 = vadd.f32 %v10100_v22, %v10060_v59  ;;  %v10064_v40 = vpop.f32.mrb[35].mxu0 }
 0x8d4   : > { %v10103_v3 = vadd.f32 %v10102_v57, %v10062_v46  ;;  %10139 = sbr.rel (%p11394_p5) target bundleno = 2543 (0x9ef), region = 152 }
 0x8d5   : > { %v10119_v17 = vadd.f32 %v10112_v53, %v10101_v2 }
 0x8d6   : > { %v10120_v49 = vadd.f32 %v10116_v16, %v10103_v3 }
 0x8d8   : > { %v10123_v13 = vcombine.low %v10119_v17, %v10120_v49 }
 0x8da   : > { %11393 = vst.sshfl [vmem:[%s10134_s2] sm:$0x33 pattern:$0x76325410] %v10123_v13 }
 0x8e1   : > { %v10140_v37 = vld [vmem:[#allocation5] sm:$0xf]  ;;  %v10148_v0 = vld [vmem:[#allocation5 + $0x4] sm:$0xf]  ;;  %v10159_v8 = vld [vmem:[#allocation5 + $0xc] sm:$0xf] }
 0x8e2   : > { %v11395_v35 = vmul.f32 -1.442695, %v10140_v37  ;;  %v11396_v60 = vmul.f32 -1.442695, %v10148_v0  ;;  %v11397_v11 = vmul.f32 -1.442695, %v10159_v8 }
 0x8e3   : > { %v10156_v34 = vld [vmem:[#allocation5 + $0x8] sm:$0xf] }
 0x8e4   : > { %13288 = vpow2.f32 %v11395_v35 }
 0x8e5   : > { %13290 = vpow2.f32 %v11396_v60 }
 0x8e6   : > { %13292 = vpow2.f32 %v11397_v11 }
 0x8e7   : > { %13294 = vtanh.f32 %v10156_v34 }
 0x8ee   : > { %v13289_v45 = vpop.eup %13288 }
 0x8ef   : > { %v13291_v58 = vpop.eup %13290  ;;  %v10144_v39 = vadd.f32 1.0, %v13289_v45 }
 0x8f0   : > { %v10152_v18 = vadd.f32 1.0, %v13291_v58  ;;  %v13293_v36 = vpop.eup %13292 }
 0x8f1   : > { %13296 = vrcp.f32 %v10144_v39  ;;  %v13295_v15 = vpop.eup %13294  ;;  %v10163_v23 = vadd.f32 1.0, %v13293_v36 }
 0x8f2   : > { %13298 = vrcp.f32 %v10152_v18 }
 0x8f3   : > { %13300 = vrcp.f32 %v10163_v23 }
 0x8fb   : > { %v13297_v41 = vpop.eup %13296 }
 0x8fc   : > { %v13299_v54 = vpop.eup %13298  ;;  %v10168_v19 = vmul.f32 %v13297_v41, %v13295_v15 }
 0x8fd   : > { %v10167_v32 = vmul.f32 %v13299_v54, %v10166_v27  ;;  %v13301_v50 = vpop.eup %13300 }
 0x8ff   : > { %v10169_v5 = vadd.f32 %v10168_v19, %v10167_v32 }
 0x901   : > { %13302 = vtanh.f32 %v10169_v5  ;;  %10172 = vst [vmem:[#allocation30] sm:$0xf] %v10169_v5 }
 0x90b   : > { %v13303_v29 = vpop.eup %13302 }
 0x90c   : > { %v10171_v44 = vmul.f32 %v13303_v29, %v13301_v50 }
 0x90e   : > { %10173 = vst [vmem:[#allocation28] sm:$0xf] %v10171_v44  ;;  %v10181_v22 = vrot.slane %v10171_v44, %v10180_v21 }
 0x910   : > { %v10182_v57 = vcombine.high %v10181_v22, %v10181_v22  ;;  %v10185_v1 = vpack.c.bf16 %v10181_v22, %v10181_v22 }
 0x912   : > { %v10186_v20 = vpack.c.bf16 %v10182_v57, %v10182_v57 }
 0x914   : > { %10354 = vmatprep.mubr.bf16.mxu0 %v10186_v20 }
 0x915   : > { %10355 = vmatmul.mubr.bf16.vlgmr.msra.gmra.mrb[0].mxu0 %v10185_v1 }
 0x9e8   : > { %v11648_v43 = vpop.f32.mrb[0].mxu0 }
 0x9e9   : > { %v11649_v42 = vpop.f32.mrb[1].mxu0 }
 0x9ea   : > { %v11650_v28 = vadd.f32 %v11649_v42, %v11648_v43  ;;  %v11651_v59 = vpop.f32.mrb[2].mxu0 }
 0x9eb   : > { %v11652_v53 = vpop.f32.mrb[3].mxu0 }
 0x9ec   : > { %v10357_v26 = vadd.f32 %v11650_v28, %v11398_v33 }
 0x9ee   : > { %10363 = vst.msk [vmem:[#allocation27] sm:$0x3] %vm10362_vm15, %v10357_v26 }
 0x9ef PF: > { %s17445_s3 = sld [smem:[#allocation43_spill]]  ;;  %s13877_s2 = smov [#allocation28]  }
 0x9f0   : > { %s10382_s12 = sshll.u32 %s13877_s2, 4  ;;  %s13878_s22 = smov [#allocation27]   ;;  %s10383_s12 = int_to_ptr.vmem [resolvable:$true] %s10382_s12 }
 0x9f1   : > { %s10371_s20 = sshll.u32 %s13878_s22, 4  ;;  %s13702_s28 = scalar_lea.vmem %s10383_s12, 64  ;;  %s10372_s20 = int_to_ptr.vmem [resolvable:$true] %s10371_s20 }
 0x9f2   : > { %p13703_p3 = scmp.ne.s32.totalorder %s10383_s12, %s13702_s28  ;;  %p13709_p13 = scmp.lt.s32.totalorder %s10383_s12, %s10383_s12 }
 0x9f3   : > { %p13710_p4 = scmp.lt.s32.totalorder %s13702_s28, %s13702_s28 }
 0x9f5   : > { %p12364_p9 = scmp.eq.s32.totalorder %s17445_s3, 3  ;;  %p13711_p8 = por %p13710_p4, %p13709_p13 }
 0x9f7   : > { %p13704_p2 = pnand %p13703_p3, %p12364_p9 }
 0x9f9   : > { %p13705_p7 = pneg %p13704_p2 }
 0x9fb   : > { %p13712_p10 = pnand %p13711_p8, %p13705_p7 }
 0x9fd   : > { %13715 = shalt.err (!%p13712_p10)
}
 0x9fe   : > { %s17446_s17 = sld [smem:[#allocation65_spill]] }
 0xa04   : > { %s13716_s0 = scalar_lea.hbm %s17446_s17, 64 }
 0xa05   : > { %p13717_p0 = scmp.ne.s32.totalorder %s17446_s17, %s13716_s0  ;;  %p13722_p1 = scmp.lt.u32.totalorder %s13716_s0, %s17446_s17 }
 0xa07   : > { %p13718_p6 = pnand %p13717_p0, %p12364_p9 }
 0xa09   : > { %p13719_p12 = pneg %p13718_p6 }
 0xa0b   : > { %p13724_p11 = pnand %p13722_p1, %p13719_p12 }
 0xa0d   : > { %13727 = shalt.err (!%p13724_p11)
}
 0xa0e   : > { %12288 = dma.vmem_to_hbm [thread:$0]  (%p12364_p9), %s10383_s12, 64, %s17446_s17, [#allocation29]  }
 0xa0f   : > { %s13728_s30 = scalar_lea.vmem %s10372_s20, 32  ;;  %p13735_p7 = scmp.lt.s32.totalorder %s10372_s20, %s10372_s20 }
 0xa10   : > { %p13729_p5 = scmp.ne.s32.totalorder %s10372_s20, %s13728_s30  ;;  %p13736_p13 = scmp.lt.s32.totalorder %s13728_s30, %s13728_s30 }
 0xa12   : > { %p13730_p3 = pnand %p13729_p5, %p12364_p9  ;;  %p13737_p4 = por %p13736_p13, %p13735_p7 }
 0xa14   : > { %p13731_p2 = pneg %p13730_p3 }
 0xa16   : > { %p13738_p8 = pnand %p13737_p4, %p13731_p2 }
 0xa18   : > { %13741 = shalt.err (!%p13738_p8)
}
 0xa19   : > { %s17447_s28 = sld [smem:[#allocation64_spill]] }
 0xa1f   : > { %s13742_s10 = scalar_lea.hbm %s17447_s28, 32 }
 0xa20   : > { %p13743_p10 = scmp.ne.s32.totalorder %s17447_s28, %s13742_s10  ;;  %p13748_p12 = scmp.lt.u32.totalorder %s13742_s10, %s17447_s28 }
 0xa22   : > { %p13744_p0 = pnand %p13743_p10, %p12364_p9 }
 0xa24   : > { %p13745_p6 = pneg %p13744_p0 }
 0xa26   : > { %p13750_p1 = pnand %p13748_p12, %p13745_p6 }
 0xa28   : > { %13753 = shalt.err (!%p13750_p1)
}
 0xa29   : > { %12286 = dma.vmem_to_hbm [thread:$0]  (%p12364_p9), %s10372_s20, 32, %s17447_s28, [#allocation8]  }
 0xa2a   : > { %s13879_s25 = smov [#allocation30]  }
 0xa2b   : > { %s10393_s21 = sshll.u32 %s13879_s25, 4  ;;  %s10394_s21 = int_to_ptr.vmem [resolvable:$true] %s10393_s21 }
 0xa2c   : > { %s13754_s18 = scalar_lea.vmem %s10394_s21, 64  ;;  %p13761_p2 = scmp.lt.s32.totalorder %s10394_s21, %s10394_s21 }
 0xa2d   : > { %p13755_p11 = scmp.ne.s32.totalorder %s10394_s21, %s13754_s18  ;;  %p13762_p7 = scmp.lt.s32.totalorder %s13754_s18, %s13754_s18 }
 0xa2f   : > { %p13756_p5 = pnand %p13755_p11, %p12364_p9  ;;  %p13763_p13 = por %p13762_p7, %p13761_p2 }
 0xa31   : > { %p13757_p3 = pneg %p13756_p5 }
 0xa33   : > { %p13764_p4 = pnand %p13763_p13, %p13757_p3 }
 0xa35   : > { %13767 = shalt.err (!%p13764_p4)
}
 0xa36   : > { %s17448_s22 = sld [smem:[#allocation66_spill]] }
 0xa3c   : > { %s13768_s10 = scalar_lea.hbm %s17448_s22, 64 }
 0xa3d   : > { %p13769_p8 = scmp.ne.s32.totalorder %s17448_s22, %s13768_s10  ;;  %p13774_p6 = scmp.lt.u32.totalorder %s13768_s10, %s17448_s22 }
 0xa3f   : > { %p13770_p10 = pnand %p13769_p8, %p12364_p9 }
 0xa41   : > { %p13771_p0 = pneg %p13770_p10 }
 0xa43   : > { %p13776_p12 = pnand %p13774_p6, %p13771_p0 }
 0xa45   : > { %13779 = shalt.err (!%p13776_p12)
}
 0xa46   : > { %12290 = dma.vmem_to_hbm [thread:$0]  (%p12364_p9), %s10394_s21, 64, %s17448_s22, [#allocation29]  }
 0xa47   : > { %13829 = dma.done.wait (%p12364_p9), [#allocation8], 32  }
 0xa48   : > { %13831 = vsyncadd (%p12364_p9), [#allocation8], 4294967264 }
 0xa49   : > { %13833 = dma.done.wait (%p12364_p9), [#allocation29], 128  }
 0xa4a   : > { %13835 = vsyncadd (%p12364_p9), [#allocation29], 4294967168 }
 0xa4b PF: > { %s17449_s21 = sld [smem:[#allocation45_spill]]  ;;  %s17450_s0 = sld [smem:[#allocation41_spill]] }
 0xa4c   : > { %s17451_s30 = sld [smem:[#allocation42_spill]]  ;;  %s17452_s20 = sld [smem:[#allocation46_spill]] }
 0xa51   : > { %p35_p1 = scmp.ge.s32.totalorder %s17449_s21, 6  }
 0xa53   :  { %37 = sbr.rel (!%p35_p1) target bundleno = 22 (0x16), region = 230 }
 0xa5a   :  { %10414 = vsyncpa [#allocation7], 1 }
 0xa5b   :  { %10416 = vsyncpa [#allocation7 + $0x1], 1 }
 0xa5c   :  { %10417 = vsyncpa [#allocation10], 1 }
 0xa5d   :  { %10418 = vsyncpa [#allocation13], 1 }
 0xa5e   :  { %10419 = vsyncpa [#allocation16], 1 }
 0xa5f   :  { %10420 = vsyncpa [#allocation19], 1 }
 0xa60   :  { %10421 = vsyncpa [#allocation22], 1 }
 0xa61   :  { %10422 = vsyncpa [#allocation8], 1 }
 0xa62   :  { %10424 = vsyncpa [#allocation8 + $0x1], 1 }
 0xa63   :  { %10425 = vsyncpa [#allocation29], 1 }

</bundles_post_ra>
